<compile_context>
chip_gen: v7x
topology: tpu7x:2x2x1
jax: 0.10.0
libtpu: 0.0.40
codegen_flags: <defaults>
</compile_context>

<pallas_src>
import functools

import jax
import jax.numpy as jnp
from jax.experimental import pallas as pl
from jax.experimental.pallas import tpu as pltpu

EPS = 1e-5


def _res_block_kernel(x_ref, w1_ref, g1_ref, b1_ref, w2_ref, g2_ref, b2_ref,
                      o_ref, pad_ref, cf_ref, col_ref, *, H, W, C, Cp, NB):
    """Fused residual-block body for NB batch samples per grid step.

    x_ref  : (NB, C, H*W)       channels-first flat input samples
    w*_ref : (9*Cp, Cp) bf16    conv taps, row = (kh*3+kw)*Cp + cin
    g*/b*  : (1, Cp) f32        InstanceNorm affine params (zero-padded)
    o_ref  : (NB, C, H*W)       channels-first flat output samples
    pad_ref: (H+2, W+2, Cp) f32 zero-haloed channels-last activation scratch
    cf_ref : (Cp, H*W) f32      channels-first staging scratch (rows C:Cp == 0)
    col_ref: (H*W, 9*Cp) bf16   im2col patch matrix (MXU LHS)
    """
    HW = H * W
    f32 = jnp.float32

    # One-time init of persistent scratch state (grid runs sequentially on one
    # core -> program_id(0)==0 executes first).  Invariants kept afterwards:
    #   * pad_ref halo rows/cols are never written again       -> stay zero
    #   * pad_ref interior is fully overwritten (all Cp lanes) every stage:
    #     by cf_ref.T (rows C:Cp zero) on load, by y1 (padded channels exactly
    #     zero because gamma/beta padding is zero) between stages
    #   * cf_ref rows C:Cp are never written again             -> stay zero
    @pl.when(pl.program_id(0) == 0)
    def _init():
        pad_ref[...] = jnp.zeros_like(pad_ref)
        cf_ref[...] = jnp.zeros_like(cf_ref)

    def conv3x3_in(w_ref, g_ref, b_ref, relu):
        # im2col: 9 explicit (HW, Cp) copies (the W-slice of the haloed buffer
        # is not a view anyway), then ONE K=9*Cp MXU matmul in bf16 x bf16
        # with f32 accumulation.
        for kh in range(3):
            for kw in range(3):
                t = kh * 3 + kw
                col_ref[:, t * Cp:(t + 1) * Cp] = (
                    pad_ref[kh:kh + H, kw:kw + W, :]
                    .reshape(HW, Cp).astype(col_ref.dtype))
        acc = jnp.dot(col_ref[...], w_ref[...],
                      preferred_element_type=f32)                  # (HW, Cp)
        # InstanceNorm2d (training-mode statistics), two-pass biased variance.
        inv_n = 1.0 / float(HW)
        mean = jnp.sum(acc, axis=0, keepdims=True) * inv_n          # (1, Cp)
        d = acc - mean
        var = jnp.sum(d * d, axis=0, keepdims=True) * inv_n         # (1, Cp)
        scale = jax.lax.rsqrt(var + EPS) * g_ref[...]
        y = d * scale + b_ref[...]
        if relu:
            y = jnp.maximum(y, 0.0)
        return y                                                    # (HW, Cp)

    for n in range(NB):   # NB is a small static constant -> unrolled
        # ---- load sample n: channels-first -> channels-last interior ----
        cf_ref[0:C, :] = x_ref[n].astype(f32)
        pad_ref[1:H + 1, 1:W + 1, :] = cf_ref[...].T.reshape(H, W, Cp)

        y1 = conv3x3_in(w1_ref, g1_ref, b1_ref, relu=True)
        # Stage-2 input never leaves VMEM: overwrite the interior (halo and
        # padded-channel lanes stay exactly zero -- y1's padded lanes are 0).
        pad_ref[1:H + 1, 1:W + 1, :] = y1.reshape(H, W, Cp)
        y2 = conv3x3_in(w2_ref, g2_ref, b2_ref, relu=False)

        # Back to channels-first; drop channel padding on the store.
        o_ref[n] = y2.T[0:C, :].astype(o_ref.dtype)


def _pick_nb(N, max_nb=4):
    """Largest divisor of N that is <= max_nb (samples per grid step)."""
    nb = min(N, max_nb)
    while N % nb:
        nb -= 1
    return max(nb, 1)


def _round_up(x, m):
    return ((x + m - 1) // m) * m


def residual_block_forward(x_nchw, params, *, max_nb=4):
    """Pallas implementation of Residual_block.forward. x_nchw: (N, C, H, W)."""
    w1, g1, b1, w2, g2, b2 = params       # w: (3,3,C,C) HWIO, g/b: (1,C)
    N, C, H, W = x_nchw.shape
    HW = H * W
    Cp = _round_up(C, 128)                # lane/MXU-dense channel padding
    nb = _pick_nb(N, max_nb)

    # Free layout change: NCHW -> (N, C, H*W) (trailing dims merge, no copy).
    x2d = x_nchw.reshape(N, C, HW)

    # Tiny one-time parameter repacking: zero-pad channels, flatten the 9 taps
    # into the matmul K dim, cast conv weights to bf16 (MXU operands only).
    def pad_w(w):
        wp = jnp.pad(w.astype(jnp.float32),
                     ((0, 0), (0, 0), (0, Cp - C), (0, Cp - C)))
        return wp.reshape(9 * Cp, Cp).astype(jnp.bfloat16)

    def pad_v(v):
        return jnp.pad(v.astype(jnp.float32), ((0, 0), (0, Cp - C)))

    w1r, w2r = pad_w(w1), pad_w(w2)
    g1p, b1p, g2p, b2p = pad_v(g1), pad_v(b1), pad_v(g2), pad_v(b2)

    kernel = functools.partial(_res_block_kernel,
                               H=H, W=W, C=C, Cp=Cp, NB=nb)

    # Honest cost estimate: real channels C, bf16 weight bytes.
    flops = 2 * 2 * 9 * N * HW * C * C                 # 2 convs, 2 flops/MAC
    bytes_accessed = 2 * N * C * HW * 4 + 2 * 9 * C * C * 2 + 4 * C * 4
    transcendentals = 2 * N * C                        # one rsqrt per chan/stage

    # Explicit scoped-VMEM budget (>= default so small configs never regress,
    # capped at v7x's 64 MiB physical VMEM).
    est_bytes = (
        2 * 2 * 9 * Cp * Cp * 2                        # w1,w2 blocks (dbuf)
        + 2 * 2 * nb * C * HW * 4                      # in/out blocks (dbuf)
        + (H + 2) * _round_up(W + 2, 8) * Cp * 4       # pad_ref
        + Cp * HW * 4                                  # cf_ref
        + HW * 9 * Cp * 2                              # col_ref
        + 6 * HW * Cp * 4)                             # live f32 temporaries
    vmem_limit = int(min(max(2 * est_bytes, 32 * 1024 * 1024),
                         64 * 1024 * 1024))

    out2d = pl.pallas_call(
        kernel,
        out_shape=jax.ShapeDtypeStruct((N, C, HW), x_nchw.dtype),
        grid_spec=pltpu.PrefetchScalarGridSpec(
            num_scalar_prefetch=0,
            grid=(N // nb,),
            in_specs=[
                pl.BlockSpec((nb, C, HW), lambda i: (i, 0, 0)),
                pl.BlockSpec((9 * Cp, Cp), lambda i: (0, 0)),
                pl.BlockSpec((1, Cp), lambda i: (0, 0)),
                pl.BlockSpec((1, Cp), lambda i: (0, 0)),
                pl.BlockSpec((9 * Cp, Cp), lambda i: (0, 0)),
                pl.BlockSpec((1, Cp), lambda i: (0, 0)),
                pl.BlockSpec((1, Cp), lambda i: (0, 0)),
            ],
            out_specs=pl.BlockSpec((nb, C, HW), lambda i: (i, 0, 0)),
            scratch_shapes=[
                pltpu.VMEM((H + 2, W + 2, Cp), jnp.float32),   # haloed activ.
                pltpu.VMEM((Cp, HW), jnp.float32),             # cf staging
                pltpu.VMEM((HW, 9 * Cp), jnp.bfloat16),        # im2col patches
            ],
        ),
        # "arbitrary": the one-time scratch init relies on sequential grid
        # execution on a single core (see kernel comment).
        compiler_params=pltpu.CompilerParams(
            dimension_semantics=("arbitrary",),
            vmem_limit_bytes=vmem_limit),
        cost_estimate=pl.CostEstimate(
            flops=flops, transcendentals=transcendentals,
            bytes_accessed=bytes_accessed),
    )(x2d, w1r, g1p, b1p, w2r, g2p, b2p)

    return out2d.reshape(N, C, H, W)


def init_params(key, c):
    """Deterministic parameter init matching the module's shapes.

    Conv2d(c, c, 3, bias=False): weight built directly in HWIO = (3, 3, c, c).
    InstanceNorm2d(affine=True): gamma=1, beta=0.
    """
    k1, k2 = jax.random.split(key)
    fan_in = c * 3 * 3
    bound = 1.0 / (fan_in ** 0.5)   # PyTorch kaiming-uniform-style bound
    w1 = jax.random.uniform(k1, (3, 3, c, c), jnp.float32, -bound, bound)
    w2 = jax.random.uniform(k2, (3, 3, c, c), jnp.float32, -bound, bound)
    g1 = jnp.ones((1, c), jnp.float32)
    b1 = jnp.zeros((1, c), jnp.float32)
    g2 = jnp.ones((1, c), jnp.float32)
    b2 = jnp.zeros((1, c), jnp.float32)
    return (w1, g1, b1, w2, g2, b2)


def _reference(x_nchw, params):
    """Pure-JAX reference (NHWC internally).

    Matmul operands are cast to bf16 exactly like the kernel's MXU inputs
    (accumulation and InstanceNorm math stay f32), so the comparison isolates
    layout/indexing bugs rather than operand-rounding differences.
    """
    w1, g1, b1, w2, g2, b2 = params
    x = jnp.transpose(x_nchw, (0, 2, 3, 1)).astype(jnp.float32)

    def conv_in(x, w, g, b, relu):
        N, H, W, C = x.shape
        xb = x.astype(jnp.bfloat16)
        wb = w.astype(jnp.bfloat16)
        xp = jnp.pad(xb, ((0, 0), (1, 1), (1, 1), (0, 0)))
        acc = jnp.zeros((N, H, W, C), jnp.float32)
        for kh in range(3):
            for kw in range(3):
                acc = acc + jnp.einsum(
                    'nhwc,cd->nhwd', xp[:, kh:kh + H, kw:kw + W, :],
                    wb[kh, kw], preferred_element_type=jnp.float32)
        mean = acc.mean(axis=(1, 2), keepdims=True)
        var = ((acc - mean) ** 2).mean(axis=(1, 2), keepdims=True)
        y = (acc - mean) * jax.lax.rsqrt(var + EPS)
        y = y * g.reshape(1, 1, 1, -1) + b.reshape(1, 1, 1, -1)
        return jnp.maximum(y, 0.0) if relu else y

    y = conv_in(x, w1, g1, b1, True)
    z = conv_in(y, w2, g2, b2, False)
    return jnp.transpose(z, (0, 3, 1, 2))


if __name__ == "__main__":
    key = jax.random.PRNGKey(0)
    kx, kp = jax.random.split(key)
    N, C, H, W = 2, 4, 16, 16
    x = jax.random.normal(kx, (N, C, H, W), jnp.float32)   # NCHW like PyTorch
    params = init_params(kp, C)

    fwd = jax.jit(residual_block_forward)
    out = jax.block_until_ready(fwd(x, params))

    assert out.shape == (N, C, H, W), out.shape
    assert bool(jnp.all(jnp.isfinite(out)))

    ref = _reference(x, params)
    err = jnp.abs(out - ref)
    max_err = float(jnp.max(err))
    mean_err = float(jnp.mean(err))
    # bf16 MXU operands bound the worst-case element error (~1e-2 at a bf16
    # rounding cliff); layout/transpose regressions produce O(1) errors and
    # are caught by both checks.  Mean error stays ~1e-5 when correct.
    assert max_err < 1e-2, f"max err vs reference: {max_err}"
    assert mean_err < 1e-4, f"mean err vs reference: {mean_err}"

    print("KERNEL_OK")
</pallas_src>

<mosaic_0001>
module attributes {stable_mosaic.version = 11 : i64} {
  func.func @_res_block_kernel(%arg0: i32, %arg1: memref<2x4x256xf32, #tpu.memory_space<vmem>>, %arg2: memref<1152x128xbf16, #tpu.memory_space<vmem>>, %arg3: memref<1x128xf32, #tpu.memory_space<vmem>>, %arg4: memref<1x128xf32, #tpu.memory_space<vmem>>, %arg5: memref<1152x128xbf16, #tpu.memory_space<vmem>>, %arg6: memref<1x128xf32, #tpu.memory_space<vmem>>, %arg7: memref<1x128xf32, #tpu.memory_space<vmem>>, %arg8: memref<2x4x256xf32, #tpu.memory_space<vmem>>, %arg9: memref<18x18x128xf32, #tpu.memory_space<vmem>>, %arg10: memref<128x256xf32, #tpu.memory_space<vmem>>, %arg11: memref<256x1152xbf16, #tpu.memory_space<vmem>>) attributes {dimension_semantics = [#tpu.dimension_semantics<arbitrary>], iteration_bounds = array<i64: 1>, scalar_prefetch = 0 : i64, scratch_operands = 3 : i64, tpu.core_type = #tpu.core_type<tc>, window_params = [{transform_indices = @transform_0, window_bounds = array<i64: 2, 4, 256>}, {pipeline_mode = #tpu.pipeline_mode<synchronous>, transform_indices = @transform_1, window_bounds = array<i64: 1152, 128>}, {pipeline_mode = #tpu.pipeline_mode<synchronous>, transform_indices = @transform_2, window_bounds = array<i64: 1, 128>}, {pipeline_mode = #tpu.pipeline_mode<synchronous>, transform_indices = @transform_3, window_bounds = array<i64: 1, 128>}, {pipeline_mode = #tpu.pipeline_mode<synchronous>, transform_indices = @transform_4, window_bounds = array<i64: 1152, 128>}, {pipeline_mode = #tpu.pipeline_mode<synchronous>, transform_indices = @transform_5, window_bounds = array<i64: 1, 128>}, {pipeline_mode = #tpu.pipeline_mode<synchronous>, transform_indices = @transform_6, window_bounds = array<i64: 1, 128>}, {transform_indices = @transform_7, window_bounds = array<i64: 2, 4, 256>}]} {
    %c0_i32 = arith.constant 0 : i32
    %0 = arith.cmpi eq, %arg0, %c0_i32 : i32
    %1 = arith.extui %0 : i1 to i32
    %c0_i32_0 = arith.constant 0 : i32
    %2 = arith.cmpi ne, %1, %c0_i32_0 : i32
    scf.if %2 {
      %cst_259 = arith.constant 0.000000e+00 : f32
      %275 = vector.broadcast %cst_259 : f32 to vector<18x18x128xf32>
      %c0_260 = arith.constant 0 : index
      %c0_261 = arith.constant 0 : index
      %c0_262 = arith.constant 0 : index
      %276 = vector.load %arg9[%c0_260, %c0_261, %c0_262] : memref<18x18x128xf32, #tpu.memory_space<vmem>>, vector<18x18x128xf32>
      tpu.vector_store %arg9[%c0_260, %c0_261, %c0_262], %275 {strides = array<i32>} : memref<18x18x128xf32, #tpu.memory_space<vmem>>, vector<18x18x128xf32>,
      %cst_263 = arith.constant 0.000000e+00 : f32
      %277 = vector.broadcast %cst_263 : f32 to vector<128x256xf32>
      %c0_264 = arith.constant 0 : index
      %c0_265 = arith.constant 0 : index
      %278 = vector.load %arg10[%c0_264, %c0_265] : memref<128x256xf32, #tpu.memory_space<vmem>>, vector<128x256xf32>
      tpu.vector_store %arg10[%c0_264, %c0_265], %277 {strides = array<i32>} : memref<128x256xf32, #tpu.memory_space<vmem>>, vector<128x256xf32>,
    } else {
    }
    %c0 = arith.constant 0 : index
    %c0_1 = arith.constant 0 : index
    %c0_2 = arith.constant 0 : index
    %3 = vector.load %arg1[%c0, %c0_1, %c0_2] : memref<2x4x256xf32, #tpu.memory_space<vmem>>, vector<1x4x256xf32>
    %4 = vector.shape_cast %3 : vector<1x4x256xf32> to vector<4x256xf32>
    %c0_3 = arith.constant 0 : index
    %c0_4 = arith.constant 0 : index
    %5 = vector.load %arg10[%c0_3, %c0_4] : memref<128x256xf32, #tpu.memory_space<vmem>>, vector<4x256xf32>
    tpu.vector_store %arg10[%c0_3, %c0_4], %4 {strides = array<i32>} : memref<128x256xf32, #tpu.memory_space<vmem>>, vector<4x256xf32>,
    %c0_5 = arith.constant 0 : index
    %c0_6 = arith.constant 0 : index
    %6 = vector.load %arg10[%c0_5, %c0_6] : memref<128x256xf32, #tpu.memory_space<vmem>>, vector<128x256xf32>
    %7 = tpu.transpose %6, [1, 0] : vector<128x256xf32> -> vector<256x128xf32>
    %8 = vector.shape_cast %7 : vector<256x128xf32> to vector<16x16x128xf32>
    %c1 = arith.constant 1 : index
    %c1_7 = arith.constant 1 : index
    %c0_8 = arith.constant 0 : index
    %9 = vector.load %arg9[%c1, %c1_7, %c0_8] : memref<18x18x128xf32, #tpu.memory_space<vmem>>, vector<16x16x128xf32>
    tpu.vector_store %arg9[%c1, %c1_7, %c0_8], %8 {strides = array<i32>} : memref<18x18x128xf32, #tpu.memory_space<vmem>>, vector<16x16x128xf32>,
    %c0_9 = arith.constant 0 : index
    %c0_10 = arith.constant 0 : index
    %c0_11 = arith.constant 0 : index
    %10 = vector.load %arg9[%c0_9, %c0_10, %c0_11] : memref<18x18x128xf32, #tpu.memory_space<vmem>>, vector<16x16x128xf32>
    %11 = vector.shape_cast %10 : vector<16x16x128xf32> to vector<256x128xf32>
    %12 = arith.truncf %11 : vector<256x128xf32> to vector<256x128xbf16>
    %c0_12 = arith.constant 0 : index
    %c0_13 = arith.constant 0 : index
    %13 = vector.load %arg11[%c0_12, %c0_13] : memref<256x1152xbf16, #tpu.memory_space<vmem>>, vector<256x128xbf16>
    tpu.vector_store %arg11[%c0_12, %c0_13], %12 {strides = array<i32>} : memref<256x1152xbf16, #tpu.memory_space<vmem>>, vector<256x128xbf16>,
    %c0_14 = arith.constant 0 : index
    %c1_15 = arith.constant 1 : index
    %c0_16 = arith.constant 0 : index
    %14 = vector.load %arg9[%c0_14, %c1_15, %c0_16] : memref<18x18x128xf32, #tpu.memory_space<vmem>>, vector<16x16x128xf32>
    %15 = vector.shape_cast %14 : vector<16x16x128xf32> to vector<256x128xf32>
    %16 = arith.truncf %15 : vector<256x128xf32> to vector<256x128xbf16>
    %c0_17 = arith.constant 0 : index
    %c128 = arith.constant 128 : index
    %17 = vector.load %arg11[%c0_17, %c128] : memref<256x1152xbf16, #tpu.memory_space<vmem>>, vector<256x128xbf16>
    tpu.vector_store %arg11[%c0_17, %c128], %16 {strides = array<i32>} : memref<256x1152xbf16, #tpu.memory_space<vmem>>, vector<256x128xbf16>,
    %c0_18 = arith.constant 0 : index
    %c2 = arith.constant 2 : index
    %c0_19 = arith.constant 0 : index
    %18 = vector.load %arg9[%c0_18, %c2, %c0_19] : memref<18x18x128xf32, #tpu.memory_space<vmem>>, vector<16x16x128xf32>
    %19 = vector.shape_cast %18 : vector<16x16x128xf32> to vector<256x128xf32>
    %20 = arith.truncf %19 : vector<256x128xf32> to vector<256x128xbf16>
    %c0_20 = arith.constant 0 : index
    %c256 = arith.constant 256 : index
    %21 = vector.load %arg11[%c0_20, %c256] : memref<256x1152xbf16, #tpu.memory_space<vmem>>, vector<256x128xbf16>
    tpu.vector_store %arg11[%c0_20, %c256], %20 {strides = array<i32>} : memref<256x1152xbf16, #tpu.memory_space<vmem>>, vector<256x128xbf16>,
    %c1_21 = arith.constant 1 : index
    %c0_22 = arith.constant 0 : index
    %c0_23 = arith.constant 0 : index
    %22 = vector.load %arg9[%c1_21, %c0_22, %c0_23] : memref<18x18x128xf32, #tpu.memory_space<vmem>>, vector<16x16x128xf32>
    %23 = vector.shape_cast %22 : vector<16x16x128xf32> to vector<256x128xf32>
    %24 = arith.truncf %23 : vector<256x128xf32> to vector<256x128xbf16>
    %c0_24 = arith.constant 0 : index
    %c384 = arith.constant 384 : index
    %25 = vector.load %arg11[%c0_24, %c384] : memref<256x1152xbf16, #tpu.memory_space<vmem>>, vector<256x128xbf16>
    tpu.vector_store %arg11[%c0_24, %c384], %24 {strides = array<i32>} : memref<256x1152xbf16, #tpu.memory_space<vmem>>, vector<256x128xbf16>,
    %c1_25 = arith.constant 1 : index
    %c1_26 = arith.constant 1 : index
    %c0_27 = arith.constant 0 : index
    %26 = vector.load %arg9[%c1_25, %c1_26, %c0_27] : memref<18x18x128xf32, #tpu.memory_space<vmem>>, vector<16x16x128xf32>
    %27 = vector.shape_cast %26 : vector<16x16x128xf32> to vector<256x128xf32>
    %28 = arith.truncf %27 : vector<256x128xf32> to vector<256x128xbf16>
    %c0_28 = arith.constant 0 : index
    %c512 = arith.constant 512 : index
    %29 = vector.load %arg11[%c0_28, %c512] : memref<256x1152xbf16, #tpu.memory_space<vmem>>, vector<256x128xbf16>
    tpu.vector_store %arg11[%c0_28, %c512], %28 {strides = array<i32>} : memref<256x1152xbf16, #tpu.memory_space<vmem>>, vector<256x128xbf16>,
    %c1_29 = arith.constant 1 : index
    %c2_30 = arith.constant 2 : index
    %c0_31 = arith.constant 0 : index
    %30 = vector.load %arg9[%c1_29, %c2_30, %c0_31] : memref<18x18x128xf32, #tpu.memory_space<vmem>>, vector<16x16x128xf32>
    %31 = vector.shape_cast %30 : vector<16x16x128xf32> to vector<256x128xf32>
    %32 = arith.truncf %31 : vector<256x128xf32> to vector<256x128xbf16>
    %c0_32 = arith.constant 0 : index
    %c640 = arith.constant 640 : index
    %33 = vector.load %arg11[%c0_32, %c640] : memref<256x1152xbf16, #tpu.memory_space<vmem>>, vector<256x128xbf16>
    tpu.vector_store %arg11[%c0_32, %c640], %32 {strides = array<i32>} : memref<256x1152xbf16, #tpu.memory_space<vmem>>, vector<256x128xbf16>,
    %c2_33 = arith.constant 2 : index
    %c0_34 = arith.constant 0 : index
    %c0_35 = arith.constant 0 : index
    %34 = vector.load %arg9[%c2_33, %c0_34, %c0_35] : memref<18x18x128xf32, #tpu.memory_space<vmem>>, vector<16x16x128xf32>
    %35 = vector.shape_cast %34 : vector<16x16x128xf32> to vector<256x128xf32>
    %36 = arith.truncf %35 : vector<256x128xf32> to vector<256x128xbf16>
    %c0_36 = arith.constant 0 : index
    %c768 = arith.constant 768 : index
    %37 = vector.load %arg11[%c0_36, %c768] : memref<256x1152xbf16, #tpu.memory_space<vmem>>, vector<256x128xbf16>
    tpu.vector_store %arg11[%c0_36, %c768], %36 {strides = array<i32>} : memref<256x1152xbf16, #tpu.memory_space<vmem>>, vector<256x128xbf16>,
    %c2_37 = arith.constant 2 : index
    %c1_38 = arith.constant 1 : index
    %c0_39 = arith.constant 0 : index
    %38 = vector.load %arg9[%c2_37, %c1_38, %c0_39] : memref<18x18x128xf32, #tpu.memory_space<vmem>>, vector<16x16x128xf32>
    %39 = vector.shape_cast %38 : vector<16x16x128xf32> to vector<256x128xf32>
    %40 = arith.truncf %39 : vector<256x128xf32> to vector<256x128xbf16>
    %c0_40 = arith.constant 0 : index
    %c896 = arith.constant 896 : index
    %41 = vector.load %arg11[%c0_40, %c896] : memref<256x1152xbf16, #tpu.memory_space<vmem>>, vector<256x128xbf16>
    tpu.vector_store %arg11[%c0_40, %c896], %40 {strides = array<i32>} : memref<256x1152xbf16, #tpu.memory_space<vmem>>, vector<256x128xbf16>,
    %c2_41 = arith.constant 2 : index
    %c2_42 = arith.constant 2 : index
    %c0_43 = arith.constant 0 : index
    %42 = vector.load %arg9[%c2_41, %c2_42, %c0_43] : memref<18x18x128xf32, #tpu.memory_space<vmem>>, vector<16x16x128xf32>
    %43 = vector.shape_cast %42 : vector<16x16x128xf32> to vector<256x128xf32>
    %44 = arith.truncf %43 : vector<256x128xf32> to vector<256x128xbf16>
    %c0_44 = arith.constant 0 : index
    %c1024 = arith.constant 1024 : index
    %45 = vector.load %arg11[%c0_44, %c1024] : memref<256x1152xbf16, #tpu.memory_space<vmem>>, vector<256x128xbf16>
    tpu.vector_store %arg11[%c0_44, %c1024], %44 {strides = array<i32>} : memref<256x1152xbf16, #tpu.memory_space<vmem>>, vector<256x128xbf16>,
    %c0_45 = arith.constant 0 : index
    %c0_46 = arith.constant 0 : index
    %46 = vector.load %arg11[%c0_45, %c0_46] : memref<256x1152xbf16, #tpu.memory_space<vmem>>, vector<256x1152xbf16>
    %c0_47 = arith.constant 0 : index
    %c0_48 = arith.constant 0 : index
    %47 = vector.load %arg2[%c0_47, %c0_48] : memref<1152x128xbf16, #tpu.memory_space<vmem>>, vector<1152x128xbf16>
    %cst = arith.constant dense<0.000000e+00> : vector<256x128xf32>
    %48 = tpu.matmul %46, %47, %cst {dimension_numbers = #tpu.dot_dimension_numbers<[1], [0], [0], [1], [0, 0, 1, 1], [], []>} : vector<256x1152xbf16>, vector<1152x128xbf16>, vector<256x128xf32> -> vector<256x128xf32>
    %cst_49 = arith.constant dense<0.000000e+00> : vector<128xf32>
    %49 = vector.multi_reduction <add>, %48, %cst_49 [0] : vector<256x128xf32> to vector<128xf32>
    %50 = vector.shape_cast %49 : vector<128xf32> to vector<1x128xf32>
    %cst_50 = arith.constant 3.906250e-03 : f32
    %51 = vector.broadcast %cst_50 : f32 to vector<1x128xf32>
    %52 = arith.mulf %50, %51 : vector<1x128xf32>
    %53 = vector.broadcast %52 : vector<1x128xf32> to vector<256x128xf32>
    %54 = arith.subf %48, %53 : vector<256x128xf32>
    %55 = arith.mulf %54, %54 : vector<256x128xf32>
    %cst_51 = arith.constant dense<0.000000e+00> : vector<128xf32>
    %56 = vector.multi_reduction <add>, %55, %cst_51 [0] : vector<256x128xf32> to vector<128xf32>
    %57 = vector.shape_cast %56 : vector<128xf32> to vector<1x128xf32>
    %cst_52 = arith.constant 3.906250e-03 : f32
    %58 = vector.broadcast %cst_52 : f32 to vector<1x128xf32>
    %59 = arith.mulf %57, %58 : vector<1x128xf32>
    %cst_53 = arith.constant 9.99999974E-6 : f32
    %60 = vector.broadcast %cst_53 : f32 to vector<1x128xf32>
    %61 = arith.addf %59, %60 : vector<1x128xf32>
    %62 = math.rsqrt %61 : vector<1x128xf32>
    %c0_54 = arith.constant 0 : index
    %c0_55 = arith.constant 0 : index
    %63 = vector.load %arg3[%c0_54, %c0_55] : memref<1x128xf32, #tpu.memory_space<vmem>>, vector<1x128xf32>
    %64 = arith.mulf %62, %63 : vector<1x128xf32>
    %65 = vector.broadcast %64 : vector<1x128xf32> to vector<256x128xf32>
    %66 = arith.mulf %54, %65 : vector<256x128xf32>
    %c0_56 = arith.constant 0 : index
    %c0_57 = arith.constant 0 : index
    %67 = vector.load %arg4[%c0_56, %c0_57] : memref<1x128xf32, #tpu.memory_space<vmem>>, vector<1x128xf32>
    %68 = vector.broadcast %67 : vector<1x128xf32> to vector<256x128xf32>
    %69 = arith.addf %66, %68 : vector<256x128xf32>
    %cst_58 = arith.constant 0.000000e+00 : f32
    %70 = vector.broadcast %cst_58 : f32 to vector<256x128xf32>
    %71 = arith.maximumf %69, %70 : vector<256x128xf32>
    %72 = vector.shape_cast %71 : vector<256x128xf32> to vector<16x16x128xf32>
    %c1_59 = arith.constant 1 : index
    %c1_60 = arith.constant 1 : index
    %c0_61 = arith.constant 0 : index
    %73 = vector.load %arg9[%c1_59, %c1_60, %c0_61] : memref<18x18x128xf32, #tpu.memory_space<vmem>>, vector<16x16x128xf32>
    tpu.vector_store %arg9[%c1_59, %c1_60, %c0_61], %72 {strides = array<i32>} : memref<18x18x128xf32, #tpu.memory_space<vmem>>, vector<16x16x128xf32>,
    %c0_62 = arith.constant 0 : index
    %c0_63 = arith.constant 0 : index
    %c0_64 = arith.constant 0 : index
    %74 = vector.load %arg9[%c0_62, %c0_63, %c0_64] : memref<18x18x128xf32, #tpu.memory_space<vmem>>, vector<16x16x128xf32>
    %75 = vector.shape_cast %74 : vector<16x16x128xf32> to vector<256x128xf32>
    %76 = arith.truncf %75 : vector<256x128xf32> to vector<256x128xbf16>
    %c0_65 = arith.constant 0 : index
    %c0_66 = arith.constant 0 : index
    %77 = vector.load %arg11[%c0_65, %c0_66] : memref<256x1152xbf16, #tpu.memory_space<vmem>>, vector<256x128xbf16>
    tpu.vector_store %arg11[%c0_65, %c0_66], %76 {strides = array<i32>} : memref<256x1152xbf16, #tpu.memory_space<vmem>>, vector<256x128xbf16>,
    %c0_67 = arith.constant 0 : index
    %c1_68 = arith.constant 1 : index
    %c0_69 = arith.constant 0 : index
    %78 = vector.load %arg9[%c0_67, %c1_68, %c0_69] : memref<18x18x128xf32, #tpu.memory_space<vmem>>, vector<16x16x128xf32>
    %79 = vector.shape_cast %78 : vector<16x16x128xf32> to vector<256x128xf32>
    %80 = arith.truncf %79 : vector<256x128xf32> to vector<256x128xbf16>
    %c0_70 = arith.constant 0 : index
    %c128_71 = arith.constant 128 : index
    %81 = vector.load %arg11[%c0_70, %c128_71] : memref<256x1152xbf16, #tpu.memory_space<vmem>>, vector<256x128xbf16>
    tpu.vector_store %arg11[%c0_70, %c128_71], %80 {strides = array<i32>} : memref<256x1152xbf16, #tpu.memory_space<vmem>>, vector<256x128xbf16>,
    %c0_72 = arith.constant 0 : index
    %c2_73 = arith.constant 2 : index
    %c0_74 = arith.constant 0 : index
    %82 = vector.load %arg9[%c0_72, %c2_73, %c0_74] : memref<18x18x128xf32, #tpu.memory_space<vmem>>, vector<16x16x128xf32>
    %83 = vector.shape_cast %82 : vector<16x16x128xf32> to vector<256x128xf32>
    %84 = arith.truncf %83 : vector<256x128xf32> to vector<256x128xbf16>
    %c0_75 = arith.constant 0 : index
    %c256_76 = arith.constant 256 : index
    %85 = vector.load %arg11[%c0_75, %c256_76] : memref<256x1152xbf16, #tpu.memory_space<vmem>>, vector<256x128xbf16>
    tpu.vector_store %arg11[%c0_75, %c256_76], %84 {strides = array<i32>} : memref<256x1152xbf16, #tpu.memory_space<vmem>>, vector<256x128xbf16>,
    %c1_77 = arith.constant 1 : index
    %c0_78 = arith.constant 0 : index
    %c0_79 = arith.constant 0 : index
    %86 = vector.load %arg9[%c1_77, %c0_78, %c0_79] : memref<18x18x128xf32, #tpu.memory_space<vmem>>, vector<16x16x128xf32>
    %87 = vector.shape_cast %86 : vector<16x16x128xf32> to vector<256x128xf32>
    %88 = arith.truncf %87 : vector<256x128xf32> to vector<256x128xbf16>
    %c0_80 = arith.constant 0 : index
    %c384_81 = arith.constant 384 : index
    %89 = vector.load %arg11[%c0_80, %c384_81] : memref<256x1152xbf16, #tpu.memory_space<vmem>>, vector<256x128xbf16>
    tpu.vector_store %arg11[%c0_80, %c384_81], %88 {strides = array<i32>} : memref<256x1152xbf16, #tpu.memory_space<vmem>>, vector<256x128xbf16>,
    %c1_82 = arith.constant 1 : index
    %c1_83 = arith.constant 1 : index
    %c0_84 = arith.constant 0 : index
    %90 = vector.load %arg9[%c1_82, %c1_83, %c0_84] : memref<18x18x128xf32, #tpu.memory_space<vmem>>, vector<16x16x128xf32>
    %91 = vector.shape_cast %90 : vector<16x16x128xf32> to vector<256x128xf32>
    %92 = arith.truncf %91 : vector<256x128xf32> to vector<256x128xbf16>
    %c0_85 = arith.constant 0 : index
    %c512_86 = arith.constant 512 : index
    %93 = vector.load %arg11[%c0_85, %c512_86] : memref<256x1152xbf16, #tpu.memory_space<vmem>>, vector<256x128xbf16>
    tpu.vector_store %arg11[%c0_85, %c512_86], %92 {strides = array<i32>} : memref<256x1152xbf16, #tpu.memory_space<vmem>>, vector<256x128xbf16>,
    %c1_87 = arith.constant 1 : index
    %c2_88 = arith.constant 2 : index
    %c0_89 = arith.constant 0 : index
    %94 = vector.load %arg9[%c1_87, %c2_88, %c0_89] : memref<18x18x128xf32, #tpu.memory_space<vmem>>, vector<16x16x128xf32>
    %95 = vector.shape_cast %94 : vector<16x16x128xf32> to vector<256x128xf32>
    %96 = arith.truncf %95 : vector<256x128xf32> to vector<256x128xbf16>
    %c0_90 = arith.constant 0 : index
    %c640_91 = arith.constant 640 : index
    %97 = vector.load %arg11[%c0_90, %c640_91] : memref<256x1152xbf16, #tpu.memory_space<vmem>>, vector<256x128xbf16>
    tpu.vector_store %arg11[%c0_90, %c640_91], %96 {strides = array<i32>} : memref<256x1152xbf16, #tpu.memory_space<vmem>>, vector<256x128xbf16>,
    %c2_92 = arith.constant 2 : index
    %c0_93 = arith.constant 0 : index
    %c0_94 = arith.constant 0 : index
    %98 = vector.load %arg9[%c2_92, %c0_93, %c0_94] : memref<18x18x128xf32, #tpu.memory_space<vmem>>, vector<16x16x128xf32>
    %99 = vector.shape_cast %98 : vector<16x16x128xf32> to vector<256x128xf32>
    %100 = arith.truncf %99 : vector<256x128xf32> to vector<256x128xbf16>
    %c0_95 = arith.constant 0 : index
    %c768_96 = arith.constant 768 : index
    %101 = vector.load %arg11[%c0_95, %c768_96] : memref<256x1152xbf16, #tpu.memory_space<vmem>>, vector<256x128xbf16>
    tpu.vector_store %arg11[%c0_95, %c768_96], %100 {strides = array<i32>} : memref<256x1152xbf16, #tpu.memory_space<vmem>>, vector<256x128xbf16>,
    %c2_97 = arith.constant 2 : index
    %c1_98 = arith.constant 1 : index
    %c0_99 = arith.constant 0 : index
    %102 = vector.load %arg9[%c2_97, %c1_98, %c0_99] : memref<18x18x128xf32, #tpu.memory_space<vmem>>, vector<16x16x128xf32>
    %103 = vector.shape_cast %102 : vector<16x16x128xf32> to vector<256x128xf32>
    %104 = arith.truncf %103 : vector<256x128xf32> to vector<256x128xbf16>
    %c0_100 = arith.constant 0 : index
    %c896_101 = arith.constant 896 : index
    %105 = vector.load %arg11[%c0_100, %c896_101] : memref<256x1152xbf16, #tpu.memory_space<vmem>>, vector<256x128xbf16>
    tpu.vector_store %arg11[%c0_100, %c896_101], %104 {strides = array<i32>} : memref<256x1152xbf16, #tpu.memory_space<vmem>>, vector<256x128xbf16>,
    %c2_102 = arith.constant 2 : index
    %c2_103 = arith.constant 2 : index
    %c0_104 = arith.constant 0 : index
    %106 = vector.load %arg9[%c2_102, %c2_103, %c0_104] : memref<18x18x128xf32, #tpu.memory_space<vmem>>, vector<16x16x128xf32>
    %107 = vector.shape_cast %106 : vector<16x16x128xf32> to vector<256x128xf32>
    %108 = arith.truncf %107 : vector<256x128xf32> to vector<256x128xbf16>
    %c0_105 = arith.constant 0 : index
    %c1024_106 = arith.constant 1024 : index
    %109 = vector.load %arg11[%c0_105, %c1024_106] : memref<256x1152xbf16, #tpu.memory_space<vmem>>, vector<256x128xbf16>
    tpu.vector_store %arg11[%c0_105, %c1024_106], %108 {strides = array<i32>} : memref<256x1152xbf16, #tpu.memory_space<vmem>>, vector<256x128xbf16>,
    %c0_107 = arith.constant 0 : index
    %c0_108 = arith.constant 0 : index
    %110 = vector.load %arg11[%c0_107, %c0_108] : memref<256x1152xbf16, #tpu.memory_space<vmem>>, vector<256x1152xbf16>
    %c0_109 = arith.constant 0 : index
    %c0_110 = arith.constant 0 : index
    %111 = vector.load %arg5[%c0_109, %c0_110] : memref<1152x128xbf16, #tpu.memory_space<vmem>>, vector<1152x128xbf16>
    %cst_111 = arith.constant dense<0.000000e+00> : vector<256x128xf32>
    %112 = tpu.matmul %110, %111, %cst_111 {dimension_numbers = #tpu.dot_dimension_numbers<[1], [0], [0], [1], [0, 0, 1, 1], [], []>} : vector<256x1152xbf16>, vector<1152x128xbf16>, vector<256x128xf32> -> vector<256x128xf32>
    %cst_112 = arith.constant dense<0.000000e+00> : vector<128xf32>
    %113 = vector.multi_reduction <add>, %112, %cst_112 [0] : vector<256x128xf32> to vector<128xf32>
    %114 = vector.shape_cast %113 : vector<128xf32> to vector<1x128xf32>
    %cst_113 = arith.constant 3.906250e-03 : f32
    %115 = vector.broadcast %cst_113 : f32 to vector<1x128xf32>
    %116 = arith.mulf %114, %115 : vector<1x128xf32>
    %117 = vector.broadcast %116 : vector<1x128xf32> to vector<256x128xf32>
    %118 = arith.subf %112, %117 : vector<256x128xf32>
    %119 = arith.mulf %118, %118 : vector<256x128xf32>
    %cst_114 = arith.constant dense<0.000000e+00> : vector<128xf32>
    %120 = vector.multi_reduction <add>, %119, %cst_114 [0] : vector<256x128xf32> to vector<128xf32>
    %121 = vector.shape_cast %120 : vector<128xf32> to vector<1x128xf32>
    %cst_115 = arith.constant 3.906250e-03 : f32
    %122 = vector.broadcast %cst_115 : f32 to vector<1x128xf32>
    %123 = arith.mulf %121, %122 : vector<1x128xf32>
    %cst_116 = arith.constant 9.99999974E-6 : f32
    %124 = vector.broadcast %cst_116 : f32 to vector<1x128xf32>
    %125 = arith.addf %123, %124 : vector<1x128xf32>
    %126 = math.rsqrt %125 : vector<1x128xf32>
    %c0_117 = arith.constant 0 : index
    %c0_118 = arith.constant 0 : index
    %127 = vector.load %arg6[%c0_117, %c0_118] : memref<1x128xf32, #tpu.memory_space<vmem>>, vector<1x128xf32>
    %128 = arith.mulf %126, %127 : vector<1x128xf32>
    %129 = vector.broadcast %128 : vector<1x128xf32> to vector<256x128xf32>
    %130 = arith.mulf %118, %129 : vector<256x128xf32>
    %c0_119 = arith.constant 0 : index
    %c0_120 = arith.constant 0 : index
    %131 = vector.load %arg7[%c0_119, %c0_120] : memref<1x128xf32, #tpu.memory_space<vmem>>, vector<1x128xf32>
    %132 = vector.broadcast %131 : vector<1x128xf32> to vector<256x128xf32>
    %133 = arith.addf %130, %132 : vector<256x128xf32>
    %134 = tpu.transpose %133, [1, 0] : vector<256x128xf32> -> vector<128x256xf32>
    %135 = vector.extract_strided_slice %134 {offsets = [0, 0], sizes = [4, 256], strides = [1, 1]} : vector<128x256xf32> to vector<4x256xf32>
    %c0_121 = arith.constant 0 : index
    %c0_122 = arith.constant 0 : index
    %c0_123 = arith.constant 0 : index
    %136 = vector.load %arg8[%c0_121, %c0_122, %c0_123] : memref<2x4x256xf32, #tpu.memory_space<vmem>>, vector<1x4x256xf32>
    %137 = vector.shape_cast %136 : vector<1x4x256xf32> to vector<4x256xf32>
    %138 = vector.shape_cast %135 : vector<4x256xf32> to vector<1x4x256xf32>
    tpu.vector_store %arg8[%c0_121, %c0_122, %c0_123], %138 {strides = array<i32>} : memref<2x4x256xf32, #tpu.memory_space<vmem>>, vector<1x4x256xf32>,
    %c1_124 = arith.constant 1 : index
    %c0_125 = arith.constant 0 : index
    %c0_126 = arith.constant 0 : index
    %139 = vector.load %arg1[%c1_124, %c0_125, %c0_126] : memref<2x4x256xf32, #tpu.memory_space<vmem>>, vector<1x4x256xf32>
    %140 = vector.shape_cast %139 : vector<1x4x256xf32> to vector<4x256xf32>
    %c0_127 = arith.constant 0 : index
    %c0_128 = arith.constant 0 : index
    %141 = vector.load %arg10[%c0_127, %c0_128] : memref<128x256xf32, #tpu.memory_space<vmem>>, vector<4x256xf32>
    tpu.vector_store %arg10[%c0_127, %c0_128], %140 {strides = array<i32>} : memref<128x256xf32, #tpu.memory_space<vmem>>, vector<4x256xf32>,
    %c0_129 = arith.constant 0 : index
    %c0_130 = arith.constant 0 : index
    %142 = vector.load %arg10[%c0_129, %c0_130] : memref<128x256xf32, #tpu.memory_space<vmem>>, vector<128x256xf32>
    %143 = tpu.transpose %142, [1, 0] : vector<128x256xf32> -> vector<256x128xf32>
    %144 = vector.shape_cast %143 : vector<256x128xf32> to vector<16x16x128xf32>
    %c1_131 = arith.constant 1 : index
    %c1_132 = arith.constant 1 : index
    %c0_133 = arith.constant 0 : index
    %145 = vector.load %arg9[%c1_131, %c1_132, %c0_133] : memref<18x18x128xf32, #tpu.memory_space<vmem>>, vector<16x16x128xf32>
    tpu.vector_store %arg9[%c1_131, %c1_132, %c0_133], %144 {strides = array<i32>} : memref<18x18x128xf32, #tpu.memory_space<vmem>>, vector<16x16x128xf32>,
    %c0_134 = arith.constant 0 : index
    %c0_135 = arith.constant 0 : index
    %c0_136 = arith.constant 0 : index
    %146 = vector.load %arg9[%c0_134, %c0_135, %c0_136] : memref<18x18x128xf32, #tpu.memory_space<vmem>>, vector<16x16x128xf32>
    %147 = vector.shape_cast %146 : vector<16x16x128xf32> to vector<256x128xf32>
    %148 = arith.truncf %147 : vector<256x128xf32> to vector<256x128xbf16>
    %c0_137 = arith.constant 0 : index
    %c0_138 = arith.constant 0 : index
    %149 = vector.load %arg11[%c0_137, %c0_138] : memref<256x1152xbf16, #tpu.memory_space<vmem>>, vector<256x128xbf16>
    tpu.vector_store %arg11[%c0_137, %c0_138], %148 {strides = array<i32>} : memref<256x1152xbf16, #tpu.memory_space<vmem>>, vector<256x128xbf16>,
    %c0_139 = arith.constant 0 : index
    %c1_140 = arith.constant 1 : index
    %c0_141 = arith.constant 0 : index
    %150 = vector.load %arg9[%c0_139, %c1_140, %c0_141] : memref<18x18x128xf32, #tpu.memory_space<vmem>>, vector<16x16x128xf32>
    %151 = vector.shape_cast %150 : vector<16x16x128xf32> to vector<256x128xf32>
    %152 = arith.truncf %151 : vector<256x128xf32> to vector<256x128xbf16>
    %c0_142 = arith.constant 0 : index
    %c128_143 = arith.constant 128 : index
    %153 = vector.load %arg11[%c0_142, %c128_143] : memref<256x1152xbf16, #tpu.memory_space<vmem>>, vector<256x128xbf16>
    tpu.vector_store %arg11[%c0_142, %c128_143], %152 {strides = array<i32>} : memref<256x1152xbf16, #tpu.memory_space<vmem>>, vector<256x128xbf16>,
    %c0_144 = arith.constant 0 : index
    %c2_145 = arith.constant 2 : index
    %c0_146 = arith.constant 0 : index
    %154 = vector.load %arg9[%c0_144, %c2_145, %c0_146] : memref<18x18x128xf32, #tpu.memory_space<vmem>>, vector<16x16x128xf32>
    %155 = vector.shape_cast %154 : vector<16x16x128xf32> to vector<256x128xf32>
    %156 = arith.truncf %155 : vector<256x128xf32> to vector<256x128xbf16>
    %c0_147 = arith.constant 0 : index
    %c256_148 = arith.constant 256 : index
    %157 = vector.load %arg11[%c0_147, %c256_148] : memref<256x1152xbf16, #tpu.memory_space<vmem>>, vector<256x128xbf16>
    tpu.vector_store %arg11[%c0_147, %c256_148], %156 {strides = array<i32>} : memref<256x1152xbf16, #tpu.memory_space<vmem>>, vector<256x128xbf16>,
    %c1_149 = arith.constant 1 : index
    %c0_150 = arith.constant 0 : index
    %c0_151 = arith.constant 0 : index
    %158 = vector.load %arg9[%c1_149, %c0_150, %c0_151] : memref<18x18x128xf32, #tpu.memory_space<vmem>>, vector<16x16x128xf32>
    %159 = vector.shape_cast %158 : vector<16x16x128xf32> to vector<256x128xf32>
    %160 = arith.truncf %159 : vector<256x128xf32> to vector<256x128xbf16>
    %c0_152 = arith.constant 0 : index
    %c384_153 = arith.constant 384 : index
    %161 = vector.load %arg11[%c0_152, %c384_153] : memref<256x1152xbf16, #tpu.memory_space<vmem>>, vector<256x128xbf16>
    tpu.vector_store %arg11[%c0_152, %c384_153], %160 {strides = array<i32>} : memref<256x1152xbf16, #tpu.memory_space<vmem>>, vector<256x128xbf16>,
    %c1_154 = arith.constant 1 : index
    %c1_155 = arith.constant 1 : index
    %c0_156 = arith.constant 0 : index
    %162 = vector.load %arg9[%c1_154, %c1_155, %c0_156] : memref<18x18x128xf32, #tpu.memory_space<vmem>>, vector<16x16x128xf32>
    %163 = vector.shape_cast %162 : vector<16x16x128xf32> to vector<256x128xf32>
    %164 = arith.truncf %163 : vector<256x128xf32> to vector<256x128xbf16>
    %c0_157 = arith.constant 0 : index
    %c512_158 = arith.constant 512 : index
    %165 = vector.load %arg11[%c0_157, %c512_158] : memref<256x1152xbf16, #tpu.memory_space<vmem>>, vector<256x128xbf16>
    tpu.vector_store %arg11[%c0_157, %c512_158], %164 {strides = array<i32>} : memref<256x1152xbf16, #tpu.memory_space<vmem>>, vector<256x128xbf16>,
    %c1_159 = arith.constant 1 : index
    %c2_160 = arith.constant 2 : index
    %c0_161 = arith.constant 0 : index
    %166 = vector.load %arg9[%c1_159, %c2_160, %c0_161] : memref<18x18x128xf32, #tpu.memory_space<vmem>>, vector<16x16x128xf32>
    %167 = vector.shape_cast %166 : vector<16x16x128xf32> to vector<256x128xf32>
    %168 = arith.truncf %167 : vector<256x128xf32> to vector<256x128xbf16>
    %c0_162 = arith.constant 0 : index
    %c640_163 = arith.constant 640 : index
    %169 = vector.load %arg11[%c0_162, %c640_163] : memref<256x1152xbf16, #tpu.memory_space<vmem>>, vector<256x128xbf16>
    tpu.vector_store %arg11[%c0_162, %c640_163], %168 {strides = array<i32>} : memref<256x1152xbf16, #tpu.memory_space<vmem>>, vector<256x128xbf16>,
    %c2_164 = arith.constant 2 : index
    %c0_165 = arith.constant 0 : index
    %c0_166 = arith.constant 0 : index
    %170 = vector.load %arg9[%c2_164, %c0_165, %c0_166] : memref<18x18x128xf32, #tpu.memory_space<vmem>>, vector<16x16x128xf32>
    %171 = vector.shape_cast %170 : vector<16x16x128xf32> to vector<256x128xf32>
    %172 = arith.truncf %171 : vector<256x128xf32> to vector<256x128xbf16>
    %c0_167 = arith.constant 0 : index
    %c768_168 = arith.constant 768 : index
    %173 = vector.load %arg11[%c0_167, %c768_168] : memref<256x1152xbf16, #tpu.memory_space<vmem>>, vector<256x128xbf16>
    tpu.vector_store %arg11[%c0_167, %c768_168], %172 {strides = array<i32>} : memref<256x1152xbf16, #tpu.memory_space<vmem>>, vector<256x128xbf16>,
    %c2_169 = arith.constant 2 : index
    %c1_170 = arith.constant 1 : index
    %c0_171 = arith.constant 0 : index
    %174 = vector.load %arg9[%c2_169, %c1_170, %c0_171] : memref<18x18x128xf32, #tpu.memory_space<vmem>>, vector<16x16x128xf32>
    %175 = vector.shape_cast %174 : vector<16x16x128xf32> to vector<256x128xf32>
    %176 = arith.truncf %175 : vector<256x128xf32> to vector<256x128xbf16>
    %c0_172 = arith.constant 0 : index
    %c896_173 = arith.constant 896 : index
    %177 = vector.load %arg11[%c0_172, %c896_173] : memref<256x1152xbf16, #tpu.memory_space<vmem>>, vector<256x128xbf16>
    tpu.vector_store %arg11[%c0_172, %c896_173], %176 {strides = array<i32>} : memref<256x1152xbf16, #tpu.memory_space<vmem>>, vector<256x128xbf16>,
    %c2_174 = arith.constant 2 : index
    %c2_175 = arith.constant 2 : index
    %c0_176 = arith.constant 0 : index
    %178 = vector.load %arg9[%c2_174, %c2_175, %c0_176] : memref<18x18x128xf32, #tpu.memory_space<vmem>>, vector<16x16x128xf32>
    %179 = vector.shape_cast %178 : vector<16x16x128xf32> to vector<256x128xf32>
    %180 = arith.truncf %179 : vector<256x128xf32> to vector<256x128xbf16>
    %c0_177 = arith.constant 0 : index
    %c1024_178 = arith.constant 1024 : index
    %181 = vector.load %arg11[%c0_177, %c1024_178] : memref<256x1152xbf16, #tpu.memory_space<vmem>>, vector<256x128xbf16>
    tpu.vector_store %arg11[%c0_177, %c1024_178], %180 {strides = array<i32>} : memref<256x1152xbf16, #tpu.memory_space<vmem>>, vector<256x128xbf16>,
    %c0_179 = arith.constant 0 : index
    %c0_180 = arith.constant 0 : index
    %182 = vector.load %arg11[%c0_179, %c0_180] : memref<256x1152xbf16, #tpu.memory_space<vmem>>, vector<256x1152xbf16>
    %c0_181 = arith.constant 0 : index
    %c0_182 = arith.constant 0 : index
    %183 = vector.load %arg2[%c0_181, %c0_182] : memref<1152x128xbf16, #tpu.memory_space<vmem>>, vector<1152x128xbf16>
    %cst_183 = arith.constant dense<0.000000e+00> : vector<256x128xf32>
    %184 = tpu.matmul %182, %183, %cst_183 {dimension_numbers = #tpu.dot_dimension_numbers<[1], [0], [0], [1], [0, 0, 1, 1], [], []>} : vector<256x1152xbf16>, vector<1152x128xbf16>, vector<256x128xf32> -> vector<256x128xf32>
    %cst_184 = arith.constant dense<0.000000e+00> : vector<128xf32>
    %185 = vector.multi_reduction <add>, %184, %cst_184 [0] : vector<256x128xf32> to vector<128xf32>
    %186 = vector.shape_cast %185 : vector<128xf32> to vector<1x128xf32>
    %cst_185 = arith.constant 3.906250e-03 : f32
    %187 = vector.broadcast %cst_185 : f32 to vector<1x128xf32>
    %188 = arith.mulf %186, %187 : vector<1x128xf32>
    %189 = vector.broadcast %188 : vector<1x128xf32> to vector<256x128xf32>
    %190 = arith.subf %184, %189 : vector<256x128xf32>
    %191 = arith.mulf %190, %190 : vector<256x128xf32>
    %cst_186 = arith.constant dense<0.000000e+00> : vector<128xf32>
    %192 = vector.multi_reduction <add>, %191, %cst_186 [0] : vector<256x128xf32> to vector<128xf32>
    %193 = vector.shape_cast %192 : vector<128xf32> to vector<1x128xf32>
    %cst_187 = arith.constant 3.906250e-03 : f32
    %194 = vector.broadcast %cst_187 : f32 to vector<1x128xf32>
    %195 = arith.mulf %193, %194 : vector<1x128xf32>
    %cst_188 = arith.constant 9.99999974E-6 : f32
    %196 = vector.broadcast %cst_188 : f32 to vector<1x128xf32>
    %197 = arith.addf %195, %196 : vector<1x128xf32>
    %198 = math.rsqrt %197 : vector<1x128xf32>
    %c0_189 = arith.constant 0 : index
    %c0_190 = arith.constant 0 : index
    %199 = vector.load %arg3[%c0_189, %c0_190] : memref<1x128xf32, #tpu.memory_space<vmem>>, vector<1x128xf32>
    %200 = arith.mulf %198, %199 : vector<1x128xf32>
    %201 = vector.broadcast %200 : vector<1x128xf32> to vector<256x128xf32>
    %202 = arith.mulf %190, %201 : vector<256x128xf32>
    %c0_191 = arith.constant 0 : index
    %c0_192 = arith.constant 0 : index
    %203 = vector.load %arg4[%c0_191, %c0_192] : memref<1x128xf32, #tpu.memory_space<vmem>>, vector<1x128xf32>
    %204 = vector.broadcast %203 : vector<1x128xf32> to vector<256x128xf32>
    %205 = arith.addf %202, %204 : vector<256x128xf32>
    %cst_193 = arith.constant 0.000000e+00 : f32
    %206 = vector.broadcast %cst_193 : f32 to vector<256x128xf32>
    %207 = arith.maximumf %205, %206 : vector<256x128xf32>
    %208 = vector.shape_cast %207 : vector<256x128xf32> to vector<16x16x128xf32>
    %c1_194 = arith.constant 1 : index
    %c1_195 = arith.constant 1 : index
    %c0_196 = arith.constant 0 : index
    %209 = vector.load %arg9[%c1_194, %c1_195, %c0_196] : memref<18x18x128xf32, #tpu.memory_space<vmem>>, vector<16x16x128xf32>
    tpu.vector_store %arg9[%c1_194, %c1_195, %c0_196], %208 {strides = array<i32>} : memref<18x18x128xf32, #tpu.memory_space<vmem>>, vector<16x16x128xf32>,
    %c0_197 = arith.constant 0 : index
    %c0_198 = arith.constant 0 : index
    %c0_199 = arith.constant 0 : index
    %210 = vector.load %arg9[%c0_197, %c0_198, %c0_199] : memref<18x18x128xf32, #tpu.memory_space<vmem>>, vector<16x16x128xf32>
    %211 = vector.shape_cast %210 : vector<16x16x128xf32> to vector<256x128xf32>
    %212 = arith.truncf %211 : vector<256x128xf32> to vector<256x128xbf16>
    %c0_200 = arith.constant 0 : index
    %c0_201 = arith.constant 0 : index
    %213 = vector.load %arg11[%c0_200, %c0_201] : memref<256x1152xbf16, #tpu.memory_space<vmem>>, vector<256x128xbf16>
    tpu.vector_store %arg11[%c0_200, %c0_201], %212 {strides = array<i32>} : memref<256x1152xbf16, #tpu.memory_space<vmem>>, vector<256x128xbf16>,
    %c0_202 = arith.constant 0 : index
    %c1_203 = arith.constant 1 : index
    %c0_204 = arith.constant 0 : index
    %214 = vector.load %arg9[%c0_202, %c1_203, %c0_204] : memref<18x18x128xf32, #tpu.memory_space<vmem>>, vector<16x16x128xf32>
    %215 = vector.shape_cast %214 : vector<16x16x128xf32> to vector<256x128xf32>
    %216 = arith.truncf %215 : vector<256x128xf32> to vector<256x128xbf16>
    %c0_205 = arith.constant 0 : index
    %c128_206 = arith.constant 128 : index
    %217 = vector.load %arg11[%c0_205, %c128_206] : memref<256x1152xbf16, #tpu.memory_space<vmem>>, vector<256x128xbf16>
    tpu.vector_store %arg11[%c0_205, %c128_206], %216 {strides = array<i32>} : memref<256x1152xbf16, #tpu.memory_space<vmem>>, vector<256x128xbf16>,
    %c0_207 = arith.constant 0 : index
    %c2_208 = arith.constant 2 : index
    %c0_209 = arith.constant 0 : index
    %218 = vector.load %arg9[%c0_207, %c2_208, %c0_209] : memref<18x18x128xf32, #tpu.memory_space<vmem>>, vector<16x16x128xf32>
    %219 = vector.shape_cast %218 : vector<16x16x128xf32> to vector<256x128xf32>
    %220 = arith.truncf %219 : vector<256x128xf32> to vector<256x128xbf16>
    %c0_210 = arith.constant 0 : index
    %c256_211 = arith.constant 256 : index
    %221 = vector.load %arg11[%c0_210, %c256_211] : memref<256x1152xbf16, #tpu.memory_space<vmem>>, vector<256x128xbf16>
    tpu.vector_store %arg11[%c0_210, %c256_211], %220 {strides = array<i32>} : memref<256x1152xbf16, #tpu.memory_space<vmem>>, vector<256x128xbf16>,
    %c1_212 = arith.constant 1 : index
    %c0_213 = arith.constant 0 : index
    %c0_214 = arith.constant 0 : index
    %222 = vector.load %arg9[%c1_212, %c0_213, %c0_214] : memref<18x18x128xf32, #tpu.memory_space<vmem>>, vector<16x16x128xf32>
    %223 = vector.shape_cast %222 : vector<16x16x128xf32> to vector<256x128xf32>
    %224 = arith.truncf %223 : vector<256x128xf32> to vector<256x128xbf16>
    %c0_215 = arith.constant 0 : index
    %c384_216 = arith.constant 384 : index
    %225 = vector.load %arg11[%c0_215, %c384_216] : memref<256x1152xbf16, #tpu.memory_space<vmem>>, vector<256x128xbf16>
    tpu.vector_store %arg11[%c0_215, %c384_216], %224 {strides = array<i32>} : memref<256x1152xbf16, #tpu.memory_space<vmem>>, vector<256x128xbf16>,
    %c1_217 = arith.constant 1 : index
    %c1_218 = arith.constant 1 : index
    %c0_219 = arith.constant 0 : index
    %226 = vector.load %arg9[%c1_217, %c1_218, %c0_219] : memref<18x18x128xf32, #tpu.memory_space<vmem>>, vector<16x16x128xf32>
    %227 = vector.shape_cast %226 : vector<16x16x128xf32> to vector<256x128xf32>
    %228 = arith.truncf %227 : vector<256x128xf32> to vector<256x128xbf16>
    %c0_220 = arith.constant 0 : index
    %c512_221 = arith.constant 512 : index
    %229 = vector.load %arg11[%c0_220, %c512_221] : memref<256x1152xbf16, #tpu.memory_space<vmem>>, vector<256x128xbf16>
    tpu.vector_store %arg11[%c0_220, %c512_221], %228 {strides = array<i32>} : memref<256x1152xbf16, #tpu.memory_space<vmem>>, vector<256x128xbf16>,
    %c1_222 = arith.constant 1 : index
    %c2_223 = arith.constant 2 : index
    %c0_224 = arith.constant 0 : index
    %230 = vector.load %arg9[%c1_222, %c2_223, %c0_224] : memref<18x18x128xf32, #tpu.memory_space<vmem>>, vector<16x16x128xf32>
    %231 = vector.shape_cast %230 : vector<16x16x128xf32> to vector<256x128xf32>
    %232 = arith.truncf %231 : vector<256x128xf32> to vector<256x128xbf16>
    %c0_225 = arith.constant 0 : index
    %c640_226 = arith.constant 640 : index
    %233 = vector.load %arg11[%c0_225, %c640_226] : memref<256x1152xbf16, #tpu.memory_space<vmem>>, vector<256x128xbf16>
    tpu.vector_store %arg11[%c0_225, %c640_226], %232 {strides = array<i32>} : memref<256x1152xbf16, #tpu.memory_space<vmem>>, vector<256x128xbf16>,
    %c2_227 = arith.constant 2 : index
    %c0_228 = arith.constant 0 : index
    %c0_229 = arith.constant 0 : index
    %234 = vector.load %arg9[%c2_227, %c0_228, %c0_229] : memref<18x18x128xf32, #tpu.memory_space<vmem>>, vector<16x16x128xf32>
    %235 = vector.shape_cast %234 : vector<16x16x128xf32> to vector<256x128xf32>
    %236 = arith.truncf %235 : vector<256x128xf32> to vector<256x128xbf16>
    %c0_230 = arith.constant 0 : index
    %c768_231 = arith.constant 768 : index
    %237 = vector.load %arg11[%c0_230, %c768_231] : memref<256x1152xbf16, #tpu.memory_space<vmem>>, vector<256x128xbf16>
    tpu.vector_store %arg11[%c0_230, %c768_231], %236 {strides = array<i32>} : memref<256x1152xbf16, #tpu.memory_space<vmem>>, vector<256x128xbf16>,
    %c2_232 = arith.constant 2 : index
    %c1_233 = arith.constant 1 : index
    %c0_234 = arith.constant 0 : index
    %238 = vector.load %arg9[%c2_232, %c1_233, %c0_234] : memref<18x18x128xf32, #tpu.memory_space<vmem>>, vector<16x16x128xf32>
    %239 = vector.shape_cast %238 : vector<16x16x128xf32> to vector<256x128xf32>
    %240 = arith.truncf %239 : vector<256x128xf32> to vector<256x128xbf16>
    %c0_235 = arith.constant 0 : index
    %c896_236 = arith.constant 896 : index
    %241 = vector.load %arg11[%c0_235, %c896_236] : memref<256x1152xbf16, #tpu.memory_space<vmem>>, vector<256x128xbf16>
    tpu.vector_store %arg11[%c0_235, %c896_236], %240 {strides = array<i32>} : memref<256x1152xbf16, #tpu.memory_space<vmem>>, vector<256x128xbf16>,
    %c2_237 = arith.constant 2 : index
    %c2_238 = arith.constant 2 : index
    %c0_239 = arith.constant 0 : index
    %242 = vector.load %arg9[%c2_237, %c2_238, %c0_239] : memref<18x18x128xf32, #tpu.memory_space<vmem>>, vector<16x16x128xf32>
    %243 = vector.shape_cast %242 : vector<16x16x128xf32> to vector<256x128xf32>
    %244 = arith.truncf %243 : vector<256x128xf32> to vector<256x128xbf16>
    %c0_240 = arith.constant 0 : index
    %c1024_241 = arith.constant 1024 : index
    %245 = vector.load %arg11[%c0_240, %c1024_241] : memref<256x1152xbf16, #tpu.memory_space<vmem>>, vector<256x128xbf16>
    tpu.vector_store %arg11[%c0_240, %c1024_241], %244 {strides = array<i32>} : memref<256x1152xbf16, #tpu.memory_space<vmem>>, vector<256x128xbf16>,
    %c0_242 = arith.constant 0 : index
    %c0_243 = arith.constant 0 : index
    %246 = vector.load %arg11[%c0_242, %c0_243] : memref<256x1152xbf16, #tpu.memory_space<vmem>>, vector<256x1152xbf16>
    %c0_244 = arith.constant 0 : index
    %c0_245 = arith.constant 0 : index
    %247 = vector.load %arg5[%c0_244, %c0_245] : memref<1152x128xbf16, #tpu.memory_space<vmem>>, vector<1152x128xbf16>
    %cst_246 = arith.constant dense<0.000000e+00> : vector<256x128xf32>
    %248 = tpu.matmul %246, %247, %cst_246 {dimension_numbers = #tpu.dot_dimension_numbers<[1], [0], [0], [1], [0, 0, 1, 1], [], []>} : vector<256x1152xbf16>, vector<1152x128xbf16>, vector<256x128xf32> -> vector<256x128xf32>
    %cst_247 = arith.constant dense<0.000000e+00> : vector<128xf32>
    %249 = vector.multi_reduction <add>, %248, %cst_247 [0] : vector<256x128xf32> to vector<128xf32>
    %250 = vector.shape_cast %249 : vector<128xf32> to vector<1x128xf32>
    %cst_248 = arith.constant 3.906250e-03 : f32
    %251 = vector.broadcast %cst_248 : f32 to vector<1x128xf32>
    %252 = arith.mulf %250, %251 : vector<1x128xf32>
    %253 = vector.broadcast %252 : vector<1x128xf32> to vector<256x128xf32>
    %254 = arith.subf %248, %253 : vector<256x128xf32>
    %255 = arith.mulf %254, %254 : vector<256x128xf32>
    %cst_249 = arith.constant dense<0.000000e+00> : vector<128xf32>
    %256 = vector.multi_reduction <add>, %255, %cst_249 [0] : vector<256x128xf32> to vector<128xf32>
    %257 = vector.shape_cast %256 : vector<128xf32> to vector<1x128xf32>
    %cst_250 = arith.constant 3.906250e-03 : f32
    %258 = vector.broadcast %cst_250 : f32 to vector<1x128xf32>
    %259 = arith.mulf %257, %258 : vector<1x128xf32>
    %cst_251 = arith.constant 9.99999974E-6 : f32
    %260 = vector.broadcast %cst_251 : f32 to vector<1x128xf32>
    %261 = arith.addf %259, %260 : vector<1x128xf32>
    %262 = math.rsqrt %261 : vector<1x128xf32>
    %c0_252 = arith.constant 0 : index
    %c0_253 = arith.constant 0 : index
    %263 = vector.load %arg6[%c0_252, %c0_253] : memref<1x128xf32, #tpu.memory_space<vmem>>, vector<1x128xf32>
    %264 = arith.mulf %262, %263 : vector<1x128xf32>
    %265 = vector.broadcast %264 : vector<1x128xf32> to vector<256x128xf32>
    %266 = arith.mulf %254, %265 : vector<256x128xf32>
    %c0_254 = arith.constant 0 : index
    %c0_255 = arith.constant 0 : index
    %267 = vector.load %arg7[%c0_254, %c0_255] : memref<1x128xf32, #tpu.memory_space<vmem>>, vector<1x128xf32>
    %268 = vector.broadcast %267 : vector<1x128xf32> to vector<256x128xf32>
    %269 = arith.addf %266, %268 : vector<256x128xf32>
    %270 = tpu.transpose %269, [1, 0] : vector<256x128xf32> -> vector<128x256xf32>
    %271 = vector.extract_strided_slice %270 {offsets = [0, 0], sizes = [4, 256], strides = [1, 1]} : vector<128x256xf32> to vector<4x256xf32>
    %c1_256 = arith.constant 1 : index
    %c0_257 = arith.constant 0 : index
    %c0_258 = arith.constant 0 : index
    %272 = vector.load %arg8[%c1_256, %c0_257, %c0_258] : memref<2x4x256xf32, #tpu.memory_space<vmem>>, vector<1x4x256xf32>
    %273 = vector.shape_cast %272 : vector<1x4x256xf32> to vector<4x256xf32>
    %274 = vector.shape_cast %271 : vector<4x256xf32> to vector<1x4x256xf32>
    tpu.vector_store %arg8[%c1_256, %c0_257, %c0_258], %274 {strides = array<i32>} : memref<2x4x256xf32, #tpu.memory_space<vmem>>, vector<1x4x256xf32>,
    return
  }
  func.func @transform_0(%arg0: i32) -> (i32, i32, i32) {
    %c0_i32 = arith.constant 0 : i32
    %c0_i32_0 = arith.constant 0 : i32
    %c0_i32_1 = arith.constant 0 : i32
    return %arg0, %c0_i32, %c0_i32_0 : i32, i32, i32
  }
  func.func @transform_1(%arg0: i32) -> (i32, i32) {
    %c0_i32 = arith.constant 0 : i32
    %c0_i32_0 = arith.constant 0 : i32
    %c0_i32_1 = arith.constant 0 : i32
    return %c0_i32, %c0_i32_0 : i32, i32
  }
  func.func @transform_2(%arg0: i32) -> (i32, i32) {
    %c0_i32 = arith.constant 0 : i32
    %c0_i32_0 = arith.constant 0 : i32
    %c0_i32_1 = arith.constant 0 : i32
    return %c0_i32, %c0_i32_0 : i32, i32
  }
  func.func @transform_3(%arg0: i32) -> (i32, i32) {
    %c0_i32 = arith.constant 0 : i32
    %c0_i32_0 = arith.constant 0 : i32
    %c0_i32_1 = arith.constant 0 : i32
    return %c0_i32, %c0_i32_0 : i32, i32
  }
  func.func @transform_4(%arg0: i32) -> (i32, i32) {
    %c0_i32 = arith.constant 0 : i32
    %c0_i32_0 = arith.constant 0 : i32
    %c0_i32_1 = arith.constant 0 : i32
    return %c0_i32, %c0_i32_0 : i32, i32
  }
  func.func @transform_5(%arg0: i32) -> (i32, i32) {
    %c0_i32 = arith.constant 0 : i32
    %c0_i32_0 = arith.constant 0 : i32
    %c0_i32_1 = arith.constant 0 : i32
    return %c0_i32, %c0_i32_0 : i32, i32
  }
  func.func @transform_6(%arg0: i32) -> (i32, i32) {
    %c0_i32 = arith.constant 0 : i32
    %c0_i32_0 = arith.constant 0 : i32
    %c0_i32_1 = arith.constant 0 : i32
    return %c0_i32, %c0_i32_0 : i32, i32
  }
  func.func @transform_7(%arg0: i32) -> (i32, i32, i32) {
    %c0_i32 = arith.constant 0 : i32
    %c0_i32_0 = arith.constant 0 : i32
    %c0_i32_1 = arith.constant 0 : i32
    return %arg0, %c0_i32, %c0_i32_0 : i32, i32, i32
  }
}

</mosaic_0001>

<bundles_post_ra>
// kernel: residual_block_forward.1
= control target key start
LH: loop header
LB: loop body
LE: loop exit
PB: predicated region body
PF: predicated region fallthrough
CT: control target
= control target key end

     0   :  { %v12620_v0 = vmov 0.0   ;;  %v12621_v43 = vmov 0.0|0.0   ;;  %s17423_s0 = inlined_call_operand.vmem [shape: f32[2,4,256], index: 0, kind: input, shape index: {}]   ;;  %s17424_s1 = inlined_call_operand.vmem [shape: bf16[1152,128], index: 1, kind: input, shape index: {}]   ;;  %s17425_s4 = inlined_call_operand.vmem [shape: bf16[1152,128], index: 4, kind: input, shape index: {}]   ;;  %s17426_s2 = inlined_call_operand.vmem [shape: f32[1,128], index: 2, kind: input, shape index: {}]   ;;  %s17427_s3 = inlined_call_operand.vmem [shape: f32[1,128], index: 3, kind: input, shape index: {}]   ;;  %s17428_s5 = inlined_call_operand.vmem [shape: f32[1,128], index: 5, kind: input, shape index: {}]   ;;  %s17429_s6 = inlined_call_operand.vmem [shape: f32[1,128], index: 6, kind: input, shape index: {}]   ;;  %s17430_s7 = inlined_call_operand.vmem [shape: f32[2,4,256], index: 7, kind: output, shape index: {}]  }
   0x1   :  { %85 = vst [vmem:[#allocation3] sm:$0xff] %v12620_v0  ;;  %v117_v1 = vld [vmem:[%s17423_s0] sm:$0xff]  ;;  %31 = vst [vmem:[#allocation2] sm:$0xff] %v12620_v0  ;;  %v12318_v5 = vld [vmem:[%s17424_s1 + $0x48] sm:$0xff]  }
   0x2   :  { %32 = vst [vmem:[#allocation2 + $0x8] sm:$0xff] %v12620_v0  ;;  %33 = vst [vmem:[#allocation2 + $0x10] sm:$0x3] %v12620_v0  ;;  %v119_v2 = vcombine.high %v117_v1, %v117_v1  ;;  %v12316_v3 = vld [vmem:[%s17424_s1 + $0x40] sm:$0xff]   ;;  %v10085_v6 = vld [vmem:[%s17423_s0 + $0x8] sm:$0xff] }
   0x3   :  { %34 = vst [vmem:[#allocation2 + $0x18] sm:$0xff] %v12620_v0  ;;  %35 = vst [vmem:[#allocation2 + $0x20] sm:$0xff] %v12620_v0  ;;  %v12317_v4 = vld [vmem:[%s17424_s1] sm:$0xff]   ;;  %10233 = vmatprep.subr.bf16.mxu0 %v12316_v3  ;;  %v12319_v7 = vld [vmem:[%s17424_s1 + $0x8] sm:$0xff]   ;;  %v5029_v10 = vcombine.high %v10085_v6, %v10085_v6 }
   0x4   :  { %36 = vst [vmem:[#allocation2 + $0x28] sm:$0x3] %v12620_v0  ;;  %37 = vst [vmem:[#allocation2 + $0x30] sm:$0xff] %v12620_v0  ;;  %10234 = vmatpush3.bf16.msra.mxu0 %v12317_v4  ;;  %v12320_v8 = vld [vmem:[%s17424_s1 + $0x50] sm:$0xff]   ;;  %v12322_v11 = vld [vmem:[%s17424_s1 + $0xc0] sm:$0xff]  }
   0x5   :  { %38 = vst [vmem:[#allocation2 + $0x38] sm:$0xff] %v12620_v0  ;;  %39 = vst [vmem:[#allocation2 + $0x40] sm:$0x3] %v12620_v0  ;;  %10235 = vmatprep.subr.bf16.mxu0 %v12318_v5  ;;  %v12321_v9 = vld [vmem:[%s17424_s1 + $0x10] sm:$0xff]   ;;  %v12323_v13 = vld [vmem:[%s17424_s1 + $0x58] sm:$0xff]   ;;  %10345 = vmatprep.subr.bf16.mxu1 %v12322_v11 }
   0x6   :  { %40 = vst [vmem:[#allocation2 + $0x48] sm:$0xff] %v12620_v0  ;;  %41 = vst [vmem:[#allocation2 + $0x50] sm:$0xff] %v12620_v0  ;;  %v12324_v14 = vld [vmem:[%s17424_s1 + $0x80] sm:$0xff]   ;;  %v12325_v16 = vld [vmem:[%s17424_s1 + $0x18] sm:$0xff]  }
   0x7   :  { %42 = vst [vmem:[#allocation2 + $0x58] sm:$0x3] %v12620_v0  ;;  %43 = vst [vmem:[#allocation2 + $0x60] sm:$0xff] %v12620_v0  ;;  %10346 = vmatpush3.bf16.msra.mxu1 %v12324_v14  ;;  %v12326_v17 = vld [vmem:[%s17424_s1 + $0xc8] sm:$0xff]   ;;  %v12327_v18 = vld [vmem:[%s17424_s1 + $0x60] sm:$0xff]  }
   0x8   :  { %44 = vst [vmem:[#allocation2 + $0x68] sm:$0xff] %v12620_v0  ;;  %45 = vst [vmem:[#allocation2 + $0x70] sm:$0x3] %v12620_v0  ;;  %10236 = vmatpush3.bf16.msra.mxu0 %v12319_v7  ;;  %10347 = vmatprep.subr.bf16.mxu1 %v12326_v17  ;;  %v12328_v19 = vld [vmem:[%s17424_s1 + $0x88] sm:$0xff]   ;;  %v12329_v20 = vld [vmem:[%s17424_s1 + $0x20] sm:$0xff]  }
   0x9   :  { %46 = vst [vmem:[#allocation2 + $0x78] sm:$0xff] %v12620_v0  ;;  %47 = vst [vmem:[#allocation2 + $0x80] sm:$0xff] %v12620_v0  ;;  %10237 = vmatprep.subr.bf16.mxu0 %v12320_v8  ;;  %v12330_v21 = vld [vmem:[%s17424_s1 + $0xd0] sm:$0xff]   ;;  %v12331_v22 = vld [vmem:[%s17424_s1 + $0x68] sm:$0xff]  }
   0xa   :  { %48 = vst [vmem:[#allocation2 + $0x88] sm:$0x3] %v12620_v0  ;;  %49 = vst [vmem:[#allocation2 + $0x90] sm:$0xff] %v12620_v0  ;;  %v12332_v23 = vld [vmem:[%s17424_s1 + $0x90] sm:$0xff]   ;;  %v12333_v24 = vld [vmem:[%s17424_s1 + $0x28] sm:$0xff]  }
   0xb   :  { %50 = vst [vmem:[#allocation2 + $0x98] sm:$0xff] %v12620_v0  ;;  %51 = vst [vmem:[#allocation2 + $0xa0] sm:$0x3] %v12620_v0  ;;  %10348 = vmatpush3.bf16.msra.mxu1 %v12328_v19  ;;  %v12334_v25 = vld [vmem:[%s17424_s1 + $0xd8] sm:$0xff]   ;;  %v12335_v26 = vld [vmem:[%s17424_s1 + $0x70] sm:$0xff]  }
   0xc   :  { %52 = vst [vmem:[#allocation2 + $0xa8] sm:$0xff] %v12620_v0  ;;  %53 = vst [vmem:[#allocation2 + $0xb0] sm:$0xff] %v12620_v0  ;;  %10238 = vmatpush3.bf16.msra.mxu0 %v12321_v9  ;;  %10349 = vmatprep.subr.bf16.mxu1 %v12330_v21  ;;  %v12336_v27 = vld [vmem:[%s17424_s1 + $0x98] sm:$0xff]   ;;  %v12337_v28 = vld [vmem:[%s17424_s1 + $0x30] sm:$0xff]  }
   0xd   :  { %54 = vst [vmem:[#allocation2 + $0xb8] sm:$0x3] %v12620_v0  ;;  %55 = vst [vmem:[#allocation2 + $0xc0] sm:$0xff] %v12620_v0  ;;  %10239 = vmatprep.subr.bf16.mxu0 %v12323_v13  ;;  %v12338_v29 = vld [vmem:[%s17424_s1 + $0xe0] sm:$0xff]   ;;  %v12339_v30 = vld [vmem:[%s17424_s1 + $0x78] sm:$0xff]  }
   0xe   :  { %56 = vst [vmem:[#allocation2 + $0xc8] sm:$0xff] %v12620_v0  ;;  %57 = vst [vmem:[#allocation2 + $0xd0] sm:$0x3] %v12620_v0  ;;  %v12340_v31 = vld [vmem:[%s17424_s1 + $0xa0] sm:$0xff]   ;;  %v12341_v32 = vld [vmem:[%s17424_s1 + $0x38] sm:$0xff]  }
   0xf   :  { %58 = vst [vmem:[#allocation2 + $0xd8] sm:$0xff] %v12620_v0  ;;  %59 = vst [vmem:[#allocation2 + $0xe0] sm:$0xff] %v12620_v0  ;;  %10350 = vmatpush3.bf16.msra.mxu1 %v12332_v23  ;;  %v316_v33 = vld [vmem:[#allocation2 + $0x1] sm:$0xff]  ;;  %v317_v34 = vld [vmem:[#allocation2 + $0x9] sm:$0xff] }
  0x10   :  { %60 = vst [vmem:[#allocation2 + $0xe8] sm:$0x3] %v12620_v0  ;;  %61 = vst [vmem:[#allocation2 + $0xf0] sm:$0xff] %v12620_v0  ;;  %10240 = vmatpush3.bf16.msra.mxu0 %v12325_v16  ;;  %10351 = vmatprep.subr.bf16.mxu1 %v12334_v25  ;;  %v348_v35 = vpack.c.bf16 %v317_v34, %v316_v33  ;;  %v12342_v36 = vld [vmem:[%s17424_s1 + $0xe8] sm:$0xff]   ;;  %v12344_v38 = vld [vmem:[%s17424_s1 + $0x140] sm:$0xff]  }
  0x11   :  { %62 = vst [vmem:[#allocation2 + $0xf8] sm:$0xff] %v12620_v0  ;;  %63 = vst [vmem:[#allocation2 + $0x100] sm:$0x3] %v12620_v0  ;;  %10241 = vmatprep.subr.bf16.mxu0 %v12327_v18  ;;  %v12343_v37 = vld [vmem:[%s17424_s1 + $0xa8] sm:$0xff]   ;;  %v12345_v39 = vld [vmem:[%s17424_s1 + $0xf0] sm:$0xff]  }
  0x12   :  { %64 = vst [vmem:[#allocation2 + $0x108] sm:$0xff] %v12620_v0  ;;  %65 = vst [vmem:[#allocation2 + $0x110] sm:$0xff] %v12620_v0  ;;  %1581 = vmatprep.mubr.bf16.mxu0 %v348_v35  ;;  %v12346_v40 = vld [vmem:[%s17424_s1 + $0x100] sm:$0xff]   ;;  %v12347_v41 = vld [vmem:[%s17424_s1 + $0xb0] sm:$0xff]  }
  0x13   :  { %66 = vst [vmem:[#allocation2 + $0x118] sm:$0x3] %v12620_v0  ;;  %67 = vst [vmem:[#allocation2 + $0x120] sm:$0xff] %v12620_v0  ;;  %10352 = vmatpush3.bf16.msra.mxu1 %v12336_v27  ;;  %v12348_v42 = vld [vmem:[%s17424_s1 + $0xf8] sm:$0xff]   ;;  %v12350_v45 = vld [vmem:[%s17424_s1 + $0x148] sm:$0xff]  }
  0x14   :  { %68 = vst [vmem:[#allocation2 + $0x128] sm:$0xff] %v12620_v0  ;;  %69 = vst [vmem:[#allocation2 + $0x130] sm:$0x3] %v12620_v0  ;;  %10242 = vmatpush3.bf16.msra.mxu0 %v12329_v20  ;;  %10353 = vmatprep.subr.bf16.mxu1 %v12338_v29  ;;  %v12349_v44 = vld [vmem:[%s17424_s1 + $0xb8] sm:$0xff]   ;;  %v12351_v46 = vld [vmem:[%s17424_s1 + $0x108] sm:$0xff]  }
  0x15   :  { %70 = vst [vmem:[#allocation2 + $0x138] sm:$0xff] %v12620_v0  ;;  %71 = vst [vmem:[#allocation2 + $0x140] sm:$0xff] %v12620_v0  ;;  %10243 = vmatprep.subr.bf16.mxu0 %v12331_v22  ;;  %v12352_v47 = vld [vmem:[%s17424_s1 + $0x150] sm:$0xff]   ;;  %v12354_v49 = vld [vmem:[%s17424_s1 + $0x158] sm:$0xff]  }
  0x16   :  { %72 = vst [vmem:[#allocation2 + $0x148] sm:$0x3] %v12620_v0  ;;  %73 = vst [vmem:[#allocation2 + $0x150] sm:$0xff] %v12620_v0  ;;  %v12353_v48 = vld [vmem:[%s17424_s1 + $0x110] sm:$0xff]   ;;  %v12355_v50 = vld [vmem:[%s17424_s1 + $0x118] sm:$0xff]  }
  0x17   :  { %74 = vst [vmem:[#allocation2 + $0x158] sm:$0xff] %v12620_v0  ;;  %75 = vst [vmem:[#allocation2 + $0x160] sm:$0x3] %v12620_v0  ;;  %10354 = vmatpush3.bf16.msra.mxu1 %v12340_v31  ;;  %v12356_v51 = vld [vmem:[%s17424_s1 + $0x160] sm:$0xff]   ;;  %v12360_v54 = vld [vmem:[%s17424_s1 + $0x168] sm:$0xff]  }
  0x18   :  { %76 = vst [vmem:[#allocation2 + $0x168] sm:$0xff] %v12620_v0  ;;  %77 = vst [vmem:[#allocation2 + $0x170] sm:$0xff] %v12620_v0  ;;  %10244 = vmatpush3.bf16.msra.mxu0 %v12333_v24  ;;  %10355 = vmatprep.subr.bf16.mxu1 %v12342_v36  ;;  %v12357_v52 = vld [vmem:[%s17424_s1 + $0x1c0] sm:$0xff]   ;;  %v12362_v55 = vld [vmem:[%s17424_s1 + $0x128] sm:$0xff]  }
  0x19   :  { %78 = vst [vmem:[#allocation2 + $0x178] sm:$0x3] %v12620_v0  ;;  %79 = vst [vmem:[#allocation2 + $0x180] sm:$0xff] %v12620_v0  ;;  %10245 = vmatprep.subr.bf16.mxu0 %v12335_v26  ;;  %v12358_v53 = vld [vmem:[%s17424_s1 + $0x120] sm:$0xff]   ;;  %v12364_v56 = vld [vmem:[%s17424_s1 + $0x170] sm:$0xff]  }
  0x1a   :  { %80 = vst [vmem:[#allocation2 + $0x188] sm:$0xff] %v12620_v0  ;;  %81 = vst [vmem:[#allocation2 + $0x190] sm:$0x3] %v12620_v0  ;;  %v12366_v57 = vld [vmem:[%s17424_s1 + $0x130] sm:$0xff]   ;;  %v12368_v58 = vld [vmem:[%s17424_s1 + $0x178] sm:$0xff]  }
  0x1b   :  { %82 = vst [vmem:[#allocation2 + $0x198] sm:$0xff] %v12620_v0  ;;  %83 = vst [vmem:[#allocation2 + $0x1a0] sm:$0xff] %v12620_v0  ;;  %10356 = vmatpush3.bf16.msra.mxu1 %v12343_v37  ;;  %v12370_v59 = vld [vmem:[%s17424_s1 + $0x138] sm:$0xff]   ;;  %v12904_v61 = vld [vmem:[%s17424_s1 + $0x200] sm:$0xff]  }
  0x1c   :  { %84 = vst [vmem:[#allocation2 + $0x1a8] sm:$0x3] %v12620_v0  ;;  %86 = vst [vmem:[#allocation3 + $0x8] sm:$0xff] %v12620_v0  ;;  %10246 = vmatpush3.bf16.msra.mxu0 %v12337_v28  ;;  %10357 = vmatprep.subr.bf16.mxu1 %v12345_v39  ;;  %v380_v3 = vld [vmem:[#allocation2 + $0x2] sm:$0xff]  ;;  %v381_v4 = vld [vmem:[#allocation2 + $0xa] sm:$0xff] }
  0x1d   :  { %121 = vst [vmem:[#allocation3] sm:$0xf] %v117_v1  ;;  %122 = vst [vmem:[#allocation3 + $0x8] sm:$0xf] %v119_v2  ;;  %10247 = vmatprep.subr.bf16.mxu0 %v12339_v30  ;;  %v412_v9 = vpack.c.bf16 %v381_v4, %v380_v3  ;;  %v12361_v14 = vld [vmem:[%s17424_s1 + $0x1c8] sm:$0xff]   ;;  %v12365_v18 = vld [vmem:[%s17424_s1 + $0x1d0] sm:$0xff]  }
  0x1e   :  { %v12363_v16 = vld [vmem:[%s17424_s1 + $0x188] sm:$0xff]   ;;  %v12367_v26 = vld [vmem:[%s17424_s1 + $0x190] sm:$0xff]   ;;  %v12369_v29 = vld [vmem:[%s17424_s1 + $0x1d8] sm:$0xff]  }
  0x1f   :  { %10358 = vmatpush3.bf16.msra.mxu1 %v12347_v41  ;;  %v12371_v31 = vld [vmem:[%s17424_s1 + $0x198] sm:$0xff]   ;;  %v12372_v33 = vld [vmem:[%s17424_s1 + $0x1e0] sm:$0xff]  }
  0x20   :  { %10248 = vmatpush3.bf16.msra.mxu0 %v12341_v32  ;;  %10359 = vmatprep.subr.bf16.mxu1 %v12348_v42  ;;  %v12373_v41 = vld [vmem:[%s17424_s1 + $0x1a0] sm:$0xff]  }
  0x21   :  { %10457 = vmatprep.subr.bf16.mxu0 %v12344_v38 }
  0x23   :  { %1582 = vmatmul.mubr.bf16.vlgmr.msra.gmra.mrb[0].mxu0 %v12621_v43  ;;  %10360 = vmatpush3.bf16.msra.mxu1 %v12349_v44  ;;  %v12374_v44 = vld [vmem:[%s17424_s1 + $0x1e8] sm:$0xff]  }
  0x24   :  { %v123_v12 = vld [vmem:[#allocation3] sm:$0xff]  ;;  %v124_v15 = vld [vmem:[#allocation3 + $0x8] sm:$0xff]  ;;  %10458 = vmatpush3.bf16.msra.mxu0 %v12346_v40  ;;  %10569 = vmatprep.subr.bf16.mxu1 %v12357_v52 }
  0x25   :  { %155 = vxpose.xlu0.b32.start [1/16] %v123_v12, 128  ;;  %5031 = vst [vmem:[#allocation3] sm:$0xf] %v10085_v6  ;;  %187 = vxpose.xlu1.b32.start [1/16] %v124_v15, 128  ;;  %5032 = vst [vmem:[#allocation3 + $0x8] sm:$0xf] %v5029_v10  ;;  %v12359_v12 = vld [vmem:[%s17424_s1 + $0x180] sm:$0xff]  }
  0x26   :  { %10459 = vmatprep.subr.bf16.mxu0 %v12350_v45 }
  0x28   :  { %10460 = vmatpush3.bf16.msra.mxu0 %v12351_v46  ;;  %v12375_v46 = vld [vmem:[%s17424_s1 + $0x1a8] sm:$0xff]  }
  0x29   :  { %156 = vxpose.xlu0.b32.cont [2/16] %v12620_v0, 128  ;;  %188 = vxpose.xlu1.b32.cont [2/16] %v12620_v0, 128 }
  0x2a   :  { %10461 = vmatprep.subr.bf16.mxu0 %v12352_v47 }
  0x2c   :  { %10462 = vmatpush3.bf16.msra.mxu0 %v12353_v48  ;;  %v12377_v48 = vld [vmem:[%s17424_s1 + $0x1f0] sm:$0xff]  }
  0x2d   :  { %157 = vxpose.xlu0.b32.cont [3/16] %v12620_v0, 128  ;;  %189 = vxpose.xlu1.b32.cont [3/16] %v12620_v0, 128 }
  0x2e   :  { %10463 = vmatprep.subr.bf16.mxu0 %v12354_v49 }
  0x30   :  { %10464 = vmatpush3.bf16.msra.mxu0 %v12355_v50 }
  0x31   :  { %158 = vxpose.xlu0.b32.cont [4/16] %v12620_v0, 128  ;;  %190 = vxpose.xlu1.b32.cont [4/16] %v12620_v0, 128 }
  0x32   :  { %10465 = vmatprep.subr.bf16.mxu0 %v12356_v51 }
  0x34   :  { %10466 = vmatpush3.bf16.msra.mxu0 %v12358_v53 }
  0x35   :  { %159 = vxpose.xlu0.b32.cont [5/16] %v12620_v0, 128  ;;  %191 = vxpose.xlu1.b32.cont [5/16] %v12620_v0, 128 }
  0x36   :  { %10467 = vmatprep.subr.bf16.mxu0 %v12360_v54 }
  0x38   :  { %10468 = vmatpush3.bf16.msra.mxu0 %v12362_v55 }
  0x39   :  { %160 = vxpose.xlu0.b32.cont [6/16] %v12620_v0, 128  ;;  %192 = vxpose.xlu1.b32.cont [6/16] %v12620_v0, 128 }
  0x3a   :  { %10469 = vmatprep.subr.bf16.mxu0 %v12364_v56  ;;  %v12378_v56 = vld [vmem:[%s17424_s1 + $0x1b0] sm:$0xff]  }
  0x3c   :  { %10470 = vmatpush3.bf16.msra.mxu0 %v12366_v57 }
  0x3d   :  { %161 = vxpose.xlu0.b32.cont [7/16] %v12620_v0, 128  ;;  %193 = vxpose.xlu1.b32.cont [7/16] %v12620_v0, 128 }
  0x3e   :  { %10471 = vmatprep.subr.bf16.mxu0 %v12368_v58 }
  0x40   :  { %10472 = vmatpush3.bf16.msra.mxu0 %v12370_v59  ;;  %v12379_v59 = vld [vmem:[%s17424_s1 + $0x1f8] sm:$0xff]  }
  0x41   :  { %162 = vxpose.xlu0.b32.cont [8/16] %v12620_v0, 128  ;;  %194 = vxpose.xlu1.b32.cont [8/16] %v12620_v0, 128 }
  0x42   :  { %12121 = vmatprep.subr.bf16.mxu0 %v12904_v61 }
  0x45   :  { %163 = vxpose.xlu0.b32.cont [9/16] %v12620_v0, 128  ;;  %195 = vxpose.xlu1.b32.cont [9/16] %v12620_v0, 128 }
  0x49   :  { %164 = vxpose.xlu0.b32.cont [10/16] %v12620_v0, 128  ;;  %196 = vxpose.xlu1.b32.cont [10/16] %v12620_v0, 128 }
  0x4d   :  { %165 = vxpose.xlu0.b32.cont [11/16] %v12620_v0, 128  ;;  %197 = vxpose.xlu1.b32.cont [11/16] %v12620_v0, 128 }
  0x51   :  { %166 = vxpose.xlu0.b32.cont [12/16] %v12620_v0, 128  ;;  %198 = vxpose.xlu1.b32.cont [12/16] %v12620_v0, 128 }
  0x55   :  { %167 = vxpose.xlu0.b32.cont [13/16] %v12620_v0, 128  ;;  %199 = vxpose.xlu1.b32.cont [13/16] %v12620_v0, 128 }
  0x59   :  { %168 = vxpose.xlu0.b32.cont [14/16] %v12620_v0, 128  ;;  %200 = vxpose.xlu1.b32.cont [14/16] %v12620_v0, 128 }
  0x5d   :  { %169 = vxpose.xlu0.b32.cont [15/16] %v12620_v0, 128  ;;  %201 = vxpose.xlu1.b32.cont [15/16] %v12620_v0, 128 }
  0x61   :  { %170 = vxpose.xlu0.b32.end [16/16] %v12620_v0, 128  ;;  %202 = vxpose.xlu1.b32.end [16/16] %v12620_v0, 128 }
  0xa5   :  { %v171_v60 = vpop.trf.xlu0  ;;  %v12906_v62 = vpop.trf.xlu1 }
  0xa6   :  { %220 = vst [vmem:[#allocation2 + $0x19] sm:$0xff] %v171_v60  ;;  %236 = vst [vmem:[#allocation2 + $0xd9] sm:$0xff] %v12906_v62 }
  0xa9   :  { %v172_v63 = vpop.trf.xlu0  ;;  %v12912_v1 = vpop.trf.xlu1 }
  0xaa   :  { %221 = vst [vmem:[#allocation2 + $0x21] sm:$0xff] %v172_v63  ;;  %v12910_v0 = vpack.c.bf16 %v172_v63, %v171_v60  ;;  %237 = vst [vmem:[#allocation2 + $0xe1] sm:$0xff] %v12912_v1  ;;  %v12380_v63 = vld [vmem:[%s17424_s1 + $0x1b8] sm:$0xff]  }
  0xac   :  { %1589 = vmatprep.mubr.bf16.mxu0 %v12910_v0 }
  0xad   :  { %v173_v2 = vpop.trf.xlu0  ;;  %v12916_v5 = vpop.trf.xlu1  ;;  %v444_v7 = vld [vmem:[#allocation2 + $0x18] sm:$0xff] }
  0xae   :  { %222 = vst [vmem:[#allocation2 + $0x31] sm:$0xff] %v173_v2  ;;  %238 = vst [vmem:[#allocation2 + $0xf1] sm:$0xff] %v12916_v5 }
  0xb1   :  { %v174_v6 = vpop.trf.xlu0  ;;  %v445_v8 = vld [vmem:[#allocation2 + $0x20] sm:$0xff]  ;;  %v12924_v13 = vpop.trf.xlu1 }
  0xb2   :  { %223 = vst [vmem:[#allocation2 + $0x39] sm:$0xff] %v174_v6  ;;  %v476_v10 = vpack.c.bf16 %v445_v8, %v444_v7  ;;  %v12919_v11 = vpack.c.bf16 %v174_v6, %v173_v2  ;;  %239 = vst [vmem:[#allocation2 + $0xf9] sm:$0xff] %v12924_v13  ;;  %v382_v19 = vld [vmem:[#allocation2 + $0x1a] sm:$0xff]  ;;  %v383_v20 = vld [vmem:[#allocation2 + $0x22] sm:$0xff] }
  0xb3   :  { %v12947_v27 = vpack.c.bf16 %v383_v20, %v382_v19 }
  0xb4   :  { %1742 = vmatprep.mubr.bf16.mxu1 %v476_v10  ;;  %1590 = vmatmul.mubr.bf16.gmra.mrb[4].mxu0 %v476_v10 }
  0xb5   :  { %1743 = vmatmul.mubr.bf16.vlgmr.msra.gmra.mrb[0].mxu1 %v412_v9  ;;  %v175_v15 = vpop.trf.xlu0  ;;  %1597 = vmatprep.mubr.bf16.mxu0 %v12919_v11  ;;  %v12934_v17 = vpop.trf.xlu1  ;;  %v446_v22 = vld [vmem:[#allocation2 + $0x30] sm:$0xff] }
  0xb6   :  { %224 = vst [vmem:[#allocation2 + $0x49] sm:$0xff] %v175_v15  ;;  %10570 = vmatpush3.bf16.msra.mxu1 %v12359_v12  ;;  %240 = vst [vmem:[#allocation2 + $0x109] sm:$0xff] %v12934_v17 }
  0xb7   :  { %10571 = vmatprep.subr.bf16.mxu1 %v12361_v14 }
  0xb9   :  { %v176_v21 = vpop.trf.xlu0  ;;  %v447_v23 = vld [vmem:[#allocation2 + $0x38] sm:$0xff]  ;;  %v12949_v28 = vpop.trf.xlu1 }
  0xba   :  { %225 = vst [vmem:[#allocation2 + $0x51] sm:$0xff] %v176_v21  ;;  %v12940_v24 = vpack.c.bf16 %v447_v23, %v446_v22  ;;  %v12942_v25 = vpack.c.bf16 %v176_v21, %v175_v15  ;;  %10572 = vmatpush3.bf16.msra.mxu1 %v12363_v16  ;;  %241 = vst [vmem:[#allocation2 + $0x111] sm:$0xff] %v12949_v28  ;;  %v384_v34 = vld [vmem:[#allocation2 + $0x32] sm:$0xff]  ;;  %v385_v35 = vld [vmem:[#allocation2 + $0x3a] sm:$0xff] }
  0xbb   :  { %10573 = vmatprep.subr.bf16.mxu1 %v12365_v18  ;;  %v12975_v42 = vpack.c.bf16 %v385_v35, %v384_v34 }
  0xbc   :  { %1750 = vmatprep.mubr.bf16.mxu1 %v12940_v24  ;;  %1598 = vmatmul.mubr.bf16.gmra.mrb[8].mxu0 %v12940_v24 }
  0xbd   :  { %1751 = vmatmul.mubr.bf16.gmra.mrb[4].mxu1 %v12947_v27  ;;  %v177_v30 = vpop.trf.xlu0  ;;  %1605 = vmatprep.mubr.bf16.mxu0 %v12942_v25  ;;  %v12962_v32 = vpop.trf.xlu1  ;;  %v448_v37 = vld [vmem:[#allocation2 + $0x48] sm:$0xff] }
  0xbe   :  { %226 = vst [vmem:[#allocation2 + $0x61] sm:$0xff] %v177_v30  ;;  %10574 = vmatpush3.bf16.msra.mxu1 %v12367_v26  ;;  %242 = vst [vmem:[#allocation2 + $0x121] sm:$0xff] %v12962_v32 }
  0xbf   :  { %10575 = vmatprep.subr.bf16.mxu1 %v12369_v29 }
  0xc1   :  { %v178_v36 = vpop.trf.xlu0  ;;  %v449_v38 = vld [vmem:[#allocation2 + $0x50] sm:$0xff]  ;;  %v12977_v43 = vpop.trf.xlu1 }
  0xc2   :  { %227 = vst [vmem:[#allocation2 + $0x69] sm:$0xff] %v178_v36  ;;  %v12968_v39 = vpack.c.bf16 %v449_v38, %v448_v37  ;;  %v12970_v40 = vpack.c.bf16 %v178_v36, %v177_v30  ;;  %10576 = vmatpush3.bf16.msra.mxu1 %v12371_v31  ;;  %243 = vst [vmem:[#allocation2 + $0x129] sm:$0xff] %v12977_v43  ;;  %v386_v49 = vld [vmem:[#allocation2 + $0x4a] sm:$0xff]  ;;  %v387_v50 = vld [vmem:[#allocation2 + $0x52] sm:$0xff] }
  0xc3   :  { %10577 = vmatprep.subr.bf16.mxu1 %v12372_v33  ;;  %v13003_v57 = vpack.c.bf16 %v387_v50, %v386_v49  ;;  %v461_v49 = vld [vmem:[#allocation2 + $0xe0] sm:$0xff] }
  0xc4   :  { %1758 = vmatprep.mubr.bf16.mxu1 %v12968_v39  ;;  %1606 = vmatmul.mubr.bf16.gmra.mrb[12].mxu0 %v12968_v39 }
  0xc5   :  { %1759 = vmatmul.mubr.bf16.gmra.mrb[8].mxu1 %v12975_v42  ;;  %v179_v45 = vpop.trf.xlu0  ;;  %1613 = vmatprep.mubr.bf16.mxu0 %v12970_v40  ;;  %v12990_v47 = vpop.trf.xlu1  ;;  %v450_v52 = vld [vmem:[#allocation2 + $0x60] sm:$0xff] }
  0xc6   :  { %228 = vst [vmem:[#allocation2 + $0x79] sm:$0xff] %v179_v45  ;;  %10578 = vmatpush3.bf16.msra.mxu1 %v12373_v41  ;;  %244 = vst [vmem:[#allocation2 + $0x139] sm:$0xff] %v12990_v47 }
  0xc7   :  { %10579 = vmatprep.subr.bf16.mxu1 %v12374_v44 }
  0xc9   :  { %v180_v51 = vpop.trf.xlu0  ;;  %v451_v53 = vld [vmem:[#allocation2 + $0x68] sm:$0xff]  ;;  %v13005_v58 = vpop.trf.xlu1 }
  0xca   :  { %229 = vst [vmem:[#allocation2 + $0x81] sm:$0xff] %v180_v51  ;;  %v12996_v54 = vpack.c.bf16 %v451_v53, %v450_v52  ;;  %v12998_v55 = vpack.c.bf16 %v180_v51, %v179_v45  ;;  %10580 = vmatpush3.bf16.msra.mxu1 %v12375_v46  ;;  %245 = vst [vmem:[#allocation2 + $0x141] sm:$0xff] %v13005_v58  ;;  %v388_v3 = vld [vmem:[#allocation2 + $0x62] sm:$0xff]  ;;  %v389_v4 = vld [vmem:[#allocation2 + $0x6a] sm:$0xff] }
  0xcb   :  { %10581 = vmatprep.subr.bf16.mxu1 %v12377_v48  ;;  %v13025_v12 = vpack.c.bf16 %v389_v4, %v388_v3  ;;  %v460_v48 = vld [vmem:[#allocation2 + $0xd8] sm:$0xff]  ;;  %v462_v3 = vld [vmem:[#allocation2 + $0xf0] sm:$0xff] }
  0xcc   :  { %1766 = vmatprep.mubr.bf16.mxu1 %v12996_v54  ;;  %1614 = vmatmul.mubr.bf16.gmra.mrb[16].mxu0 %v12996_v54  ;;  %v463_v4 = vld [vmem:[#allocation2 + $0xf8] sm:$0xff] }
  0xcd   :  { %1767 = vmatmul.mubr.bf16.gmra.mrb[12].mxu1 %v13003_v57  ;;  %v181_v60 = vpop.trf.xlu0  ;;  %1621 = vmatprep.mubr.bf16.mxu0 %v12998_v55  ;;  %v13018_v2 = vpop.trf.xlu1  ;;  %v452_v7 = vld [vmem:[#allocation2 + $0x78] sm:$0xff] }
  0xce   :  { %230 = vst [vmem:[#allocation2 + $0x91] sm:$0xff] %v181_v60  ;;  %10582 = vmatpush3.bf16.msra.mxu1 %v12378_v56  ;;  %246 = vst [vmem:[#allocation2 + $0x151] sm:$0xff] %v13018_v2 }
  0xcf   :  { %10583 = vmatprep.subr.bf16.mxu1 %v12379_v59  ;;  %v13068_v59 = vpack.c.bf16 %v461_v49, %v460_v48  ;;  %v402_v48 = vld [vmem:[#allocation2 + $0x10a] sm:$0xff]  ;;  %v403_v49 = vld [vmem:[#allocation2 + $0x112] sm:$0xff] }
  0xd1   :  { %v182_v6 = vpop.trf.xlu0  ;;  %v453_v8 = vld [vmem:[#allocation2 + $0x80] sm:$0xff]  ;;  %v13027_v14 = vpop.trf.xlu1 }
  0xd2   :  { %231 = vst [vmem:[#allocation2 + $0x99] sm:$0xff] %v182_v6  ;;  %v13021_v9 = vpack.c.bf16 %v453_v8, %v452_v7  ;;  %v13023_v10 = vpack.c.bf16 %v182_v6, %v181_v60  ;;  %10584 = vmatpush3.bf16.msra.mxu1 %v12380_v63  ;;  %247 = vst [vmem:[#allocation2 + $0x159] sm:$0xff] %v13027_v14  ;;  %v390_v18 = vld [vmem:[#allocation2 + $0x7a] sm:$0xff]  ;;  %v391_v19 = vld [vmem:[#allocation2 + $0x82] sm:$0xff]  ;;  %v13074_v63 = vpack.c.bf16 %v12912_v1, %v12906_v62 }
  0xd3   :  { %v13041_v29 = vpack.c.bf16 %v391_v19, %v390_v18  ;;  %v13081_v8 = vpack.c.bf16 %v463_v4, %v462_v3  ;;  %v13087_v62 = vpack.c.bf16 %v12924_v13, %v12916_v5  ;;  %v464_v1 = vld [vmem:[#allocation2 + $0x108] sm:$0xff]  ;;  %v465_v18 = vld [vmem:[#allocation2 + $0x110] sm:$0xff]  ;;  %v398_v19 = vld [vmem:[#allocation2 + $0xda] sm:$0xff]  ;;  %v13099_v5 = vpack.c.bf16 %v12949_v28, %v12934_v17 }
  0xd4   :  { %1774 = vmatprep.mubr.bf16.mxu1 %v13021_v9  ;;  %1622 = vmatmul.mubr.bf16.gmra.mrb[20].mxu0 %v13021_v9  ;;  %v466_v13 = vld [vmem:[#allocation2 + $0x120] sm:$0xff]  ;;  %v13111_v17 = vpack.c.bf16 %v12977_v43, %v12962_v32  ;;  %v468_v28 = vld [vmem:[#allocation2 + $0x138] sm:$0xff]  ;;  %v13123_v32 = vpack.c.bf16 %v13005_v58, %v12990_v47  ;;  %v405_v3 = vld [vmem:[#allocation2 + $0x12a] sm:$0xff]  ;;  %v13135_v47 = vpack.c.bf16 %v13027_v14, %v13018_v2 }
  0xd5   :  { %1775 = vmatmul.mubr.bf16.gmra.mrb[16].mxu1 %v13025_v12  ;;  %v183_v15 = vpop.trf.xlu0  ;;  %1629 = vmatprep.mubr.bf16.mxu0 %v13023_v10  ;;  %v13034_v16 = vpop.trf.xlu1  ;;  %v454_v21 = vld [vmem:[#allocation2 + $0x90] sm:$0xff]  ;;  %v407_v2 = vld [vmem:[#allocation2 + $0x142] sm:$0xff] }
  0xd6   :  { %232 = vst [vmem:[#allocation2 + $0xa9] sm:$0xff] %v183_v15  ;;  %248 = vst [vmem:[#allocation2 + $0x169] sm:$0xff] %v13034_v16  ;;  %v470_v43 = vld [vmem:[#allocation2 + $0x150] sm:$0xff] }
  0xd9   :  { %v184_v20 = vpop.trf.xlu0  ;;  %v455_v22 = vld [vmem:[#allocation2 + $0x98] sm:$0xff]  ;;  %v13043_v30 = vpop.trf.xlu1 }
  0xda   :  { %233 = vst [vmem:[#allocation2 + $0xb1] sm:$0xff] %v184_v20  ;;  %v13037_v23 = vpack.c.bf16 %v455_v22, %v454_v21  ;;  %v13039_v26 = vpack.c.bf16 %v184_v20, %v183_v15  ;;  %249 = vst [vmem:[#allocation2 + $0x171] sm:$0xff] %v13043_v30  ;;  %v392_v34 = vld [vmem:[#allocation2 + $0x92] sm:$0xff]  ;;  %v393_v35 = vld [vmem:[#allocation2 + $0x9a] sm:$0xff]  ;;  %v13093_v21 = vpack.c.bf16 %v465_v18, %v464_v1 }
  0xdb   :  { %v13057_v45 = vpack.c.bf16 %v393_v35, %v392_v34  ;;  %v399_v20 = vld [vmem:[#allocation2 + $0xe2] sm:$0xff]  ;;  %v400_v34 = vld [vmem:[#allocation2 + $0xf2] sm:$0xff]  ;;  %v401_v35 = vld [vmem:[#allocation2 + $0xfa] sm:$0xff] }
  0xdc   :  { %1782 = vmatprep.mubr.bf16.mxu1 %v13037_v23  ;;  %1630 = vmatmul.mubr.bf16.gmra.mrb[24].mxu0 %v13037_v23  ;;  %v13095_v22 = vpack.c.bf16 %v399_v20, %v398_v19 }
  0xdd   :  { %1783 = vmatmul.mubr.bf16.gmra.mrb[20].mxu1 %v13041_v29  ;;  %v185_v31 = vpop.trf.xlu0  ;;  %1637 = vmatprep.mubr.bf16.mxu0 %v13039_v26  ;;  %v13050_v33 = vpop.trf.xlu1  ;;  %v456_v37 = vld [vmem:[#allocation2 + $0xa8] sm:$0xff] }
  0xde   :  { %234 = vst [vmem:[#allocation2 + $0xc1] sm:$0xff] %v185_v31  ;;  %250 = vst [vmem:[#allocation2 + $0x181] sm:$0xff] %v13050_v33 }
  0xe1   :  { %v186_v36 = vpop.trf.xlu0  ;;  %v457_v38 = vld [vmem:[#allocation2 + $0xb0] sm:$0xff]  ;;  %v13059_v46 = vpop.trf.xlu1 }
  0xe2   :  { %235 = vst [vmem:[#allocation2 + $0xc9] sm:$0xff] %v186_v36  ;;  %v13053_v41 = vpack.c.bf16 %v457_v38, %v456_v37  ;;  %v13055_v44 = vpack.c.bf16 %v186_v36, %v185_v31  ;;  %251 = vst [vmem:[#allocation2 + $0x189] sm:$0xff] %v13059_v46  ;;  %v394_v50 = vld [vmem:[#allocation2 + $0xaa] sm:$0xff]  ;;  %v395_v51 = vld [vmem:[#allocation2 + $0xb2] sm:$0xff]  ;;  %v13107_v37 = vpack.c.bf16 %v401_v35, %v400_v34 }
  0xe3   :  { %v13070_v60 = vpack.c.bf16 %v395_v51, %v394_v50  ;;  %v467_v31 = vld [vmem:[#allocation2 + $0x128] sm:$0xff]  ;;  %v469_v38 = vld [vmem:[#allocation2 + $0x140] sm:$0xff]  ;;  %v13119_v51 = vpack.c.bf16 %v403_v49, %v402_v48  ;;  %v408_v49 = vld [vmem:[#allocation2 + $0x152] sm:$0xff] }
  0xe4   :  { %1790 = vmatprep.mubr.bf16.mxu1 %v13053_v41  ;;  %1638 = vmatmul.mubr.bf16.gmra.mrb[28].mxu0 %v13053_v41  ;;  %v13105_v36 = vpack.c.bf16 %v467_v31, %v466_v13  ;;  %v13117_v50 = vpack.c.bf16 %v469_v38, %v468_v28  ;;  %v472_v13 = vld [vmem:[#allocation2 + $0x168] sm:$0xff]  ;;  %v473_v31 = vld [vmem:[#allocation2 + $0x170] sm:$0xff]  ;;  %v406_v34 = vld [vmem:[#allocation2 + $0x13a] sm:$0xff]  ;;  %v13151_v28 = vpack.c.bf16 %v13043_v30, %v13034_v16 }
  0xe5   :  { %1791 = vmatmul.mubr.bf16.gmra.mrb[24].mxu1 %v13057_v45  ;;  %1645 = vmatprep.mubr.bf16.mxu0 %v13055_v44  ;;  %v458_v52 = vld [vmem:[#allocation2 + $0xc0] sm:$0xff]  ;;  %v13145_v14 = vpack.c.bf16 %v473_v31, %v472_v13  ;;  %v13147_v35 = vpack.c.bf16 %v407_v2, %v406_v34  ;;  %v410_v16 = vld [vmem:[#allocation2 + $0x16a] sm:$0xff]  ;;  %v411_v30 = vld [vmem:[#allocation2 + $0x172] sm:$0xff] }
  0xe6   :  { %v474_v38 = vld [vmem:[#allocation2 + $0x180] sm:$0xff] }
  0xe9   :  { %v459_v53 = vld [vmem:[#allocation2 + $0xc8] sm:$0xff] }
  0xea   :  { %v13066_v56 = vpack.c.bf16 %v459_v53, %v458_v52  ;;  %v396_v6 = vld [vmem:[#allocation2 + $0xc2] sm:$0xff]  ;;  %v397_v7 = vld [vmem:[#allocation2 + $0xca] sm:$0xff]  ;;  %v471_v52 = vld [vmem:[#allocation2 + $0x158] sm:$0xff] }
  0xeb   :  { %v13083_v15 = vpack.c.bf16 %v397_v7, %v396_v6  ;;  %v404_v53 = vld [vmem:[#allocation2 + $0x122] sm:$0xff]  ;;  %v13129_v4 = vpack.c.bf16 %v471_v52, %v470_v43  ;;  %v409_v43 = vld [vmem:[#allocation2 + $0x15a] sm:$0xff] }
  0xec   :  { %1798 = vmatprep.mubr.bf16.mxu1 %v13066_v56  ;;  %1646 = vmatmul.mubr.bf16.gmra.mrb[32].mxu0 %v13066_v56  ;;  %v13131_v7 = vpack.c.bf16 %v405_v3, %v404_v53  ;;  %v475_v48 = vld [vmem:[#allocation2 + $0x188] sm:$0xff]  ;;  %v13159_v53 = vpack.c.bf16 %v409_v43, %v408_v49  ;;  %v13165_v3 = vpack.c.bf16 %v411_v30, %v410_v16  ;;  %v731_v43 = vld [vmem:[#allocation2 + $0x199] sm:$0xff] }
  0xed   :  { %1799 = vmatmul.mubr.bf16.gmra.mrb[28].mxu1 %v13070_v60  ;;  %1653 = vmatprep.mubr.bf16.mxu0 %v13074_v63  ;;  %v13157_v52 = vpack.c.bf16 %v475_v48, %v474_v38  ;;  %v747_v38 = vpack.c.bf16 %v13059_v46, %v13050_v33 }
  0xee   :  { %1806 = vmatprep.mubr.bf16.mxu1 %v13068_v59 }
  0xf4   :  { %1654 = vmatmul.mubr.bf16.gmra.mrb[36].mxu0 %v13068_v59 }
  0xf5   :  { %1807 = vmatmul.mubr.bf16.gmra.mrb[32].mxu1 %v13083_v15  ;;  %1661 = vmatprep.mubr.bf16.mxu0 %v13087_v62 }
  0xf6   :  { %1814 = vmatprep.mubr.bf16.mxu1 %v13081_v8  ;;  %v10249_v6 = vpop.f32.mrb[0].mxu0 }
  0xf7   :  { %v10250_v58 = vpop.f32.mrb[1].mxu0 }
  0xf8   :  { %v13138_v1 = vadd.f32 %v10250_v58, %v10249_v6  ;;  %v10252_v18 = vpop.f32.mrb[2].mxu0  ;;  %v12381_v6 = vld [vmem:[%s17424_s1 + $0x208] sm:$0xff]   ;;  %v12383_v58 = vld [vmem:[%s17424_s1 + $0x218] sm:$0xff]  }
  0xf9   :  { %v10253_v19 = vpop.f32.mrb[3].mxu0 }
  0xfa   :  { %v13143_v20 = vadd.f32 %v10253_v19, %v10252_v18 }
  0xfc   :  { %1662 = vmatmul.mubr.bf16.gmra.mrb[40].mxu0 %v13081_v8 }
  0xfd   :  { %1815 = vmatmul.mubr.bf16.gmra.mrb[36].mxu1 %v13095_v22  ;;  %1669 = vmatprep.mubr.bf16.mxu0 %v13099_v5 }
  0xfe   :  { %1822 = vmatprep.mubr.bf16.mxu1 %v13093_v21 }
 0x104   :  { %1670 = vmatmul.mubr.bf16.gmra.mrb[44].mxu0 %v13093_v21 }
 0x105   :  { %1823 = vmatmul.mubr.bf16.gmra.mrb[40].mxu1 %v13107_v37  ;;  %1677 = vmatprep.mubr.bf16.mxu0 %v13111_v17 }
 0x106   :  { %1830 = vmatprep.mubr.bf16.mxu1 %v13105_v36 }
 0x10c   :  { %1678 = vmatmul.mubr.bf16.gmra.mrb[48].mxu0 %v13105_v36 }
 0x10d   :  { %1831 = vmatmul.mubr.bf16.gmra.mrb[44].mxu1 %v13119_v51  ;;  %1685 = vmatprep.mubr.bf16.mxu0 %v13123_v32 }
 0x10e   :  { %1838 = vmatprep.mubr.bf16.mxu1 %v13117_v50 }
 0x114   :  { %1686 = vmatmul.mubr.bf16.gmra.mrb[52].mxu0 %v13117_v50 }
 0x115   :  { %1839 = vmatmul.mubr.bf16.gmra.mrb[48].mxu1 %v13131_v7  ;;  %1693 = vmatprep.mubr.bf16.mxu0 %v13135_v47 }
 0x116   :  { %1846 = vmatprep.mubr.bf16.mxu1 %v13129_v4 }
 0x11c   :  { %1694 = vmatmul.mubr.bf16.gmra.mrb[56].mxu0 %v13129_v4 }
 0x11d   :  { %1847 = vmatmul.mubr.bf16.gmra.mrb[52].mxu1 %v13147_v35  ;;  %1701 = vmatprep.mubr.bf16.mxu0 %v13151_v28 }
 0x11e   :  { %1854 = vmatprep.mubr.bf16.mxu1 %v13145_v14 }
 0x124   :  { %1702 = vmatmul.mubr.bf16.gmra.mrb[60].mxu0 %v13145_v14 }
 0x125   :  { %1855 = vmatmul.mubr.bf16.gmra.mrb[56].mxu1 %v13159_v53  ;;  %1903 = vmatprep.mubr.bf16.mxu0 %v12947_v27  ;;  %v12382_v27 = vld [vmem:[%s17424_s1 + $0x210] sm:$0xff]  }
 0x126   :  { %1862 = vmatprep.mubr.bf16.mxu1 %v13157_v52 }
 0x12c   :  { %1904 = vmatmul.mubr.bf16.vlgmr.msra.gmra.mrb[64].mxu0 %v12910_v0  ;;  %v12385_v0 = vld [vmem:[%s17424_s1 + $0x228] sm:$0xff]  }
 0x12d   :  { %1863 = vmatmul.mubr.bf16.gmra.mrb[60].mxu1 %v13165_v3  ;;  %12122 = vmatpush3.bf16.msra.mxu0 %v12904_v61  ;;  %v12384_v61 = vld [vmem:[%s17424_s1 + $0x220] sm:$0xff]  }
 0x12e   :  { %1911 = vmatprep.mubr.bf16.mxu0 %v12975_v42  ;;  %2064 = vmatprep.mubr.bf16.mxu1 %v12919_v11 }
 0x12f   :  { %12123 = vmatprep.subr.bf16.mxu0 %v12381_v6 }
 0x131   :  { %12124 = vmatpush3.bf16.msra.mxu0 %v12381_v6  ;;  %v766_v6 = vld [vmem:[#allocation2 + $0x3a] sm:$0xff] }
 0x132   :  { %12125 = vmatprep.subr.bf16.mxu0 %v12382_v27 }
 0x134   :  { %1912 = vmatmul.mubr.bf16.gmra.mrb[68].mxu0 %v12919_v11  ;;  %v12386_v11 = vld [vmem:[%s17424_s1 + $0x230] sm:$0xff]  }
 0x135   :  { %2065 = vmatmul.mubr.bf16.vlgmr.msra.gmra.mrb[64].mxu1 %v12940_v24  ;;  %1919 = vmatprep.mubr.bf16.mxu0 %v13003_v57  ;;  %v12387_v24 = vld [vmem:[%s17424_s1 + $0x238] sm:$0xff]  }
 0x136   :  { %2072 = vmatprep.mubr.bf16.mxu1 %v12942_v25  ;;  %12126 = vmatpush3.bf16.msra.mxu0 %v12382_v27 }
 0x137   :  { %12127 = vmatprep.subr.bf16.mxu0 %v12383_v58 }
 0x13a   :  { %12128 = vmatpush3.bf16.msra.mxu0 %v12383_v58 }
 0x13b   :  { %12129 = vmatprep.subr.bf16.mxu0 %v12384_v61 }
 0x13c   :  { %1920 = vmatmul.mubr.bf16.gmra.mrb[72].mxu0 %v12942_v25 }
 0x13d   :  { %2073 = vmatmul.mubr.bf16.gmra.mrb[68].mxu1 %v12968_v39  ;;  %1927 = vmatprep.mubr.bf16.mxu0 %v13025_v12 }
 0x13e   :  { %2080 = vmatprep.mubr.bf16.mxu1 %v12970_v40  ;;  %12130 = vmatpush3.bf16.msra.mxu0 %v12384_v61 }
 0x13f   :  { %12131 = vmatprep.subr.bf16.mxu0 %v12385_v0 }
 0x142   :  { %12132 = vmatpush3.bf16.msra.mxu0 %v12385_v0 }
 0x143   :  { %12133 = vmatprep.subr.bf16.mxu0 %v12386_v11 }
 0x144   :  { %1928 = vmatmul.mubr.bf16.gmra.mrb[76].mxu0 %v12970_v40 }
 0x145   :  { %2081 = vmatmul.mubr.bf16.gmra.mrb[72].mxu1 %v12996_v54  ;;  %1935 = vmatprep.mubr.bf16.mxu0 %v13041_v29 }
 0x146   :  { %2088 = vmatprep.mubr.bf16.mxu1 %v12998_v55  ;;  %12134 = vmatpush3.bf16.msra.mxu0 %v12386_v11 }
 0x147   :  { %12135 = vmatprep.subr.bf16.mxu0 %v12387_v24 }
 0x14a   :  { %12136 = vmatpush3.bf16.msra.mxu0 %v12387_v24 }
 0x14c   :  { %1936 = vmatmul.mubr.bf16.gmra.mrb[80].mxu0 %v12998_v55 }
 0x14d   :  { %2089 = vmatmul.mubr.bf16.gmra.mrb[76].mxu1 %v13021_v9  ;;  %1943 = vmatprep.mubr.bf16.mxu0 %v13057_v45 }
 0x14e   :  { %2096 = vmatprep.mubr.bf16.mxu1 %v13023_v10 }
 0x154   :  { %1944 = vmatmul.mubr.bf16.gmra.mrb[84].mxu0 %v13023_v10 }
 0x155   :  { %2097 = vmatmul.mubr.bf16.gmra.mrb[80].mxu1 %v13037_v23  ;;  %1951 = vmatprep.mubr.bf16.mxu0 %v13070_v60 }
 0x156   :  { %2104 = vmatprep.mubr.bf16.mxu1 %v13039_v26 }
 0x15c   :  { %1952 = vmatmul.mubr.bf16.gmra.mrb[88].mxu0 %v13039_v26 }
 0x15d   :  { %2105 = vmatmul.mubr.bf16.gmra.mrb[84].mxu1 %v13053_v41  ;;  %1959 = vmatprep.mubr.bf16.mxu0 %v13083_v15 }
 0x15e   :  { %2112 = vmatprep.mubr.bf16.mxu1 %v13055_v44 }
 0x164   :  { %1960 = vmatmul.mubr.bf16.gmra.mrb[92].mxu0 %v13055_v44 }
 0x165   :  { %2113 = vmatmul.mubr.bf16.gmra.mrb[88].mxu1 %v13066_v56  ;;  %1967 = vmatprep.mubr.bf16.mxu0 %v13095_v22 }
 0x166   :  { %2120 = vmatprep.mubr.bf16.mxu1 %v13074_v63 }
 0x16c   :  { %1968 = vmatmul.mubr.bf16.gmra.mrb[96].mxu0 %v13074_v63 }
 0x16d   :  { %2121 = vmatmul.mubr.bf16.gmra.mrb[92].mxu1 %v13068_v59  ;;  %1975 = vmatprep.mubr.bf16.mxu0 %v13107_v37 }
 0x16e   :  { %2128 = vmatprep.mubr.bf16.mxu1 %v13087_v62 }
 0x174   :  { %1976 = vmatmul.mubr.bf16.gmra.mrb[100].mxu0 %v13087_v62 }
 0x175   :  { %2129 = vmatmul.mubr.bf16.gmra.mrb[96].mxu1 %v13081_v8  ;;  %1983 = vmatprep.mubr.bf16.mxu0 %v13119_v51 }
 0x176   :  { %2136 = vmatprep.mubr.bf16.mxu1 %v13099_v5 }
 0x17c   :  { %1984 = vmatmul.mubr.bf16.gmra.mrb[104].mxu0 %v13099_v5 }
 0x17d   :  { %2137 = vmatmul.mubr.bf16.gmra.mrb[100].mxu1 %v13093_v21  ;;  %1991 = vmatprep.mubr.bf16.mxu0 %v13131_v7  ;;  %v603_v7 = vld [vmem:[#allocation2 + $0x18a] sm:$0xff] }
 0x17e   :  { %2144 = vmatprep.mubr.bf16.mxu1 %v13111_v17 }
 0x184   :  { %1992 = vmatmul.mubr.bf16.gmra.mrb[108].mxu0 %v13111_v17 }
 0x185   :  { %2145 = vmatmul.mubr.bf16.gmra.mrb[104].mxu1 %v13105_v36  ;;  %1999 = vmatprep.mubr.bf16.mxu0 %v13147_v35 }
 0x186   :  { %2152 = vmatprep.mubr.bf16.mxu1 %v13123_v32 }
 0x187   :  { %v10255_v25 = vpop.f32.mrb[4].mxu0 }
 0x188   :  { %v10361_v39 = vpop.f32.mrb[0].mxu1  ;;  %v10256_v40 = vpop.f32.mrb[5].mxu0 }
 0x189   :  { %v10257_v42 = vadd.f32 %v10256_v40, %v10255_v25  ;;  %v10362_v54 = vpop.f32.mrb[1].mxu1  ;;  %v10258_v55 = vpop.f32.mrb[6].mxu0 }
 0x18a   :  { %v10363_v57 = vadd.f32 %v10362_v54, %v10361_v39  ;;  %v10364_v9 = vpop.f32.mrb[2].mxu1  ;;  %v10259_v10 = vpop.f32.mrb[7].mxu0  ;;  %v767_v54 = vld [vmem:[#allocation2 + $0x4a] sm:$0xff] }
 0x18b   :  { %v10260_v12 = vadd.f32 %v10259_v10, %v10258_v55  ;;  %v10365_v23 = vpop.f32.mrb[3].mxu1  ;;  %v768_v55 = vld [vmem:[#allocation2 + $0x52] sm:$0xff]  ;;  %v769_v10 = vld [vmem:[#allocation2 + $0x62] sm:$0xff] }
 0x18c   :  { %v13238_v26 = vadd.f32 %v10363_v57, %v13138_v1  ;;  %v10366_v29 = vadd.f32 %v10365_v23, %v10364_v9  ;;  %2000 = vmatmul.mubr.bf16.gmra.mrb[112].mxu0 %v13123_v32  ;;  %v602_v32 = vld [vmem:[#allocation2 + $0x182] sm:$0xff] }
 0x18d   :  { %2153 = vmatmul.mubr.bf16.gmra.mrb[108].mxu1 %v13117_v50  ;;  %2007 = vmatprep.mubr.bf16.mxu0 %v13159_v53  ;;  %v732_v53 = vld [vmem:[#allocation2 + $0x1a1] sm:$0xff] }
 0x18e   :  { %v13244_v41 = vadd.f32 %v10366_v29, %v13143_v20  ;;  %2160 = vmatprep.mubr.bf16.mxu1 %v13135_v47  ;;  %v748_v46 = vpack.c.bf16 %v732_v53, %v731_v43 }
 0x18f   :  { %v10261_v44 = vpop.f32.mrb[8].mxu0 }
 0x190   :  { %v10367_v45 = vpop.f32.mrb[4].mxu1  ;;  %v10262_v56 = vpop.f32.mrb[9].mxu0 }
 0x191   :  { %v10263_v59 = vadd.f32 %v10262_v56, %v10261_v44  ;;  %v10368_v60 = vpop.f32.mrb[5].mxu1  ;;  %v10264_v63 = vpop.f32.mrb[10].mxu0 }
 0x192   :  { %v10369_v8 = vadd.f32 %v10368_v60, %v10367_v45  ;;  %v10370_v15 = vpop.f32.mrb[6].mxu1  ;;  %v10265_v62 = vpop.f32.mrb[11].mxu0  ;;  %v12612_v45 = vld [vmem:[#allocation2] sm:$0xff] }
 0x193   :  { %v10266_v21 = vadd.f32 %v10265_v62, %v10264_v63  ;;  %v10371_v22 = vpop.f32.mrb[7].mxu1  ;;  %v684_v56 = vpack.c.bf16 %v12612_v45, %v12612_v45 }
 0x194   :  { %v13247_v5 = vadd.f32 %v10369_v8, %v10257_v42  ;;  %v10372_v36 = vadd.f32 %v10371_v22, %v10370_v15  ;;  %2008 = vmatmul.mubr.bf16.gmra.mrb[116].mxu0 %v13135_v47 }
 0x195   :  { %2161 = vmatmul.mubr.bf16.gmra.mrb[112].mxu1 %v13129_v4  ;;  %2015 = vmatprep.mubr.bf16.mxu0 %v13165_v3  ;;  %v13255_v4 = vpack.c.bf16 %v603_v7, %v602_v32  ;;  %v765_v3 = vld [vmem:[#allocation2 + $0x32] sm:$0xff] }
 0x196   :  { %v13252_v37 = vadd.f32 %v10372_v36, %v10260_v12  ;;  %2168 = vmatprep.mubr.bf16.mxu1 %v13151_v28  ;;  %v797_v24 = vpack.c.bf16 %v766_v6, %v765_v3  ;;  %v770_v12 = vld [vmem:[#allocation2 + $0x6a] sm:$0xff] }
 0x197   :  { %v10267_v17 = vpop.f32.mrb[12].mxu0  ;;  %v799_v62 = vpack.c.bf16 %v770_v12, %v769_v10  ;;  %v775_v6 = vld [vmem:[#allocation2 + $0xaa] sm:$0xff] }
 0x198   :  { %v10373_v50 = vpop.f32.mrb[8].mxu1  ;;  %v10268_v51 = vpop.f32.mrb[13].mxu0 }
 0x199   :  { %v10269_v1 = vadd.f32 %v10268_v51, %v10267_v17  ;;  %v10374_v18 = vpop.f32.mrb[9].mxu1  ;;  %v10270_v19 = vpop.f32.mrb[14].mxu0  ;;  %v772_v51 = vld [vmem:[#allocation2 + $0x82] sm:$0xff] }
 0x19a   :  { %v10375_v20 = vadd.f32 %v10374_v18, %v10373_v50  ;;  %v10376_v13 = vpop.f32.mrb[10].mxu1  ;;  %v10271_v31 = vpop.f32.mrb[15].mxu0  ;;  %v771_v50 = vld [vmem:[#allocation2 + $0x7a] sm:$0xff] }
 0x19b   :  { %v10272_v47 = vadd.f32 %v10271_v31, %v10270_v19  ;;  %v10377_v34 = vpop.f32.mrb[11].mxu1  ;;  %v774_v18 = vld [vmem:[#allocation2 + $0x9a] sm:$0xff] }
 0x19c   :  { %v13257_v2 = vadd.f32 %v10375_v20, %v10263_v59  ;;  %v10378_v35 = vadd.f32 %v10377_v34, %v10376_v13  ;;  %2016 = vmatmul.mubr.bf16.gmra.mrb[120].mxu0 %v13151_v28 }
 0x19d   :  { %2169 = vmatmul.mubr.bf16.gmra.mrb[116].mxu1 %v13145_v14  ;;  %2023 = vmatprep.mubr.bf16.mxu0 %v13255_v4 }
 0x19e   :  { %v13264_v48 = vadd.f32 %v10378_v35, %v10266_v21  ;;  %2176 = vmatprep.mubr.bf16.mxu1 %v747_v38  ;;  %v800_v35 = vpack.c.bf16 %v772_v51, %v771_v50 }
 0x19f   :  { %v10273_v49 = vpop.f32.mrb[16].mxu0 }
 0x1a0   :  { %v10379_v16 = vpop.f32.mrb[12].mxu1  ;;  %v10274_v30 = vpop.f32.mrb[17].mxu0 }
 0x1a1   :  { %v10275_v27 = vadd.f32 %v10274_v30, %v10273_v49  ;;  %v10380_v58 = vpop.f32.mrb[13].mxu1  ;;  %v10276_v28 = vpop.f32.mrb[18].mxu0 }
 0x1a2   :  { %v10381_v61 = vadd.f32 %v10380_v58, %v10379_v16  ;;  %v10382_v0 = vpop.f32.mrb[14].mxu1  ;;  %v10277_v33 = vpop.f32.mrb[19].mxu0 }
 0x1a3   :  { %v10278_v14 = vadd.f32 %v10277_v33, %v10276_v28  ;;  %v10383_v11 = vpop.f32.mrb[15].mxu1 }
 0x1a4   :  { %v13266_v25 = vadd.f32 %v10381_v61, %v10269_v1  ;;  %v10384_v39 = vadd.f32 %v10383_v11, %v10382_v0  ;;  %2024 = vmatmul.mubr.bf16.gmra.mrb[124].mxu0 %v747_v38  ;;  %v773_v1 = vld [vmem:[#allocation2 + $0x92] sm:$0xff]  ;;  %v777_v61 = vld [vmem:[#allocation2 + $0xc2] sm:$0xff]  ;;  %v778_v0 = vld [vmem:[#allocation2 + $0xca] sm:$0xff] }
 0x1a5   :  { %2177 = vmatmul.mubr.bf16.gmra.mrb[120].mxu1 %v13157_v52  ;;  %12137 = vmatprep.mubr.bf16.mxu0 %v797_v24  ;;  %v798_v52 = vpack.c.bf16 %v768_v55, %v767_v54  ;;  %v801_v43 = vpack.c.bf16 %v774_v18, %v773_v1 }
 0x1a6   :  { %v13269_v40 = vadd.f32 %v10384_v39, %v10272_v47  ;;  %2184 = vmatprep.mubr.bf16.mxu1 %v748_v46 }
 0x1a7   :  { %v10279_v42 = vpop.f32.mrb[20].mxu0 }
 0x1a8   :  { %v10385_v57 = vpop.f32.mrb[16].mxu1  ;;  %v10280_v9 = vpop.f32.mrb[21].mxu0 }
 0x1a9   :  { %v10281_v23 = vadd.f32 %v10280_v9, %v10279_v42  ;;  %v10386_v29 = vpop.f32.mrb[17].mxu1  ;;  %v10282_v44 = vpop.f32.mrb[22].mxu0 }
 0x1aa   :  { %v10387_v59 = vadd.f32 %v10386_v29, %v10385_v57  ;;  %v10388_v60 = vpop.f32.mrb[18].mxu1  ;;  %v10283_v63 = vpop.f32.mrb[23].mxu0  ;;  %v803_v57 = vpack.c.bf16 %v778_v0, %v777_v61  ;;  %v779_v29 = vld [vmem:[#allocation2 + $0xda] sm:$0xff] }
 0x1ab   :  { %v10284_v8 = vadd.f32 %v10283_v63, %v10282_v44  ;;  %v10389_v15 = vpop.f32.mrb[19].mxu1  ;;  %v780_v44 = vld [vmem:[#allocation2 + $0xe2] sm:$0xff] }
 0x1ac   :  { %v13271_v21 = vadd.f32 %v10387_v59, %v10275_v27  ;;  %v10390_v22 = vadd.f32 %v10389_v15, %v10388_v60  ;;  %12138 = vmatmul.mubr.bf16.vlgmr.msra.gmra.mrb[128].mxu0 %v798_v52  ;;  %v776_v27 = vld [vmem:[#allocation2 + $0xb2] sm:$0xff]  ;;  %v782_v60 = vld [vmem:[#allocation2 + $0xfa] sm:$0xff] }
 0x1ad   :  { %2185 = vmatmul.mubr.bf16.gmra.mrb[124].mxu1 %v684_v56  ;;  %12141 = vmatprep.mubr.bf16.mxu0 %v799_v62  ;;  %v802_v42 = vpack.c.bf16 %v776_v27, %v775_v6  ;;  %v781_v59 = vld [vmem:[#allocation2 + $0xf2] sm:$0xff] }
 0x1ae   :  { %v13273_v36 = vadd.f32 %v10390_v22, %v10278_v14 }
 0x1af   :  { %v10285_v17 = vpop.f32.mrb[24].mxu0 }
 0x1b0   :  { %v10391_v32 = vpop.f32.mrb[20].mxu1  ;;  %v10286_v7 = vpop.f32.mrb[25].mxu0 }
 0x1b1   :  { %v10287_v19 = vadd.f32 %v10286_v7, %v10285_v17  ;;  %v10392_v20 = vpop.f32.mrb[21].mxu1  ;;  %v10288_v13 = vpop.f32.mrb[26].mxu0  ;;  %v804_v17 = vpack.c.bf16 %v780_v44, %v779_v29 }
 0x1b2   :  { %v10393_v31 = vadd.f32 %v10392_v20, %v10391_v32  ;;  %v10394_v47 = vpop.f32.mrb[22].mxu1  ;;  %v10289_v34 = vpop.f32.mrb[27].mxu0  ;;  %v805_v32 = vpack.c.bf16 %v782_v60, %v781_v59  ;;  %v783_v20 = vld [vmem:[#allocation2 + $0x10a] sm:$0xff] }
 0x1b3   :  { %v10290_v38 = vadd.f32 %v10289_v34, %v10288_v13  ;;  %v10395_v49 = vpop.f32.mrb[23].mxu1  ;;  %v784_v13 = vld [vmem:[#allocation2 + $0x112] sm:$0xff]  ;;  %v785_v34 = vld [vmem:[#allocation2 + $0x122] sm:$0xff] }
 0x1b4   :  { %v13275_v53 = vadd.f32 %v10393_v31, %v10281_v23  ;;  %v10396_v16 = vadd.f32 %v10395_v49, %v10394_v47  ;;  %12142 = vmatmul.mubr.bf16.gmra.mrb[132].mxu0 %v800_v35  ;;  %v786_v35 = vld [vmem:[#allocation2 + $0x12a] sm:$0xff]  ;;  %v806_v27 = vpack.c.bf16 %v784_v13, %v783_v20 }
 0x1b5   :  { %12145 = vmatprep.mubr.bf16.mxu0 %v801_v43  ;;  %v807_v61 = vpack.c.bf16 %v786_v35, %v785_v34 }
 0x1b6   :  { %v13277_v30 = vadd.f32 %v10396_v16, %v10284_v8 }
 0x1b7   :  { %v10291_v3 = vpop.f32.mrb[28].mxu0 }
 0x1b8   :  { %v10397_v58 = vpop.f32.mrb[24].mxu1  ;;  %v10292_v28 = vpop.f32.mrb[29].mxu0 }
 0x1b9   :  { %v10293_v33 = vadd.f32 %v10292_v28, %v10291_v3  ;;  %v10398_v46 = vpop.f32.mrb[25].mxu1  ;;  %v10294_v14 = vpop.f32.mrb[30].mxu0 }
 0x1ba   :  { %v10399_v11 = vadd.f32 %v10398_v46, %v10397_v58  ;;  %v10400_v24 = vpop.f32.mrb[26].mxu1  ;;  %v10295_v39 = vpop.f32.mrb[31].mxu0 }
 0x1bb   :  { %v10296_v54 = vadd.f32 %v10295_v39, %v10294_v14  ;;  %v10401_v55 = vpop.f32.mrb[27].mxu1 }
 0x1bc   :  { %v13279_v9 = vadd.f32 %v10399_v11, %v10287_v19  ;;  %v10402_v10 = vadd.f32 %v10401_v55, %v10400_v24  ;;  %12146 = vmatmul.mubr.bf16.gmra.mrb[136].mxu0 %v802_v42  ;;  %v787_v11 = vld [vmem:[#allocation2 + $0x13a] sm:$0xff]  ;;  %v788_v24 = vld [vmem:[#allocation2 + $0x142] sm:$0xff] }
 0x1bd   :  { %12149 = vmatprep.mubr.bf16.mxu0 %v803_v57  ;;  %v790_v55 = vld [vmem:[#allocation2 + $0x15a] sm:$0xff] }
 0x1be   :  { %v13281_v12 = vadd.f32 %v10402_v10, %v10290_v38 }
 0x1bf   :  { %v10297_v23 = vpop.f32.mrb[32].mxu0 }
 0x1c0   :  { %v10403_v45 = vpop.f32.mrb[28].mxu1  ;;  %v10298_v56 = vpop.f32.mrb[33].mxu0 }
 0x1c1   :  { %v10299_v63 = vadd.f32 %v10298_v56, %v10297_v23  ;;  %v10404_v52 = vpop.f32.mrb[29].mxu1  ;;  %v10300_v8 = vpop.f32.mrb[34].mxu0  ;;  %v808_v56 = vpack.c.bf16 %v788_v24, %v787_v11 }
 0x1c2   :  { %v10405_v15 = vadd.f32 %v10404_v52, %v10403_v45  ;;  %v10406_v62 = vpop.f32.mrb[30].mxu1  ;;  %v10301_v22 = vpop.f32.mrb[35].mxu0 }
 0x1c3   :  { %v10302_v50 = vadd.f32 %v10301_v22, %v10300_v8  ;;  %v10407_v51 = vpop.f32.mrb[31].mxu1  ;;  %v791_v22 = vld [vmem:[#allocation2 + $0x16a] sm:$0xff] }
 0x1c4   :  { %v13283_v7 = vadd.f32 %v10405_v15, %v10293_v33  ;;  %v10408_v1 = vadd.f32 %v10407_v51, %v10406_v62  ;;  %12150 = vmatmul.mubr.bf16.gmra.mrb[140].mxu0 %v804_v17  ;;  %v792_v17 = vld [vmem:[#allocation2 + $0x172] sm:$0xff] }
 0x1c5   :  { %12153 = vmatprep.mubr.bf16.mxu0 %v805_v32 }
 0x1c6   :  { %v13285_v18 = vadd.f32 %v10408_v1, %v10296_v54  ;;  %v789_v54 = vld [vmem:[#allocation2 + $0x152] sm:$0xff] }
 0x1c7   :  { %v10303_v19 = vpop.f32.mrb[36].mxu0 }
 0x1c8   :  { %v10409_v31 = vpop.f32.mrb[32].mxu1  ;;  %v10304_v47 = vpop.f32.mrb[37].mxu0 }
 0x1c9   :  { %v10305_v38 = vadd.f32 %v10304_v47, %v10303_v19  ;;  %v10410_v49 = vpop.f32.mrb[33].mxu1  ;;  %v10306_v43 = vpop.f32.mrb[38].mxu0  ;;  %v810_v47 = vpack.c.bf16 %v792_v17, %v791_v22 }
 0x1ca   :  { %v10411_v16 = vadd.f32 %v10410_v49, %v10409_v31  ;;  %v10412_v3 = vpop.f32.mrb[34].mxu1  ;;  %v10307_v6 = vpop.f32.mrb[39].mxu0 }
 0x1cb   :  { %v10308_v58 = vadd.f32 %v10307_v6, %v10306_v43  ;;  %v10413_v28 = vpop.f32.mrb[35].mxu1  ;;  %v795_v43 = vld [vmem:[#allocation2 + $0x19a] sm:$0xff] }
 0x1cc   :  { %v13287_v0 = vadd.f32 %v10411_v16, %v10299_v63  ;;  %v10414_v33 = vadd.f32 %v10413_v28, %v10412_v3  ;;  %12154 = vmatmul.mubr.bf16.gmra.mrb[144].mxu0 %v806_v27  ;;  %v809_v63 = vpack.c.bf16 %v790_v55, %v789_v54  ;;  %v796_v16 = vld [vmem:[#allocation2 + $0x1a2] sm:$0xff] }
 0x1cd   :  { %12157 = vmatprep.mubr.bf16.mxu0 %v807_v61  ;;  %v812_v28 = vpack.c.bf16 %v796_v16, %v795_v43 }
 0x1ce   :  { %v13289_v46 = vadd.f32 %v10414_v33, %v10302_v50 }
 0x1cf   :  { %v10309_v14 = vpop.f32.mrb[40].mxu0 }
 0x1d0   :  { %v10415_v39 = vpop.f32.mrb[36].mxu1  ;;  %v10310_v42 = vpop.f32.mrb[41].mxu0 }
 0x1d1   :  { %v10311_v57 = vadd.f32 %v10310_v42, %v10309_v14  ;;  %v10416_v10 = vpop.f32.mrb[37].mxu1  ;;  %v10312_v23 = vpop.f32.mrb[42].mxu0 }
 0x1d2   :  { %v10417_v29 = vadd.f32 %v10416_v10, %v10415_v39  ;;  %v10418_v44 = vpop.f32.mrb[38].mxu1  ;;  %v10313_v45 = vpop.f32.mrb[43].mxu0 }
 0x1d3   :  { %v10314_v59 = vadd.f32 %v10313_v45, %v10312_v23  ;;  %v10419_v60 = vpop.f32.mrb[39].mxu1 }
 0x1d4   :  { %v13291_v52 = vadd.f32 %v10417_v29, %v10305_v38  ;;  %v10420_v8 = vadd.f32 %v10419_v60, %v10418_v44  ;;  %12158 = vmatmul.mubr.bf16.gmra.mrb[148].mxu0 %v808_v56 }
 0x1d5   :  { %12161 = vmatprep.mubr.bf16.mxu0 %v809_v63 }
 0x1d6   :  { %v13293_v15 = vadd.f32 %v10420_v8, %v10308_v58 }
 0x1d7   :  { %v10315_v62 = vpop.f32.mrb[44].mxu0 }
 0x1d8   :  { %v10421_v50 = vpop.f32.mrb[40].mxu1  ;;  %v10316_v51 = vpop.f32.mrb[45].mxu0 }
 0x1d9   :  { %v10317_v32 = vadd.f32 %v10316_v51, %v10315_v62  ;;  %v10422_v1 = vpop.f32.mrb[41].mxu1  ;;  %v10318_v19 = vpop.f32.mrb[46].mxu0 }
 0x1da   :  { %v10423_v20 = vadd.f32 %v10422_v1, %v10421_v50  ;;  %v10424_v13 = vpop.f32.mrb[42].mxu1  ;;  %v10319_v31 = vpop.f32.mrb[47].mxu0 }
 0x1db   :  { %v10320_v34 = vadd.f32 %v10319_v31, %v10318_v19  ;;  %v10425_v35 = vpop.f32.mrb[43].mxu1 }
 0x1dc   :  { %v13295_v38 = vadd.f32 %v10423_v20, %v10311_v57  ;;  %v10426_v49 = vadd.f32 %v10425_v35, %v10424_v13  ;;  %12162 = vmatmul.mubr.bf16.gmra.mrb[152].mxu0 %v810_v47 }
 0x1dd   :  { %12165 = vmatprep.mubr.bf16.mxu0 %v13255_v4 }
 0x1de   :  { %v13298_v3 = vadd.f32 %v10426_v49, %v10314_v59 }
 0x1df   :  { %v10321_v6 = vpop.f32.mrb[48].mxu0 }
 0x1e0   :  { %v10427_v27 = vpop.f32.mrb[44].mxu1  ;;  %v10322_v58 = vpop.f32.mrb[49].mxu0 }
 0x1e1   :  { %v10323_v61 = vadd.f32 %v10322_v58, %v10321_v6  ;;  %v10428_v33 = vpop.f32.mrb[45].mxu1  ;;  %v10324_v14 = vpop.f32.mrb[50].mxu0 }
 0x1e2   :  { %v10429_v11 = vadd.f32 %v10428_v33, %v10427_v27  ;;  %v10430_v24 = vpop.f32.mrb[46].mxu1  ;;  %v10325_v39 = vpop.f32.mrb[51].mxu0 }
 0x1e3   :  { %v10326_v42 = vadd.f32 %v10325_v39, %v10324_v14  ;;  %v10431_v54 = vpop.f32.mrb[47].mxu1 }
 0x1e4   :  { %v13300_v55 = vadd.f32 %v10429_v11, %v10317_v32  ;;  %v10432_v57 = vadd.f32 %v10431_v54, %v10430_v24  ;;  %12166 = vmatmul.mubr.bf16.gmra.mrb[156].mxu0 %v812_v28 }
 0x1e6   :  { %v13302_v4 = vadd.f32 %v10432_v57, %v10320_v34 }
 0x1e7   :  { %v10327_v10 = vpop.f32.mrb[52].mxu0 }
 0x1e8   :  { %v10433_v23 = vpop.f32.mrb[48].mxu1  ;;  %v10328_v29 = vpop.f32.mrb[53].mxu0 }
 0x1e9   :  { %v10329_v44 = vadd.f32 %v10328_v29, %v10327_v10  ;;  %v10434_v45 = vpop.f32.mrb[49].mxu1  ;;  %v10330_v56 = vpop.f32.mrb[54].mxu0 }
 0x1ea   :  { %v10435_v59 = vadd.f32 %v10434_v45, %v10433_v23  ;;  %v10436_v60 = vpop.f32.mrb[50].mxu1  ;;  %v10331_v63 = vpop.f32.mrb[55].mxu0 }
 0x1eb   :  { %v10332_v8 = vadd.f32 %v10331_v63, %v10330_v56  ;;  %v10437_v62 = vpop.f32.mrb[51].mxu1 }
 0x1ec   :  { %v13304_v22 = vadd.f32 %v10435_v59, %v10323_v61  ;;  %v10438_v17 = vadd.f32 %v10437_v62, %v10436_v60 }
 0x1ee   :  { %v13306_v50 = vadd.f32 %v10438_v17, %v10326_v42 }
 0x1ef   :  { %v10333_v51 = vpop.f32.mrb[56].mxu0 }
 0x1f0   :  { %v10439_v32 = vpop.f32.mrb[52].mxu1  ;;  %v10334_v1 = vpop.f32.mrb[57].mxu0 }
 0x1f1   :  { %v10335_v19 = vadd.f32 %v10334_v1, %v10333_v51  ;;  %v10440_v20 = vpop.f32.mrb[53].mxu1  ;;  %v10336_v13 = vpop.f32.mrb[58].mxu0 }
 0x1f2   :  { %v10441_v31 = vadd.f32 %v10440_v20, %v10439_v32  ;;  %v10442_v47 = vpop.f32.mrb[54].mxu1  ;;  %v10337_v34 = vpop.f32.mrb[59].mxu0 }
 0x1f3   :  { %v10338_v35 = vadd.f32 %v10337_v34, %v10336_v13  ;;  %v10443_v49 = vpop.f32.mrb[55].mxu1 }
 0x1f4   :  { %v13308_v43 = vadd.f32 %v10441_v31, %v10329_v44  ;;  %v10444_v16 = vadd.f32 %v10443_v49, %v10442_v47 }
 0x1f6   :  { %v13310_v6 = vadd.f32 %v10444_v16, %v10332_v8 }
 0x1f7   :  { %v10339_v27 = vpop.f32.mrb[60].mxu0 }
 0x1f8   :  { %v10445_v58 = vpop.f32.mrb[56].mxu1  ;;  %v10340_v28 = vpop.f32.mrb[61].mxu0 }
 0x1f9   :  { %v10341_v61 = vadd.f32 %v10340_v28, %v10339_v27  ;;  %v10446_v33 = vpop.f32.mrb[57].mxu1  ;;  %v10342_v14 = vpop.f32.mrb[62].mxu0 }
 0x1fa   :  { %v10447_v11 = vadd.f32 %v10446_v33, %v10445_v58  ;;  %v10448_v24 = vpop.f32.mrb[58].mxu1  ;;  %v10343_v39 = vpop.f32.mrb[63].mxu0 }
 0x1fb   :  { %v10344_v42 = vadd.f32 %v10343_v39, %v10342_v14  ;;  %v10449_v54 = vpop.f32.mrb[59].mxu1 }
 0x1fc   :  { %v13312_v57 = vadd.f32 %v10447_v11, %v10335_v19  ;;  %v10450_v10 = vadd.f32 %v10449_v54, %v10448_v24 }
 0x1fe   :  { %v13314_v23 = vadd.f32 %v10450_v10, %v10338_v35 }
 0x1ff   :  { %v10473_v29 = vpop.f32.mrb[64].mxu0 }
 0x200   :  { %v10451_v44 = vpop.f32.mrb[60].mxu1  ;;  %v10474_v45 = vpop.f32.mrb[65].mxu0 }
 0x201   :  { %v10452_v56 = vpop.f32.mrb[61].mxu1  ;;  %v10475_v59 = vadd.f32 %v10474_v45, %v10473_v29  ;;  %v10476_v60 = vpop.f32.mrb[66].mxu0 }
 0x202   :  { %v10453_v63 = vadd.f32 %v10452_v56, %v10451_v44  ;;  %v10454_v8 = vpop.f32.mrb[62].mxu1  ;;  %v10477_v62 = vpop.f32.mrb[67].mxu0 }
 0x203   :  { %v1906_v17 = vadd.f32 %v10475_v59, %v13238_v26  ;;  %v10455_v51 = vpop.f32.mrb[63].mxu1  ;;  %v10478_v32 = vadd.f32 %v10477_v62, %v10476_v60 }
 0x204   :  { %v13317_v1 = vadd.f32 %v10453_v63, %v10341_v61  ;;  %v10456_v19 = vadd.f32 %v10455_v51, %v10454_v8 }
 0x205   :  { %v1909_v20 = vadd.f32 %v10478_v32, %v13244_v41 }
 0x206   :  { %v13320_v13 = vadd.f32 %v10456_v19, %v10344_v42 }
 0x207   :  { %v10479_v31 = vpop.f32.mrb[68].mxu0 }
 0x208   :  { %v10585_v47 = vpop.f32.mrb[64].mxu1  ;;  %v10480_v34 = vpop.f32.mrb[69].mxu0 }
 0x209   :  { %v10481_v35 = vadd.f32 %v10480_v34, %v10479_v31  ;;  %v10586_v49 = vpop.f32.mrb[65].mxu1  ;;  %v10482_v16 = vpop.f32.mrb[70].mxu0 }
 0x20a   :  { %v10587_v27 = vadd.f32 %v10586_v49, %v10585_v47  ;;  %v10588_v58 = vpop.f32.mrb[66].mxu1  ;;  %v10483_v28 = vpop.f32.mrb[71].mxu0 }
 0x20b   :  { %v1914_v26 = vadd.f32 %v10481_v35, %v13247_v5  ;;  %v10484_v33 = vadd.f32 %v10483_v28, %v10482_v16  ;;  %v10589_v14 = vpop.f32.mrb[67].mxu1 }
 0x20c   :  { %v10590_v61 = vadd.f32 %v10589_v14, %v10588_v58  ;;  %v13323_v11 = vadd.f32 %v10587_v27, %v1906_v17 }
 0x20d   :  { %v1917_v41 = vadd.f32 %v10484_v33, %v13252_v37 }
 0x20e   :  { %v13326_v24 = vadd.f32 %v10590_v61, %v1909_v20 }
 0x20f   :  { %v10485_v39 = vpop.f32.mrb[72].mxu0 }
 0x210   :  { %v10591_v42 = vpop.f32.mrb[68].mxu1  ;;  %v10486_v54 = vpop.f32.mrb[73].mxu0 }
 0x211   :  { %v10487_v10 = vadd.f32 %v10486_v54, %v10485_v39  ;;  %v10592_v29 = vpop.f32.mrb[69].mxu1  ;;  %v10488_v44 = vpop.f32.mrb[74].mxu0 }
 0x212   :  { %v10593_v45 = vadd.f32 %v10592_v29, %v10591_v42  ;;  %v10594_v56 = vpop.f32.mrb[70].mxu1  ;;  %v10489_v59 = vpop.f32.mrb[75].mxu0 }
 0x213   :  { %v1922_v5 = vadd.f32 %v10487_v10, %v13257_v2  ;;  %v10490_v60 = vadd.f32 %v10489_v59, %v10488_v44  ;;  %v10595_v63 = vpop.f32.mrb[71].mxu1 }
 0x214   :  { %v10596_v8 = vadd.f32 %v10595_v63, %v10594_v56  ;;  %v13329_v62 = vadd.f32 %v10593_v45, %v1914_v26 }
 0x215   :  { %v1925_v37 = vadd.f32 %v10490_v60, %v13264_v48 }
 0x216   :  { %v13332_v17 = vadd.f32 %v10596_v8, %v1917_v41 }
 0x217   :  { %v10491_v51 = vpop.f32.mrb[76].mxu0 }
 0x218   :  { %v10597_v32 = vpop.f32.mrb[72].mxu1  ;;  %v10492_v19 = vpop.f32.mrb[77].mxu0 }
 0x219   :  { %v10493_v20 = vadd.f32 %v10492_v19, %v10491_v51  ;;  %v10598_v31 = vpop.f32.mrb[73].mxu1  ;;  %v10494_v47 = vpop.f32.mrb[78].mxu0 }
 0x21a   :  { %v10599_v34 = vadd.f32 %v10598_v31, %v10597_v32  ;;  %v10600_v35 = vpop.f32.mrb[74].mxu1  ;;  %v10495_v49 = vpop.f32.mrb[79].mxu0 }
 0x21b   :  { %v1930_v2 = vadd.f32 %v10493_v20, %v13266_v25  ;;  %v10496_v16 = vadd.f32 %v10495_v49, %v10494_v47  ;;  %v10601_v27 = vpop.f32.mrb[75].mxu1 }
 0x21c   :  { %v10602_v58 = vadd.f32 %v10601_v27, %v10600_v35  ;;  %v13335_v28 = vadd.f32 %v10599_v34, %v1922_v5 }
 0x21d   :  { %v1933_v48 = vadd.f32 %v10496_v16, %v13269_v40 }
 0x21e   :  { %v13338_v26 = vadd.f32 %v10602_v58, %v1925_v37 }
 0x21f   :  { %v10497_v33 = vpop.f32.mrb[80].mxu0 }
 0x220   :  { %v10603_v14 = vpop.f32.mrb[76].mxu1  ;;  %v10498_v61 = vpop.f32.mrb[81].mxu0 }
 0x221   :  { %v10499_v41 = vadd.f32 %v10498_v61, %v10497_v33  ;;  %v10604_v39 = vpop.f32.mrb[77].mxu1  ;;  %v10500_v42 = vpop.f32.mrb[82].mxu0 }
 0x222   :  { %v10605_v54 = vadd.f32 %v10604_v39, %v10603_v14  ;;  %v10606_v10 = vpop.f32.mrb[78].mxu1  ;;  %v10501_v29 = vpop.f32.mrb[83].mxu0 }
 0x223   :  { %v1938_v25 = vadd.f32 %v10499_v41, %v13271_v21  ;;  %v10502_v44 = vadd.f32 %v10501_v29, %v10500_v42  ;;  %v10607_v45 = vpop.f32.mrb[79].mxu1 }
 0x224   :  { %v10608_v56 = vadd.f32 %v10607_v45, %v10606_v10  ;;  %v13341_v59 = vadd.f32 %v10605_v54, %v1930_v2 }
 0x225   :  { %v1941_v40 = vadd.f32 %v10502_v44, %v13273_v36 }
 0x226   :  { %v13344_v5 = vadd.f32 %v10608_v56, %v1933_v48 }
 0x227   :  { %v10503_v60 = vpop.f32.mrb[84].mxu0 }
 0x228   :  { %v10609_v63 = vpop.f32.mrb[80].mxu1  ;;  %v10504_v8 = vpop.f32.mrb[85].mxu0 }
 0x229   :  { %v10505_v37 = vadd.f32 %v10504_v8, %v10503_v60  ;;  %v10610_v51 = vpop.f32.mrb[81].mxu1  ;;  %v10506_v32 = vpop.f32.mrb[86].mxu0 }
 0x22a   :  { %v10611_v19 = vadd.f32 %v10610_v51, %v10609_v63  ;;  %v10612_v20 = vpop.f32.mrb[82].mxu1  ;;  %v10507_v31 = vpop.f32.mrb[87].mxu0 }
 0x22b   :  { %v1946_v21 = vadd.f32 %v10505_v37, %v13275_v53  ;;  %v10508_v47 = vadd.f32 %v10507_v31, %v10506_v32  ;;  %v10613_v34 = vpop.f32.mrb[83].mxu1 }
 0x22c   :  { %v10614_v35 = vadd.f32 %v10613_v34, %v10612_v20  ;;  %v13347_v49 = vadd.f32 %v10611_v19, %v1938_v25 }
 0x22d   :  { %v1949_v36 = vadd.f32 %v10508_v47, %v13277_v30 }
 0x22e   :  { %v13350_v2 = vadd.f32 %v10614_v35, %v1941_v40 }
 0x22f   :  { %v10509_v16 = vpop.f32.mrb[88].mxu0 }
 0x230   :  { %v10615_v27 = vpop.f32.mrb[84].mxu1  ;;  %v10510_v58 = vpop.f32.mrb[89].mxu0 }
 0x231   :  { %v10511_v48 = vadd.f32 %v10510_v58, %v10509_v16  ;;  %v10616_v33 = vpop.f32.mrb[85].mxu1  ;;  %v10512_v14 = vpop.f32.mrb[90].mxu0 }
 0x232   :  { %v10617_v61 = vadd.f32 %v10616_v33, %v10615_v27  ;;  %v10618_v41 = vpop.f32.mrb[86].mxu1  ;;  %v10513_v39 = vpop.f32.mrb[91].mxu0 }
 0x233   :  { %v1954_v53 = vadd.f32 %v10511_v48, %v13279_v9  ;;  %v10514_v42 = vadd.f32 %v10513_v39, %v10512_v14  ;;  %v10619_v54 = vpop.f32.mrb[87].mxu1 }
 0x234   :  { %v10620_v10 = vadd.f32 %v10619_v54, %v10618_v41  ;;  %v13353_v29 = vadd.f32 %v10617_v61, %v1946_v21 }
 0x235   :  { %v1957_v30 = vadd.f32 %v10514_v42, %v13281_v12 }
 0x236   :  { %v13356_v25 = vadd.f32 %v10620_v10, %v1949_v36 }
 0x237   :  { %v10515_v44 = vpop.f32.mrb[92].mxu0 }
 0x238   :  { %v10621_v45 = vpop.f32.mrb[88].mxu1  ;;  %v10516_v56 = vpop.f32.mrb[93].mxu0 }
 0x239   :  { %v10517_v40 = vadd.f32 %v10516_v56, %v10515_v44  ;;  %v10622_v60 = vpop.f32.mrb[89].mxu1  ;;  %v10518_v63 = vpop.f32.mrb[94].mxu0 }
 0x23a   :  { %v10623_v8 = vadd.f32 %v10622_v60, %v10621_v45  ;;  %v10624_v37 = vpop.f32.mrb[90].mxu1  ;;  %v10519_v51 = vpop.f32.mrb[95].mxu0 }
 0x23b   :  { %v1962_v9 = vadd.f32 %v10517_v40, %v13283_v7  ;;  %v10520_v32 = vadd.f32 %v10519_v51, %v10518_v63  ;;  %v10625_v19 = vpop.f32.mrb[91].mxu1 }
 0x23c   :  { %v10626_v20 = vadd.f32 %v10625_v19, %v10624_v37  ;;  %v13359_v31 = vadd.f32 %v10623_v8, %v1954_v53 }
 0x23d   :  { %v1965_v12 = vadd.f32 %v10520_v32, %v13285_v18 }
 0x23e   :  { %v13362_v21 = vadd.f32 %v10626_v20, %v1957_v30 }
 0x23f   :  { %v10521_v47 = vpop.f32.mrb[96].mxu0 }
 0x240   :  { %v10627_v34 = vpop.f32.mrb[92].mxu1  ;;  %v10522_v35 = vpop.f32.mrb[97].mxu0 }
 0x241   :  { %v10523_v36 = vadd.f32 %v10522_v35, %v10521_v47  ;;  %v10628_v16 = vpop.f32.mrb[93].mxu1  ;;  %v10524_v27 = vpop.f32.mrb[98].mxu0 }
 0x242   :  { %v10629_v58 = vadd.f32 %v10628_v16, %v10627_v34  ;;  %v10630_v48 = vpop.f32.mrb[94].mxu1  ;;  %v10525_v33 = vpop.f32.mrb[99].mxu0 }
 0x243   :  { %v1970_v7 = vadd.f32 %v10523_v36, %v13287_v0  ;;  %v10526_v14 = vadd.f32 %v10525_v33, %v10524_v27  ;;  %v10631_v61 = vpop.f32.mrb[95].mxu1 }
 0x244   :  { %v10632_v41 = vadd.f32 %v10631_v61, %v10630_v48  ;;  %v13365_v39 = vadd.f32 %v10629_v58, %v1962_v9 }
 0x245   :  { %v1973_v18 = vadd.f32 %v10526_v14, %v13289_v46 }
 0x246   :  { %v13368_v53 = vadd.f32 %v10632_v41, %v1965_v12 }
 0x247   :  { %v10527_v42 = vpop.f32.mrb[100].mxu0 }
 0x248   :  { %v10633_v54 = vpop.f32.mrb[96].mxu1  ;;  %v10528_v10 = vpop.f32.mrb[101].mxu0 }
 0x249   :  { %v10529_v30 = vadd.f32 %v10528_v10, %v10527_v42  ;;  %v10634_v44 = vpop.f32.mrb[97].mxu1  ;;  %v10530_v45 = vpop.f32.mrb[102].mxu0 }
 0x24a   :  { %v10635_v56 = vadd.f32 %v10634_v44, %v10633_v54  ;;  %v10636_v40 = vpop.f32.mrb[98].mxu1  ;;  %v10531_v60 = vpop.f32.mrb[103].mxu0 }
 0x24b   :  { %v1978_v0 = vadd.f32 %v10529_v30, %v13291_v52  ;;  %v10532_v63 = vadd.f32 %v10531_v60, %v10530_v45  ;;  %v10637_v8 = vpop.f32.mrb[99].mxu1 }
 0x24c   :  { %v10638_v37 = vadd.f32 %v10637_v8, %v10636_v40  ;;  %v13371_v51 = vadd.f32 %v10635_v56, %v1970_v7 }
 0x24d   :  { %v1981_v46 = vadd.f32 %v10532_v63, %v13293_v15 }
 0x24e   :  { %v13374_v9 = vadd.f32 %v10638_v37, %v1973_v18 }
 0x24f   :  { %v10533_v32 = vpop.f32.mrb[104].mxu0 }
 0x250   :  { %v10639_v19 = vpop.f32.mrb[100].mxu1  ;;  %v10534_v20 = vpop.f32.mrb[105].mxu0 }
 0x251   :  { %v10535_v12 = vadd.f32 %v10534_v20, %v10533_v32  ;;  %v10640_v47 = vpop.f32.mrb[101].mxu1  ;;  %v10536_v34 = vpop.f32.mrb[106].mxu0 }
 0x252   :  { %v10641_v35 = vadd.f32 %v10640_v47, %v10639_v19  ;;  %v10642_v36 = vpop.f32.mrb[102].mxu1  ;;  %v10537_v16 = vpop.f32.mrb[107].mxu0 }
 0x253   :  { %v1986_v52 = vadd.f32 %v10535_v12, %v13295_v38  ;;  %v10538_v27 = vadd.f32 %v10537_v16, %v10536_v34  ;;  %v10643_v58 = vpop.f32.mrb[103].mxu1 }
 0x254   :  { %v10644_v48 = vadd.f32 %v10643_v58, %v10642_v36  ;;  %v13377_v33 = vadd.f32 %v10641_v35, %v1978_v0 }
 0x255   :  { %v1989_v15 = vadd.f32 %v10538_v27, %v13298_v3 }
 0x256   :  { %v13380_v7 = vadd.f32 %v10644_v48, %v1981_v46 }
 0x257   :  { %v10539_v14 = vpop.f32.mrb[108].mxu0 }
 0x258   :  { %v10645_v61 = vpop.f32.mrb[104].mxu1  ;;  %v10540_v41 = vpop.f32.mrb[109].mxu0 }
 0x259   :  { %v10541_v18 = vadd.f32 %v10540_v41, %v10539_v14  ;;  %v10646_v42 = vpop.f32.mrb[105].mxu1  ;;  %v10542_v54 = vpop.f32.mrb[110].mxu0 }
 0x25a   :  { %v10647_v10 = vadd.f32 %v10646_v42, %v10645_v61  ;;  %v10648_v30 = vpop.f32.mrb[106].mxu1  ;;  %v10543_v44 = vpop.f32.mrb[111].mxu0 }
 0x25b   :  { %v1994_v38 = vadd.f32 %v10541_v18, %v13300_v55  ;;  %v10544_v45 = vadd.f32 %v10543_v44, %v10542_v54  ;;  %v10649_v56 = vpop.f32.mrb[107].mxu1 }
 0x25c   :  { %v10650_v40 = vadd.f32 %v10649_v56, %v10648_v30  ;;  %v13383_v60 = vadd.f32 %v10647_v10, %v1986_v52 }
 0x25d   :  { %v1997_v3 = vadd.f32 %v10544_v45, %v13302_v4 }
 0x25e   :  { %v13386_v0 = vadd.f32 %v10650_v40, %v1989_v15 }
 0x25f   :  { %v10545_v63 = vpop.f32.mrb[112].mxu0 }
 0x260   :  { %v10651_v8 = vpop.f32.mrb[108].mxu1  ;;  %v10546_v37 = vpop.f32.mrb[113].mxu0 }
 0x261   :  { %v10547_v46 = vadd.f32 %v10546_v37, %v10545_v63  ;;  %v10652_v32 = vpop.f32.mrb[109].mxu1  ;;  %v10548_v19 = vpop.f32.mrb[114].mxu0 }
 0x262   :  { %v10653_v20 = vadd.f32 %v10652_v32, %v10651_v8  ;;  %v10654_v12 = vpop.f32.mrb[110].mxu1  ;;  %v10549_v47 = vpop.f32.mrb[115].mxu0 }
 0x263   :  { %v2002_v55 = vadd.f32 %v10547_v46, %v13304_v22  ;;  %v10550_v34 = vadd.f32 %v10549_v47, %v10548_v19  ;;  %v10655_v35 = vpop.f32.mrb[111].mxu1 }
 0x264   :  { %v10656_v36 = vadd.f32 %v10655_v35, %v10654_v12  ;;  %v13389_v16 = vadd.f32 %v10653_v20, %v1994_v38 }
 0x265   :  { %v2005_v4 = vadd.f32 %v10550_v34, %v13306_v50 }
 0x266   :  { %v13392_v52 = vadd.f32 %v10656_v36, %v1997_v3 }
 0x267   :  { %v10551_v27 = vpop.f32.mrb[116].mxu0 }
 0x268   :  { %v10657_v58 = vpop.f32.mrb[112].mxu1  ;;  %v10552_v48 = vpop.f32.mrb[117].mxu0 }
 0x269   :  { %v10553_v15 = vadd.f32 %v10552_v48, %v10551_v27  ;;  %v10658_v14 = vpop.f32.mrb[113].mxu1  ;;  %v10554_v61 = vpop.f32.mrb[118].mxu0 }
 0x26a   :  { %v10659_v41 = vadd.f32 %v10658_v14, %v10657_v58  ;;  %v10660_v18 = vpop.f32.mrb[114].mxu1  ;;  %v10555_v42 = vpop.f32.mrb[119].mxu0 }
 0x26b   :  { %v2010_v22 = vadd.f32 %v10553_v15, %v13308_v43  ;;  %v10556_v54 = vadd.f32 %v10555_v42, %v10554_v61  ;;  %v10661_v10 = vpop.f32.mrb[115].mxu1 }
 0x26c   :  { %v10662_v30 = vadd.f32 %v10661_v10, %v10660_v18  ;;  %v13395_v44 = vadd.f32 %v10659_v41, %v2002_v55 }
 0x26d   :  { %v2013_v50 = vadd.f32 %v10556_v54, %v13310_v6 }
 0x26e   :  { %v13398_v38 = vadd.f32 %v10662_v30, %v2005_v4 }
 0x26f   :  { %v10557_v45 = vpop.f32.mrb[120].mxu0 }
 0x270   :  { %v10663_v56 = vpop.f32.mrb[116].mxu1  ;;  %v10558_v40 = vpop.f32.mrb[121].mxu0 }
 0x271   :  { %v10559_v3 = vadd.f32 %v10558_v40, %v10557_v45  ;;  %v10664_v63 = vpop.f32.mrb[117].mxu1  ;;  %v10560_v8 = vpop.f32.mrb[122].mxu0 }
 0x272   :  { %v10665_v37 = vadd.f32 %v10664_v63, %v10663_v56  ;;  %v10666_v46 = vpop.f32.mrb[118].mxu1  ;;  %v10561_v32 = vpop.f32.mrb[123].mxu0 }
 0x273   :  { %v2018_v43 = vadd.f32 %v10559_v3, %v13312_v57  ;;  %v10562_v19 = vadd.f32 %v10561_v32, %v10560_v8  ;;  %v10667_v20 = vpop.f32.mrb[119].mxu1 }
 0x274   :  { %v10668_v12 = vadd.f32 %v10667_v20, %v10666_v46  ;;  %v13401_v47 = vadd.f32 %v10665_v37, %v2010_v22 }
 0x275   :  { %v2021_v6 = vadd.f32 %v10562_v19, %v13314_v23 }
 0x276   :  { %v13404_v55 = vadd.f32 %v10668_v12, %v2013_v50 }
 0x277   :  { %v10563_v34 = vpop.f32.mrb[124].mxu0 }
 0x278   :  { %v10669_v35 = vpop.f32.mrb[120].mxu1  ;;  %v10564_v36 = vpop.f32.mrb[125].mxu0 }
 0x279   :  { %v10565_v4 = vadd.f32 %v10564_v36, %v10563_v34  ;;  %v10670_v27 = vpop.f32.mrb[121].mxu1  ;;  %v10566_v58 = vpop.f32.mrb[126].mxu0 }
 0x27a   :  { %v10671_v48 = vadd.f32 %v10670_v27, %v10669_v35  ;;  %v10672_v15 = vpop.f32.mrb[122].mxu1  ;;  %v10567_v14 = vpop.f32.mrb[127].mxu0 }
 0x27b   :  { %v2026_v57 = vadd.f32 %v10565_v4, %v13317_v1  ;;  %v10568_v61 = vadd.f32 %v10567_v14, %v10566_v58  ;;  %v10673_v41 = vpop.f32.mrb[123].mxu1 }
 0x27c   :  { %v10674_v18 = vadd.f32 %v10673_v41, %v10672_v15  ;;  %v13407_v42 = vadd.f32 %v10671_v48, %v2018_v43 }
 0x27d   :  { %v2029_v23 = vadd.f32 %v10568_v61, %v13320_v13 }
 0x27e   :  { %v13410_v22 = vadd.f32 %v10674_v18, %v2021_v6 }
 0x27f   :  { %v12139_v54 = vpop.f32.mrb[128].mxu0 }
 0x280   :  { %v10675_v10 = vpop.f32.mrb[124].mxu1  ;;  %v13413_v30 = vadd.f32 %v12139_v54, %v13329_v62  ;;  %v2227_v50 = vpop.f32.mrb[129].mxu0 }
 0x281   :  { %v10676_v45 = vpop.f32.mrb[125].mxu1  ;;  %v13416_v56 = vadd.f32 %v2227_v50, %v13323_v11  ;;  %v12140_v1 = vpop.f32.mrb[130].mxu0 }
 0x282   :  { %v10677_v40 = vadd.f32 %v10676_v45, %v10675_v10  ;;  %v10678_v3 = vpop.f32.mrb[126].mxu1  ;;  %v13419_v63 = vadd.f32 %v12140_v1, %v13332_v17  ;;  %v2230_v8 = vpop.f32.mrb[131].mxu0 }
 0x283   :  { %v10679_v13 = vpop.f32.mrb[127].mxu1  ;;  %v13422_v37 = vadd.f32 %v2230_v8, %v13326_v24 }
 0x284   :  { %v10680_v46 = vadd.f32 %v10679_v13, %v10678_v3  ;;  %v13424_v32 = vadd.f32 %v10677_v40, %v2026_v57 }
 0x285   :  { %v2354_v62 = vadd.f32 %v13422_v37, %v13416_v56 }
 0x286   :  { %v13428_v43 = vadd.f32 %v10680_v46, %v2029_v23 }
 0x287   :  { %v2355_v11 = vadd.f32 %v2354_v62, %v13413_v30  ;;  %v12143_v19 = vpop.f32.mrb[132].mxu0 }
 0x288   :  { %v13432_v20 = vadd.f32 %v12143_v19, %v13341_v59  ;;  %v2243_v17 = vpop.f32.mrb[133].mxu0 }
 0x289   :  { %v13435_v12 = vadd.f32 %v2243_v17, %v13335_v28  ;;  %v2356_v24 = vadd.f32 %v2355_v11, %v13419_v63  ;;  %v12144_v6 = vpop.f32.mrb[134].mxu0 }
 0x28a   :  { %v13439_v34 = vadd.f32 %v12144_v6, %v13344_v5  ;;  %v2246_v35 = vpop.f32.mrb[135].mxu0 }
 0x28b   :  { %v2357_v36 = vadd.f32 %v2356_v24, %v13435_v12  ;;  %v13443_v4 = vadd.f32 %v2246_v35, %v13338_v26 }
 0x28d   :  { %v2358_v27 = vadd.f32 %v2357_v36, %v13443_v4 }
 0x28f   :  { %v2359_v59 = vadd.f32 %v2358_v27, %v13432_v20  ;;  %v12147_v58 = vpop.f32.mrb[136].mxu0 }
 0x290   :  { %v13448_v28 = vadd.f32 %v12147_v58, %v13353_v29  ;;  %v2259_v48 = vpop.f32.mrb[137].mxu0 }
 0x291   :  { %v13451_v15 = vadd.f32 %v2259_v48, %v13347_v49  ;;  %v2360_v5 = vadd.f32 %v2359_v59, %v13439_v34  ;;  %v12148_v14 = vpop.f32.mrb[138].mxu0 }
 0x292   :  { %v13455_v57 = vadd.f32 %v12148_v14, %v13356_v25  ;;  %v2262_v26 = vpop.f32.mrb[139].mxu0 }
 0x293   :  { %v2361_v61 = vadd.f32 %v2360_v5, %v13451_v15  ;;  %v13459_v41 = vadd.f32 %v2262_v26, %v13350_v2 }
 0x295   :  { %v2362_v18 = vadd.f32 %v2361_v61, %v13459_v41 }
 0x297   :  { %v2363_v29 = vadd.f32 %v2362_v18, %v13448_v28  ;;  %v12151_v23 = vpop.f32.mrb[140].mxu0 }
 0x298   :  { %v13464_v49 = vadd.f32 %v12151_v23, %v13365_v39  ;;  %v2275_v54 = vpop.f32.mrb[141].mxu0 }
 0x299   :  { %v13467_v10 = vadd.f32 %v2275_v54, %v13359_v31  ;;  %v2364_v25 = vadd.f32 %v2363_v29, %v13455_v57  ;;  %v12152_v50 = vpop.f32.mrb[142].mxu0 }
 0x29a   :  { %v13471_v45 = vadd.f32 %v12152_v50, %v13368_v53  ;;  %v2278_v2 = vpop.f32.mrb[143].mxu0 }
 0x29b   :  { %v2365_v1 = vadd.f32 %v2364_v25, %v13467_v10  ;;  %v13475_v40 = vadd.f32 %v2278_v2, %v13362_v21 }
 0x29d   :  { %v2366_v3 = vadd.f32 %v2365_v1, %v13475_v40 }
 0x29f   :  { %v2367_v39 = vadd.f32 %v2366_v3, %v13464_v49  ;;  %v12155_v8 = vpop.f32.mrb[144].mxu0 }
 0x2a0   :  { %v13480_v31 = vadd.f32 %v12155_v8, %v13377_v33  ;;  %v2291_v13 = vpop.f32.mrb[145].mxu0 }
 0x2a1   :  { %v13483_v46 = vadd.f32 %v2291_v13, %v13371_v51  ;;  %v2368_v53 = vadd.f32 %v2367_v39, %v13471_v45  ;;  %v12156_v62 = vpop.f32.mrb[146].mxu0 }
 0x2a2   :  { %v13487_v11 = vadd.f32 %v12156_v62, %v13380_v7  ;;  %v2294_v21 = vpop.f32.mrb[147].mxu0 }
 0x2a3   :  { %v2369_v19 = vadd.f32 %v2368_v53, %v13483_v46  ;;  %v13491_v17 = vadd.f32 %v2294_v21, %v13374_v9  ;;  %v12390_v53 = vld [vmem:[%s17425_s4 + $0x48] sm:$0xff]  }
 0x2a5   :  { %v2370_v24 = vadd.f32 %v2369_v19, %v13491_v17 }
 0x2a7   :  { %v2371_v33 = vadd.f32 %v2370_v24, %v13480_v31  ;;  %v12159_v6 = vpop.f32.mrb[148].mxu0  ;;  %v12393_v24 = vld [vmem:[%s17425_s4 + $0x10] sm:$0xff]  }
 0x2a8   :  { %v13496_v51 = vadd.f32 %v12159_v6, %v13389_v16  ;;  %v2307_v35 = vpop.f32.mrb[149].mxu0  ;;  %v12399_v6 = vld [vmem:[%s17425_s4 + $0x80] sm:$0xff]  }
 0x2a9   :  { %v13499_v36 = vadd.f32 %v2307_v35, %v13383_v60  ;;  %v2372_v7 = vadd.f32 %v2371_v33, %v13487_v11  ;;  %v12160_v27 = vpop.f32.mrb[150].mxu0  ;;  %v12394_v35 = vld [vmem:[%s17425_s4 + $0x58] sm:$0xff]  }
 0x2aa   :  { %v13503_v59 = vadd.f32 %v12160_v27, %v13392_v52  ;;  %v2310_v9 = vpop.f32.mrb[151].mxu0  ;;  %v12395_v27 = vld [vmem:[%s17425_s4 + $0x18] sm:$0xff]  }
 0x2ab   :  { %v2373_v58 = vadd.f32 %v2372_v7, %v13499_v36  ;;  %v13507_v48 = vadd.f32 %v2310_v9, %v13386_v0  ;;  %v12400_v9 = vld [vmem:[%s17425_s4 + $0xc8] sm:$0xff]  }
 0x2ad   :  { %v2374_v5 = vadd.f32 %v2373_v58, %v13507_v48 }
 0x2af   :  { %v2375_v16 = vadd.f32 %v2374_v5, %v13496_v51  ;;  %v12163_v14 = vpop.f32.mrb[152].mxu0  ;;  %v12401_v5 = vld [vmem:[%s17425_s4 + $0x88] sm:$0xff]  }
 0x2b0   :  { %v13512_v60 = vadd.f32 %v12163_v14, %v13401_v47  ;;  %v2323_v26 = vpop.f32.mrb[153].mxu0  ;;  %v12388_v47 = vld [vmem:[%s17425_s4 + $0x40] sm:$0xff]  }
 0x2b1   :  { %v13515_v61 = vadd.f32 %v2323_v26, %v13395_v44  ;;  %v2376_v52 = vadd.f32 %v2375_v16, %v13503_v59  ;;  %v12164_v18 = vpop.f32.mrb[154].mxu0  ;;  %10705 = vmatprep.subr.bf16.mxu1 %v12388_v47  ;;  %v12396_v16 = vld [vmem:[%s17425_s4 + $0x60] sm:$0xff]   ;;  %v12404_v47 = vld [vmem:[%s17425_s4 + $0x28] sm:$0xff]  }
 0x2b2   :  { %v13519_v29 = vadd.f32 %v12164_v18, %v13404_v55  ;;  %v2326_v0 = vpop.f32.mrb[155].mxu0  ;;  %v12389_v55 = vld [vmem:[%s17425_s4] sm:$0xff]  }
 0x2b3   :  { %v2377_v23 = vadd.f32 %v2376_v52, %v13515_v61  ;;  %v13523_v54 = vadd.f32 %v2326_v0, %v13398_v38  ;;  %10706 = vmatpush3.bf16.msra.mxu1 %v12389_v55  ;;  %v12398_v26 = vld [vmem:[%s17425_s4 + $0x20] sm:$0xff]   ;;  %v12403_v52 = vld [vmem:[%s17425_s4 + $0xd0] sm:$0xff]   ;;  %v12407_v55 = vld [vmem:[%s17425_s4 + $0x98] sm:$0xff]  }
 0x2b4   :  { %10707 = vmatprep.subr.bf16.mxu1 %v12390_v53  ;;  %v12405_v0 = vld [vmem:[%s17425_s4 + $0x90] sm:$0xff]   ;;  %v12411_v53 = vld [vmem:[%s17425_s4 + $0xa0] sm:$0xff]  }
 0x2b5   :  { %v2378_v25 = vadd.f32 %v2377_v23, %v13523_v54  ;;  %v12402_v23 = vld [vmem:[%s17425_s4 + $0x68] sm:$0xff]  }
 0x2b7   :  { %v2379_v44 = vadd.f32 %v2378_v25, %v13512_v60  ;;  %v12167_v50 = vpop.f32.mrb[156].mxu0 }
 0x2b8   :  { %v13534_v2 = vadd.f32 %v12167_v50, %v13424_v32  ;;  %v2339_v1 = vpop.f32.mrb[157].mxu0 }
 0x2b9   :  { %v13537_v38 = vadd.f32 %v2339_v1, %v13407_v42  ;;  %v2380_v3 = vadd.f32 %v2379_v44, %v13519_v29  ;;  %v12168_v39 = vpop.f32.mrb[158].mxu0  ;;  %v12391_v42 = vld [vmem:[%s17425_s4 + $0x8] sm:$0xff]   ;;  %v12406_v44 = vld [vmem:[%s17425_s4 + $0xd8] sm:$0xff]   ;;  %v12408_v1 = vld [vmem:[%s17425_s4 + $0x70] sm:$0xff]  }
 0x2ba   :  { %v13541_v8 = vadd.f32 %v12168_v39, %v13428_v43  ;;  %v2342_v13 = vpop.f32.mrb[159].mxu0  ;;  %10708 = vmatpush3.bf16.msra.mxu1 %v12391_v42  ;;  %v12392_v43 = vld [vmem:[%s17425_s4 + $0x50] sm:$0xff]  }
 0x2bb   :  { %v2381_v32 = vadd.f32 %v2380_v3, %v13537_v38  ;;  %v13548_v62 = vadd.f32 %v2342_v13, %v13410_v22  ;;  %10709 = vmatprep.subr.bf16.mxu1 %v12392_v43  ;;  %v12397_v22 = vld [vmem:[%s17425_s4 + $0xc0] sm:$0xff]   ;;  %v12410_v39 = vld [vmem:[%s17425_s4 + $0x30] sm:$0xff]  }
 0x2bc   :  { %10817 = vmatprep.subr.bf16.mxu0 %v12397_v22  ;;  %v12409_v13 = vld [vmem:[%s17425_s4 + $0xe0] sm:$0xff]   ;;  %v12412_v22 = vld [vmem:[%s17425_s4 + $0xe8] sm:$0xff]  }
 0x2bd   :  { %v2382_v21 = vadd.f32 %v2381_v32, %v13548_v62  ;;  %10818 = vmatpush3.bf16.msra.mxu0 %v12399_v6  ;;  %v12414_v32 = vld [vmem:[%s17425_s4 + $0x78] sm:$0xff]  }
 0x2be   :  { %10710 = vmatpush3.bf16.msra.mxu1 %v12393_v24  ;;  %10819 = vmatprep.subr.bf16.mxu0 %v12400_v9  ;;  %v12416_v24 = vld [vmem:[%s17425_s4 + $0x38] sm:$0xff]   ;;  %v2702_v9 = vld [vmem:[#allocation2 + $0x9] sm:$0xff] }
 0x2bf   :  { %v2383_v19 = vadd.f32 %v2382_v21, %v13534_v2  ;;  %10711 = vmatprep.subr.bf16.mxu1 %v12394_v35 }
 0x2c1   :  { %v2384_v33 = vadd.f32 %v2383_v19, %v13541_v8  ;;  %10820 = vmatpush3.bf16.msra.mxu0 %v12401_v5 }
 0x2c2   :  { %10712 = vmatpush3.bf16.msra.mxu1 %v12395_v27  ;;  %10821 = vmatprep.subr.bf16.mxu0 %v12403_v52  ;;  %v12421_v27 = vld [vmem:[%s17425_s4 + $0x1c0] sm:$0xff]  }
 0x2c3   :  { %v2385_v7 = vrot.slane %v2384_v33, 4  ;;  %10713 = vmatprep.subr.bf16.mxu1 %v12396_v16 }
 0x2c5   :  { %v2386_v58 = vadd.f32 %v2385_v7, %v2384_v33  ;;  %10822 = vmatpush3.bf16.msra.mxu0 %v12405_v0  ;;  %v12413_v33 = vld [vmem:[%s17425_s4 + $0xa8] sm:$0xff]   ;;  %v12418_v7 = vld [vmem:[%s17425_s4 + $0xf8] sm:$0xff]   ;;  %v13773_v0 = vld [vmem:[#allocation2] sm:$0xff] }
 0x2c6   :  { %10714 = vmatpush3.bf16.msra.mxu1 %v12398_v26  ;;  %10823 = vmatprep.subr.bf16.mxu0 %v12406_v44 }
 0x2c7   :  { %v2387_v14 = vrot.slane %v2386_v58, 2  ;;  %10715 = vmatprep.subr.bf16.mxu1 %v12402_v23 }
 0x2c9   :  { %v2388_v18 = vadd.f32 %v2387_v14, %v2386_v58  ;;  %10824 = vmatpush3.bf16.msra.mxu0 %v12407_v55  ;;  %v12422_v14 = vld [vmem:[%s17425_s4 + $0x100] sm:$0xff]  }
 0x2ca   :  { %10716 = vmatpush3.bf16.msra.mxu1 %v12404_v47  ;;  %10825 = vmatprep.subr.bf16.mxu0 %v12409_v13  ;;  %v12424_v47 = vld [vmem:[%s17425_s4 + $0x148] sm:$0xff]  }
 0x2cb   :  { %v2389_v25 = vrot.slane %v2388_v18, 1  ;;  %10717 = vmatprep.subr.bf16.mxu1 %v12408_v1 }
 0x2cd   :  { %v2390_v50 = vadd.f32 %v2389_v25, %v2388_v18  ;;  %10826 = vmatpush3.bf16.msra.mxu0 %v12411_v53 }
 0x2ce   :  { %10718 = vmatpush3.bf16.msra.mxu1 %v12410_v39  ;;  %10827 = vmatprep.subr.bf16.mxu0 %v12412_v22 }
 0x2cf   :  { %v13607_v3 = vmul.f32 0.00390625, %v2390_v50  ;;  %10719 = vmatprep.subr.bf16.mxu1 %v12414_v32 }
 0x2d1   :  { %v13623_v42 = vsub.f32 %v13451_v15, %v13607_v3  ;;  %v13627_v21 = vsub.f32 %v13459_v41, %v13607_v3  ;;  %v13631_v43 = vsub.f32 %v13448_v28, %v13607_v3  ;;  %v13635_v19 = vsub.f32 %v13455_v57, %v13607_v3  ;;  %10828 = vmatpush3.bf16.msra.mxu0 %v12413_v33 }
 0x2d2   :  { %v13642_v15 = vsub.f32 %v13467_v10, %v13607_v3  ;;  %v13646_v41 = vsub.f32 %v13475_v40, %v13607_v3  ;;  %v13650_v28 = vsub.f32 %v13464_v49, %v13607_v3  ;;  %v13654_v57 = vsub.f32 %v13471_v45, %v13607_v3  ;;  %10720 = vmatpush3.bf16.msra.mxu1 %v12416_v24  ;;  %v12426_v24 = vld [vmem:[%s17425_s4 + $0x108] sm:$0xff]  }
 0x2d3   :  { %v13661_v10 = vsub.f32 %v13483_v46, %v13607_v3  ;;  %v13665_v40 = vsub.f32 %v13491_v17, %v13607_v3  ;;  %v13669_v49 = vsub.f32 %v13480_v31, %v13607_v3  ;;  %v13673_v45 = vsub.f32 %v13487_v11, %v13607_v3 }
 0x2d4   :  { %v13680_v46 = vsub.f32 %v13499_v36, %v13607_v3  ;;  %v13684_v17 = vsub.f32 %v13507_v48, %v13607_v3  ;;  %v13688_v31 = vsub.f32 %v13496_v51, %v13607_v3  ;;  %v13692_v11 = vsub.f32 %v13503_v59, %v13607_v3  ;;  %v12415_v59 = vld [vmem:[%s17425_s4 + $0xf0] sm:$0xff]  }
 0x2d5   :  { %v13696_v6 = vsub.f32 %v13515_v61, %v13607_v3  ;;  %v13700_v36 = vsub.f32 %v13523_v54, %v13607_v3  ;;  %v13704_v48 = vsub.f32 %v13512_v60, %v13607_v3  ;;  %v13708_v51 = vsub.f32 %v13519_v29, %v13607_v3  ;;  %v12417_v61 = vld [vmem:[%s17425_s4 + $0xb0] sm:$0xff]   ;;  %10829 = vmatprep.subr.bf16.mxu0 %v12415_v59 }
 0x2d6   :  { %v13718_v54 = vsub.f32 %v13537_v38, %v13607_v3  ;;  %v13722_v60 = vsub.f32 %v13548_v62, %v13607_v3  ;;  %v13726_v29 = vsub.f32 %v13534_v2, %v13607_v3  ;;  %v13730_v35 = vsub.f32 %v13541_v8, %v13607_v3  ;;  %v12420_v2 = vld [vmem:[%s17425_s4 + $0x140] sm:$0xff]   ;;  %10830 = vmatpush3.bf16.msra.mxu0 %v12417_v61  ;;  %v12419_v8 = vld [vmem:[%s17425_s4 + $0xb8] sm:$0xff]  }
 0x2d7   :  { %v13737_v38 = vsub.f32 %v13416_v56, %v13607_v3  ;;  %v13741_v62 = vsub.f32 %v13422_v37, %v13607_v3  ;;  %v2701_v56 = vld [vmem:[#allocation2 + $0x1] sm:$0xff]  ;;  %10831 = vmatprep.subr.bf16.mxu0 %v12418_v7  ;;  %v13754_v37 = vsub.f32 %v13413_v30, %v13607_v3  ;;  %10929 = vmatprep.subr.bf16.mxu1 %v12420_v2 }
 0x2d8   :  { %v13762_v16 = vsub.f32 %v13419_v63, %v13607_v3  ;;  %v13769_v30 = vsub.f32 %v13435_v12, %v13607_v3  ;;  %v2733_v18 = vpack.c.bf16 %v2702_v9, %v2701_v56  ;;  %v2669_v63 = vpack.c.bf16 %v13773_v0, %v13773_v0 }
 0x2d9   :  { %v2424_v58 = vmul.f32 %v13737_v38, %v13737_v38  ;;  %v2425_v5 = vmul.f32 %v13741_v62, %v13741_v62  ;;  %v2426_v26 = vmul.f32 %v13754_v37, %v13754_v37  ;;  %v13779_v23 = vsub.f32 %v13443_v4, %v13607_v3 }
 0x2da   :  { %10832 = vmatpush3.bf16.msra.mxu0 %v12419_v8  ;;  %v2427_v25 = vmul.f32 %v13762_v16, %v13762_v16  ;;  %3965 = vmatprep.mubr.bf16.mxu1 %v2733_v18  ;;  %v13788_v44 = vsub.f32 %v13432_v20, %v13607_v3  ;;  %v2428_v50 = vmul.f32 %v13769_v30, %v13769_v30  ;;  %v12428_v8 = vld [vmem:[%s17425_s4 + $0x150] sm:$0xff]  }
 0x2db   :  { %11041 = vmatprep.subr.bf16.mxu0 %v12421_v27  ;;  %v2456_v52 = vadd.f32 %v2425_v5, %v2424_v58  ;;  %3966 = vmatmul.mubr.bf16.vlgmr.msra.gmra.mrb[128].mxu1 %v2669_v63  ;;  %v13794_v4 = vsub.f32 %v13439_v34, %v13607_v3  ;;  %v2429_v1 = vmul.f32 %v13779_v23, %v13779_v23  ;;  %v12430_v18 = vld [vmem:[%s17425_s4 + $0x110] sm:$0xff]  }
 0x2dc   :  { %10930 = vmatpush3.bf16.msra.mxu1 %v12422_v14  ;;  %v2430_v13 = vmul.f32 %v13788_v44, %v13788_v44  ;;  %v2432_v34 = vmul.f32 %v13623_v42, %v13623_v42  ;;  %v2433_v22 = vmul.f32 %v13627_v21, %v13627_v21  ;;  %v2434_v59 = vmul.f32 %v13631_v43, %v13631_v43 }
 0x2dd   :  { %v2457_v12 = vadd.f32 %v2456_v52, %v2426_v26  ;;  %10931 = vmatprep.subr.bf16.mxu1 %v12424_v47  ;;  %v2431_v20 = vmul.f32 %v13794_v4, %v13794_v4  ;;  %v2435_v7 = vmul.f32 %v13635_v19, %v13635_v19  ;;  %v2436_v27 = vmul.f32 %v13642_v15, %v13642_v15 }
 0x2de   :  { %v2437_v9 = vmul.f32 %v13646_v41, %v13646_v41  ;;  %v2438_v5 = vmul.f32 %v13650_v28, %v13650_v28  ;;  %v2439_v26 = vmul.f32 %v13654_v57, %v13654_v57  ;;  %v2440_v63 = vmul.f32 %v13661_v10, %v13661_v10 }
 0x2df   :  { %v2458_v55 = vadd.f32 %v2457_v12, %v2427_v25  ;;  %v2441_v12 = vmul.f32 %v13665_v40, %v13665_v40 }
 0x2e0   :  { %10932 = vmatpush3.bf16.msra.mxu1 %v12426_v24 }
 0x2e1   :  { %v2459_v39 = vadd.f32 %v2458_v55, %v2428_v50  ;;  %10933 = vmatprep.subr.bf16.mxu1 %v12428_v8  ;;  %v2442_v50 = vmul.f32 %v13669_v49, %v13669_v49 }
 0x2e3   :  { %v2460_v53 = vadd.f32 %v2459_v39, %v2429_v1  ;;  %v2443_v1 = vmul.f32 %v13673_v45, %v13673_v45 }
 0x2e4   :  { %10934 = vmatpush3.bf16.msra.mxu1 %v12430_v18 }
 0x2e5   :  { %v2461_v32 = vadd.f32 %v2460_v53, %v2430_v13  ;;  %v12432_v13 = vld [vmem:[%s17425_s4 + $0x158] sm:$0xff]   ;;  %v2444_v53 = vmul.f32 %v13680_v46, %v13680_v46 }
 0x2e6   :  { %10935 = vmatprep.subr.bf16.mxu1 %v12432_v13 }
 0x2e7   :  { %v2462_v3 = vadd.f32 %v2461_v32, %v2431_v20  ;;  %v2445_v32 = vmul.f32 %v13684_v17, %v13684_v17 }
 0x2e9   :  { %v2463_v33 = vadd.f32 %v2462_v3, %v2432_v34  ;;  %v2446_v34 = vmul.f32 %v13688_v31, %v13688_v31 }
 0x2eb   :  { %v2464_v61 = vadd.f32 %v2463_v33, %v2433_v22  ;;  %v2447_v22 = vmul.f32 %v13692_v11, %v13692_v11 }
 0x2ed   :  { %v2465_v2 = vadd.f32 %v2464_v61, %v2434_v59  ;;  %v12434_v59 = vld [vmem:[%s17425_s4 + $0x118] sm:$0xff]   ;;  %v2448_v61 = vmul.f32 %v13696_v6, %v13696_v6 }
 0x2ee   :  { %10936 = vmatpush3.bf16.msra.mxu1 %v12434_v59 }
 0x2ef   :  { %v2466_v56 = vadd.f32 %v2465_v2, %v2435_v7  ;;  %v2449_v2 = vmul.f32 %v13700_v36, %v13700_v36 }
 0x2f1   :  { %v2467_v58 = vadd.f32 %v2466_v56, %v2436_v27  ;;  %v2450_v27 = vmul.f32 %v13704_v48, %v13704_v48 }
 0x2f3   :  { %v2468_v14 = vadd.f32 %v2467_v58, %v2437_v9  ;;  %v2451_v9 = vmul.f32 %v13708_v51, %v13708_v51 }
 0x2f5   :  { %v2469_v52 = vadd.f32 %v2468_v14, %v2438_v5  ;;  %v12436_v5 = vld [vmem:[%s17425_s4 + $0x160] sm:$0xff]   ;;  %v2452_v14 = vmul.f32 %v13718_v54, %v13718_v54 }
 0x2f6   :  { %10937 = vmatprep.subr.bf16.mxu1 %v12436_v5 }
 0x2f7   :  { %v2470_v25 = vadd.f32 %v2469_v52, %v2439_v26  ;;  %v2453_v52 = vmul.f32 %v13722_v60, %v13722_v60 }
 0x2f9   :  { %v2471_v47 = vadd.f32 %v2470_v25, %v2440_v63  ;;  %v2454_v63 = vmul.f32 %v13726_v29, %v13726_v29 }
 0x2fb   :  { %v2472_v55 = vadd.f32 %v2471_v47, %v2441_v12  ;;  %v2455_v12 = vmul.f32 %v13730_v35, %v13730_v35 }
 0x2fd   :  { %v2473_v39 = vadd.f32 %v2472_v55, %v2442_v50  ;;  %v12438_v50 = vld [vmem:[%s17425_s4 + $0x120] sm:$0xff]  }
 0x2fe   :  { %10938 = vmatpush3.bf16.msra.mxu1 %v12438_v50 }
 0x2ff   :  { %v2474_v20 = vadd.f32 %v2473_v39, %v2443_v1 }
 0x301   :  { %v2475_v24 = vadd.f32 %v2474_v20, %v2444_v53  ;;  %v12440_v53 = vld [vmem:[%s17425_s4 + $0x168] sm:$0xff]  }
 0x302   :  { %10939 = vmatprep.subr.bf16.mxu1 %v12440_v53 }
 0x303   :  { %v2476_v3 = vadd.f32 %v2475_v24, %v2445_v32 }
 0x305   :  { %v2477_v33 = vadd.f32 %v2476_v3, %v2446_v34  ;;  %v12442_v3 = vld [vmem:[%s17425_s4 + $0x128] sm:$0xff]  }
 0x306   :  { %10940 = vmatpush3.bf16.msra.mxu1 %v12442_v3 }
 0x307   :  { %v2478_v7 = vadd.f32 %v2477_v33, %v2447_v22  ;;  %v2498_v33 = vlaneseq }
 0x309   :  { %v2479_v8 = vadd.f32 %v2478_v7, %v2448_v61  ;;  %v2499_v59 = vshrl.u32 %v2498_v33, 7  ;;  %v12444_v61 = vld [vmem:[%s17425_s4 + $0x170] sm:$0xff]   ;;  %v2496_v7 = vld [vmem:[%s17426_s2] sm:$0x1] }
 0x30a   :  { %10941 = vmatprep.subr.bf16.mxu1 %v12444_v61 }
 0x30b   :  { %v2480_v56 = vadd.f32 %v2479_v8, %v2449_v2  ;;  %v13883_v2 = vsub.s32 0, %v2499_v59 }
 0x30d   :  { %v2481_v58 = vadd.f32 %v2480_v56, %v2450_v27  ;;  %17475 = vst [vmem:[#allocation5_spill] sm:$0xff] %v13883_v2  ;;  %v12446_v56 = vld [vmem:[%s17425_s4 + $0x130] sm:$0xff]  }
 0x30e   :  { %10942 = vmatpush3.bf16.msra.mxu1 %v12446_v56 }
 0x30f   :  { %v2482_v26 = vadd.f32 %v2481_v58, %v2451_v9  ;;  %v13892_v58 = vld [vmem:[%s17427_s3] ss:$0 sm:$0xff] }
 0x311   :  { %v2483_v18 = vadd.f32 %v2482_v26, %v2452_v14 }
 0x313   :  { %v2484_v25 = vadd.f32 %v2483_v18, %v2453_v52 }
 0x315   :  { %v2485_v47 = vadd.f32 %v2484_v25, %v2454_v63 }
 0x317   :  { %v2486_v55 = vadd.f32 %v2485_v47, %v2455_v12 }
 0x319   :  { %v2487_v1 = vrot.slane %v2486_v55, 4 }
 0x31b   :  { %v2488_v39 = vadd.f32 %v2487_v1, %v2486_v55 }
 0x31d   :  { %v2489_v13 = vrot.slane %v2488_v39, 2 }
 0x31f   :  { %v2490_v20 = vadd.f32 %v2489_v13, %v2488_v39 }
 0x321   :  { %v2491_v32 = vrot.slane %v2490_v20, 1 }
 0x323   :  { %v2492_v24 = vadd.f32 %v2491_v32, %v2490_v20 }
 0x325   :  { %v2493_v34 = vmul.f32 0.00390625, %v2492_v24 }
 0x327   :  { %v2494_v22 = vadd.f32 1e-05, %v2493_v34 }
 0x329   :  { %12604 = vrsqrt.f32 %v2494_v22 }
 0x333   :  { %v12605_v8 = vpop.eup %12604 }
 0x334   :  { %v2497_v27 = vmul.f32 %v12605_v8, %v2496_v7  ;;  %v12450_v8 = vld [vmem:[%s17425_s4 + $0x138] sm:$0xff]  }
 0x336   :  { %v2501_v9 = vrot.slane %v2497_v27, %v13883_v2 }
 0x338   :  { %v2531_v5 = vmul.f32 %v2501_v9, %v13722_v60  ;;  %v2502_v14 = vmul.f32 %v2501_v9, %v13737_v38  ;;  %v2503_v26 = vmul.f32 %v2501_v9, %v13741_v62  ;;  %v2504_v52 = vmul.f32 %v2501_v9, %v13754_v37 }
 0x339   :  { %v2505_v18 = vmul.f32 %v2501_v9, %v13762_v16  ;;  %v2506_v63 = vmul.f32 %v2501_v9, %v13769_v30  ;;  %v2507_v25 = vmul.f32 %v2501_v9, %v13779_v23  ;;  %v2508_v12 = vmul.f32 %v2501_v9, %v13788_v44 }
 0x33a   :  { %v2570_v47 = vadd.f32 %v13892_v58, %v2531_v5  ;;  %v2509_v50 = vmul.f32 %v2501_v9, %v13794_v4  ;;  %v2510_v60 = vmul.f32 %v2501_v9, %v13623_v42  ;;  %v2511_v38 = vmul.f32 %v2501_v9, %v13627_v21 }
 0x33b   :  { %v2512_v62 = vmul.f32 %v2501_v9, %v13631_v43  ;;  %v2513_v37 = vmul.f32 %v2501_v9, %v13635_v19  ;;  %v2514_v16 = vmul.f32 %v2501_v9, %v13642_v15  ;;  %v2515_v30 = vmul.f32 %v2501_v9, %v13646_v41 }
 0x33c   :  { %v2602_v55 = vmax.f32 %v2570_v47, 0.0  ;;  %v2516_v23 = vmul.f32 %v2501_v9, %v13650_v28  ;;  %v2517_v44 = vmul.f32 %v2501_v9, %v13654_v57  ;;  %v2518_v1 = vmul.f32 %v2501_v9, %v13661_v10  ;;  %v12448_v57 = vld [vmem:[%s17425_s4 + $0x178] sm:$0xff]  }
 0x33d   :  { %v2519_v4 = vmul.f32 %v2501_v9, %v13665_v40  ;;  %v2520_v42 = vmul.f32 %v2501_v9, %v13669_v49  ;;  %v2521_v21 = vmul.f32 %v2501_v9, %v13673_v45  ;;  %v2522_v43 = vmul.f32 %v2501_v9, %v13680_v46  ;;  %10943 = vmatprep.subr.bf16.mxu1 %v12448_v57 }
 0x33e   :  { %v2523_v19 = vmul.f32 %v2501_v9, %v13684_v17  ;;  %v2524_v15 = vmul.f32 %v2501_v9, %v13688_v31  ;;  %v2525_v41 = vmul.f32 %v2501_v9, %v13692_v11  ;;  %v2526_v28 = vmul.f32 %v2501_v9, %v13696_v6  ;;  %2634 = vst [vmem:[#allocation2 + $0x171] sm:$0xff] %v2602_v55 }
 0x33f   :  { %v2527_v10 = vmul.f32 %v2501_v9, %v13700_v36  ;;  %v2528_v40 = vmul.f32 %v2501_v9, %v13704_v48  ;;  %v2529_v49 = vmul.f32 %v2501_v9, %v13708_v51  ;;  %v2530_v45 = vmul.f32 %v2501_v9, %v13718_v54  ;;  %10944 = vmatpush3.bf16.msra.mxu1 %v12450_v8 }
 0x340   :  { %v2532_v46 = vmul.f32 %v2501_v9, %v13726_v29  ;;  %v2533_v17 = vmul.f32 %v2501_v9, %v13730_v35  ;;  %v13931_v31 = vadd.f32 %v13892_v58, %v2502_v14  ;;  %v13934_v11 = vadd.f32 %v13892_v58, %v2503_v26  ;;  %v5033_v14 = vld [vmem:[#allocation3] sm:$0xff] }
 0x341   :  { %v13937_v6 = vadd.f32 %v13892_v58, %v2504_v52  ;;  %v13940_v36 = vadd.f32 %v13892_v58, %v2505_v18  ;;  %v13943_v48 = vadd.f32 %v13892_v58, %v2506_v63  ;;  %v13946_v51 = vadd.f32 %v13892_v58, %v2507_v25  ;;  %5065 = vxpose.xlu0.b32.start [1/16] %v5033_v14, 128 }
 0x342   :  { %v13949_v54 = vadd.f32 %v13892_v58, %v2508_v12  ;;  %v13952_v29 = vadd.f32 %v13892_v58, %v2509_v50  ;;  %v13955_v35 = vadd.f32 %v13892_v58, %v2510_v60  ;;  %v13958_v39 = vadd.f32 %v13892_v58, %v2511_v38 }
 0x343   :  { %v13961_v13 = vadd.f32 %v13892_v58, %v2512_v62  ;;  %v13964_v53 = vadd.f32 %v13892_v58, %v2513_v37  ;;  %v13967_v20 = vadd.f32 %v13892_v58, %v2514_v16  ;;  %v13970_v32 = vadd.f32 %v13892_v58, %v2515_v30 }
 0x344   :  { %v13973_v24 = vadd.f32 %v13892_v58, %v2516_v23  ;;  %v13976_v34 = vadd.f32 %v13892_v58, %v2517_v44  ;;  %v13979_v3 = vadd.f32 %v13892_v58, %v2518_v1  ;;  %v13982_v22 = vadd.f32 %v13892_v58, %v2519_v4 }
 0x345   :  { %v13985_v33 = vadd.f32 %v13892_v58, %v2520_v42  ;;  %v13988_v59 = vadd.f32 %v13892_v58, %v2521_v21  ;;  %v13991_v61 = vadd.f32 %v13892_v58, %v2522_v43  ;;  %v13994_v7 = vadd.f32 %v13892_v58, %v2523_v19  ;;  %5066 = vxpose.xlu0.b32.cont [2/16] %v13773_v0, 128 }
 0x346   :  { %v14000_v27 = vadd.f32 %v13892_v58, %v2524_v15  ;;  %v14003_v56 = vadd.f32 %v13892_v58, %v2525_v41  ;;  %v14006_v9 = vadd.f32 %v13892_v58, %v2526_v28  ;;  %v14009_v5 = vadd.f32 %v13892_v58, %v2527_v10  ;;  %v2765_v10 = vld [vmem:[#allocation2 + $0x2] sm:$0xff] }
 0x347   :  { %v14012_v26 = vadd.f32 %v13892_v58, %v2528_v40  ;;  %v14015_v52 = vadd.f32 %v13892_v58, %v2529_v49  ;;  %v14018_v18 = vadd.f32 %v13892_v58, %v2530_v45  ;;  %v14021_v63 = vadd.f32 %v13892_v58, %v2532_v46 }
 0x348   :  { %v14024_v25 = vadd.f32 %v13892_v58, %v2533_v17  ;;  %v2573_v12 = vmax.f32 %v13931_v31, 0.0  ;;  %v2574_v47 = vmax.f32 %v13934_v11, 0.0  ;;  %v2575_v50 = vmax.f32 %v13937_v6, 0.0  ;;  %v2766_v17 = vld [vmem:[#allocation2 + $0xa] sm:$0xff]  ;;  %v14091_v11 = vld [vmem:[%s17425_s4 + $0x200] sm:$0xff]  }
 0x349   :  { %v2576_v60 = vmax.f32 %v13940_v36, 0.0  ;;  %v2577_v38 = vmax.f32 %v13943_v48, 0.0  ;;  %v2578_v62 = vmax.f32 %v13946_v51, 0.0  ;;  %v2579_v37 = vmax.f32 %v13949_v54, 0.0  ;;  %5067 = vxpose.xlu0.b32.cont [3/16] %v13773_v0, 128  ;;  %12169 = vmatprep.subr.bf16.mxu1 %v14091_v11  ;;  %v12423_v31 = vld [vmem:[%s17425_s4 + $0x180] sm:$0xff]   ;;  %v12427_v6 = vld [vmem:[%s17425_s4 + $0x188] sm:$0xff]  }
 0x34a   :  { %v2580_v16 = vmax.f32 %v13952_v29, 0.0  ;;  %v2581_v58 = vmax.f32 %v13955_v35, 0.0  ;;  %v2582_v30 = vmax.f32 %v13958_v39, 0.0  ;;  %v2583_v55 = vmax.f32 %v13961_v13, 0.0  ;;  %2605 = vst [vmem:[#allocation2 + $0x19] sm:$0xff] %v2573_v12  ;;  %2606 = vst [vmem:[#allocation2 + $0x21] sm:$0xff] %v2574_v47 }
 0x34b   :  { %2607 = vst [vmem:[#allocation2 + $0x31] sm:$0xff] %v2575_v50  ;;  %v2584_v23 = vmax.f32 %v13964_v53, 0.0  ;;  %v2585_v44 = vmax.f32 %v13967_v20, 0.0  ;;  %v2586_v1 = vmax.f32 %v13970_v32, 0.0  ;;  %v2587_v4 = vmax.f32 %v13973_v24, 0.0  ;;  %2608 = vst [vmem:[#allocation2 + $0x39] sm:$0xff] %v2576_v60 }
 0x34c   :  { %2609 = vst [vmem:[#allocation2 + $0x49] sm:$0xff] %v2577_v38  ;;  %2610 = vst [vmem:[#allocation2 + $0x51] sm:$0xff] %v2578_v62  ;;  %v2588_v42 = vmax.f32 %v13976_v34, 0.0  ;;  %v2589_v21 = vmax.f32 %v13979_v3, 0.0  ;;  %v2590_v43 = vmax.f32 %v13982_v22, 0.0  ;;  %v2591_v19 = vmax.f32 %v13985_v33, 0.0 }
 0x34d   :  { %2611 = vst [vmem:[#allocation2 + $0x61] sm:$0xff] %v2579_v37  ;;  %2612 = vst [vmem:[#allocation2 + $0x69] sm:$0xff] %v2580_v16  ;;  %v2592_v15 = vmax.f32 %v13988_v59, 0.0  ;;  %v2593_v41 = vmax.f32 %v13991_v61, 0.0  ;;  %v2594_v28 = vmax.f32 %v13994_v7, 0.0  ;;  %v2595_v57 = vmax.f32 %v14000_v27, 0.0  ;;  %5068 = vxpose.xlu0.b32.cont [4/16] %v13773_v0, 128 }
 0x34e   :  { %2613 = vst [vmem:[#allocation2 + $0x79] sm:$0xff] %v2581_v58  ;;  %2614 = vst [vmem:[#allocation2 + $0x81] sm:$0xff] %v2582_v30  ;;  %v2596_v40 = vmax.f32 %v14003_v56, 0.0  ;;  %v2597_v49 = vmax.f32 %v14006_v9, 0.0  ;;  %v2598_v45 = vmax.f32 %v14009_v5, 0.0  ;;  %v2599_v46 = vmax.f32 %v14012_v26, 0.0 }
 0x34f   :  { %2615 = vst [vmem:[#allocation2 + $0x91] sm:$0xff] %v2583_v55  ;;  %2616 = vst [vmem:[#allocation2 + $0x99] sm:$0xff] %v2584_v23  ;;  %v2600_v33 = vmax.f32 %v14015_v52, 0.0  ;;  %v2601_v59 = vmax.f32 %v14018_v18, 0.0  ;;  %v2603_v61 = vmax.f32 %v14021_v63, 0.0  ;;  %v2604_v7 = vmax.f32 %v14024_v25, 0.0 }
 0x350   :  { %2617 = vst [vmem:[#allocation2 + $0xa9] sm:$0xff] %v2585_v44  ;;  %2618 = vst [vmem:[#allocation2 + $0xb1] sm:$0xff] %v2586_v1  ;;  %v2734_v8 = vpack.c.bf16 %v2574_v47, %v2573_v12  ;;  %v2797_v9 = vpack.c.bf16 %v2766_v17, %v2765_v10  ;;  %v14106_v52 = vpack.c.bf16 %v2592_v15, %v2591_v19  ;;  %v12425_v12 = vld [vmem:[%s17425_s4 + $0x1c8] sm:$0xff]   ;;  %v12429_v36 = vld [vmem:[%s17425_s4 + $0x1d0] sm:$0xff]  }
 0x351   :  { %2619 = vst [vmem:[#allocation2 + $0xc1] sm:$0xff] %v2587_v4  ;;  %2620 = vst [vmem:[#allocation2 + $0xc9] sm:$0xff] %v2588_v42  ;;  %v2829_v27 = vld [vmem:[#allocation2 + $0x18] sm:$0xff]  ;;  %v2830_v56 = vld [vmem:[#allocation2 + $0x20] sm:$0xff]  ;;  %v14108_v63 = vpack.c.bf16 %v2594_v28, %v2593_v41  ;;  %v2735_v25 = vpack.c.bf16 %v2576_v60, %v2575_v50  ;;  %v14117_v47 = vpack.c.bf16 %v2596_v40, %v2595_v57  ;;  %5069 = vxpose.xlu0.b32.cont [5/16] %v13773_v0, 128 }
 0x352   :  { %2621 = vst [vmem:[#allocation2 + $0xd9] sm:$0xff] %v2589_v21  ;;  %2622 = vst [vmem:[#allocation2 + $0xe1] sm:$0xff] %v2590_v43  ;;  %v2831_v5 = vld [vmem:[#allocation2 + $0x30] sm:$0xff]  ;;  %3973 = vmatprep.mubr.bf16.mxu1 %v2734_v8  ;;  %v2861_v14 = vpack.c.bf16 %v2830_v56, %v2829_v27  ;;  %v2832_v26 = vld [vmem:[#allocation2 + $0x38] sm:$0xff]  ;;  %v14119_v10 = vpack.c.bf16 %v2598_v45, %v2597_v49  ;;  %v2737_v8 = vpack.c.bf16 %v2580_v16, %v2579_v37 }
 0x353   :  { %2623 = vst [vmem:[#allocation2 + $0xf1] sm:$0xff] %v2591_v19  ;;  %2624 = vst [vmem:[#allocation2 + $0xf9] sm:$0xff] %v2592_v15  ;;  %v14121_v17 = vpack.c.bf16 %v2832_v26, %v2831_v5  ;;  %v14123_v19 = vpack.c.bf16 %v2600_v33, %v2599_v46  ;;  %v2767_v50 = vld [vmem:[#allocation2 + $0x1a] sm:$0xff]  ;;  %v2768_v60 = vld [vmem:[#allocation2 + $0x22] sm:$0xff]  ;;  %v2738_v26 = vpack.c.bf16 %v2582_v30, %v2581_v58 }
 0x354   :  { %2625 = vst [vmem:[#allocation2 + $0x109] sm:$0xff] %v2593_v41  ;;  %2626 = vst [vmem:[#allocation2 + $0x111] sm:$0xff] %v2594_v28  ;;  %4126 = vmatprep.mubr.bf16.mxu0 %v2861_v14  ;;  %3974 = vmatmul.mubr.bf16.gmra.mrb[132].mxu1 %v2861_v14  ;;  %v2833_v15 = vld [vmem:[#allocation2 + $0x48] sm:$0xff]  ;;  %v2834_v41 = vld [vmem:[#allocation2 + $0x50] sm:$0xff]  ;;  %v2741_v32 = vpack.c.bf16 %v2588_v42, %v2587_v4  ;;  %v2742_v42 = vpack.c.bf16 %v2590_v43, %v2589_v21 }
 0x355   :  { %2627 = vst [vmem:[#allocation2 + $0x121] sm:$0xff] %v2595_v57  ;;  %2628 = vst [vmem:[#allocation2 + $0x129] sm:$0xff] %v2596_v40  ;;  %4127 = vmatmul.mubr.bf16.vlgmr.msra.gmra.mrb[160].mxu0 %v2797_v9  ;;  %3981 = vmatprep.mubr.bf16.mxu1 %v2735_v25  ;;  %v12431_v28 = vld [vmem:[%s17425_s4 + $0x190] sm:$0xff]   ;;  %v14136_v57 = vpack.c.bf16 %v2768_v60, %v2767_v50  ;;  %v2736_v40 = vpack.c.bf16 %v2578_v62, %v2577_v38  ;;  %v12435_v48 = vld [vmem:[%s17425_s4 + $0x198] sm:$0xff]  }
 0x356   :  { %2629 = vst [vmem:[#allocation2 + $0x139] sm:$0xff] %v2597_v49  ;;  %2630 = vst [vmem:[#allocation2 + $0x141] sm:$0xff] %v2598_v45  ;;  %11042 = vmatpush3.bf16.msra.mxu0 %v12423_v31  ;;  %4134 = vmatprep.mubr.bf16.mxu0 %v14121_v17  ;;  %v12433_v49 = vld [vmem:[%s17425_s4 + $0x1d8] sm:$0xff]   ;;  %v14147_v45 = vpack.c.bf16 %v2834_v41, %v2833_v15  ;;  %v12437_v51 = vld [vmem:[%s17425_s4 + $0x1e0] sm:$0xff]   ;;  %v2739_v60 = vpack.c.bf16 %v2584_v23, %v2583_v55 }
 0x357   :  { %2631 = vst [vmem:[#allocation2 + $0x151] sm:$0xff] %v2599_v46  ;;  %2632 = vst [vmem:[#allocation2 + $0x159] sm:$0xff] %v2600_v33  ;;  %11043 = vmatprep.subr.bf16.mxu0 %v12425_v12  ;;  %5070 = vxpose.xlu0.b32.cont [6/16] %v13773_v0, 128  ;;  %v2769_v38 = vld [vmem:[#allocation2 + $0x32] sm:$0xff]  ;;  %v2770_v62 = vld [vmem:[#allocation2 + $0x3a] sm:$0xff] }
 0x358   :  { %2633 = vst [vmem:[#allocation2 + $0x169] sm:$0xff] %v2601_v59  ;;  %2635 = vst [vmem:[#allocation2 + $0x181] sm:$0xff] %v2603_v61  ;;  %v2835_v46 = vld [vmem:[#allocation2 + $0x60] sm:$0xff]  ;;  %v2836_v33 = vld [vmem:[#allocation2 + $0x68] sm:$0xff] }
 0x359   :  { %2636 = vst [vmem:[#allocation2 + $0x189] sm:$0xff] %v2604_v7  ;;  %v12439_v61 = vld [vmem:[%s17425_s4 + $0x1a0] sm:$0xff]   ;;  %v14161_v7 = vpack.c.bf16 %v2770_v62, %v2769_v38  ;;  %v12441_v27 = vld [vmem:[%s17425_s4 + $0x1e8] sm:$0xff]   ;;  %v14172_v56 = vpack.c.bf16 %v2836_v33, %v2835_v46  ;;  %v12445_v29 = vld [vmem:[%s17425_s4 + $0x1f0] sm:$0xff]  }
 0x35a   :  { %11044 = vmatpush3.bf16.msra.mxu0 %v12427_v6  ;;  %v12443_v54 = vld [vmem:[%s17425_s4 + $0x1a8] sm:$0xff]   ;;  %v2772_v16 = vld [vmem:[#allocation2 + $0x52] sm:$0xff]  ;;  %v2838_v5 = vld [vmem:[#allocation2 + $0x80] sm:$0xff] }
 0x35b   :  { %11045 = vmatprep.subr.bf16.mxu0 %v12429_v36  ;;  %5071 = vxpose.xlu0.b32.cont [7/16] %v13773_v0, 128  ;;  %v2771_v37 = vld [vmem:[#allocation2 + $0x4a] sm:$0xff]  ;;  %v2837_v9 = vld [vmem:[#allocation2 + $0x78] sm:$0xff]  ;;  %v12453_v39 = vld [vmem:[%s17424_s1 + $0x40] sm:$0xff]  }
 0x35c   :  { %3982 = vmatmul.mubr.bf16.gmra.mrb[136].mxu1 %v14121_v17  ;;  %v12447_v14 = vld [vmem:[%s17425_s4 + $0x1b0] sm:$0xff]   ;;  %v14186_v31 = vpack.c.bf16 %v2772_v16, %v2771_v37  ;;  %v12449_v25 = vld [vmem:[%s17425_s4 + $0x1f8] sm:$0xff]   ;;  %v14197_v12 = vpack.c.bf16 %v2838_v5, %v2837_v9  ;;  %v2773_v58 = vld [vmem:[#allocation2 + $0x62] sm:$0xff] }
 0x35d   :  { %4135 = vmatmul.mubr.bf16.gmra.mrb[164].mxu0 %v14136_v57  ;;  %3989 = vmatprep.mubr.bf16.mxu1 %v2736_v40  ;;  %v12451_v35 = vld [vmem:[%s17425_s4 + $0x1b8] sm:$0xff]   ;;  %v2774_v30 = vld [vmem:[#allocation2 + $0x6a] sm:$0xff]  ;;  %v14214_v15 = vld [vmem:[#allocation2] sm:$0xff] }
 0x35e   :  { %4142 = vmatprep.mubr.bf16.mxu0 %v14147_v45  ;;  %11046 = vmatpush3.bf16.msra.mxu0 %v12431_v28  ;;  %v2839_v6 = vld [vmem:[#allocation2 + $0x90] sm:$0xff]  ;;  %v2840_v36 = vld [vmem:[#allocation2 + $0x98] sm:$0xff]  ;;  %v14208_v50 = vpack.c.bf16 %v2774_v30, %v2773_v58  ;;  %v2776_v41 = vld [vmem:[#allocation2 + $0x82] sm:$0xff]  ;;  %v2740_v28 = vpack.c.bf16 %v2586_v1, %v2585_v44 }
 0x35f   :  { %11047 = vmatprep.subr.bf16.mxu0 %v12433_v49  ;;  %5072 = vxpose.xlu0.b32.cont [8/16] %v13773_v0, 128  ;;  %v2775_v13 = vld [vmem:[#allocation2 + $0x7a] sm:$0xff]  ;;  %v2841_v53 = vld [vmem:[#allocation2 + $0xa8] sm:$0xff]  ;;  %v2842_v55 = vld [vmem:[#allocation2 + $0xb0] sm:$0xff] }
 0x360   :  { %v14223_v23 = vpack.c.bf16 %v2776_v41, %v2775_v13  ;;  %v14231_v40 = vpack.c.bf16 %v2842_v55, %v2841_v53  ;;  %v2777_v49 = vld [vmem:[#allocation2 + $0x92] sm:$0xff]  ;;  %v2844_v20 = vld [vmem:[#allocation2 + $0xc8] sm:$0xff]  ;;  %v2846_v34 = vld [vmem:[#allocation2 + $0xe0] sm:$0xff] }
 0x361   :  { %v5034_v1 = vld [vmem:[#allocation3 + $0x8] sm:$0xff]  ;;  %v2779_v62 = vld [vmem:[#allocation2 + $0xaa] sm:$0xff]  ;;  %v2784_v43 = vld [vmem:[#allocation2 + $0xe2] sm:$0xff] }
 0x362   :  { %11048 = vmatpush3.bf16.msra.mxu0 %v12435_v48  ;;  %v2778_v48 = vld [vmem:[#allocation2 + $0x9a] sm:$0xff]  ;;  %5097 = vxpose.xlu1.b32.start [1/16] %v5034_v1, 128  ;;  %v2780_v24 = vld [vmem:[#allocation2 + $0xb2] sm:$0xff]  ;;  %v2792_v1 = vld [vmem:[#allocation2 + $0x142] sm:$0xff] }
 0x363   :  { %11049 = vmatprep.subr.bf16.mxu0 %v12437_v51  ;;  %5073 = vxpose.xlu0.b32.cont [9/16] %v13773_v0, 128  ;;  %v2843_v51 = vld [vmem:[#allocation2 + $0xc0] sm:$0xff]  ;;  %v14236_v38 = vpack.c.bf16 %v2778_v48, %v2777_v49  ;;  %v2845_v46 = vld [vmem:[#allocation2 + $0xd8] sm:$0xff]  ;;  %v14249_v4 = vpack.c.bf16 %v2780_v24, %v2779_v62  ;;  %v2850_v37 = vld [vmem:[#allocation2 + $0x110] sm:$0xff] }
 0x364   :  { %3990 = vmatmul.mubr.bf16.gmra.mrb[140].mxu1 %v14147_v45  ;;  %v14244_v44 = vpack.c.bf16 %v2844_v20, %v2843_v51  ;;  %v14257_v33 = vpack.c.bf16 %v2846_v34, %v2845_v46  ;;  %v2848_v3 = vld [vmem:[#allocation2 + $0xf8] sm:$0xff]  ;;  %v2854_v30 = vld [vmem:[#allocation2 + $0x140] sm:$0xff]  ;;  %v2855_v13 = vld [vmem:[#allocation2 + $0x150] sm:$0xff] }
 0x365   :  { %4143 = vmatmul.mubr.bf16.gmra.mrb[168].mxu0 %v14161_v7  ;;  %3997 = vmatprep.mubr.bf16.mxu1 %v2737_v8  ;;  %v2782_v8 = vld [vmem:[#allocation2 + $0xca] sm:$0xff]  ;;  %v2783_v21 = vld [vmem:[#allocation2 + $0xda] sm:$0xff] }
 0x366   :  { %4150 = vmatprep.mubr.bf16.mxu0 %v14172_v56  ;;  %11050 = vmatpush3.bf16.msra.mxu0 %v12439_v61  ;;  %v2781_v61 = vld [vmem:[#allocation2 + $0xc2] sm:$0xff]  ;;  %v14272_v16 = vpack.c.bf16 %v2784_v43, %v2783_v21  ;;  %v2786_v5 = vld [vmem:[#allocation2 + $0xfa] sm:$0xff]  ;;  %v14316_v62 = vld [vmem:[#allocation2 + $0x171] sm:$0xff] }
 0x367   :  { %11051 = vmatprep.subr.bf16.mxu0 %v12441_v27  ;;  %5074 = vxpose.xlu0.b32.cont [10/16] %v13773_v0, 128  ;;  %v14218_v0 = vpack.c.bf16 %v2840_v36, %v2839_v6  ;;  %v2847_v27 = vld [vmem:[#allocation2 + $0xf0] sm:$0xff]  ;;  %v2853_v58 = vld [vmem:[#allocation2 + $0x138] sm:$0xff]  ;;  %v2857_v24 = vld [vmem:[#allocation2 + $0x168] sm:$0xff] }
 0x368   :  { %5098 = vxpose.xlu1.b32.cont [2/16] %v14214_v15, 128  ;;  %v14266_v22 = vpack.c.bf16 %v2848_v3, %v2847_v27  ;;  %v14296_v36 = vpack.c.bf16 %v2854_v30, %v2853_v58  ;;  %v2856_v41 = vld [vmem:[#allocation2 + $0x158] sm:$0xff]  ;;  %v2858_v46 = vld [vmem:[#allocation2 + $0x170] sm:$0xff]  ;;  %v2859_v27 = vld [vmem:[#allocation2 + $0x180] sm:$0xff] }
 0x369   :  { %v2860_v3 = vld [vmem:[#allocation2 + $0x188] sm:$0xff]  ;;  %v2893_v21 = vld [vmem:[#allocation2 + $0x19] sm:$0xff] }
 0x36a   :  { %11052 = vmatpush3.bf16.msra.mxu0 %v12443_v54  ;;  %v14262_v54 = vpack.c.bf16 %v2782_v8, %v2781_v61  ;;  %v2793_v61 = vld [vmem:[#allocation2 + $0x152] sm:$0xff]  ;;  %v2794_v8 = vld [vmem:[#allocation2 + $0x15a] sm:$0xff] }
 0x36b   :  { %11053 = vmatprep.subr.bf16.mxu0 %v12445_v29  ;;  %5075 = vxpose.xlu0.b32.cont [11/16] %v14214_v15, 128  ;;  %v2849_v29 = vld [vmem:[#allocation2 + $0x108] sm:$0xff]  ;;  %v14330_v18 = vpack.c.bf16 %v2794_v8, %v2793_v61  ;;  %v12462_v61 = vld [vmem:[%s17424_s1 + $0x58] sm:$0xff]  }
 0x36c   :  { %3998 = vmatmul.mubr.bf16.gmra.mrb[144].mxu1 %v14172_v56  ;;  %5099 = vxpose.xlu1.b32.cont [3/16] %v14214_v15, 128  ;;  %v14276_v9 = vpack.c.bf16 %v2850_v37, %v2849_v29  ;;  %v2894_v43 = vld [vmem:[#allocation2 + $0x21] sm:$0xff]  ;;  %v2795_v29 = vld [vmem:[#allocation2 + $0x16a] sm:$0xff]  ;;  %v2796_v37 = vld [vmem:[#allocation2 + $0x172] sm:$0xff] }
 0x36d   :  { %4151 = vmatmul.mubr.bf16.gmra.mrb[172].mxu0 %v14186_v31  ;;  %4005 = vmatprep.mubr.bf16.mxu1 %v2738_v26  ;;  %v2852_v26 = vld [vmem:[#allocation2 + $0x128] sm:$0xff] }
 0x36e   :  { %4158 = vmatprep.mubr.bf16.mxu0 %v14197_v12  ;;  %11054 = vmatpush3.bf16.msra.mxu0 %v12447_v14  ;;  %v2851_v14 = vld [vmem:[#allocation2 + $0x120] sm:$0xff]  ;;  %v14394_v8 = vld [vmem:[#allocation2 + $0x4a] sm:$0xff] }
 0x36f   :  { %11055 = vmatprep.subr.bf16.mxu0 %v12449_v25  ;;  %5076 = vxpose.xlu0.b32.cont [12/16] %v14214_v15, 128 }
 0x370   :  { %5100 = vxpose.xlu1.b32.cont [4/16] %v14214_v15, 128 }
 0x372   :  { %11056 = vmatpush3.bf16.msra.mxu0 %v12451_v35  ;;  %v14286_v35 = vpack.c.bf16 %v2852_v26, %v2851_v14  ;;  %v2925_v14 = vpack.c.bf16 %v2894_v43, %v2893_v21  ;;  %v14339_v26 = vpack.c.bf16 %v2796_v37, %v2795_v29  ;;  %v12467_v21 = vld [vmem:[%s17425_s4 + $0x228] sm:$0xff]   ;;  %v12463_v43 = vld [vmem:[%s17424_s1 + $0x18] sm:$0xff]   ;;  %v12465_v29 = vld [vmem:[%s17424_s1 + $0x60] sm:$0xff]  }
 0x373   :  { %11177 = vmatprep.subr.bf16.mxu0 %v12453_v39  ;;  %5077 = vxpose.xlu0.b32.cont [13/16] %v14214_v15, 128  ;;  %v2788_v39 = vld [vmem:[#allocation2 + $0x112] sm:$0xff] }
 0x374   :  { %4006 = vmatmul.mubr.bf16.gmra.mrb[148].mxu1 %v14197_v12  ;;  %5101 = vxpose.xlu1.b32.cont [5/16] %v14214_v15, 128  ;;  %v14410_v37 = vld [vmem:[#allocation2 + $0x52] sm:$0xff] }
 0x375   :  { %4159 = vmatmul.mubr.bf16.gmra.mrb[176].mxu0 %v14208_v50  ;;  %4013 = vmatprep.mubr.bf16.mxu1 %v2739_v60  ;;  %v2790_v60 = vld [vmem:[#allocation2 + $0x12a] sm:$0xff] }
 0x376   :  { %4166 = vmatprep.mubr.bf16.mxu0 %v14218_v0 }
 0x377   :  { %5078 = vxpose.xlu0.b32.cont [14/16] %v14214_v15, 128 }
 0x378   :  { %5102 = vxpose.xlu1.b32.cont [6/16] %v14214_v15, 128 }
 0x37b   :  { %5079 = vxpose.xlu0.b32.cont [15/16] %v14214_v15, 128 }
 0x37c   :  { %4014 = vmatmul.mubr.bf16.gmra.mrb[152].mxu1 %v14218_v0  ;;  %5103 = vxpose.xlu1.b32.cont [7/16] %v14214_v15, 128 }
 0x37d   :  { %4167 = vmatmul.mubr.bf16.gmra.mrb[180].mxu0 %v14223_v23  ;;  %4021 = vmatprep.mubr.bf16.mxu1 %v2740_v28 }
 0x37e   :  { %4174 = vmatprep.mubr.bf16.mxu0 %v14231_v40 }
 0x37f   :  { %5080 = vxpose.xlu0.b32.end [16/16] %v14214_v15, 128 }
 0x380   :  { %5104 = vxpose.xlu1.b32.cont [8/16] %v14214_v15, 128 }
 0x384   :  { %4022 = vmatmul.mubr.bf16.gmra.mrb[156].mxu1 %v14231_v40  ;;  %5105 = vxpose.xlu1.b32.cont [9/16] %v14214_v15, 128 }
 0x385   :  { %4175 = vmatmul.mubr.bf16.gmra.mrb[184].mxu0 %v14236_v38  ;;  %4029 = vmatprep.mubr.bf16.mxu1 %v2741_v32  ;;  %v2791_v32 = vld [vmem:[#allocation2 + $0x13a] sm:$0xff] }
 0x386   :  { %4182 = vmatprep.mubr.bf16.mxu0 %v14244_v44  ;;  %v14318_v34 = vpack.c.bf16 %v2792_v1, %v2791_v32  ;;  %v14378_v32 = vld [vmem:[#allocation2 + $0x3a] sm:$0xff] }
 0x388   :  { %5106 = vxpose.xlu1.b32.cont [10/16] %v14214_v15, 128 }
 0x38c   :  { %4030 = vmatmul.mubr.bf16.gmra.mrb[160].mxu1 %v14244_v44  ;;  %5107 = vxpose.xlu1.b32.cont [11/16] %v14214_v15, 128 }
 0x38d   :  { %4183 = vmatmul.mubr.bf16.gmra.mrb[188].mxu0 %v14249_v4  ;;  %4037 = vmatprep.mubr.bf16.mxu1 %v2742_v42  ;;  %v2748_v42 = vpack.c.bf16 %v14316_v62, %v2601_v59  ;;  %v14334_v59 = vpack.c.bf16 %v2860_v3, %v2859_v27 }
 0x38e   :  { %4190 = vmatprep.mubr.bf16.mxu0 %v14257_v33 }
 0x390   :  { %5108 = vxpose.xlu1.b32.cont [12/16] %v14214_v15, 128 }
 0x394   :  { %4038 = vmatmul.mubr.bf16.gmra.mrb[164].mxu1 %v14257_v33  ;;  %5109 = vxpose.xlu1.b32.cont [13/16] %v14214_v15, 128 }
 0x395   :  { %4191 = vmatmul.mubr.bf16.gmra.mrb[192].mxu0 %v14262_v54  ;;  %4045 = vmatprep.mubr.bf16.mxu1 %v14106_v52  ;;  %v2785_v52 = vld [vmem:[#allocation2 + $0xf2] sm:$0xff] }
 0x396   :  { %4198 = vmatprep.mubr.bf16.mxu0 %v14266_v22  ;;  %v14282_v25 = vpack.c.bf16 %v2786_v5, %v2785_v52  ;;  %v3085_v52 = vld [vmem:[#allocation2 + $0x31] sm:$0xff]  ;;  %v3086_v5 = vld [vmem:[#allocation2 + $0x39] sm:$0xff] }
 0x397   :  { %v3117_v58 = vpack.c.bf16 %v3086_v5, %v3085_v52  ;;  %v3091_v5 = vld [vmem:[#allocation2 + $0x79] sm:$0xff] }
 0x398   :  { %5110 = vxpose.xlu1.b32.cont [14/16] %v14214_v15, 128 }
 0x39c   :  { %4046 = vmatmul.mubr.bf16.gmra.mrb[168].mxu1 %v14266_v22  ;;  %5111 = vxpose.xlu1.b32.cont [15/16] %v14214_v15, 128 }
 0x39d   :  { %4199 = vmatmul.mubr.bf16.gmra.mrb[196].mxu0 %v14272_v16  ;;  %4053 = vmatprep.mubr.bf16.mxu1 %v14108_v63  ;;  %v2787_v63 = vld [vmem:[#allocation2 + $0x10a] sm:$0xff] }
 0x39e   :  { %4206 = vmatprep.mubr.bf16.mxu0 %v14276_v9  ;;  %v14292_v6 = vpack.c.bf16 %v2788_v39, %v2787_v63  ;;  %v12455_v63 = vld [vmem:[%s17425_s4 + $0x208] sm:$0xff]  }
 0x3a0   :  { %5112 = vxpose.xlu1.b32.end [16/16] %v14214_v15, 128 }
 0x3a4   :  { %4054 = vmatmul.mubr.bf16.gmra.mrb[172].mxu1 %v14276_v9 }
 0x3a5   :  { %4207 = vmatmul.mubr.bf16.gmra.mrb[200].mxu0 %v14282_v25  ;;  %4061 = vmatprep.mubr.bf16.mxu1 %v14117_v47  ;;  %v2789_v47 = vld [vmem:[#allocation2 + $0x122] sm:$0xff] }
 0x3a6   :  { %4214 = vmatprep.mubr.bf16.mxu0 %v14286_v35  ;;  %v14302_v28 = vpack.c.bf16 %v2790_v60, %v2789_v47  ;;  %v3087_v47 = vld [vmem:[#allocation2 + $0x49] sm:$0xff]  ;;  %v3088_v60 = vld [vmem:[#allocation2 + $0x51] sm:$0xff] }
 0x3ac   :  { %4062 = vmatmul.mubr.bf16.gmra.mrb[176].mxu1 %v14286_v35 }
 0x3ad   :  { %4215 = vmatmul.mubr.bf16.gmra.mrb[204].mxu0 %v14292_v6  ;;  %4069 = vmatprep.mubr.bf16.mxu1 %v14119_v10  ;;  %v14308_v10 = vpack.c.bf16 %v2856_v41, %v2855_v13  ;;  %v12454_v13 = vld [vmem:[%s17424_s1] sm:$0xff]  }
 0x3ae   :  { %4222 = vmatprep.mubr.bf16.mxu0 %v14296_v36  ;;  %v10721_v53 = vpop.f32.mrb[128].mxu1 }
 0x3af   :  { %v10722_v55 = vpop.f32.mrb[129].mxu1 }
 0x3b0   :  { %v14304_v49 = vadd.f32 %v10722_v55, %v10721_v53  ;;  %v10724_v48 = vpop.f32.mrb[130].mxu1  ;;  %v3118_v53 = vpack.c.bf16 %v3088_v60, %v3087_v47  ;;  %v12461_v55 = vld [vmem:[%s17425_s4 + $0x218] sm:$0xff]  }
 0x3b1   :  { %v10725_v51 = vpop.f32.mrb[131].mxu1 }
 0x3b2   :  { %v14312_v20 = vadd.f32 %v10725_v51, %v10724_v48  ;;  %v12457_v48 = vld [vmem:[%s17424_s1 + $0x8] sm:$0xff]   ;;  %v12459_v51 = vld [vmem:[%s17424_s1 + $0x50] sm:$0xff]  }
 0x3b4   :  { %4070 = vmatmul.mubr.bf16.gmra.mrb[180].mxu1 %v14296_v36 }
 0x3b5   :  { %4223 = vmatmul.mubr.bf16.gmra.mrb[208].mxu0 %v14302_v28  ;;  %4077 = vmatprep.mubr.bf16.mxu1 %v14123_v19  ;;  %v14325_v19 = vpack.c.bf16 %v2858_v46, %v2857_v24  ;;  %v3089_v24 = vld [vmem:[#allocation2 + $0x61] sm:$0xff]  ;;  %v3090_v46 = vld [vmem:[#allocation2 + $0x69] sm:$0xff] }
 0x3b6   :  { %4230 = vmatprep.mubr.bf16.mxu0 %v14308_v10  ;;  %v3119_v3 = vpack.c.bf16 %v3090_v46, %v3089_v24  ;;  %v12472_v24 = vld [vmem:[%s17424_s1 + $0x30] sm:$0xff]   ;;  %v12474_v46 = vld [vmem:[%s17424_s1 + $0x78] sm:$0xff]  }
 0x3bc   :  { %4078 = vmatmul.mubr.bf16.gmra.mrb[184].mxu1 %v14308_v10 }
 0x3bd   :  { %4231 = vmatmul.mubr.bf16.gmra.mrb[212].mxu0 %v14318_v34  ;;  %4085 = vmatprep.mubr.bf16.mxu1 %v2748_v42  ;;  %v12460_v42 = vld [vmem:[%s17424_s1 + $0x10] sm:$0xff]  }
 0x3be   :  { %4238 = vmatprep.mubr.bf16.mxu0 %v14325_v19 }
 0x3c3   :  { %v14344_v39 = vpop.trf.xlu0 }
 0x3c4   :  { %4086 = vmatmul.mubr.bf16.gmra.mrb[188].mxu1 %v14325_v19  ;;  %5129 = vst [vmem:[#allocation2 + $0x19] sm:$0xff] %v14344_v39 }
 0x3c5   :  { %4239 = vmatmul.mubr.bf16.gmra.mrb[216].mxu0 %v14330_v18  ;;  %4287 = vmatprep.mubr.bf16.mxu1 %v14136_v57  ;;  %v12458_v57 = vld [vmem:[%s17425_s4 + $0x210] sm:$0xff]  }
 0x3c6   :  { %4246 = vmatprep.mubr.bf16.mxu0 %v14334_v59 }
 0x3c7   :  { %v14353_v30 = vpop.trf.xlu0 }
 0x3c8   :  { %5130 = vst [vmem:[#allocation2 + $0x21] sm:$0xff] %v14353_v30 }
 0x3cb   :  { %v14364_v41 = vpop.trf.xlu0 }
 0x3cc   :  { %4288 = vmatmul.mubr.bf16.vlgmr.msra.gmra.mrb[192].mxu1 %v2925_v14  ;;  %v3092_v14 = vld [vmem:[#allocation2 + $0x81] sm:$0xff] }
 0x3cd   :  { %4247 = vmatmul.mubr.bf16.gmra.mrb[220].mxu0 %v14339_v26  ;;  %4295 = vmatprep.mubr.bf16.mxu1 %v14161_v7  ;;  %v14362_v7 = vld [vmem:[#allocation2 + $0x32] sm:$0xff]  ;;  %v3120_v60 = vpack.c.bf16 %v3092_v14, %v3091_v5 }
 0x3ce   :  { %4448 = vmatprep.mubr.bf16.mxu0 %v3117_v58  ;;  %12170 = vmatpush3.bf16.msra.mxu1 %v14091_v11  ;;  %v12456_v11 = vld [vmem:[%s17424_s1 + $0x48] sm:$0xff]   ;;  %5131 = vst [vmem:[#allocation2 + $0x31] sm:$0xff] %v14364_v41  ;;  %v3096_v5 = vld [vmem:[#allocation2 + $0xb1] sm:$0xff] }
 0x3cf   :  { %12171 = vmatprep.subr.bf16.mxu1 %v12455_v63  ;;  %v14380_v1 = vpop.trf.xlu0  ;;  %v14478_v14 = vld [vmem:[#allocation2 + $0x92] sm:$0xff] }
 0x3d0   :  { %5132 = vst [vmem:[#allocation2 + $0x39] sm:$0xff] %v14380_v1 }
 0x3d2   :  { %12172 = vmatpush3.bf16.msra.mxu1 %v12455_v63  ;;  %v12466_v63 = vld [vmem:[%s17424_s1 + $0x20] sm:$0xff]  }
 0x3d3   :  { %12173 = vmatprep.subr.bf16.mxu1 %v12458_v57  ;;  %v14396_v27 = vpop.trf.xlu0 }
 0x3d4   :  { %4296 = vmatmul.mubr.bf16.gmra.mrb[196].mxu1 %v3117_v58  ;;  %5133 = vst [vmem:[#allocation2 + $0x49] sm:$0xff] %v14396_v27  ;;  %v12468_v58 = vld [vmem:[%s17424_s1 + $0x68] sm:$0xff]  }
 0x3d5   :  { %4449 = vmatmul.mubr.bf16.vlgmr.msra.gmra.mrb[224].mxu0 %v14121_v17  ;;  %4303 = vmatprep.mubr.bf16.mxu1 %v14186_v31  ;;  %v12464_v17 = vld [vmem:[%s17425_s4 + $0x220] sm:$0xff]  }
 0x3d6   :  { %11178 = vmatpush3.bf16.msra.mxu0 %v12454_v13  ;;  %4456 = vmatprep.mubr.bf16.mxu0 %v3118_v53  ;;  %v12473_v13 = vld [vmem:[%s17425_s4 + $0x238] sm:$0xff]  }
 0x3d7   :  { %11179 = vmatprep.subr.bf16.mxu0 %v12456_v11  ;;  %12174 = vmatpush3.bf16.msra.mxu1 %v12458_v57  ;;  %v14412_v52 = vpop.trf.xlu0  ;;  %v14426_v57 = vld [vmem:[#allocation2 + $0x62] sm:$0xff] }
 0x3d8   :  { %12175 = vmatprep.subr.bf16.mxu1 %v12461_v55  ;;  %5134 = vst [vmem:[#allocation2 + $0x51] sm:$0xff] %v14412_v52  ;;  %v12469_v11 = vld [vmem:[%s17424_s1 + $0x28] sm:$0xff]  }
 0x3da   :  { %11180 = vmatpush3.bf16.msra.mxu0 %v12457_v48 }
 0x3db   :  { %11181 = vmatprep.subr.bf16.mxu0 %v12459_v51  ;;  %12176 = vmatpush3.bf16.msra.mxu1 %v12461_v55  ;;  %v14428_v47 = vpop.trf.xlu0  ;;  %v14442_v55 = vld [vmem:[#allocation2 + $0x6a] sm:$0xff] }
 0x3dc   :  { %4304 = vmatmul.mubr.bf16.gmra.mrb[200].mxu1 %v3118_v53  ;;  %12177 = vmatprep.subr.bf16.mxu1 %v12464_v17  ;;  %5135 = vst [vmem:[#allocation2 + $0x61] sm:$0xff] %v14428_v47  ;;  %v12471_v53 = vld [vmem:[%s17424_s1 + $0x70] sm:$0xff]  }
 0x3dd   :  { %4457 = vmatmul.mubr.bf16.gmra.mrb[228].mxu0 %v14147_v45  ;;  %4311 = vmatprep.mubr.bf16.mxu1 %v14208_v50  ;;  %v12470_v45 = vld [vmem:[%s17425_s4 + $0x230] sm:$0xff]   ;;  %v14560_v50 = vld [vmem:[#allocation2 + $0x122] sm:$0xff] }
 0x3de   :  { %4464 = vmatprep.mubr.bf16.mxu0 %v3119_v3  ;;  %11182 = vmatpush3.bf16.msra.mxu0 %v12460_v42  ;;  %v3093_v51 = vld [vmem:[#allocation2 + $0x91] sm:$0xff]  ;;  %v14458_v42 = vld [vmem:[#allocation2 + $0x7a] sm:$0xff] }
 0x3df   :  { %11183 = vmatprep.subr.bf16.mxu0 %v12462_v61  ;;  %12178 = vmatpush3.bf16.msra.mxu1 %v12464_v17  ;;  %v14444_v48 = vpop.trf.xlu0  ;;  %v3094_v17 = vld [vmem:[#allocation2 + $0x99] sm:$0xff] }
 0x3e0   :  { %12179 = vmatprep.subr.bf16.mxu1 %v12467_v21  ;;  %5136 = vst [vmem:[#allocation2 + $0x69] sm:$0xff] %v14444_v48 }
 0x3e2   :  { %11184 = vmatpush3.bf16.msra.mxu0 %v12463_v43  ;;  %v12477_v43 = vld [vmem:[%s17424_s1 + $0x140] sm:$0xff]  }
 0x3e3   :  { %11185 = vmatprep.subr.bf16.mxu0 %v12465_v29  ;;  %12180 = vmatpush3.bf16.msra.mxu1 %v12467_v21  ;;  %v14460_v61 = vpop.trf.xlu0  ;;  %v12475_v21 = vld [vmem:[%s17424_s1 + $0x38] sm:$0xff]   ;;  %v14471_v29 = vld [vmem:[#allocation2 + $0x82] sm:$0xff] }
 0x3e4   :  { %4312 = vmatmul.mubr.bf16.gmra.mrb[204].mxu1 %v3119_v3  ;;  %12181 = vmatprep.subr.bf16.mxu1 %v12470_v45  ;;  %17476 = vst [vmem:[#allocation6_spill] sm:$0xff] %v14460_v61  ;;  %v3121_v3 = vpack.c.bf16 %v3094_v17, %v3093_v51  ;;  %5137 = vst [vmem:[#allocation2 + $0x79] sm:$0xff] %v14460_v61  ;;  %v14492_v51 = vld [vmem:[#allocation2 + $0xaa] sm:$0xff] }
 0x3e5   :  { %4465 = vmatmul.mubr.bf16.gmra.mrb[232].mxu0 %v14172_v56  ;;  %4319 = vmatprep.mubr.bf16.mxu1 %v14223_v23  ;;  %v12476_v56 = vld [vmem:[%s17424_s1 + $0xc0] sm:$0xff]  }
 0x3e6   :  { %4472 = vmatprep.mubr.bf16.mxu0 %v3120_v60  ;;  %11186 = vmatpush3.bf16.msra.mxu0 %v12466_v63 }
 0x3e7   :  { %11187 = vmatprep.subr.bf16.mxu0 %v12468_v58  ;;  %12182 = vmatpush3.bf16.msra.mxu1 %v12470_v45  ;;  %v14473_v45 = vpop.trf.xlu0 }
 0x3e8   :  { %12183 = vmatprep.subr.bf16.mxu1 %v12473_v13  ;;  %5138 = vst [vmem:[#allocation2 + $0x81] sm:$0xff] %v14473_v45 }
 0x3ea   :  { %11188 = vmatpush3.bf16.msra.mxu0 %v12469_v11 }
 0x3eb   :  { %11189 = vmatprep.subr.bf16.mxu0 %v12471_v53  ;;  %12184 = vmatpush3.bf16.msra.mxu1 %v12473_v13  ;;  %v14480_v63 = vpop.trf.xlu0  ;;  %v3097_v53 = vld [vmem:[#allocation2 + $0xc1] sm:$0xff] }
 0x3ec   :  { %4320 = vmatmul.mubr.bf16.gmra.mrb[208].mxu1 %v3120_v60  ;;  %11289 = vmatprep.subr.bf16.mxu1 %v12476_v56  ;;  %17477 = vst [vmem:[#allocation7_spill] sm:$0xff] %v14480_v63  ;;  %5139 = vst [vmem:[#allocation2 + $0x91] sm:$0xff] %v14480_v63  ;;  %v14485_v60 = vld [vmem:[#allocation2 + $0x9a] sm:$0xff]  ;;  %v3098_v56 = vld [vmem:[#allocation2 + $0xc9] sm:$0xff] }
 0x3ed   :  { %4473 = vmatmul.mubr.bf16.gmra.mrb[236].mxu0 %v14197_v12  ;;  %4327 = vmatprep.mubr.bf16.mxu1 %v14236_v38  ;;  %v3095_v38 = vld [vmem:[#allocation2 + $0xa9] sm:$0xff] }
 0x3ee   :  { %4480 = vmatprep.mubr.bf16.mxu0 %v3121_v3  ;;  %11190 = vmatpush3.bf16.msra.mxu0 %v12472_v24  ;;  %v3122_v58 = vpack.c.bf16 %v3096_v5, %v3095_v38  ;;  %v14546_v12 = vld [vmem:[#allocation2 + $0x10a] sm:$0xff] }
 0x3ef   :  { %11191 = vmatprep.subr.bf16.mxu0 %v12474_v46  ;;  %v14487_v13 = vpop.trf.xlu0  ;;  %v3104_v46 = vld [vmem:[#allocation2 + $0x111] sm:$0xff] }
 0x3f0   :  { %17478 = vst [vmem:[#allocation8_spill] sm:$0xff] %v14487_v13  ;;  %5140 = vst [vmem:[#allocation2 + $0x99] sm:$0xff] %v14487_v13 }
 0x3f2   :  { %11192 = vmatpush3.bf16.msra.mxu0 %v12475_v21  ;;  %v3100_v21 = vld [vmem:[#allocation2 + $0xe1] sm:$0xff] }
 0x3f3   :  { %11401 = vmatprep.subr.bf16.mxu0 %v12477_v43  ;;  %v14494_v17 = vpop.trf.xlu0  ;;  %v14506_v43 = vld [vmem:[#allocation2 + $0xc2] sm:$0xff] }
 0x3f4   :  { %4328 = vmatmul.mubr.bf16.gmra.mrb[212].mxu1 %v3121_v3  ;;  %17479 = vst [vmem:[#allocation9_spill] sm:$0xff] %v14494_v17  ;;  %5141 = vst [vmem:[#allocation2 + $0xa9] sm:$0xff] %v14494_v17  ;;  %v3099_v3 = vld [vmem:[#allocation2 + $0xd9] sm:$0xff] }
 0x3f5   :  { %4481 = vmatmul.mubr.bf16.gmra.mrb[240].mxu0 %v14218_v0  ;;  %4335 = vmatprep.mubr.bf16.mxu1 %v14249_v4  ;;  %v3123_v0 = vpack.c.bf16 %v3098_v56, %v3097_v53  ;;  %v14499_v4 = vld [vmem:[#allocation2 + $0xb2] sm:$0xff] }
 0x3f6   :  { %4488 = vmatprep.mubr.bf16.mxu0 %v3122_v58  ;;  %v3101_v53 = vld [vmem:[#allocation2 + $0xf1] sm:$0xff]  ;;  %v3102_v56 = vld [vmem:[#allocation2 + $0xf9] sm:$0xff] }
 0x3f7   :  { %v14501_v24 = vpop.trf.xlu0 }
 0x3f8   :  { %17480 = vst [vmem:[#allocation10_spill] sm:$0xff] %v14501_v24  ;;  %5142 = vst [vmem:[#allocation2 + $0xb1] sm:$0xff] %v14501_v24 }
 0x3fb   :  { %v14508_v38 = vpop.trf.xlu0 }
 0x3fc   :  { %4336 = vmatmul.mubr.bf16.gmra.mrb[216].mxu1 %v3122_v58  ;;  %17481 = vst [vmem:[#allocation11_spill] sm:$0xff] %v14508_v38  ;;  %5143 = vst [vmem:[#allocation2 + $0xc1] sm:$0xff] %v14508_v38  ;;  %v3103_v58 = vld [vmem:[#allocation2 + $0x109] sm:$0xff] }
 0x3fd   :  { %4489 = vmatmul.mubr.bf16.gmra.mrb[244].mxu0 %v14231_v40  ;;  %4343 = vmatprep.mubr.bf16.mxu1 %v14262_v54  ;;  %v3124_v40 = vpack.c.bf16 %v3100_v21, %v3099_v3  ;;  %v14513_v54 = vld [vmem:[#allocation2 + $0xca] sm:$0xff]  ;;  %v14520_v3 = vld [vmem:[#allocation2 + $0xda] sm:$0xff]  ;;  %v14522_v21 = vpop.trf.xlu1 }
 0x3fe   :  { %4496 = vmatprep.mubr.bf16.mxu0 %v3123_v0  ;;  %17483 = vst [vmem:[#allocation13_spill] sm:$0xff] %v14522_v21  ;;  %5145 = vst [vmem:[#allocation2 + $0xd9] sm:$0xff] %v14522_v21 }
 0x3ff   :  { %v14515_v5 = vpop.trf.xlu0 }
 0x400   :  { %17482 = vst [vmem:[#allocation12_spill] sm:$0xff] %v14515_v5  ;;  %5144 = vst [vmem:[#allocation2 + $0xc9] sm:$0xff] %v14515_v5 }
 0x404   :  { %4344 = vmatmul.mubr.bf16.gmra.mrb[220].mxu1 %v3123_v0  ;;  %v3125_v0 = vpack.c.bf16 %v3102_v56, %v3101_v53  ;;  %v14532_v53 = vld [vmem:[#allocation2 + $0xf2] sm:$0xff] }
 0x405   :  { %4497 = vmatmul.mubr.bf16.gmra.mrb[248].mxu0 %v14244_v44  ;;  %4351 = vmatprep.mubr.bf16.mxu1 %v14272_v16  ;;  %v14527_v44 = vld [vmem:[#allocation2 + $0xe2] sm:$0xff]  ;;  %v14529_v16 = vpop.trf.xlu1 }
 0x406   :  { %4504 = vmatprep.mubr.bf16.mxu0 %v3124_v40  ;;  %17484 = vst [vmem:[#allocation14_spill] sm:$0xff] %v14529_v16  ;;  %5146 = vst [vmem:[#allocation2 + $0xe1] sm:$0xff] %v14529_v16 }
 0x409   :  { %v14534_v56 = vpop.trf.xlu1 }
 0x40a   :  { %17485 = vst [vmem:[#allocation15_spill] sm:$0xff] %v14534_v56  ;;  %5147 = vst [vmem:[#allocation2 + $0xf1] sm:$0xff] %v14534_v56 }
 0x40c   :  { %4352 = vmatmul.mubr.bf16.gmra.mrb[224].mxu1 %v3124_v40  ;;  %v3126_v40 = vpack.c.bf16 %v3104_v46, %v3103_v58  ;;  %v3106_v46 = vld [vmem:[#allocation2 + $0x129] sm:$0xff] }
 0x40d   :  { %4505 = vmatmul.mubr.bf16.gmra.mrb[252].mxu0 %v14257_v33  ;;  %4359 = vmatprep.mubr.bf16.mxu1 %v14282_v25  ;;  %v14539_v33 = vld [vmem:[#allocation2 + $0xfa] sm:$0xff]  ;;  %v14541_v25 = vpop.trf.xlu1 }
 0x40e   :  { %4512 = vmatprep.mubr.bf16.mxu0 %v3125_v0  ;;  %17486 = vst [vmem:[#allocation16_spill] sm:$0xff] %v14541_v25  ;;  %5148 = vst [vmem:[#allocation2 + $0xf9] sm:$0xff] %v14541_v25  ;;  %v3110_v25 = vld [vmem:[#allocation2 + $0x159] sm:$0xff] }
 0x414   :  { %4360 = vmatmul.mubr.bf16.gmra.mrb[228].mxu1 %v3125_v0  ;;  %v3105_v0 = vld [vmem:[#allocation2 + $0x121] sm:$0xff] }
 0x415   :  { %4513 = vmatmul.mubr.bf16.gmra.mrb[0].mxu0 %v14266_v22  ;;  %4367 = vmatprep.mubr.bf16.mxu1 %v14292_v6  ;;  %v3127_v58 = vpack.c.bf16 %v3106_v46, %v3105_v0  ;;  %v14548_v22 = vpop.trf.xlu1  ;;  %v14553_v6 = vld [vmem:[#allocation2 + $0x112] sm:$0xff]  ;;  %v3108_v0 = vld [vmem:[#allocation2 + $0x141] sm:$0xff] }
 0x416   :  { %4520 = vmatprep.mubr.bf16.mxu0 %v3126_v40  ;;  %17487 = vst [vmem:[#allocation17_spill] sm:$0xff] %v14548_v22  ;;  %5149 = vst [vmem:[#allocation2 + $0x109] sm:$0xff] %v14548_v22 }
 0x419   :  { %v14555_v11 = vpop.trf.xlu1 }
 0x41a   :  { %17488 = vst [vmem:[#allocation18_spill] sm:$0xff] %v14555_v11  ;;  %5150 = vst [vmem:[#allocation2 + $0x111] sm:$0xff] %v14555_v11 }
 0x41c   :  { %4368 = vmatmul.mubr.bf16.gmra.mrb[232].mxu1 %v3126_v40  ;;  %v3107_v40 = vld [vmem:[#allocation2 + $0x139] sm:$0xff] }
 0x41d   :  { %4521 = vmatmul.mubr.bf16.gmra.mrb[4].mxu0 %v14276_v9  ;;  %4375 = vmatprep.mubr.bf16.mxu1 %v14302_v28  ;;  %v3128_v46 = vpack.c.bf16 %v3108_v0, %v3107_v40  ;;  %v14562_v9 = vpop.trf.xlu1  ;;  %v3109_v0 = vld [vmem:[#allocation2 + $0x151] sm:$0xff] }
 0x41e   :  { %4528 = vmatprep.mubr.bf16.mxu0 %v3127_v58  ;;  %17489 = vst [vmem:[#allocation19_spill] sm:$0xff] %v14562_v9  ;;  %5151 = vst [vmem:[#allocation2 + $0x121] sm:$0xff] %v14562_v9  ;;  %v3129_v2 = vpack.c.bf16 %v3110_v25, %v3109_v0  ;;  %v14589_v0 = vld [vmem:[#allocation2 + $0x142] sm:$0xff] }
 0x421   :  { %v14571_v17 = vpop.trf.xlu1 }
 0x422   :  { %17490 = vst [vmem:[#allocation20_spill] sm:$0xff] %v14571_v17 }
 0x424   :  { %4376 = vmatmul.mubr.bf16.gmra.mrb[236].mxu1 %v3127_v58 }
 0x425   :  { %4529 = vmatmul.mubr.bf16.gmra.mrb[8].mxu0 %v14286_v35  ;;  %4383 = vmatprep.mubr.bf16.mxu1 %v14318_v34  ;;  %v14569_v34 = vld [vmem:[#allocation2 + $0x12a] sm:$0xff] }
 0x426   :  { %4536 = vmatprep.mubr.bf16.mxu0 %v3128_v46  ;;  %5152 = vst [vmem:[#allocation2 + $0x129] sm:$0xff] %v14571_v17 }
 0x427   :  { %v10727_v28 = vpop.f32.mrb[132].mxu1 }
 0x428   :  { %v10833_v31 = vpop.f32.mrb[160].mxu0  ;;  %v10728_v23 = vpop.f32.mrb[133].mxu1 }
 0x429   :  { %v10729_v56 = vadd.f32 %v10728_v23, %v10727_v28  ;;  %v10834_v58 = vpop.f32.mrb[161].mxu0  ;;  %v10730_v40 = vpop.f32.mrb[134].mxu1 }
 0x42a   :  { %v10835_v21 = vadd.f32 %v10834_v58, %v10833_v31  ;;  %v10836_v16 = vpop.f32.mrb[162].mxu0  ;;  %v10731_v5 = vpop.f32.mrb[135].mxu1 }
 0x42b   :  { %v10732_v35 = vadd.f32 %v10731_v5, %v10730_v40  ;;  %v10837_v38 = vpop.f32.mrb[163].mxu0  ;;  %v14582_v5 = vld [vmem:[#allocation2 + $0x13a] sm:$0xff]  ;;  %v14584_v28 = vpop.trf.xlu1 }
 0x42c   :  { %v14574_v24 = vadd.f32 %v10835_v21, %v14304_v49  ;;  %v10838_v63 = vadd.f32 %v10837_v38, %v10836_v16  ;;  %4384 = vmatmul.mubr.bf16.gmra.mrb[240].mxu1 %v3128_v46  ;;  %17493 = vst [vmem:[#allocation23_spill] sm:$0xff] %v14584_v28  ;;  %5153 = vst [vmem:[#allocation2 + $0x139] sm:$0xff] %v14584_v28  ;;  %v3181_v28 = vpack.c.bf16 %v14378_v32, %v14362_v7 }
 0x42d   :  { %4537 = vmatmul.mubr.bf16.gmra.mrb[12].mxu0 %v14296_v36  ;;  %4391 = vmatprep.mubr.bf16.mxu1 %v14330_v18  ;;  %v3111_v18 = vld [vmem:[#allocation2 + $0x169] sm:$0xff] }
 0x42e   :  { %17491 = vst [vmem:[#allocation21_spill] sm:$0xff] %v14574_v24  ;;  %v14580_v31 = vadd.f32 %v10838_v63, %v14312_v20  ;;  %4544 = vmatprep.mubr.bf16.mxu0 %v3129_v2  ;;  %v3130_v24 = vpack.c.bf16 %v14316_v62, %v3111_v18 }
 0x42f   :  { %v10733_v23 = vpop.f32.mrb[136].mxu1  ;;  %v14591_v22 = vpop.trf.xlu1 }
 0x430   :  { %17492 = vst [vmem:[#allocation22_spill] sm:$0xff] %v14580_v31  ;;  %v10839_v49 = vpop.f32.mrb[164].mxu0  ;;  %v10734_v21 = vpop.f32.mrb[137].mxu1  ;;  %17494 = vst [vmem:[#allocation24_spill] sm:$0xff] %v14591_v22 }
 0x431   :  { %v10735_v16 = vadd.f32 %v10734_v21, %v10733_v23  ;;  %v10840_v36 = vpop.f32.mrb[165].mxu0  ;;  %v10736_v25 = vpop.f32.mrb[138].mxu1  ;;  %5154 = vst [vmem:[#allocation2 + $0x141] sm:$0xff] %v14591_v22  ;;  %v14601_v21 = vld [vmem:[#allocation2 + $0x152] sm:$0xff] }
 0x432   :  { %v10841_v46 = vadd.f32 %v10840_v36, %v10839_v49  ;;  %v10842_v20 = vpop.f32.mrb[166].mxu0  ;;  %v10737_v63 = vpop.f32.mrb[139].mxu1  ;;  %v14630_v22 = vld [vmem:[#allocation2 + $0x172] sm:$0xff] }
 0x433   :  { %v10738_v58 = vadd.f32 %v10737_v63, %v10736_v25  ;;  %v10843_v40 = vpop.f32.mrb[167].mxu0  ;;  %v14603_v36 = vpop.trf.xlu1 }
 0x434   :  { %v14593_v11 = vadd.f32 %v10841_v46, %v10729_v56  ;;  %v10844_v31 = vadd.f32 %v10843_v40, %v10842_v20  ;;  %4392 = vmatmul.mubr.bf16.gmra.mrb[244].mxu1 %v3129_v2  ;;  %v2987_v46 = vld [vmem:[#allocation2 + $0x182] sm:$0xff]  ;;  %v2988_v2 = vld [vmem:[#allocation2 + $0x18a] sm:$0xff]  ;;  %5155 = vst [vmem:[#allocation2 + $0x151] sm:$0xff] %v14603_v36 }
 0x435   :  { %4545 = vmatmul.mubr.bf16.gmra.mrb[16].mxu0 %v14308_v10  ;;  %4399 = vmatprep.mubr.bf16.mxu1 %v14339_v26  ;;  %v14608_v17 = vpack.c.bf16 %v2988_v2, %v2987_v46  ;;  %v3115_v46 = vld [vmem:[#allocation2 + $0x199] sm:$0xff]  ;;  %v3116_v2 = vld [vmem:[#allocation2 + $0x1a1] sm:$0xff] }
 0x436   :  { %17495 = vst [vmem:[#allocation25_spill] sm:$0xff] %v14593_v11  ;;  %v14599_v23 = vadd.f32 %v10844_v31, %v10732_v35  ;;  %4552 = vmatprep.mubr.bf16.mxu0 %v3130_v24  ;;  %v3113_v35 = vld [vmem:[#allocation2 + $0x181] sm:$0xff]  ;;  %v3114_v31 = vld [vmem:[#allocation2 + $0x189] sm:$0xff] }
 0x437   :  { %v10739_v49 = vpop.f32.mrb[140].mxu1  ;;  %17497 = vst [vmem:[#allocation27_spill] sm:$0xff] %v14608_v17  ;;  %v14612_v11 = vpop.trf.xlu1 }
 0x438   :  { %17496 = vst [vmem:[#allocation26_spill] sm:$0xff] %v14599_v23  ;;  %v10845_v56 = vpop.f32.mrb[168].mxu0  ;;  %v10740_v25 = vpop.f32.mrb[141].mxu1  ;;  %v14610_v23 = vld [vmem:[#allocation2 + $0x15a] sm:$0xff] }
 0x439   :  { %v10741_v10 = vadd.f32 %v10740_v25, %v10739_v49  ;;  %v10846_v18 = vpop.f32.mrb[169].mxu0  ;;  %v10742_v26 = vpop.f32.mrb[142].mxu1  ;;  %v3131_v49 = vpack.c.bf16 %v3114_v31, %v3113_v35  ;;  %5156 = vst [vmem:[#allocation2 + $0x159] sm:$0xff] %v14612_v11 }
 0x43a   :  { %v10847_v20 = vadd.f32 %v10846_v18, %v10845_v56  ;;  %v10848_v63 = vpop.f32.mrb[170].mxu0  ;;  %v10743_v40 = vpop.f32.mrb[143].mxu1  ;;  %v14621_v18 = vld [vmem:[#allocation2 + $0x16a] sm:$0xff] }
 0x43b   :  { %v10744_v38 = vadd.f32 %v10743_v40, %v10742_v26  ;;  %v10849_v9 = vpop.f32.mrb[171].mxu0  ;;  %v14623_v26 = vpop.trf.xlu1 }
 0x43c   :  { %v14614_v13 = vadd.f32 %v10847_v20, %v10735_v16  ;;  %v10850_v61 = vadd.f32 %v10849_v9, %v10848_v63  ;;  %4400 = vmatmul.mubr.bf16.gmra.mrb[248].mxu1 %v3130_v24  ;;  %5157 = vst [vmem:[#allocation2 + $0x169] sm:$0xff] %v14623_v26  ;;  %v3132_v63 = vpack.c.bf16 %v3116_v2, %v3115_v46  ;;  %v5225_v2 = vld [vmem:[#allocation2 + $0x1] sm:$0xff] }
 0x43d   :  { %4553 = vmatmul.mubr.bf16.gmra.mrb[20].mxu0 %v14325_v19  ;;  %4407 = vmatprep.mubr.bf16.mxu1 %v14608_v17 }
 0x43e   :  { %17498 = vst [vmem:[#allocation28_spill] sm:$0xff] %v14614_v13  ;;  %v14619_v56 = vadd.f32 %v10850_v61, %v10738_v58  ;;  %4560 = vmatprep.mubr.bf16.mxu0 %v3131_v49 }
 0x43f   :  { %v10745_v25 = vpop.f32.mrb[144].mxu1 }
 0x440   :  { %17499 = vst [vmem:[#allocation29_spill] sm:$0xff] %v14619_v56  ;;  %v10851_v16 = vpop.f32.mrb[172].mxu0  ;;  %v10746_v9 = vpop.f32.mrb[145].mxu1 }
 0x441   :  { %v10747_v19 = vadd.f32 %v10746_v9, %v10745_v25  ;;  %v10852_v35 = vpop.f32.mrb[173].mxu0  ;;  %v10748_v31 = vpop.f32.mrb[146].mxu1 }
 0x442   :  { %v10853_v61 = vadd.f32 %v10852_v35, %v10851_v16  ;;  %v10854_v58 = vpop.f32.mrb[174].mxu0  ;;  %v10749_v20 = vpop.f32.mrb[147].mxu1  ;;  %v5226_v16 = vld [vmem:[#allocation2 + $0x9] sm:$0xff] }
 0x443   :  { %v10750_v40 = vadd.f32 %v10749_v20, %v10748_v31  ;;  %v10855_v62 = vpop.f32.mrb[175].mxu0  ;;  %v14632_v56 = vpop.trf.xlu1 }
 0x444   :  { %v14634_v13 = vadd.f32 %v10853_v61, %v10741_v10  ;;  %v10856_v17 = vadd.f32 %v10855_v62, %v10854_v58  ;;  %4408 = vmatmul.mubr.bf16.gmra.mrb[252].mxu1 %v3131_v49  ;;  %5158 = vst [vmem:[#allocation2 + $0x171] sm:$0xff] %v14632_v56  ;;  %v3068_v49 = vpack.c.bf16 %v14214_v15, %v14214_v15  ;;  %v12478_v61 = vld [vmem:[%s17424_s1 + $0x80] sm:$0xff]   ;;  %v12480_v15 = vld [vmem:[%s17424_s1 + $0xc8] sm:$0xff]  }
 0x445   :  { %4561 = vmatmul.mubr.bf16.gmra.mrb[24].mxu0 %v14334_v59  ;;  %12185 = vmatprep.mubr.bf16.mxu1 %v3181_v28  ;;  %v17533_v24 = vld [vmem:[#allocation28_spill] sm:$0xff] }
 0x446   :  { %v14638_v25 = vadd.f32 %v10856_v17, %v10744_v38  ;;  %4568 = vmatprep.mubr.bf16.mxu0 %v3132_v63  ;;  %v3182_v17 = vpack.c.bf16 %v14410_v37, %v14394_v8  ;;  %v5257_v38 = vpack.c.bf16 %v5226_v16, %v5225_v2  ;;  %v3183_v63 = vpack.c.bf16 %v14442_v55, %v14426_v57  ;;  %v12481_v37 = vld [vmem:[%s17424_s1 + $0x88] sm:$0xff]   ;;  %v12482_v57 = vld [vmem:[%s17424_s1 + $0xd0] sm:$0xff]  }
 0x447   :  { %v10751_v46 = vpop.f32.mrb[148].mxu1 }
 0x448   :  { %v10857_v7 = vpop.f32.mrb[176].mxu0  ;;  %v10752_v32 = vpop.f32.mrb[149].mxu1 }
 0x449   :  { %v10753_v10 = vadd.f32 %v10752_v32, %v10751_v46  ;;  %v10858_v35 = vpop.f32.mrb[177].mxu0  ;;  %v10754_v62 = vpop.f32.mrb[150].mxu1 }
 0x44a   :  { %v10859_v31 = vadd.f32 %v10858_v35, %v10857_v7  ;;  %v10860_v59 = vpop.f32.mrb[178].mxu0  ;;  %v10755_v28 = vpop.f32.mrb[151].mxu1 }
 0x44b   :  { %v10756_v58 = vadd.f32 %v10755_v28, %v10754_v62  ;;  %v10861_v20 = vpop.f32.mrb[179].mxu0  ;;  %v12479_v28 = vld [vmem:[%s17424_s1 + $0x100] sm:$0xff]  }
 0x44c   :  { %v14654_v46 = vadd.f32 %v10859_v31, %v10747_v19  ;;  %v10862_v7 = vadd.f32 %v10861_v20, %v10860_v59  ;;  %12186 = vmatmul.mubr.bf16.vlgmr.msra.gmra.mrb[0].mxu1 %v3182_v17  ;;  %v3184_v59 = vpack.c.bf16 %v14471_v29, %v14458_v42  ;;  %v12483_v20 = vld [vmem:[%s17424_s1 + $0x148] sm:$0xff]  }
 0x44d   :  { %4569 = vmatmul.mubr.bf16.gmra.mrb[28].mxu0 %v3068_v49  ;;  %12189 = vmatprep.mubr.bf16.mxu1 %v3183_v63  ;;  %v12484_v63 = vld [vmem:[%s17424_s1 + $0x90] sm:$0xff]  }
 0x44e   :  { %v14656_v8 = vadd.f32 %v10862_v7, %v10750_v40  ;;  %6489 = vmatprep.mubr.bf16.mxu0 %v5257_v38  ;;  %11290 = vmatpush3.bf16.msra.mxu1 %v12478_v61  ;;  %v3185_v61 = vpack.c.bf16 %v14485_v60, %v14478_v14  ;;  %v17500_v60 = vpack.c.bf16 %v14353_v30, %v14344_v39  ;;  %v5164_v39 = vld [vmem:[#allocation2 + $0x20] sm:$0xff] }
 0x44f   :  { %v10757_v2 = vpop.f32.mrb[152].mxu1  ;;  %11291 = vmatprep.subr.bf16.mxu1 %v12480_v15  ;;  %v12486_v15 = vld [vmem:[%s17424_s1 + $0xd8] sm:$0xff]   ;;  %v12488_v30 = vld [vmem:[%s17424_s1 + $0xe0] sm:$0xff]  }
 0x450   :  { %v10863_v55 = vpop.f32.mrb[180].mxu0  ;;  %v10758_v19 = vpop.f32.mrb[153].mxu1 }
 0x451   :  { %v10759_v16 = vadd.f32 %v10758_v19, %v10757_v2  ;;  %v10864_v32 = vpop.f32.mrb[181].mxu0  ;;  %v10760_v35 = vpop.f32.mrb[154].mxu1 }
 0x452   :  { %v10865_v62 = vadd.f32 %v10864_v32, %v10863_v55  ;;  %v10866_v40 = vpop.f32.mrb[182].mxu0  ;;  %v10761_v31 = vpop.f32.mrb[155].mxu1  ;;  %11292 = vmatpush3.bf16.msra.mxu1 %v12481_v37  ;;  %v12487_v37 = vld [vmem:[%s17424_s1 + $0x98] sm:$0xff]  }
 0x453   :  { %v10762_v17 = vadd.f32 %v10761_v31, %v10760_v35  ;;  %v10867_v38 = vpop.f32.mrb[183].mxu0  ;;  %11293 = vmatprep.subr.bf16.mxu1 %v12482_v57  ;;  %v5163_v57 = vld [vmem:[#allocation2 + $0x18] sm:$0xff]  ;;  %v3186_v31 = vpack.c.bf16 %v14499_v4, %v14492_v51 }
 0x454   :  { %v14677_v42 = vadd.f32 %v10865_v62, %v10753_v10  ;;  %v10868_v29 = vadd.f32 %v10867_v38, %v10866_v40  ;;  %12190 = vmatmul.mubr.bf16.gmra.mrb[4].mxu1 %v3184_v59  ;;  %v12485_v10 = vld [vmem:[%s17424_s1 + $0x108] sm:$0xff]   ;;  %v12491_v59 = vld [vmem:[%s17424_s1 + $0x110] sm:$0xff]   ;;  %v12495_v51 = vld [vmem:[%s17424_s1 + $0x158] sm:$0xff]  }
 0x455   :  { %6490 = vmatmul.mubr.bf16.vlgmr.msra.gmra.mrb[32].mxu0 %v3068_v49  ;;  %12193 = vmatprep.mubr.bf16.mxu1 %v3185_v61  ;;  %v12489_v49 = vld [vmem:[%s17424_s1 + $0x150] sm:$0xff]   ;;  %v14704_v61 = vpack.c.bf16 %v5164_v39, %v5163_v57 }
 0x456   :  { %v14682_v14 = vadd.f32 %v10868_v29, %v10756_v58  ;;  %11402 = vmatpush3.bf16.msra.mxu0 %v12479_v28  ;;  %6497 = vmatprep.mubr.bf16.mxu0 %v17500_v60 }
 0x457   :  { %v10763_v7 = vpop.f32.mrb[156].mxu1  ;;  %11403 = vmatprep.subr.bf16.mxu0 %v12483_v20  ;;  %11294 = vmatpush3.bf16.msra.mxu1 %v12484_v63  ;;  %v3187_v20 = vpack.c.bf16 %v14513_v54, %v14506_v43  ;;  %v12490_v63 = vld [vmem:[%s17424_s1 + $0xa0] sm:$0xff]   ;;  %v17501_v54 = vpack.c.bf16 %v14380_v1, %v14364_v41  ;;  %v5165_v41 = vld [vmem:[#allocation2 + $0x30] sm:$0xff]  ;;  %v5166_v1 = vld [vmem:[#allocation2 + $0x38] sm:$0xff] }
 0x458   :  { %v10869_v58 = vpop.f32.mrb[184].mxu0  ;;  %v10764_v2 = vpop.f32.mrb[157].mxu1  ;;  %11295 = vmatprep.subr.bf16.mxu1 %v12486_v15  ;;  %v12492_v15 = vld [vmem:[%s17424_s1 + $0xe8] sm:$0xff]  }
 0x459   :  { %v10765_v55 = vadd.f32 %v10764_v2, %v10763_v7  ;;  %v10870_v19 = vpop.f32.mrb[185].mxu0  ;;  %v10766_v32 = vpop.f32.mrb[158].mxu1 }
 0x45a   :  { %v10871_v35 = vadd.f32 %v10870_v19, %v10869_v58  ;;  %v10872_v62 = vpop.f32.mrb[186].mxu0  ;;  %v10767_v40 = vpop.f32.mrb[159].mxu1  ;;  %11404 = vmatpush3.bf16.msra.mxu0 %v12485_v10  ;;  %v12493_v10 = vld [vmem:[%s17424_s1 + $0xa8] sm:$0xff]  }
 0x45b   :  { %v10768_v28 = vadd.f32 %v10767_v40, %v10766_v32  ;;  %v10873_v38 = vpop.f32.mrb[187].mxu0  ;;  %11296 = vmatpush3.bf16.msra.mxu1 %v12487_v37  ;;  %11405 = vmatprep.subr.bf16.mxu0 %v12489_v49  ;;  %v12494_v49 = vld [vmem:[%s17424_s1 + $0xf0] sm:$0xff]   ;;  %v3188_v32 = vpack.c.bf16 %v14527_v44, %v14520_v3  ;;  %v12504_v3 = vld [vmem:[%s17424_s1 + $0x168] sm:$0xff]  }
 0x45c   :  { %v14714_v4 = vadd.f32 %v10871_v35, %v10759_v16  ;;  %v10874_v29 = vadd.f32 %v10873_v38, %v10872_v62  ;;  %12194 = vmatmul.mubr.bf16.gmra.mrb[8].mxu1 %v3186_v31  ;;  %11297 = vmatprep.subr.bf16.mxu1 %v12488_v30  ;;  %v12497_v16 = vld [vmem:[%s17424_s1 + $0x118] sm:$0xff]   ;;  %v12502_v35 = vld [vmem:[%s17424_s1 + $0x120] sm:$0xff]   ;;  %v14742_v31 = vpack.c.bf16 %v5166_v1, %v5165_v41  ;;  %v12496_v38 = vld [vmem:[%s17424_s1 + $0xb0] sm:$0xff]  }
 0x45d   :  { %6498 = vmatmul.mubr.bf16.gmra.mrb[36].mxu0 %v14704_v61  ;;  %12197 = vmatprep.mubr.bf16.mxu1 %v3187_v20  ;;  %v3190_v1 = vpack.c.bf16 %v14553_v6, %v14546_v12 }
 0x45e   :  { %v14720_v43 = vadd.f32 %v10874_v29, %v10762_v17  ;;  %6505 = vmatprep.mubr.bf16.mxu0 %v17501_v54  ;;  %11406 = vmatpush3.bf16.msra.mxu0 %v12491_v59  ;;  %v12500_v17 = vld [vmem:[%s17424_s1 + $0x160] sm:$0xff]   ;;  %v3189_v59 = vpack.c.bf16 %v14539_v33, %v14532_v53  ;;  %v17502_v33 = vpack.c.bf16 %v14412_v52, %v14396_v27  ;;  %v12499_v29 = vld [vmem:[%s17424_s1 + $0xb8] sm:$0xff]   ;;  %v5167_v27 = vld [vmem:[#allocation2 + $0x48] sm:$0xff] }
 0x45f   :  { %v10769_v60 = vpop.f32.mrb[160].mxu1  ;;  %11298 = vmatpush3.bf16.msra.mxu1 %v12490_v63  ;;  %11407 = vmatprep.subr.bf16.mxu0 %v12495_v51  ;;  %v12498_v63 = vld [vmem:[%s17424_s1 + $0xf8] sm:$0xff]   ;;  %v5168_v52 = vld [vmem:[#allocation2 + $0x50] sm:$0xff] }
 0x460   :  { %v10875_v7 = vpop.f32.mrb[188].mxu0  ;;  %v10770_v37 = vpop.f32.mrb[161].mxu1  ;;  %11299 = vmatprep.subr.bf16.mxu1 %v12492_v15 }
 0x461   :  { %v10771_v58 = vadd.f32 %v10770_v37, %v10769_v60  ;;  %v10876_v2 = vpop.f32.mrb[189].mxu0  ;;  %v10772_v57 = vpop.f32.mrb[162].mxu1 }
 0x462   :  { %v10877_v39 = vadd.f32 %v10876_v2, %v10875_v7  ;;  %v10878_v30 = vpop.f32.mrb[190].mxu0  ;;  %v10773_v19 = vpop.f32.mrb[163].mxu1  ;;  %11408 = vmatpush3.bf16.msra.mxu0 %v12497_v16  ;;  %v12501_v16 = vld [vmem:[%s17424_s1 + $0x1c0] sm:$0xff]  }
 0x463   :  { %v10774_v62 = vadd.f32 %v10773_v19, %v10772_v57  ;;  %v10879_v40 = vpop.f32.mrb[191].mxu0  ;;  %11300 = vmatpush3.bf16.msra.mxu1 %v12493_v10  ;;  %11409 = vmatprep.subr.bf16.mxu0 %v12500_v17  ;;  %v12512_v19 = vld [vmem:[%s17424_s1 + $0x178] sm:$0xff]  }
 0x464   :  { %v14752_v44 = vadd.f32 %v10877_v39, %v10765_v55  ;;  %v10880_v20 = vadd.f32 %v10879_v40, %v10878_v30  ;;  %12198 = vmatmul.mubr.bf16.gmra.mrb[12].mxu1 %v3188_v32  ;;  %11301 = vmatprep.subr.bf16.mxu1 %v12494_v49  ;;  %v12506_v55 = vld [vmem:[%s17424_s1 + $0x128] sm:$0xff]   ;;  %v12510_v49 = vld [vmem:[%s17424_s1 + $0x130] sm:$0xff]   ;;  %v14780_v39 = vpack.c.bf16 %v5168_v52, %v5167_v27  ;;  %v5127_v52 = vpop.trf.xlu1 }
 0x465   :  { %6506 = vmatmul.mubr.bf16.gmra.mrb[40].mxu0 %v14742_v31  ;;  %12201 = vmatprep.mubr.bf16.mxu1 %v3189_v59  ;;  %v3191_v30 = vpack.c.bf16 %v14569_v34, %v14560_v50  ;;  %v12514_v50 = vld [vmem:[%s17424_s1 + $0x138] sm:$0xff]   ;;  %5159 = vst [vmem:[#allocation2 + $0x181] sm:$0xff] %v5127_v52 }
 0x466   :  { %v14758_v53 = vadd.f32 %v10880_v20, %v10768_v28  ;;  %6513 = vmatprep.mubr.bf16.mxu0 %v17502_v33  ;;  %11410 = vmatpush3.bf16.msra.mxu0 %v12502_v35  ;;  %v12508_v28 = vld [vmem:[%s17424_s1 + $0x170] sm:$0xff]   ;;  %v17503_v35 = vpack.c.bf16 %v14444_v48, %v14428_v47 }
 0x467   :  { %v10775_v51 = vpop.f32.mrb[164].mxu1  ;;  %11302 = vmatpush3.bf16.msra.mxu1 %v12496_v38  ;;  %11411 = vmatprep.subr.bf16.mxu0 %v12504_v3  ;;  %v5170_v38 = vld [vmem:[#allocation2 + $0x68] sm:$0xff] }
 0x468   :  { %v10881_v15 = vpop.f32.mrb[192].mxu0  ;;  %v10776_v54 = vpop.f32.mrb[165].mxu1  ;;  %11303 = vmatprep.subr.bf16.mxu1 %v12498_v63 }
 0x469   :  { %v10777_v60 = vadd.f32 %v10776_v54, %v10775_v51  ;;  %v10882_v10 = vpop.f32.mrb[193].mxu0  ;;  %v10778_v17 = vpop.f32.mrb[166].mxu1 }
 0x46a   :  { %v10883_v7 = vadd.f32 %v10882_v10, %v10881_v15  ;;  %v10884_v37 = vpop.f32.mrb[194].mxu0  ;;  %v10779_v41 = vpop.f32.mrb[167].mxu1  ;;  %11412 = vmatpush3.bf16.msra.mxu0 %v12506_v55  ;;  %v3192_v55 = vpack.c.bf16 %v14589_v0, %v14582_v5  ;;  %v3193_v15 = vpack.c.bf16 %v14610_v23, %v14601_v21  ;;  %v17504_v5 = vld [vmem:[#allocation6_spill] sm:$0xff] }
 0x46b   :  { %v10780_v2 = vadd.f32 %v10779_v41, %v10778_v17  ;;  %v10885_v57 = vpop.f32.mrb[195].mxu0  ;;  %11304 = vmatpush3.bf16.msra.mxu1 %v12499_v29  ;;  %11413 = vmatprep.subr.bf16.mxu0 %v12508_v28  ;;  %v17505_v0 = vpack.c.bf16 %v14473_v45, %v17504_v5  ;;  %v5171_v21 = vld [vmem:[#allocation2 + $0x78] sm:$0xff]  ;;  %v5128_v45 = vpop.trf.xlu1 }
 0x46c   :  { %v14787_v32 = vadd.f32 %v10883_v7, %v10771_v58  ;;  %v10886_v12 = vadd.f32 %v10885_v57, %v10884_v37  ;;  %12202 = vmatmul.mubr.bf16.gmra.mrb[16].mxu1 %v3190_v1  ;;  %11513 = vmatprep.subr.bf16.mxu1 %v12501_v16  ;;  %v14801_v58 = vld [vmem:[%s17424_s1 + $0x200] sm:$0xff]   ;;  %5160 = vst [vmem:[#allocation2 + $0x189] sm:$0xff] %v5128_v45  ;;  %v5175_v45 = vld [vmem:[#allocation2 + $0xa8] sm:$0xff] }
 0x46d   :  { %6514 = vmatmul.mubr.bf16.gmra.mrb[44].mxu0 %v14780_v39  ;;  %12205 = vmatprep.mubr.bf16.mxu1 %v3191_v30  ;;  %v5172_v7 = vld [vmem:[#allocation2 + $0x80] sm:$0xff] }
 0x46e   :  { %v14790_v6 = vadd.f32 %v10886_v12, %v10774_v62  ;;  %6521 = vmatprep.mubr.bf16.mxu0 %v17503_v35  ;;  %11414 = vmatpush3.bf16.msra.mxu0 %v12510_v49  ;;  %v5169_v62 = vld [vmem:[#allocation2 + $0x60] sm:$0xff]  ;;  %v14820_v12 = vpack.c.bf16 %v5172_v7, %v5171_v21  ;;  %v5290_v7 = vld [vmem:[#allocation2 + $0xa] sm:$0xff] }
 0x46f   :  { %v10781_v34 = vpop.f32.mrb[168].mxu1  ;;  %11415 = vmatprep.subr.bf16.mxu0 %v12512_v19  ;;  %v14805_v28 = vpack.c.bf16 %v5170_v38, %v5169_v62  ;;  %v17507_v38 = vld [vmem:[#allocation8_spill] sm:$0xff] }
 0x470   :  { %v10887_v40 = vpop.f32.mrb[196].mxu0  ;;  %v10782_v59 = vpop.f32.mrb[169].mxu1  ;;  %v5289_v21 = vld [vmem:[#allocation2 + $0x2] sm:$0xff] }
 0x471   :  { %v10783_v3 = vadd.f32 %v10782_v59, %v10781_v34  ;;  %v10888_v20 = vpop.f32.mrb[197].mxu0  ;;  %v10784_v47 = vpop.f32.mrb[170].mxu1  ;;  %v17506_v34 = vld [vmem:[#allocation27_spill] sm:$0xff] }
 0x472   :  { %v10889_v48 = vadd.f32 %v10888_v20, %v10887_v40  ;;  %v10890_v63 = vpop.f32.mrb[198].mxu0  ;;  %v10785_v33 = vpop.f32.mrb[171].mxu1  ;;  %11416 = vmatpush3.bf16.msra.mxu0 %v12514_v50  ;;  %v3179_v40 = vld [vmem:[#allocation2 + $0x19a] sm:$0xff]  ;;  %v3180_v59 = vld [vmem:[#allocation2 + $0x1a2] sm:$0xff] }
 0x473   :  { %v10786_v51 = vadd.f32 %v10785_v33, %v10784_v47  ;;  %v10891_v29 = vpop.f32.mrb[199].mxu0  ;;  %12217 = vmatprep.subr.bf16.mxu0 %v14801_v58  ;;  %v5174_v33 = vld [vmem:[#allocation2 + $0x98] sm:$0xff] }
 0x474   :  { %v14810_v54 = vadd.f32 %v10889_v48, %v10777_v60  ;;  %v10892_v27 = vadd.f32 %v10891_v29, %v10890_v63  ;;  %12206 = vmatmul.mubr.bf16.gmra.mrb[20].mxu1 %v3192_v55  ;;  %v5173_v63 = vld [vmem:[#allocation2 + $0x90] sm:$0xff] }
 0x475   :  { %6522 = vmatmul.mubr.bf16.gmra.mrb[48].mxu0 %v14805_v28  ;;  %12209 = vmatprep.mubr.bf16.mxu1 %v3193_v15 }
 0x476   :  { %v14813_v16 = vadd.f32 %v10892_v27, %v10780_v2  ;;  %6529 = vmatprep.mubr.bf16.mxu0 %v17505_v0  ;;  %v3194_v2 = vpack.c.bf16 %v14630_v22, %v14621_v18  ;;  %v17508_v22 = vld [vmem:[#allocation7_spill] sm:$0xff] }
 0x477   :  { %v10787_v10 = vpop.f32.mrb[172].mxu1  ;;  %v17509_v18 = vpack.c.bf16 %v17507_v38, %v17508_v22 }
 0x478   :  { %v10893_v17 = vpop.f32.mrb[200].mxu0  ;;  %v10788_v23 = vpop.f32.mrb[173].mxu1 }
 0x479   :  { %v10789_v60 = vadd.f32 %v10788_v23, %v10787_v10  ;;  %v10894_v37 = vpop.f32.mrb[201].mxu0  ;;  %v10790_v41 = vpop.f32.mrb[174].mxu1 }
 0x47a   :  { %v10895_v1 = vadd.f32 %v10894_v37, %v10893_v17  ;;  %v10896_v49 = vpop.f32.mrb[202].mxu0  ;;  %v10791_v57 = vpop.f32.mrb[175].mxu1 }
 0x47b   :  { %v10792_v30 = vadd.f32 %v10791_v57, %v10790_v41  ;;  %v10897_v19 = vpop.f32.mrb[203].mxu0  ;;  %v17510_v41 = vld [vmem:[#allocation10_spill] sm:$0xff] }
 0x47c   :  { %v14822_v35 = vadd.f32 %v10895_v1, %v10783_v3  ;;  %v10898_v50 = vadd.f32 %v10897_v19, %v10896_v49  ;;  %12210 = vmatmul.mubr.bf16.gmra.mrb[24].mxu1 %v3194_v2  ;;  %v3196_v3 = vpack.c.bf16 %v3180_v59, %v3179_v40  ;;  %v17511_v1 = vld [vmem:[#allocation9_spill] sm:$0xff] }
 0x47d   :  { %6530 = vmatmul.mubr.bf16.gmra.mrb[52].mxu0 %v14820_v12  ;;  %12213 = vmatprep.mubr.bf16.mxu1 %v17506_v34  ;;  %v17512_v49 = vpack.c.bf16 %v17510_v41, %v17511_v1  ;;  %v5177_v41 = vld [vmem:[#allocation2 + $0xc0] sm:$0xff] }
 0x47e   :  { %v14826_v62 = vadd.f32 %v10898_v50, %v10786_v51  ;;  %6537 = vmatprep.mubr.bf16.mxu0 %v17509_v18  ;;  %v14831_v51 = vpack.c.bf16 %v5174_v33, %v5173_v63  ;;  %v5321_v50 = vpack.c.bf16 %v5290_v7, %v5289_v21  ;;  %v17513_v33 = vld [vmem:[#allocation11_spill] sm:$0xff] }
 0x47f   :  { %v10793_v20 = vpop.f32.mrb[176].mxu1 }
 0x480   :  { %v10899_v47 = vpop.f32.mrb[204].mxu0  ;;  %v10794_v48 = vpop.f32.mrb[177].mxu1 }
 0x481   :  { %v10795_v55 = vadd.f32 %v10794_v48, %v10793_v20  ;;  %v10900_v29 = vpop.f32.mrb[205].mxu0  ;;  %v10796_v15 = vpop.f32.mrb[178].mxu1  ;;  %v12505_v48 = vld [vmem:[%s17424_s1 + $0x1c8] sm:$0xff]  }
 0x482   :  { %v10901_v27 = vadd.f32 %v10900_v29, %v10899_v47  ;;  %v10902_v52 = vpop.f32.mrb[206].mxu0  ;;  %v10797_v5 = vpop.f32.mrb[179].mxu1  ;;  %v17514_v29 = vld [vmem:[#allocation12_spill] sm:$0xff] }
 0x483   :  { %v10798_v0 = vadd.f32 %v10797_v5, %v10796_v15  ;;  %v10903_v10 = vpop.f32.mrb[207].mxu0  ;;  %v5265_v15 = vpack.c.bf16 %v17514_v29, %v17513_v33  ;;  %v12515_v33 = vld [vmem:[%s17424_s1 + $0x198] sm:$0xff]  }
 0x484   :  { %v14833_v17 = vadd.f32 %v10901_v27, %v10789_v60  ;;  %v10904_v23 = vadd.f32 %v10903_v10, %v10902_v52  ;;  %12214 = vmatmul.mubr.bf16.gmra.mrb[28].mxu1 %v3196_v3  ;;  %v5176_v60 = vld [vmem:[#allocation2 + $0xb0] sm:$0xff]  ;;  %v12507_v52 = vld [vmem:[%s17424_s1 + $0x188] sm:$0xff]  }
 0x485   :  { %6538 = vmatmul.mubr.bf16.gmra.mrb[56].mxu0 %v14831_v51  ;;  %6650 = vmatprep.mubr.bf16.mxu1 %v14704_v61  ;;  %v14845_v47 = vpack.c.bf16 %v5176_v60, %v5175_v45  ;;  %v5292_v10 = vld [vmem:[#allocation2 + $0x22] sm:$0xff]  ;;  %v12511_v60 = vld [vmem:[%s17424_s1 + $0x190] sm:$0xff]  }
 0x486   :  { %v14837_v37 = vadd.f32 %v10904_v23, %v10792_v30  ;;  %6545 = vmatprep.mubr.bf16.mxu0 %v17512_v49  ;;  %v12503_v30 = vld [vmem:[%s17424_s1 + $0x180] sm:$0xff]   ;;  %v12509_v23 = vld [vmem:[%s17424_s1 + $0x1d0] sm:$0xff]  }
 0x487   :  { %v10799_v57 = vpop.f32.mrb[180].mxu1  ;;  %v5293_v29 = vld [vmem:[#allocation2 + $0x32] sm:$0xff] }
 0x488   :  { %v10905_v2 = vpop.f32.mrb[208].mxu0  ;;  %v10800_v19 = vpop.f32.mrb[181].mxu1 }
 0x489   :  { %v10801_v34 = vadd.f32 %v10800_v19, %v10799_v57  ;;  %v10906_v40 = vpop.f32.mrb[209].mxu0  ;;  %v10802_v59 = vpop.f32.mrb[182].mxu1 }
 0x48a   :  { %v10907_v38 = vadd.f32 %v10906_v40, %v10905_v2  ;;  %v10908_v22 = vpop.f32.mrb[210].mxu0  ;;  %v10803_v61 = vpop.f32.mrb[183].mxu1 }
 0x48b   :  { %v10804_v18 = vadd.f32 %v10803_v61, %v10802_v59  ;;  %v10909_v20 = vpop.f32.mrb[211].mxu0 }
 0x48c   :  { %v14850_v3 = vadd.f32 %v10907_v38, %v10795_v55  ;;  %v10910_v63 = vadd.f32 %v10909_v20, %v10908_v22  ;;  %6651 = vmatmul.mubr.bf16.vlgmr.msra.gmra.mrb[32].mxu1 %v5321_v50  ;;  %v5291_v55 = vld [vmem:[#allocation2 + $0x1a] sm:$0xff] }
 0x48d   :  { %6546 = vmatmul.mubr.bf16.gmra.mrb[60].mxu0 %v14845_v47  ;;  %6658 = vmatprep.mubr.bf16.mxu1 %v14742_v31  ;;  %v5178_v31 = vld [vmem:[#allocation2 + $0xc8] sm:$0xff]  ;;  %v14864_v45 = vpack.c.bf16 %v5292_v10, %v5291_v55  ;;  %v12513_v38 = vld [vmem:[%s17424_s1 + $0x1d8] sm:$0xff]   ;;  %v5180_v55 = vld [vmem:[#allocation2 + $0xe0] sm:$0xff] }
 0x48e   :  { %v14856_v27 = vadd.f32 %v10910_v63, %v10798_v0  ;;  %6553 = vmatprep.mubr.bf16.mxu0 %v5265_v15  ;;  %11514 = vmatpush3.bf16.msra.mxu1 %v12503_v30  ;;  %v14869_v59 = vpack.c.bf16 %v5178_v31, %v5177_v41  ;;  %v17515_v20 = vld [vmem:[#allocation14_spill] sm:$0xff] }
 0x48f   :  { %v10805_v5 = vpop.f32.mrb[184].mxu1  ;;  %11515 = vmatprep.subr.bf16.mxu1 %v12505_v48  ;;  %v17516_v48 = vld [vmem:[#allocation13_spill] sm:$0xff]  ;;  %v5294_v15 = vld [vmem:[#allocation2 + $0x3a] sm:$0xff] }
 0x490   :  { %v10911_v21 = vpop.f32.mrb[212].mxu0  ;;  %v10806_v7 = vpop.f32.mrb[185].mxu1  ;;  %v17517_v63 = vpack.c.bf16 %v17515_v20, %v17516_v48  ;;  %v17518_v20 = vld [vmem:[#allocation16_spill] sm:$0xff]  ;;  %v17519_v48 = vld [vmem:[#allocation15_spill] sm:$0xff] }
 0x491   :  { %v10807_v0 = vadd.f32 %v10806_v7, %v10805_v5  ;;  %v10912_v1 = vpop.f32.mrb[213].mxu0  ;;  %v10808_v49 = vpop.f32.mrb[186].mxu1  ;;  %v5179_v5 = vld [vmem:[#allocation2 + $0xd8] sm:$0xff] }
 0x492   :  { %v10913_v57 = vadd.f32 %v10912_v1, %v10911_v21  ;;  %v10914_v2 = vpop.f32.mrb[214].mxu0  ;;  %v10809_v19 = vpop.f32.mrb[187].mxu1  ;;  %11516 = vmatpush3.bf16.msra.mxu1 %v12507_v52  ;;  %v12516_v52 = vld [vmem:[%s17424_s1 + $0x1e0] sm:$0xff]   ;;  %v14890_v1 = vpack.c.bf16 %v5294_v15, %v5293_v29  ;;  %v5296_v29 = vld [vmem:[#allocation2 + $0x52] sm:$0xff] }
 0x493   :  { %v10810_v50 = vadd.f32 %v10809_v19, %v10808_v49  ;;  %v10915_v40 = vpop.f32.mrb[215].mxu0  ;;  %11517 = vmatprep.subr.bf16.mxu1 %v12509_v23  ;;  %v12518_v49 = vld [vmem:[%s17424_s1 + $0x1a0] sm:$0xff]   ;;  %v14895_v19 = vpack.c.bf16 %v5180_v55, %v5179_v5  ;;  %v12522_v15 = vld [vmem:[%s17424_s1 + $0x1f0] sm:$0xff]  }
 0x494   :  { %v14874_v22 = vadd.f32 %v10913_v57, %v10801_v34  ;;  %v10916_v61 = vadd.f32 %v10915_v40, %v10914_v2  ;;  %6659 = vmatmul.mubr.bf16.gmra.mrb[36].mxu1 %v14864_v45 }
 0x495   :  { %6554 = vmatmul.mubr.bf16.gmra.mrb[64].mxu0 %v14869_v59  ;;  %6666 = vmatprep.mubr.bf16.mxu1 %v14780_v39 }
 0x496   :  { %v14879_v30 = vadd.f32 %v10916_v61, %v10804_v18  ;;  %6561 = vmatprep.mubr.bf16.mxu0 %v17517_v63  ;;  %11518 = vmatpush3.bf16.msra.mxu1 %v12511_v60  ;;  %v12519_v60 = vld [vmem:[%s17424_s1 + $0x1e8] sm:$0xff]   ;;  %v17520_v63 = vpack.c.bf16 %v17518_v20, %v17519_v48  ;;  %v12525_v48 = vld [vmem:[%s17424_s1 + $0x1f8] sm:$0xff]  }
 0x497   :  { %v10811_v34 = vpop.f32.mrb[188].mxu1  ;;  %11519 = vmatprep.subr.bf16.mxu1 %v12513_v38 }
 0x498   :  { %v10917_v39 = vpop.f32.mrb[216].mxu0  ;;  %v10812_v18 = vpop.f32.mrb[189].mxu1 }
 0x499   :  { %v10813_v10 = vadd.f32 %v10812_v18, %v10811_v34  ;;  %v10918_v23 = vpop.f32.mrb[217].mxu0  ;;  %v10814_v21 = vpop.f32.mrb[190].mxu1  ;;  %v5295_v34 = vld [vmem:[#allocation2 + $0x4a] sm:$0xff] }
 0x49a   :  { %v10919_v7 = vadd.f32 %v10918_v23, %v10917_v39  ;;  %v10920_v41 = vpop.f32.mrb[218].mxu0  ;;  %v10815_v31 = vpop.f32.mrb[191].mxu1  ;;  %11520 = vmatpush3.bf16.msra.mxu1 %v12515_v33  ;;  %v12521_v33 = vld [vmem:[%s17424_s1 + $0x1a8] sm:$0xff]   ;;  %v5182_v39 = vld [vmem:[#allocation2 + $0xf8] sm:$0xff] }
 0x49b   :  { %v10816_v57 = vadd.f32 %v10815_v31, %v10814_v21  ;;  %v10921_v2 = vpop.f32.mrb[219].mxu0  ;;  %11521 = vmatprep.subr.bf16.mxu1 %v12516_v52  ;;  %v5181_v52 = vld [vmem:[#allocation2 + $0xf0] sm:$0xff] }
 0x49c   :  { %v14900_v40 = vadd.f32 %v10919_v7, %v10807_v0  ;;  %v10922_v38 = vadd.f32 %v10921_v2, %v10920_v41  ;;  %6667 = vmatmul.mubr.bf16.gmra.mrb[40].mxu1 %v14890_v1  ;;  %v14916_v41 = vpack.c.bf16 %v5296_v29, %v5295_v34  ;;  %v12524_v31 = vld [vmem:[%s17424_s1 + $0x1b0] sm:$0xff]   ;;  %v14922_v20 = vpack.c.bf16 %v5182_v39, %v5181_v52  ;;  %v5297_v39 = vld [vmem:[#allocation2 + $0x62] sm:$0xff] }
 0x49d   :  { %6562 = vmatmul.mubr.bf16.gmra.mrb[68].mxu0 %v14895_v19  ;;  %6674 = vmatprep.mubr.bf16.mxu1 %v14805_v28 }
 0x49e   :  { %v14905_v61 = vadd.f32 %v10922_v38, %v10810_v50  ;;  %6569 = vmatprep.mubr.bf16.mxu0 %v17520_v63  ;;  %11522 = vmatpush3.bf16.msra.mxu1 %v12518_v49  ;;  %v17521_v49 = vld [vmem:[#allocation21_spill] sm:$0xff] }
 0x49f   :  { %v10945_v0 = vpop.f32.mrb[192].mxu1  ;;  %11523 = vmatprep.subr.bf16.mxu1 %v12519_v60 }
 0x4a0   :  { %v10923_v28 = vpop.f32.mrb[220].mxu0  ;;  %v10946_v50 = vpop.f32.mrb[193].mxu1 }
 0x4a1   :  { %v10924_v18 = vpop.f32.mrb[221].mxu0  ;;  %v10947_v5 = vadd.f32 %v10946_v50, %v10945_v0  ;;  %v10948_v55 = vpop.f32.mrb[194].mxu1  ;;  %v17524_v50 = vld [vmem:[#allocation17_spill] sm:$0xff] }
 0x4a2   :  { %v10925_v23 = vadd.f32 %v10924_v18, %v10923_v28  ;;  %v10926_v21 = vpop.f32.mrb[222].mxu0  ;;  %v10949_v7 = vpop.f32.mrb[195].mxu1  ;;  %11524 = vmatpush3.bf16.msra.mxu1 %v12521_v33  ;;  %v17522_v33 = vld [vmem:[#allocation22_spill] sm:$0xff]  ;;  %v5298_v18 = vld [vmem:[#allocation2 + $0x6a] sm:$0xff] }
 0x4a3   :  { %v4290_v2 = vadd.f32 %v10947_v5, %v17521_v49  ;;  %v10927_v60 = vpop.f32.mrb[223].mxu0  ;;  %v10950_v38 = vadd.f32 %v10949_v7, %v10948_v55  ;;  %11525 = vmatprep.subr.bf16.mxu1 %v12522_v15  ;;  %v17523_v28 = vld [vmem:[#allocation18_spill] sm:$0xff] }
 0x4a4   :  { %v14927_v63 = vadd.f32 %v10925_v23, %v10813_v10  ;;  %v10928_v0 = vadd.f32 %v10927_v60, %v10926_v21  ;;  %6675 = vmatmul.mubr.bf16.gmra.mrb[44].mxu1 %v14916_v41  ;;  %v17525_v15 = vpack.c.bf16 %v17523_v28, %v17524_v50  ;;  %v12527_v10 = vld [vmem:[%s17424_s1 + $0x1b8] sm:$0xff]   ;;  %v5183_v23 = vld [vmem:[#allocation2 + $0x108] sm:$0xff]  ;;  %v5184_v21 = vld [vmem:[#allocation2 + $0x110] sm:$0xff] }
 0x4a5   :  { %v4293_v34 = vadd.f32 %v10950_v38, %v17522_v33  ;;  %6570 = vmatmul.mubr.bf16.gmra.mrb[72].mxu0 %v14922_v20  ;;  %6682 = vmatprep.mubr.bf16.mxu1 %v14820_v12 }
 0x4a6   :  { %v14933_v29 = vadd.f32 %v10928_v0, %v10816_v57  ;;  %6577 = vmatprep.mubr.bf16.mxu0 %v17525_v15  ;;  %11526 = vmatpush3.bf16.msra.mxu1 %v12524_v31  ;;  %v14941_v0 = vpack.c.bf16 %v5298_v18, %v5297_v39  ;;  %v17526_v31 = vld [vmem:[#allocation25_spill] sm:$0xff]  ;;  %v14944_v15 = vpack.c.bf16 %v5184_v21, %v5183_v23  ;;  %v17529_v39 = vld [vmem:[#allocation20_spill] sm:$0xff]  ;;  %v17530_v18 = vld [vmem:[#allocation19_spill] sm:$0xff] }
 0x4a7   :  { %v10951_v52 = vpop.f32.mrb[196].mxu1  ;;  %11527 = vmatprep.subr.bf16.mxu1 %v12525_v48  ;;  %v5299_v23 = vld [vmem:[#allocation2 + $0x7a] sm:$0xff]  ;;  %v5300_v21 = vld [vmem:[#allocation2 + $0x82] sm:$0xff] }
 0x4a8   :  { %v11057_v5 = vpop.f32.mrb[224].mxu0  ;;  %v10952_v55 = vpop.f32.mrb[197].mxu1 }
 0x4a9   :  { %v10953_v12 = vadd.f32 %v10952_v55, %v10951_v52  ;;  %v11058_v57 = vpop.f32.mrb[225].mxu0  ;;  %v10954_v7 = vpop.f32.mrb[198].mxu1  ;;  %v17528_v52 = vld [vmem:[#allocation26_spill] sm:$0xff] }
 0x4aa   :  { %v11059_v49 = vadd.f32 %v11058_v57, %v11057_v5  ;;  %v11060_v60 = vpop.f32.mrb[226].mxu0  ;;  %v10955_v38 = vpop.f32.mrb[199].mxu1  ;;  %11528 = vmatpush3.bf16.msra.mxu1 %v12527_v10  ;;  %v17531_v10 = vpack.c.bf16 %v17529_v39, %v17530_v18 }
 0x4ab   :  { %v4298_v33 = vadd.f32 %v10953_v12, %v17526_v31  ;;  %v10956_v28 = vadd.f32 %v10955_v38, %v10954_v7  ;;  %v11061_v50 = vpop.f32.mrb[227].mxu0 }
 0x4ac   :  { %v11062_v48 = vadd.f32 %v11061_v50, %v11060_v60  ;;  %6683 = vmatmul.mubr.bf16.gmra.mrb[48].mxu1 %v14941_v0  ;;  %v14947_v9 = vadd.f32 %v11059_v49, %v4290_v2  ;;  %v5185_v60 = vld [vmem:[#allocation2 + $0x120] sm:$0xff]  ;;  %v5186_v2 = vld [vmem:[#allocation2 + $0x128] sm:$0xff] }
 0x4ad   :  { %v4301_v55 = vadd.f32 %v10956_v28, %v17528_v52  ;;  %6578 = vmatmul.mubr.bf16.gmra.mrb[76].mxu0 %v14944_v15  ;;  %6690 = vmatprep.mubr.bf16.mxu1 %v14831_v51  ;;  %v14957_v51 = vpack.c.bf16 %v5300_v21, %v5299_v23  ;;  %v17536_v23 = vld [vmem:[#allocation23_spill] sm:$0xff] }
 0x4ae   :  { %17527 = vst [vmem:[#allocation6_spill] sm:$0xff] %v14947_v9  ;;  %6585 = vmatprep.mubr.bf16.mxu0 %v17531_v10  ;;  %v14955_v5 = vadd.f32 %v11062_v48, %v4293_v34  ;;  %v14960_v48 = vpack.c.bf16 %v5186_v2, %v5185_v60  ;;  %v17534_v9 = vld [vmem:[#allocation29_spill] sm:$0xff]  ;;  %v5302_v2 = vld [vmem:[#allocation2 + $0x9a] sm:$0xff] }
 0x4af   :  { %v10957_v12 = vpop.f32.mrb[200].mxu1  ;;  %v5301_v60 = vld [vmem:[#allocation2 + $0x92] sm:$0xff] }
 0x4b0   :  { %17532 = vst [vmem:[#allocation27_spill] sm:$0xff] %v14955_v5  ;;  %v11063_v57 = vpop.f32.mrb[228].mxu0  ;;  %v10958_v7 = vpop.f32.mrb[201].mxu1 }
 0x4b1   :  { %v10959_v49 = vadd.f32 %v10958_v7, %v10957_v12  ;;  %v11064_v38 = vpop.f32.mrb[229].mxu0  ;;  %v10960_v31 = vpop.f32.mrb[202].mxu1 }
 0x4b2   :  { %v11065_v28 = vadd.f32 %v11064_v38, %v11063_v57  ;;  %v11066_v50 = vpop.f32.mrb[230].mxu0  ;;  %v10961_v52 = vpop.f32.mrb[203].mxu1  ;;  %v17535_v57 = vld [vmem:[#allocation24_spill] sm:$0xff] }
 0x4b3   :  { %v4306_v39 = vadd.f32 %v10959_v49, %v17533_v24  ;;  %v10962_v18 = vadd.f32 %v10961_v52, %v10960_v31  ;;  %v11067_v34 = vpop.f32.mrb[231].mxu0  ;;  %v17537_v21 = vpack.c.bf16 %v17535_v57, %v17536_v23  ;;  %v5187_v31 = vld [vmem:[#allocation2 + $0x138] sm:$0xff] }
 0x4b4   :  { %v11068_v10 = vadd.f32 %v11067_v34, %v11066_v50  ;;  %6691 = vmatmul.mubr.bf16.gmra.mrb[52].mxu1 %v14957_v51  ;;  %v14963_v5 = vadd.f32 %v11065_v28, %v4298_v33  ;;  %v5188_v33 = vld [vmem:[#allocation2 + $0x140] sm:$0xff] }
 0x4b5   :  { %v4309_v12 = vadd.f32 %v10962_v18, %v17534_v9  ;;  %6586 = vmatmul.mubr.bf16.gmra.mrb[80].mxu0 %v14960_v48  ;;  %6698 = vmatprep.mubr.bf16.mxu1 %v14845_v47  ;;  %v14973_v47 = vpack.c.bf16 %v5302_v2, %v5301_v60  ;;  %v17539_v60 = vpack.c.bf16 %v14612_v11, %v14603_v36 }
 0x4b6   :  { %6593 = vmatprep.mubr.bf16.mxu0 %v17537_v21  ;;  %v14971_v24 = vadd.f32 %v11068_v10, %v4301_v55  ;;  %v14976_v10 = vpack.c.bf16 %v5188_v33, %v5187_v31 }
 0x4b7   :  { %v10963_v7 = vpop.f32.mrb[204].mxu1 }
 0x4b8   :  { %17538 = vst [vmem:[#allocation8_spill] sm:$0xff] %v14971_v24  ;;  %v11069_v49 = vpop.f32.mrb[232].mxu0  ;;  %v10964_v38 = vpop.f32.mrb[205].mxu1 }
 0x4b9   :  { %v10965_v28 = vadd.f32 %v10964_v38, %v10963_v7  ;;  %v11070_v50 = vpop.f32.mrb[233].mxu0  ;;  %v10966_v9 = vpop.f32.mrb[206].mxu1  ;;  %v5304_v38 = vld [vmem:[#allocation2 + $0xb2] sm:$0xff] }
 0x4ba   :  { %v11071_v52 = vadd.f32 %v11070_v50, %v11069_v49  ;;  %v11072_v18 = vpop.f32.mrb[234].mxu0  ;;  %v10967_v34 = vpop.f32.mrb[207].mxu1  ;;  %v5303_v49 = vld [vmem:[#allocation2 + $0xaa] sm:$0xff] }
 0x4bb   :  { %v4314_v57 = vadd.f32 %v10965_v28, %v14634_v13  ;;  %v10968_v23 = vadd.f32 %v10967_v34, %v10966_v9  ;;  %v11073_v55 = vpop.f32.mrb[235].mxu0  ;;  %v5189_v28 = vld [vmem:[#allocation2 + $0x150] sm:$0xff] }
 0x4bc   :  { %v11074_v21 = vadd.f32 %v11073_v55, %v11072_v18  ;;  %6699 = vmatmul.mubr.bf16.gmra.mrb[56].mxu1 %v14973_v47  ;;  %v14979_v24 = vadd.f32 %v11071_v52, %v4306_v39  ;;  %v5190_v39 = vld [vmem:[#allocation2 + $0x158] sm:$0xff] }
 0x4bd   :  { %v4317_v7 = vadd.f32 %v10968_v23, %v14638_v25  ;;  %6594 = vmatmul.mubr.bf16.gmra.mrb[84].mxu0 %v14976_v10  ;;  %6706 = vmatprep.mubr.bf16.mxu1 %v14869_v59  ;;  %v14989_v59 = vpack.c.bf16 %v5304_v38, %v5303_v49  ;;  %v14992_v23 = vpack.c.bf16 %v5190_v39, %v5189_v28  ;;  %v5305_v38 = vld [vmem:[#allocation2 + $0xc2] sm:$0xff] }
 0x4be   :  { %6601 = vmatprep.mubr.bf16.mxu0 %v17539_v60  ;;  %v14987_v13 = vadd.f32 %v11074_v21, %v4309_v12  ;;  %v5191_v39 = vld [vmem:[#allocation2 + $0x168] sm:$0xff] }
 0x4bf   :  { %v10969_v2 = vpop.f32.mrb[208].mxu1 }
 0x4c0   :  { %v11075_v31 = vpop.f32.mrb[236].mxu0  ;;  %v10970_v33 = vpop.f32.mrb[209].mxu1 }
 0x4c1   :  { %v10971_v50 = vadd.f32 %v10970_v33, %v10969_v2  ;;  %v11076_v9 = vpop.f32.mrb[237].mxu0  ;;  %v10972_v25 = vpop.f32.mrb[210].mxu1  ;;  %v17540_v2 = vpack.c.bf16 %v14632_v56, %v14623_v26 }
 0x4c2   :  { %v11077_v52 = vadd.f32 %v11076_v9, %v11075_v31  ;;  %v11078_v18 = vpop.f32.mrb[238].mxu0  ;;  %v10973_v34 = vpop.f32.mrb[211].mxu1  ;;  %v5306_v31 = vld [vmem:[#allocation2 + $0xca] sm:$0xff] }
 0x4c3   :  { %v4322_v11 = vadd.f32 %v10971_v50, %v14654_v46  ;;  %v10974_v36 = vadd.f32 %v10973_v34, %v10972_v25  ;;  %v11079_v12 = vpop.f32.mrb[239].mxu0 }
 0x4c4   :  { %v11080_v55 = vadd.f32 %v11079_v12, %v11078_v18  ;;  %6707 = vmatmul.mubr.bf16.gmra.mrb[60].mxu1 %v14989_v59  ;;  %v14995_v21 = vadd.f32 %v11077_v52, %v4314_v57  ;;  %v5192_v57 = vld [vmem:[#allocation2 + $0x170] sm:$0xff] }
 0x4c5   :  { %v4325_v60 = vadd.f32 %v10974_v36, %v14656_v8  ;;  %6602 = vmatmul.mubr.bf16.gmra.mrb[88].mxu0 %v14992_v23  ;;  %6714 = vmatprep.mubr.bf16.mxu1 %v14895_v19  ;;  %v15005_v19 = vpack.c.bf16 %v5306_v31, %v5305_v38  ;;  %v15008_v34 = vpack.c.bf16 %v5192_v57, %v5191_v39  ;;  %v5308_v38 = vld [vmem:[#allocation2 + $0xe2] sm:$0xff] }
 0x4c6   :  { %6609 = vmatprep.mubr.bf16.mxu0 %v17540_v2  ;;  %v15003_v46 = vadd.f32 %v11080_v55, %v4317_v7  ;;  %v5418_v39 = vld [vmem:[#allocation2 + $0x21] sm:$0xff] }
 0x4c7   :  { %v10975_v49 = vpop.f32.mrb[212].mxu1 }
 0x4c8   :  { %v11081_v33 = vpop.f32.mrb[240].mxu0  ;;  %v10976_v28 = vpop.f32.mrb[213].mxu1 }
 0x4c9   :  { %v10977_v50 = vadd.f32 %v10976_v28, %v10975_v49  ;;  %v11082_v9 = vpop.f32.mrb[241].mxu0  ;;  %v10978_v8 = vpop.f32.mrb[214].mxu1  ;;  %v5307_v49 = vld [vmem:[#allocation2 + $0xda] sm:$0xff] }
 0x4ca   :  { %v11083_v25 = vadd.f32 %v11082_v9, %v11081_v33  ;;  %v11084_v52 = vpop.f32.mrb[242].mxu0  ;;  %v10979_v18 = vpop.f32.mrb[215].mxu1  ;;  %v5417_v28 = vld [vmem:[#allocation2 + $0x19] sm:$0xff] }
 0x4cb   :  { %v4330_v56 = vadd.f32 %v10977_v50, %v14677_v42  ;;  %v10980_v26 = vadd.f32 %v10979_v18, %v10978_v8  ;;  %v11085_v7 = vpop.f32.mrb[243].mxu0  ;;  %v12520_v18 = vld [vmem:[%s17424_s1 + $0x208] sm:$0xff]  }
 0x4cc   :  { %v11086_v36 = vadd.f32 %v11085_v7, %v11084_v52  ;;  %6715 = vmatmul.mubr.bf16.gmra.mrb[64].mxu1 %v15005_v19  ;;  %v15011_v12 = vadd.f32 %v11083_v25, %v4322_v11  ;;  %v15019_v25 = vpack.c.bf16 %v5308_v38, %v5307_v49  ;;  %v5449_v52 = vpack.c.bf16 %v5418_v39, %v5417_v28  ;;  %v5309_v49 = vld [vmem:[#allocation2 + $0xf2] sm:$0xff]  ;;  %v5310_v38 = vld [vmem:[#allocation2 + $0xfa] sm:$0xff] }
 0x4cd   :  { %v4333_v55 = vadd.f32 %v10980_v26, %v14682_v14  ;;  %6610 = vmatmul.mubr.bf16.gmra.mrb[92].mxu0 %v15008_v34  ;;  %6722 = vmatprep.mubr.bf16.mxu1 %v14922_v20  ;;  %v5420_v28 = vld [vmem:[#allocation2 + $0x39] sm:$0xff] }
 0x4ce   :  { %6811 = vmatprep.mubr.bf16.mxu0 %v14864_v45  ;;  %v15017_v2 = vadd.f32 %v11086_v36, %v4325_v60 }
 0x4cf   :  { %v10981_v42 = vpop.f32.mrb[216].mxu1 }
 0x4d0   :  { %v11087_v31 = vpop.f32.mrb[244].mxu0  ;;  %v10982_v33 = vpop.f32.mrb[217].mxu1 }
 0x4d1   :  { %v10983_v57 = vadd.f32 %v10982_v33, %v10981_v42  ;;  %v11088_v11 = vpop.f32.mrb[245].mxu0  ;;  %v10984_v50 = vpop.f32.mrb[218].mxu1 }
 0x4d2   :  { %v11089_v9 = vadd.f32 %v11088_v11, %v11087_v31  ;;  %v11090_v14 = vpop.f32.mrb[246].mxu0  ;;  %v10985_v8 = vpop.f32.mrb[219].mxu1 }
 0x4d3   :  { %v4338_v20 = vadd.f32 %v10983_v57, %v14714_v4  ;;  %v10986_v45 = vadd.f32 %v10985_v8, %v10984_v50  ;;  %v11091_v60 = vpop.f32.mrb[247].mxu0 }
 0x4d4   :  { %v11092_v26 = vadd.f32 %v11091_v60, %v11090_v14  ;;  %6723 = vmatmul.mubr.bf16.gmra.mrb[68].mxu1 %v15019_v25  ;;  %v15026_v7 = vadd.f32 %v11089_v9, %v4330_v56  ;;  %v12523_v56 = vld [vmem:[%s17424_s1 + $0x210] sm:$0xff]  }
 0x4d5   :  { %v4341_v36 = vadd.f32 %v10986_v45, %v14720_v43  ;;  %6812 = vmatmul.mubr.bf16.vlgmr.msra.gmra.mrb[96].mxu0 %v5449_v52  ;;  %6730 = vmatprep.mubr.bf16.mxu1 %v14944_v15  ;;  %v5419_v43 = vld [vmem:[#allocation2 + $0x31] sm:$0xff] }
 0x4d6   :  { %12218 = vmatpush3.bf16.msra.mxu0 %v14801_v58  ;;  %6819 = vmatprep.mubr.bf16.mxu0 %v14890_v1  ;;  %v15032_v4 = vadd.f32 %v11092_v26, %v4333_v55  ;;  %v15037_v55 = vpack.c.bf16 %v5310_v38, %v5309_v49  ;;  %v15040_v8 = vpack.c.bf16 %v5420_v28, %v5419_v43  ;;  %v12526_v45 = vld [vmem:[%s17424_s1 + $0x218] sm:$0xff]  }
 0x4d7   :  { %v10987_v42 = vpop.f32.mrb[220].mxu1  ;;  %12219 = vmatprep.subr.bf16.mxu0 %v12520_v18  ;;  %v5312_v49 = vld [vmem:[#allocation2 + $0x112] sm:$0xff] }
 0x4d8   :  { %v11093_v31 = vpop.f32.mrb[248].mxu0  ;;  %v10988_v33 = vpop.f32.mrb[221].mxu1 }
 0x4d9   :  { %v10989_v39 = vadd.f32 %v10988_v33, %v10987_v42  ;;  %v11094_v15 = vpop.f32.mrb[249].mxu0  ;;  %v10990_v57 = vpop.f32.mrb[222].mxu1  ;;  %v5311_v42 = vld [vmem:[#allocation2 + $0x10a] sm:$0xff] }
 0x4da   :  { %v11095_v58 = vadd.f32 %v11094_v15, %v11093_v31  ;;  %v11096_v11 = vpop.f32.mrb[250].mxu0  ;;  %v10991_v1 = vpop.f32.mrb[223].mxu1  ;;  %12220 = vmatpush3.bf16.msra.mxu0 %v12520_v18  ;;  %v5422_v33 = vld [vmem:[#allocation2 + $0x51] sm:$0xff] }
 0x4db   :  { %v4346_v50 = vadd.f32 %v10989_v39, %v14752_v44  ;;  %v10992_v9 = vadd.f32 %v10991_v1, %v10990_v57  ;;  %v11097_v14 = vpop.f32.mrb[251].mxu0  ;;  %12221 = vmatprep.subr.bf16.mxu0 %v12523_v56  ;;  %v12529_v1 = vld [vmem:[%s17424_s1 + $0x228] sm:$0xff]  }
 0x4dc   :  { %v11098_v60 = vadd.f32 %v11097_v14, %v11096_v11  ;;  %6731 = vmatmul.mubr.bf16.gmra.mrb[72].mxu1 %v15037_v55  ;;  %v15046_v52 = vadd.f32 %v11095_v58, %v4338_v20  ;;  %v12528_v20 = vld [vmem:[%s17424_s1 + $0x220] sm:$0xff]  }
 0x4dd   :  { %v4349_v26 = vadd.f32 %v10992_v9, %v14758_v53  ;;  %6820 = vmatmul.mubr.bf16.gmra.mrb[100].mxu0 %v15040_v8  ;;  %6738 = vmatprep.mubr.bf16.mxu1 %v14960_v48  ;;  %v5421_v53 = vld [vmem:[#allocation2 + $0x49] sm:$0xff] }
 0x4de   :  { %6827 = vmatprep.mubr.bf16.mxu0 %v14916_v41  ;;  %12222 = vmatpush3.bf16.msra.mxu0 %v12523_v56  ;;  %v15052_v44 = vadd.f32 %v11098_v60, %v4341_v36  ;;  %v15057_v36 = vpack.c.bf16 %v5312_v49, %v5311_v42  ;;  %v15060_v11 = vpack.c.bf16 %v5422_v33, %v5421_v53  ;;  %v5314_v42 = vld [vmem:[#allocation2 + $0x12a] sm:$0xff] }
 0x4df   :  { %v10993_v18 = vpop.f32.mrb[224].mxu1  ;;  %12223 = vmatprep.subr.bf16.mxu0 %v12526_v45 }
 0x4e0   :  { %v11099_v38 = vpop.f32.mrb[252].mxu0  ;;  %v10994_v31 = vpop.f32.mrb[225].mxu1 }
 0x4e1   :  { %v10995_v43 = vadd.f32 %v10994_v31, %v10993_v18  ;;  %v11100_v28 = vpop.f32.mrb[253].mxu0  ;;  %v10996_v48 = vpop.f32.mrb[226].mxu1  ;;  %v5313_v18 = vld [vmem:[#allocation2 + $0x122] sm:$0xff] }
 0x4e2   :  { %v11101_v39 = vadd.f32 %v11100_v28, %v11099_v38  ;;  %v11102_v41 = vpop.f32.mrb[254].mxu0  ;;  %v10997_v56 = vpop.f32.mrb[227].mxu1  ;;  %12224 = vmatpush3.bf16.msra.mxu0 %v12526_v45  ;;  %v5424_v31 = vld [vmem:[#allocation2 + $0x69] sm:$0xff] }
 0x4e3   :  { %v4354_v15 = vadd.f32 %v10995_v43, %v14787_v32  ;;  %v10998_v57 = vadd.f32 %v10997_v56, %v10996_v48  ;;  %v11103_v58 = vpop.f32.mrb[255].mxu0  ;;  %12225 = vmatprep.subr.bf16.mxu0 %v12528_v20  ;;  %v12531_v56 = vld [vmem:[%s17424_s1 + $0x238] sm:$0xff]  }
 0x4e4   :  { %v11104_v9 = vadd.f32 %v11103_v58, %v11102_v41  ;;  %6739 = vmatmul.mubr.bf16.gmra.mrb[76].mxu1 %v15057_v36  ;;  %v15066_v14 = vadd.f32 %v11101_v39, %v4346_v50  ;;  %v12530_v50 = vld [vmem:[%s17424_s1 + $0x230] sm:$0xff]  }
 0x4e5   :  { %v4357_v60 = vadd.f32 %v10998_v57, %v14790_v6  ;;  %6828 = vmatmul.mubr.bf16.gmra.mrb[104].mxu0 %v15060_v11  ;;  %6746 = vmatprep.mubr.bf16.mxu1 %v14976_v10  ;;  %v5423_v6 = vld [vmem:[#allocation2 + $0x61] sm:$0xff] }
 0x4e6   :  { %6835 = vmatprep.mubr.bf16.mxu0 %v14941_v0  ;;  %12226 = vmatpush3.bf16.msra.mxu0 %v12528_v20  ;;  %v15072_v32 = vadd.f32 %v11104_v9, %v4349_v26  ;;  %v15077_v26 = vpack.c.bf16 %v5314_v42, %v5313_v18  ;;  %v15080_v41 = vpack.c.bf16 %v5424_v31, %v5423_v6  ;;  %v5316_v18 = vld [vmem:[#allocation2 + $0x142] sm:$0xff] }
 0x4e7   :  { %v10999_v45 = vpop.f32.mrb[228].mxu1  ;;  %12227 = vmatprep.subr.bf16.mxu0 %v12529_v1 }
 0x4e8   :  { %v11105_v49 = vpop.f32.mrb[0].mxu0  ;;  %v11000_v38 = vpop.f32.mrb[229].mxu1 }
 0x4e9   :  { %v11001_v53 = vadd.f32 %v11000_v38, %v10999_v45  ;;  %v11106_v33 = vpop.f32.mrb[1].mxu0  ;;  %v11002_v10 = vpop.f32.mrb[230].mxu1  ;;  %v5315_v45 = vld [vmem:[#allocation2 + $0x13a] sm:$0xff] }
 0x4ea   :  { %v11107_v43 = vadd.f32 %v11106_v33, %v11105_v49  ;;  %v11108_v0 = vpop.f32.mrb[2].mxu0  ;;  %v11003_v20 = vpop.f32.mrb[231].mxu1  ;;  %12228 = vmatpush3.bf16.msra.mxu0 %v12529_v1  ;;  %v5425_v38 = vld [vmem:[#allocation2 + $0x79] sm:$0xff] }
 0x4eb   :  { %v4362_v28 = vadd.f32 %v11001_v53, %v14810_v54  ;;  %v11004_v48 = vadd.f32 %v11003_v20, %v11002_v10  ;;  %v11109_v39 = vpop.f32.mrb[3].mxu0  ;;  %12229 = vmatprep.subr.bf16.mxu0 %v12530_v50 }
 0x4ec   :  { %v11110_v57 = vadd.f32 %v11109_v39, %v11108_v0  ;;  %6747 = vmatmul.mubr.bf16.gmra.mrb[80].mxu1 %v15077_v26  ;;  %v15086_v58 = vadd.f32 %v11107_v43, %v4354_v15  ;;  %v5426_v15 = vld [vmem:[#allocation2 + $0x81] sm:$0xff] }
 0x4ed   :  { %v4365_v9 = vadd.f32 %v11004_v48, %v14813_v16  ;;  %6836 = vmatmul.mubr.bf16.gmra.mrb[108].mxu0 %v15080_v41  ;;  %6754 = vmatprep.mubr.bf16.mxu1 %v14992_v23  ;;  %v15094_v23 = vpack.c.bf16 %v5316_v18, %v5315_v45  ;;  %v15097_v43 = vpack.c.bf16 %v5426_v15, %v5425_v38  ;;  %v5383_v39 = vld [vmem:[#allocation2 + $0x180] sm:$0xff] }
 0x4ee   :  { %6843 = vmatprep.mubr.bf16.mxu0 %v14957_v51  ;;  %12230 = vmatpush3.bf16.msra.mxu0 %v12530_v50  ;;  %v15092_v54 = vadd.f32 %v11110_v57, %v4357_v60  ;;  %v5318_v45 = vld [vmem:[#allocation2 + $0x15a] sm:$0xff] }
 0x4ef   :  { %v11005_v1 = vpop.f32.mrb[232].mxu1  ;;  %12231 = vmatprep.subr.bf16.mxu0 %v12531_v56 }
 0x4f0   :  { %v11111_v42 = vpop.f32.mrb[4].mxu0  ;;  %v11006_v49 = vpop.f32.mrb[233].mxu1 }
 0x4f1   :  { %v11007_v6 = vadd.f32 %v11006_v49, %v11005_v1  ;;  %v11112_v31 = vpop.f32.mrb[5].mxu0  ;;  %v11008_v16 = vpop.f32.mrb[234].mxu1  ;;  %v5317_v1 = vld [vmem:[#allocation2 + $0x152] sm:$0xff] }
 0x4f2   :  { %v11113_v53 = vadd.f32 %v11112_v31, %v11111_v42  ;;  %v11114_v33 = vpop.f32.mrb[6].mxu0  ;;  %v11009_v10 = vpop.f32.mrb[235].mxu1  ;;  %12232 = vmatpush3.bf16.msra.mxu0 %v12531_v56  ;;  %v5384_v56 = vld [vmem:[#allocation2 + $0x188] sm:$0xff]  ;;  %v5427_v49 = vld [vmem:[#allocation2 + $0x91] sm:$0xff] }
 0x4f3   :  { %v4370_v51 = vadd.f32 %v11007_v6, %v14822_v35  ;;  %v11010_v60 = vadd.f32 %v11009_v10, %v11008_v16  ;;  %v11115_v50 = vpop.f32.mrb[7].mxu0  ;;  %v5400_v6 = vpack.c.bf16 %v5384_v56, %v5383_v39 }
 0x4f4   :  { %v11116_v0 = vadd.f32 %v11115_v50, %v11114_v33  ;;  %6755 = vmatmul.mubr.bf16.gmra.mrb[84].mxu1 %v15094_v23  ;;  %v15100_v20 = vadd.f32 %v11113_v53, %v4362_v28  ;;  %v5428_v28 = vld [vmem:[#allocation2 + $0x99] sm:$0xff]  ;;  %v15108_v53 = vpack.c.bf16 %v5318_v45, %v5317_v1 }
 0x4f5   :  { %v4373_v48 = vadd.f32 %v11010_v60, %v14826_v62  ;;  %6844 = vmatmul.mubr.bf16.gmra.mrb[112].mxu0 %v15097_v43  ;;  %6762 = vmatprep.mubr.bf16.mxu1 %v15008_v34  ;;  %v15111_v10 = vpack.c.bf16 %v5428_v28, %v5427_v49 }
 0x4f6   :  { %6851 = vmatprep.mubr.bf16.mxu0 %v14973_v47  ;;  %v15106_v35 = vadd.f32 %v11116_v0, %v4365_v9 }
 0x4f7   :  { %v11011_v57 = vpop.f32.mrb[236].mxu1 }
 0x4f8   :  { %v11117_v18 = vpop.f32.mrb[8].mxu0  ;;  %v11012_v42 = vpop.f32.mrb[237].mxu1 }
 0x4f9   :  { %v11013_v38 = vadd.f32 %v11012_v42, %v11011_v57  ;;  %v11118_v15 = vpop.f32.mrb[9].mxu0  ;;  %v11014_v62 = vpop.f32.mrb[238].mxu1  ;;  %v5320_v57 = vld [vmem:[#allocation2 + $0x172] sm:$0xff] }
 0x4fa   :  { %v11119_v31 = vadd.f32 %v11118_v15, %v11117_v18  ;;  %v11120_v16 = vpop.f32.mrb[10].mxu0  ;;  %v11015_v34 = vpop.f32.mrb[239].mxu1  ;;  %v5429_v18 = vld [vmem:[#allocation2 + $0xa9] sm:$0xff]  ;;  %v5430_v42 = vld [vmem:[#allocation2 + $0xb1] sm:$0xff] }
 0x4fb   :  { %v4378_v47 = vadd.f32 %v11013_v38, %v14833_v17  ;;  %v11016_v9 = vadd.f32 %v11015_v34, %v11014_v62  ;;  %v11121_v33 = vpop.f32.mrb[11].mxu0  ;;  %v5319_v17 = vld [vmem:[#allocation2 + $0x16a] sm:$0xff] }
 0x4fc   :  { %v11122_v60 = vadd.f32 %v11121_v33, %v11120_v16  ;;  %6763 = vmatmul.mubr.bf16.gmra.mrb[88].mxu1 %v15108_v53  ;;  %v15114_v50 = vadd.f32 %v11119_v31, %v4370_v51  ;;  %v15121_v62 = vpack.c.bf16 %v5320_v57, %v5319_v17  ;;  %v15124_v31 = vpack.c.bf16 %v5430_v42, %v5429_v18 }
 0x4fd   :  { %v4381_v0 = vadd.f32 %v11016_v9, %v14837_v37  ;;  %6852 = vmatmul.mubr.bf16.gmra.mrb[116].mxu0 %v15111_v10  ;;  %6770 = vmatprep.mubr.bf16.mxu1 %v5400_v6 }
 0x4fe   :  { %6859 = vmatprep.mubr.bf16.mxu0 %v14989_v59  ;;  %v15119_v39 = vadd.f32 %v11122_v60, %v4373_v48  ;;  %v5545_v60 = vld [vmem:[#allocation2 + $0x30] sm:$0xff] }
 0x4ff   :  { %v11017_v56 = vpop.f32.mrb[240].mxu1 }
 0x500   :  { %v11123_v1 = vpop.f32.mrb[12].mxu0  ;;  %v11018_v45 = vpop.f32.mrb[241].mxu1 }
 0x501   :  { %v11019_v49 = vadd.f32 %v11018_v45, %v11017_v56  ;;  %v11124_v28 = vpop.f32.mrb[13].mxu0  ;;  %v11020_v51 = vpop.f32.mrb[242].mxu1  ;;  %v5546_v56 = vld [vmem:[#allocation2 + $0x38] sm:$0xff]  ;;  %v5432_v45 = vld [vmem:[#allocation2 + $0xc9] sm:$0xff] }
 0x502   :  { %v11125_v38 = vadd.f32 %v11124_v28, %v11123_v1  ;;  %v11126_v15 = vpop.f32.mrb[14].mxu0  ;;  %v11021_v37 = vpop.f32.mrb[243].mxu1  ;;  %v5431_v1 = vld [vmem:[#allocation2 + $0xc1] sm:$0xff] }
 0x503   :  { %v4386_v6 = vadd.f32 %v11019_v49, %v14850_v3  ;;  %v11022_v59 = vadd.f32 %v11021_v37, %v11020_v51  ;;  %v11127_v48 = vpop.f32.mrb[15].mxu0  ;;  %v5577_v51 = vpack.c.bf16 %v5546_v56, %v5545_v60 }
 0x504   :  { %v11128_v16 = vadd.f32 %v11127_v48, %v11126_v15  ;;  %6771 = vmatmul.mubr.bf16.gmra.mrb[92].mxu1 %v15121_v62  ;;  %v15127_v34 = vadd.f32 %v11125_v38, %v4378_v47 }
 0x505   :  { %v4389_v9 = vadd.f32 %v11022_v59, %v14856_v27  ;;  %6860 = vmatmul.mubr.bf16.gmra.mrb[120].mxu0 %v15124_v31  ;;  %6972 = vmatprep.mubr.bf16.mxu1 %v15040_v8 }
 0x506   :  { %6867 = vmatprep.mubr.bf16.mxu0 %v15005_v19  ;;  %v15133_v33 = vadd.f32 %v11128_v16, %v4381_v0  ;;  %v15136_v0 = vpack.c.bf16 %v5432_v45, %v5431_v1 }
 0x507   :  { %v11023_v3 = vpop.f32.mrb[244].mxu1 }
 0x508   :  { %v11129_v17 = vpop.f32.mrb[16].mxu0  ;;  %v11024_v57 = vpop.f32.mrb[245].mxu1 }
 0x509   :  { %v11025_v18 = vadd.f32 %v11024_v57, %v11023_v3  ;;  %v11130_v47 = vpop.f32.mrb[17].mxu0  ;;  %v11026_v42 = vpop.f32.mrb[246].mxu1  ;;  %v5548_v3 = vld [vmem:[#allocation2 + $0x50] sm:$0xff]  ;;  %v5434_v57 = vld [vmem:[#allocation2 + $0xe1] sm:$0xff] }
 0x50a   :  { %v11131_v49 = vadd.f32 %v11130_v47, %v11129_v17  ;;  %v11132_v27 = vpop.f32.mrb[18].mxu0  ;;  %v11027_v28 = vpop.f32.mrb[247].mxu1  ;;  %v5433_v17 = vld [vmem:[#allocation2 + $0xd9] sm:$0xff] }
 0x50b   :  { %v4394_v8 = vadd.f32 %v11025_v18, %v14874_v22  ;;  %v11028_v38 = vadd.f32 %v11027_v28, %v11026_v42  ;;  %v11133_v19 = vpop.f32.mrb[19].mxu0  ;;  %v5547_v22 = vld [vmem:[#allocation2 + $0x48] sm:$0xff] }
 0x50c   :  { %v11134_v15 = vadd.f32 %v11133_v19, %v11132_v27  ;;  %6973 = vmatmul.mubr.bf16.vlgmr.msra.gmra.mrb[96].mxu1 %v5577_v51  ;;  %v15138_v37 = vadd.f32 %v11131_v49, %v4386_v6  ;;  %v5578_v42 = vpack.c.bf16 %v5548_v3, %v5547_v22  ;;  %v5435_v3 = vld [vmem:[#allocation2 + $0xf1] sm:$0xff] }
 0x50d   :  { %v4397_v59 = vadd.f32 %v11028_v38, %v14879_v30  ;;  %6868 = vmatmul.mubr.bf16.gmra.mrb[124].mxu0 %v15136_v0  ;;  %6980 = vmatprep.mubr.bf16.mxu1 %v15060_v11 }
 0x50e   :  { %6875 = vmatprep.mubr.bf16.mxu0 %v15019_v25  ;;  %v15144_v48 = vadd.f32 %v11134_v15, %v4389_v9  ;;  %v15147_v9 = vpack.c.bf16 %v5434_v57, %v5433_v17  ;;  %v5550_v15 = vld [vmem:[#allocation2 + $0x68] sm:$0xff] }
 0x50f   :  { %v11029_v16 = vpop.f32.mrb[248].mxu1 }
 0x510   :  { %v11135_v60 = vpop.f32.mrb[20].mxu0  ;;  %v11030_v56 = vpop.f32.mrb[249].mxu1 }
 0x511   :  { %v11031_v1 = vadd.f32 %v11030_v56, %v11029_v16  ;;  %v11136_v6 = vpop.f32.mrb[21].mxu0  ;;  %v11032_v45 = vpop.f32.mrb[250].mxu1 }
 0x512   :  { %v11137_v18 = vadd.f32 %v11136_v6, %v11135_v60  ;;  %v11138_v30 = vpop.f32.mrb[22].mxu0  ;;  %v11033_v47 = vpop.f32.mrb[251].mxu1  ;;  %v5436_v60 = vld [vmem:[#allocation2 + $0xf9] sm:$0xff] }
 0x513   :  { %v4402_v11 = vadd.f32 %v11031_v1, %v14900_v40  ;;  %v11034_v49 = vadd.f32 %v11033_v47, %v11032_v45  ;;  %v11139_v25 = vpop.f32.mrb[23].mxu0  ;;  %v5549_v40 = vld [vmem:[#allocation2 + $0x60] sm:$0xff] }
 0x514   :  { %v11140_v27 = vadd.f32 %v11139_v25, %v11138_v30  ;;  %6981 = vmatmul.mubr.bf16.gmra.mrb[100].mxu1 %v5578_v42  ;;  %v15149_v28 = vadd.f32 %v11137_v18, %v4394_v8  ;;  %v5579_v6 = vpack.c.bf16 %v5550_v15, %v5549_v40  ;;  %v5552_v25 = vld [vmem:[#allocation2 + $0x80] sm:$0xff]  ;;  %v5438_v15 = vld [vmem:[#allocation2 + $0x111] sm:$0xff] }
 0x515   :  { %v4405_v51 = vadd.f32 %v11034_v49, %v14905_v61  ;;  %6876 = vmatmul.mubr.bf16.gmra.mrb[128].mxu0 %v15147_v9  ;;  %6988 = vmatprep.mubr.bf16.mxu1 %v15080_v41 }
 0x516   :  { %6883 = vmatprep.mubr.bf16.mxu0 %v15037_v55  ;;  %v15155_v38 = vadd.f32 %v11140_v27, %v4397_v59  ;;  %v15158_v59 = vpack.c.bf16 %v5436_v60, %v5435_v3 }
 0x517   :  { %v11035_v19 = vpop.f32.mrb[252].mxu1 }
 0x518   :  { %v11141_v16 = vpop.f32.mrb[24].mxu0  ;;  %v11036_v22 = vpop.f32.mrb[253].mxu1 }
 0x519   :  { %v11037_v56 = vadd.f32 %v11036_v22, %v11035_v19  ;;  %v11142_v8 = vpop.f32.mrb[25].mxu0  ;;  %v11038_v17 = vpop.f32.mrb[254].mxu1 }
 0x51a   :  { %v11143_v57 = vadd.f32 %v11142_v8, %v11141_v16  ;;  %v11144_v61 = vpop.f32.mrb[26].mxu0  ;;  %v11039_v1 = vpop.f32.mrb[255].mxu1 }
 0x51b   :  { %v4410_v41 = vadd.f32 %v11037_v56, %v14927_v63  ;;  %v11040_v45 = vadd.f32 %v11039_v1, %v11038_v17  ;;  %v11145_v55 = vpop.f32.mrb[27].mxu0  ;;  %v5551_v63 = vld [vmem:[#allocation2 + $0x78] sm:$0xff] }
 0x51c   :  { %v11146_v18 = vadd.f32 %v11145_v55, %v11144_v61  ;;  %6989 = vmatmul.mubr.bf16.gmra.mrb[104].mxu1 %v5579_v6  ;;  %v15160_v30 = vadd.f32 %v11143_v57, %v4402_v11  ;;  %v5437_v11 = vld [vmem:[#allocation2 + $0x109] sm:$0xff]  ;;  %v5580_v8 = vpack.c.bf16 %v5552_v25, %v5551_v63  ;;  %v17543_v57 = vld [vmem:[#allocation27_spill] sm:$0xff]  ;;  %v5554_v25 = vld [vmem:[#allocation2 + $0x98] sm:$0xff] }
 0x51d   :  { %v4413_v47 = vadd.f32 %v11040_v45, %v14933_v29  ;;  %6884 = vmatmul.mubr.bf16.gmra.mrb[132].mxu0 %v15158_v59  ;;  %6996 = vmatprep.mubr.bf16.mxu1 %v15097_v43  ;;  %v17541_v29 = vld [vmem:[#allocation6_spill] sm:$0xff]  ;;  %v5553_v63 = vld [vmem:[#allocation2 + $0x90] sm:$0xff] }
 0x51e   :  { %6891 = vmatprep.mubr.bf16.mxu0 %v15057_v36  ;;  %v15166_v42 = vadd.f32 %v11146_v18, %v4405_v51  ;;  %v17542_v36 = vld [vmem:[#allocation8_spill] sm:$0xff] }
 0x51f   :  { %v12187_v49 = vpop.f32.mrb[0].mxu1 }
 0x520   :  { %v11147_v27 = vpop.f32.mrb[28].mxu0  ;;  %v15169_v19 = vadd.f32 %v12187_v49, %v14963_v5  ;;  %v4611_v40 = vpop.f32.mrb[1].mxu1  ;;  %v15180_v5 = vpack.c.bf16 %v5438_v15, %v5437_v11  ;;  %v5439_v11 = vld [vmem:[#allocation2 + $0x121] sm:$0xff]  ;;  %v5440_v15 = vld [vmem:[#allocation2 + $0x129] sm:$0xff] }
 0x521   :  { %v11148_v16 = vpop.f32.mrb[29].mxu0  ;;  %v15172_v22 = vadd.f32 %v4611_v40, %v17541_v29  ;;  %v12188_v3 = vpop.f32.mrb[2].mxu1 }
 0x522   :  { %v11149_v43 = vadd.f32 %v11148_v16, %v11147_v27  ;;  %v11150_v60 = vpop.f32.mrb[30].mxu0  ;;  %v15175_v51 = vadd.f32 %v12188_v3, %v17542_v36  ;;  %v4614_v56 = vpop.f32.mrb[3].mxu1 }
 0x523   :  { %v11151_v17 = vpop.f32.mrb[31].mxu0  ;;  %v15178_v61 = vadd.f32 %v4614_v56, %v17543_v57 }
 0x524   :  { %v11152_v1 = vadd.f32 %v11151_v17, %v11150_v60  ;;  %6997 = vmatmul.mubr.bf16.gmra.mrb[108].mxu1 %v5580_v8  ;;  %v15182_v6 = vadd.f32 %v11149_v43, %v4410_v41 }
 0x525   :  { %v4738_v45 = vadd.f32 %v15178_v61, %v15172_v22  ;;  %6892 = vmatmul.mubr.bf16.gmra.mrb[136].mxu0 %v15180_v5  ;;  %7004 = vmatprep.mubr.bf16.mxu1 %v15111_v10 }
 0x526   :  { %6899 = vmatprep.mubr.bf16.mxu0 %v15077_v26  ;;  %v15189_v55 = vadd.f32 %v11152_v1, %v4413_v47 }
 0x527   :  { %v4739_v18 = vadd.f32 %v4738_v45, %v15169_v19  ;;  %v12191_v49 = vpop.f32.mrb[4].mxu1  ;;  %v5555_v45 = vld [vmem:[#allocation2 + $0xa8] sm:$0xff] }
 0x528   :  { %v15193_v27 = vadd.f32 %v12191_v49, %v14995_v21  ;;  %v11193_v41 = vpop.f32.mrb[32].mxu0  ;;  %v4627_v40 = vpop.f32.mrb[5].mxu1  ;;  %v5581_v21 = vpack.c.bf16 %v5554_v25, %v5553_v63  ;;  %v5441_v25 = vld [vmem:[#allocation2 + $0x139] sm:$0xff] }
 0x529   :  { %v15196_v16 = vadd.f32 %v4627_v40, %v14979_v24  ;;  %v4740_v10 = vadd.f32 %v4739_v18, %v15175_v51  ;;  %v11194_v26 = vpop.f32.mrb[33].mxu0  ;;  %v12192_v47 = vpop.f32.mrb[6].mxu1  ;;  %v15208_v24 = vpack.c.bf16 %v5440_v15, %v5439_v11 }
 0x52a   :  { %17544 = vst [vmem:[#allocation7_spill] sm:$0xff] %v15193_v27  ;;  %v15199_v29 = vadd.f32 %v11194_v26, %v11193_v41  ;;  %v15202_v3 = vadd.f32 %v12192_v47, %v15003_v46  ;;  %v11196_v43 = vpop.f32.mrb[34].mxu0  ;;  %v4630_v60 = vpop.f32.mrb[7].mxu1  ;;  %v5442_v41 = vld [vmem:[#allocation2 + $0x141] sm:$0xff] }
 0x52b   :  { %17545 = vst [vmem:[#allocation10_spill] sm:$0xff] %v15196_v16  ;;  %v4741_v36 = vadd.f32 %v4740_v10, %v15196_v16  ;;  %v15206_v56 = vadd.f32 %v4630_v60, %v14987_v13  ;;  %v11197_v8 = vpop.f32.mrb[35].mxu0  ;;  %v5556_v13 = vld [vmem:[#allocation2 + $0xb0] sm:$0xff] }
 0x52c   :  { %17546 = vst [vmem:[#allocation9_spill] sm:$0xff] %v15202_v3  ;;  %v15210_v17 = vadd.f32 %v11197_v8, %v11196_v43  ;;  %7005 = vmatmul.mubr.bf16.gmra.mrb[112].mxu1 %v5581_v21 }
 0x52d   :  { %17547 = vst [vmem:[#allocation11_spill] sm:$0xff] %v15206_v56  ;;  %v4742_v57 = vadd.f32 %v4741_v36, %v15206_v56  ;;  %6900 = vmatmul.mubr.bf16.gmra.mrb[140].mxu0 %v15208_v24  ;;  %7012 = vmatprep.mubr.bf16.mxu1 %v15124_v31 }
 0x52e   :  { %6907 = vmatprep.mubr.bf16.mxu0 %v15094_v23 }
 0x52f   :  { %v4743_v46 = vadd.f32 %v4742_v57, %v15193_v27  ;;  %v12195_v1 = vpop.f32.mrb[8].mxu1 }
 0x530   :  { %v15218_v18 = vadd.f32 %v12195_v1, %v15026_v7  ;;  %v11199_v49 = vpop.f32.mrb[36].mxu0  ;;  %v4643_v63 = vpop.f32.mrb[9].mxu1  ;;  %v5582_v7 = vpack.c.bf16 %v5556_v13, %v5555_v45 }
 0x531   :  { %v15221_v40 = vadd.f32 %v4643_v63, %v15011_v12  ;;  %v4744_v11 = vadd.f32 %v4743_v46, %v15202_v3  ;;  %v11200_v31 = vpop.f32.mrb[37].mxu0  ;;  %v12196_v15 = vpop.f32.mrb[10].mxu1  ;;  %v15233_v12 = vpack.c.bf16 %v5442_v41, %v5441_v25  ;;  %v5557_v46 = vld [vmem:[#allocation2 + $0xc0] sm:$0xff] }
 0x532   :  { %v15224_v23 = vadd.f32 %v11200_v31, %v11199_v49  ;;  %v15227_v10 = vadd.f32 %v12196_v15, %v15032_v4  ;;  %v11202_v26 = vpop.f32.mrb[38].mxu0  ;;  %v4646_v47 = vpop.f32.mrb[11].mxu1  ;;  %v5443_v49 = vld [vmem:[#allocation2 + $0x151] sm:$0xff]  ;;  %v5444_v63 = vld [vmem:[#allocation2 + $0x159] sm:$0xff] }
 0x533   :  { %v4745_v43 = vadd.f32 %v4744_v11, %v15221_v40  ;;  %v15231_v60 = vadd.f32 %v4646_v47, %v15017_v2  ;;  %v11203_v21 = vpop.f32.mrb[39].mxu0  ;;  %v5558_v2 = vld [vmem:[#allocation2 + $0xc8] sm:$0xff] }
 0x534   :  { %v15235_v36 = vadd.f32 %v11203_v21, %v11202_v26  ;;  %7013 = vmatmul.mubr.bf16.gmra.mrb[116].mxu1 %v5582_v7 }
 0x535   :  { %v4746_v8 = vadd.f32 %v4745_v43, %v15231_v60  ;;  %6908 = vmatmul.mubr.bf16.gmra.mrb[144].mxu0 %v15233_v12  ;;  %7020 = vmatprep.mubr.bf16.mxu1 %v15136_v0 }
 0x536   :  { %6915 = vmatprep.mubr.bf16.mxu0 %v15108_v53 }
 0x537   :  { %v4747_v4 = vadd.f32 %v4746_v8, %v15218_v18  ;;  %v12199_v57 = vpop.f32.mrb[12].mxu1 }
 0x538   :  { %v15243_v1 = vadd.f32 %v12199_v57, %v15066_v14  ;;  %v11205_v45 = vpop.f32.mrb[40].mxu0  ;;  %v4659_v13 = vpop.f32.mrb[13].mxu1  ;;  %v5583_v14 = vpack.c.bf16 %v5558_v2, %v5557_v46  ;;  %v5559_v57 = vld [vmem:[#allocation2 + $0xd8] sm:$0xff] }
 0x539   :  { %v15246_v25 = vadd.f32 %v4659_v13, %v15046_v52  ;;  %v4748_v41 = vadd.f32 %v4747_v4, %v15227_v10  ;;  %v11206_v0 = vpop.f32.mrb[41].mxu0  ;;  %v12200_v11 = vpop.f32.mrb[14].mxu1  ;;  %v15258_v52 = vpack.c.bf16 %v5444_v63, %v5443_v49  ;;  %v5445_v13 = vld [vmem:[#allocation2 + $0x169] sm:$0xff]  ;;  %v5446_v49 = vld [vmem:[#allocation2 + $0x171] sm:$0xff] }
 0x53a   :  { %v15249_v53 = vadd.f32 %v11206_v0, %v11205_v45  ;;  %v15252_v31 = vadd.f32 %v12200_v11, %v15072_v32  ;;  %v11208_v15 = vpop.f32.mrb[42].mxu0  ;;  %v4662_v26 = vpop.f32.mrb[15].mxu1  ;;  %v5512_v11 = vld [vmem:[#allocation2 + $0x18a] sm:$0xff] }
 0x53b   :  { %v4749_v47 = vadd.f32 %v4748_v41, %v15246_v25  ;;  %v15256_v7 = vadd.f32 %v4662_v26, %v15052_v44  ;;  %v11209_v43 = vpop.f32.mrb[43].mxu0  ;;  %v5560_v44 = vld [vmem:[#allocation2 + $0xe0] sm:$0xff] }
 0x53c   :  { %v15260_v21 = vadd.f32 %v11209_v43, %v11208_v15  ;;  %7021 = vmatmul.mubr.bf16.gmra.mrb[120].mxu1 %v5583_v14 }
 0x53d   :  { %v4750_v8 = vadd.f32 %v4749_v47, %v15256_v7  ;;  %6916 = vmatmul.mubr.bf16.gmra.mrb[148].mxu0 %v15258_v52  ;;  %7028 = vmatprep.mubr.bf16.mxu1 %v15147_v9  ;;  %v5584_v47 = vpack.c.bf16 %v5560_v44, %v5559_v57  ;;  %v5561_v57 = vld [vmem:[#allocation2 + $0xf0] sm:$0xff]  ;;  %v5562_v44 = vld [vmem:[#allocation2 + $0xf8] sm:$0xff] }
 0x53e   :  { %6923 = vmatprep.mubr.bf16.mxu0 %v15121_v62  ;;  %v5511_v62 = vld [vmem:[#allocation2 + $0x182] sm:$0xff] }
 0x53f   :  { %v4751_v32 = vadd.f32 %v4750_v8, %v15243_v1  ;;  %v12203_v4 = vpop.f32.mrb[16].mxu1 }
 0x540   :  { %v15268_v46 = vadd.f32 %v12203_v4, %v15100_v20  ;;  %v11211_v2 = vpop.f32.mrb[44].mxu0  ;;  %v4675_v45 = vpop.f32.mrb[17].mxu1  ;;  %v15283_v4 = vpack.c.bf16 %v5446_v49, %v5445_v13 }
 0x541   :  { %v15271_v63 = vadd.f32 %v4675_v45, %v15086_v58  ;;  %v4752_v41 = vadd.f32 %v4751_v32, %v15252_v31  ;;  %v11212_v9 = vpop.f32.mrb[45].mxu0  ;;  %v12204_v0 = vpop.f32.mrb[18].mxu1  ;;  %v15287_v45 = vpack.c.bf16 %v5512_v11, %v5511_v62 }
 0x542   :  { %v15274_v15 = vadd.f32 %v11212_v9, %v11211_v2  ;;  %v15277_v26 = vadd.f32 %v12204_v0, %v15106_v35  ;;  %v11214_v20 = vpop.f32.mrb[46].mxu0  ;;  %v4678_v14 = vpop.f32.mrb[19].mxu1 }
 0x543   :  { %v4753_v43 = vadd.f32 %v4752_v41, %v15271_v63  ;;  %v15281_v8 = vadd.f32 %v4678_v14, %v15092_v54  ;;  %v11215_v58 = vpop.f32.mrb[47].mxu0  ;;  %17548 = vst [vmem:[#allocation12_spill] sm:$0xff] %v15287_v45 }
 0x544   :  { %v15285_v32 = vadd.f32 %v11215_v58, %v11214_v20  ;;  %7029 = vmatmul.mubr.bf16.gmra.mrb[124].mxu1 %v5584_v47  ;;  %v5674_v20 = vld [vmem:[#allocation2 + $0x3a] sm:$0xff] }
 0x545   :  { %v4754_v2 = vadd.f32 %v4753_v43, %v15281_v8  ;;  %6924 = vmatmul.mubr.bf16.gmra.mrb[152].mxu0 %v15283_v4  ;;  %7036 = vmatprep.mubr.bf16.mxu1 %v15158_v59  ;;  %v5673_v59 = vld [vmem:[#allocation2 + $0x32] sm:$0xff] }
 0x546   :  { %6931 = vmatprep.mubr.bf16.mxu0 %v15287_v45 }
 0x547   :  { %v4755_v35 = vadd.f32 %v4754_v2, %v15268_v46  ;;  %v12207_v54 = vpop.f32.mrb[20].mxu1 }
 0x548   :  { %v15295_v13 = vadd.f32 %v12207_v54, %v15127_v34  ;;  %v11217_v49 = vpop.f32.mrb[48].mxu0  ;;  %v4691_v41 = vpop.f32.mrb[21].mxu1  ;;  %v5585_v34 = vpack.c.bf16 %v5562_v44, %v5561_v57  ;;  %v5563_v44 = vld [vmem:[#allocation2 + $0x108] sm:$0xff] }
 0x549   :  { %v15298_v9 = vadd.f32 %v4691_v41, %v15114_v50  ;;  %v4756_v0 = vadd.f32 %v4755_v35, %v15277_v26  ;;  %v11218_v62 = vpop.f32.mrb[49].mxu0  ;;  %v12208_v11 = vpop.f32.mrb[22].mxu1  ;;  %v12615_v41 = vld [vmem:[#allocation2 + $0x181] sm:$0xff]  ;;  %v12616_v35 = vld [vmem:[#allocation2 + $0x189] sm:$0xff] }
 0x54a   :  { %v15301_v14 = vadd.f32 %v11218_v62, %v11217_v49  ;;  %v15304_v47 = vadd.f32 %v12208_v11, %v15133_v33  ;;  %v11220_v43 = vpop.f32.mrb[50].mxu0  ;;  %v4694_v58 = vpop.f32.mrb[23].mxu1  ;;  %v5464_v3 = vpack.c.bf16 %v12616_v35, %v12615_v41  ;;  %v5705_v49 = vpack.c.bf16 %v5674_v20, %v5673_v59 }
 0x54b   :  { %v4757_v2 = vadd.f32 %v4756_v0, %v15298_v9  ;;  %v15308_v54 = vadd.f32 %v4694_v58, %v15119_v39  ;;  %v11221_v50 = vpop.f32.mrb[51].mxu0  ;;  %v5564_v39 = vld [vmem:[#allocation2 + $0x110] sm:$0xff] }
 0x54c   :  { %v15310_v27 = vadd.f32 %v11221_v50, %v11220_v43  ;;  %7037 = vmatmul.mubr.bf16.gmra.mrb[128].mxu1 %v5585_v34  ;;  %v5675_v43 = vld [vmem:[#allocation2 + $0x4a] sm:$0xff]  ;;  %v5676_v50 = vld [vmem:[#allocation2 + $0x52] sm:$0xff]  ;;  %v5677_v34 = vld [vmem:[#allocation2 + $0x62] sm:$0xff] }
 0x54d   :  { %v4758_v62 = vadd.f32 %v4757_v2, %v15308_v54  ;;  %6932 = vmatmul.mubr.bf16.gmra.mrb[156].mxu0 %v5464_v3  ;;  %7044 = vmatprep.mubr.bf16.mxu1 %v15180_v5  ;;  %v5678_v2 = vld [vmem:[#allocation2 + $0x6a] sm:$0xff] }
 0x54e   :  { %12233 = vmatprep.mubr.bf16.mxu0 %v5705_v49  ;;  %v5707_v16 = vpack.c.bf16 %v5678_v2, %v5677_v34 }
 0x54f   :  { %v4759_v33 = vadd.f32 %v4758_v62, %v15295_v13  ;;  %v12211_v57 = vpop.f32.mrb[24].mxu1  ;;  %v5586_v62 = vpack.c.bf16 %v5564_v39, %v5563_v44  ;;  %v5565_v39 = vld [vmem:[#allocation2 + $0x120] sm:$0xff] }
 0x550   :  { %v15316_v0 = vadd.f32 %v12211_v57, %v15149_v28  ;;  %v11223_v11 = vpop.f32.mrb[52].mxu0  ;;  %v4707_v58 = vpop.f32.mrb[25].mxu1 }
 0x551   :  { %v15319_v59 = vadd.f32 %v4707_v58, %v15138_v37  ;;  %v4760_v3 = vadd.f32 %v4759_v33, %v15304_v47  ;;  %v11224_v20 = vpop.f32.mrb[53].mxu0  ;;  %v12212_v5 = vpop.f32.mrb[26].mxu1  ;;  %v5706_v58 = vpack.c.bf16 %v5676_v50, %v5675_v43  ;;  %v5679_v50 = vld [vmem:[#allocation2 + $0x7a] sm:$0xff] }
 0x552   :  { %v15322_v41 = vadd.f32 %v11224_v20, %v11223_v11  ;;  %v15325_v35 = vadd.f32 %v12212_v5, %v15155_v38  ;;  %v11226_v28 = vpop.f32.mrb[54].mxu0  ;;  %v4710_v49 = vpop.f32.mrb[27].mxu1  ;;  %v5680_v5 = vld [vmem:[#allocation2 + $0x82] sm:$0xff] }
 0x553   :  { %v4761_v57 = vadd.f32 %v4760_v3, %v15319_v59  ;;  %v15329_v56 = vadd.f32 %v4710_v49, %v15144_v48  ;;  %v11227_v37 = vpop.f32.mrb[55].mxu0  ;;  %v5566_v3 = vld [vmem:[#allocation2 + $0x128] sm:$0xff]  ;;  %v5682_v49 = vld [vmem:[#allocation2 + $0x9a] sm:$0xff] }
 0x554   :  { %17549 = vst [vmem:[#allocation14_spill] sm:$0xff] %v15322_v41  ;;  %v15331_v33 = vadd.f32 %v11227_v37, %v11226_v28  ;;  %7045 = vmatmul.mubr.bf16.gmra.mrb[132].mxu1 %v5586_v62 }
 0x555   :  { %v4762_v11 = vadd.f32 %v4761_v57, %v15329_v56  ;;  %12234 = vmatmul.mubr.bf16.vlgmr.msra.gmra.mrb[160].mxu0 %v5706_v58  ;;  %7052 = vmatprep.mubr.bf16.mxu1 %v15208_v24  ;;  %v5587_v58 = vpack.c.bf16 %v5566_v3, %v5565_v39  ;;  %v5567_v3 = vld [vmem:[#allocation2 + $0x138] sm:$0xff] }
 0x556   :  { %17550 = vst [vmem:[#allocation13_spill] sm:$0xff] %v15331_v33  ;;  %12237 = vmatprep.mubr.bf16.mxu0 %v5707_v16  ;;  %v5681_v16 = vld [vmem:[#allocation2 + $0x92] sm:$0xff] }
 0x557   :  { %v4763_v38 = vadd.f32 %v4762_v11, %v15316_v0  ;;  %v12215_v44 = vpop.f32.mrb[28].mxu1  ;;  %v5709_v33 = vpack.c.bf16 %v5682_v49, %v5681_v16  ;;  %v5685_v49 = vld [vmem:[#allocation2 + $0xc2] sm:$0xff] }
 0x558   :  { %v15337_v48 = vadd.f32 %v12215_v44, %v15182_v6  ;;  %v11229_v20 = vpop.f32.mrb[56].mxu0  ;;  %v4723_v43 = vpop.f32.mrb[29].mxu1 }
 0x559   :  { %v15340_v34 = vadd.f32 %v4723_v43, %v15160_v30  ;;  %v4764_v2 = vadd.f32 %v4763_v38, %v15325_v35  ;;  %v11230_v28 = vpop.f32.mrb[57].mxu0  ;;  %v12216_v24 = vpop.f32.mrb[30].mxu1  ;;  %v5708_v43 = vpack.c.bf16 %v5680_v5, %v5679_v50 }
 0x55a   :  { %v15343_v62 = vadd.f32 %v11230_v28, %v11229_v20  ;;  %v15346_v57 = vadd.f32 %v12216_v24, %v15189_v55  ;;  %v11232_v6 = vpop.f32.mrb[58].mxu0  ;;  %v4726_v37 = vpop.f32.mrb[31].mxu1  ;;  %v5683_v24 = vld [vmem:[#allocation2 + $0xaa] sm:$0xff] }
 0x55b   :  { %v4765_v11 = vadd.f32 %v4764_v2, %v15340_v34  ;;  %v15350_v44 = vadd.f32 %v4726_v37, %v15166_v42  ;;  %v11233_v30 = vpop.f32.mrb[59].mxu0  ;;  %v5568_v2 = vld [vmem:[#allocation2 + $0x140] sm:$0xff]  ;;  %v5684_v37 = vld [vmem:[#allocation2 + $0xb2] sm:$0xff] }
 0x55c   :  { %17551 = vst [vmem:[#allocation16_spill] sm:$0xff] %v15343_v62  ;;  %v15352_v38 = vadd.f32 %v11233_v30, %v11232_v6  ;;  %7053 = vmatmul.mubr.bf16.gmra.mrb[136].mxu1 %v5587_v58  ;;  %v5686_v58 = vld [vmem:[#allocation2 + $0xca] sm:$0xff]  ;;  %v5588_v30 = vpack.c.bf16 %v5568_v2, %v5567_v3  ;;  %v5710_v62 = vpack.c.bf16 %v5684_v37, %v5683_v24 }
 0x55d   :  { %v4766_v20 = vadd.f32 %v4765_v11, %v15350_v44  ;;  %12238 = vmatmul.mubr.bf16.gmra.mrb[164].mxu0 %v5708_v43  ;;  %7060 = vmatprep.mubr.bf16.mxu1 %v15233_v12 }
 0x55e   :  { %17552 = vst [vmem:[#allocation15_spill] sm:$0xff] %v15352_v38  ;;  %12241 = vmatprep.mubr.bf16.mxu0 %v5709_v33 }
 0x55f   :  { %v4767_v55 = vadd.f32 %v4766_v20, %v15337_v48  ;;  %v11305_v39 = vpop.f32.mrb[32].mxu1 }
 0x560   :  { %v11235_v28 = vpop.f32.mrb[60].mxu0  ;;  %v11306_v42 = vpop.f32.mrb[33].mxu1 }
 0x561   :  { %v4768_v50 = vadd.f32 %v4767_v55, %v15346_v57  ;;  %v11236_v5 = vpop.f32.mrb[61].mxu0  ;;  %v11307_v6 = vadd.f32 %v11306_v42, %v11305_v39  ;;  %v11308_v16 = vpop.f32.mrb[34].mxu1  ;;  %v5711_v55 = vpack.c.bf16 %v5686_v58, %v5685_v49  ;;  %v5569_v42 = vld [vmem:[#allocation2 + $0x150] sm:$0xff] }
 0x562   :  { %v15358_v11 = vadd.f32 %v11236_v5, %v11235_v28  ;;  %v11238_v12 = vpop.f32.mrb[62].mxu0  ;;  %v11309_v33 = vpop.f32.mrb[35].mxu1  ;;  %v5570_v5 = vld [vmem:[#allocation2 + $0x158] sm:$0xff] }
 0x563   :  { %v4769_v43 = vrot.slane %v4768_v50, 4  ;;  %v11239_v20 = vpop.f32.mrb[63].mxu0  ;;  %v11310_v38 = vadd.f32 %v11309_v33, %v11308_v16  ;;  %v15361_v41 = vadd.f32 %v11307_v6, %v15199_v29  ;;  %v5687_v29 = vld [vmem:[#allocation2 + $0xda] sm:$0xff]  ;;  %v5688_v6 = vld [vmem:[#allocation2 + $0xe2] sm:$0xff] }
 0x564   :  { %v15363_v45 = vadd.f32 %v11239_v20, %v11238_v12  ;;  %7061 = vmatmul.mubr.bf16.gmra.mrb[140].mxu1 %v5588_v30 }
 0x565   :  { %17553 = vst [vmem:[#allocation21_spill] sm:$0xff] %v15361_v41  ;;  %v4770_v39 = vadd.f32 %v4769_v43, %v4768_v50  ;;  %12242 = vmatmul.mubr.bf16.gmra.mrb[168].mxu0 %v5710_v62  ;;  %7068 = vmatprep.mubr.bf16.mxu1 %v15258_v52  ;;  %v15367_v28 = vadd.f32 %v11310_v38, %v15210_v17  ;;  %v5689_v50 = vld [vmem:[#allocation2 + $0xf2] sm:$0xff]  ;;  %v5690_v62 = vld [vmem:[#allocation2 + $0xfa] sm:$0xff] }
 0x566   :  { %12245 = vmatprep.mubr.bf16.mxu0 %v5711_v55  ;;  %v5589_v38 = vpack.c.bf16 %v5570_v5, %v5569_v42  ;;  %v5712_v55 = vpack.c.bf16 %v5688_v6, %v5687_v29  ;;  %v5691_v42 = vld [vmem:[#allocation2 + $0x10a] sm:$0xff]  ;;  %v5692_v5 = vld [vmem:[#allocation2 + $0x112] sm:$0xff] }
 0x567   :  { %17554 = vst [vmem:[#allocation22_spill] sm:$0xff] %v15367_v28  ;;  %v4771_v3 = vrot.slane %v4770_v39, 2  ;;  %v11311_v2 = vpop.f32.mrb[36].mxu1  ;;  %v5572_v6 = vld [vmem:[#allocation2 + $0x170] sm:$0xff] }
 0x568   :  { %v11241_v24 = vpop.f32.mrb[64].mxu0  ;;  %v11312_v37 = vpop.f32.mrb[37].mxu1 }
 0x569   :  { %v4772_v16 = vadd.f32 %v4771_v3, %v4770_v39  ;;  %v11242_v12 = vpop.f32.mrb[65].mxu0  ;;  %v11313_v33 = vadd.f32 %v11312_v37, %v11311_v2  ;;  %v11314_v49 = vpop.f32.mrb[38].mxu1  ;;  %v5713_v39 = vpack.c.bf16 %v5690_v62, %v5689_v50 }
 0x56a   :  { %v15369_v58 = vadd.f32 %v11242_v12, %v11241_v24  ;;  %v11244_v52 = vpop.f32.mrb[66].mxu0  ;;  %v11315_v17 = vpop.f32.mrb[39].mxu1  ;;  %v5693_v24 = vld [vmem:[#allocation2 + $0x122] sm:$0xff]  ;;  %v5694_v12 = vld [vmem:[#allocation2 + $0x12a] sm:$0xff] }
 0x56b   :  { %v4773_v30 = vrot.slane %v4772_v16, 1  ;;  %v11245_v43 = vpop.f32.mrb[67].mxu0  ;;  %v11316_v20 = vadd.f32 %v11315_v17, %v11314_v49  ;;  %v15372_v28 = vadd.f32 %v11313_v33, %v15224_v23  ;;  %v5571_v23 = vld [vmem:[#allocation2 + $0x168] sm:$0xff] }
 0x56c   :  { %v15374_v41 = vadd.f32 %v11245_v43, %v11244_v52  ;;  %7069 = vmatmul.mubr.bf16.gmra.mrb[144].mxu1 %v5589_v38  ;;  %v5637_v49 = vld [vmem:[#allocation2 + $0x181] sm:$0xff]  ;;  %v5590_v38 = vpack.c.bf16 %v5572_v6, %v5571_v23  ;;  %v5715_v43 = vpack.c.bf16 %v5694_v12, %v5693_v24 }
 0x56d   :  { %17555 = vst [vmem:[#allocation18_spill] sm:$0xff] %v15372_v28  ;;  %v4774_v3 = vadd.f32 %v4773_v30, %v4772_v16  ;;  %12246 = vmatmul.mubr.bf16.gmra.mrb[172].mxu0 %v5712_v55  ;;  %7076 = vmatprep.mubr.bf16.mxu1 %v15283_v4  ;;  %v15378_v2 = vadd.f32 %v11316_v20, %v15235_v36  ;;  %v5638_v4 = vld [vmem:[#allocation2 + $0x189] sm:$0xff]  ;;  %v5695_v6 = vld [vmem:[#allocation2 + $0x13a] sm:$0xff] }
 0x56e   :  { %12249 = vmatprep.mubr.bf16.mxu0 %v5713_v39  ;;  %v5714_v30 = vpack.c.bf16 %v5692_v5, %v5691_v42  ;;  %v5573_v5 = vld [vmem:[#allocation2 + $0x180] sm:$0xff]  ;;  %v5574_v24 = vld [vmem:[#allocation2 + $0x188] sm:$0xff] }
 0x56f   :  { %17556 = vst [vmem:[#allocation17_spill] sm:$0xff] %v15378_v2  ;;  %v15380_v37 = vmul.f32 0.00390625, %v4774_v3  ;;  %v15382_v29 = vpop.f32.mrb[40].mxu1  ;;  %v5655_v3 = vpack.c.bf16 %v5638_v4, %v5637_v49  ;;  %v5696_v4 = vld [vmem:[#allocation2 + $0x142] sm:$0xff] }
 0x570   :  { %v15384_v33 = vpop.f32.mrb[68].mxu0  ;;  %v15386_v16 = vpop.f32.mrb[41].mxu1  ;;  %v5716_v2 = vpack.c.bf16 %v5696_v4, %v5695_v6 }
 0x571   :  { %v15390_v36 = vsub.f32 %v15350_v44, %v15380_v37  ;;  %v15392_v50 = vpop.f32.mrb[69].mxu0  ;;  %v15394_v62 = vpop.f32.mrb[42].mxu1  ;;  %v15402_v20 = vsub.f32 %v15221_v40, %v15380_v37  ;;  %v15406_v55 = vsub.f32 %v15231_v60, %v15380_v37  ;;  %v15410_v44 = vsub.f32 %v15218_v18, %v15380_v37 }
 0x572   :  { %v15396_v52 = vpop.f32.mrb[70].mxu0  ;;  %v15398_v17 = vpop.f32.mrb[43].mxu1  ;;  %v15416_v23 = vsub.f32 %v15227_v10, %v15380_v37  ;;  %v15420_v42 = vsub.f32 %v15246_v25, %v15380_v37  ;;  %v15424_v40 = vsub.f32 %v15256_v7, %v15380_v37  ;;  %v15428_v60 = vsub.f32 %v15243_v1, %v15380_v37 }
 0x573   :  { %17557 = vst [vmem:[#allocation25_spill] sm:$0xff] %v15390_v36  ;;  %17558 = vst [vmem:[#allocation26_spill] sm:$0xff] %v15402_v20  ;;  %v15412_v39 = vpop.f32.mrb[71].mxu0  ;;  %v15432_v18 = vsub.f32 %v15252_v31, %v15380_v37  ;;  %v15436_v10 = vsub.f32 %v15271_v63, %v15380_v37  ;;  %v15440_v25 = vsub.f32 %v15281_v8, %v15380_v37  ;;  %v5698_v36 = vld [vmem:[#allocation2 + $0x15a] sm:$0xff] }
 0x574   :  { %17559 = vst [vmem:[#allocation20_spill] sm:$0xff] %v15406_v55  ;;  %17560 = vst [vmem:[#allocation19_spill] sm:$0xff] %v15410_v44  ;;  %7077 = vmatmul.mubr.bf16.gmra.mrb[148].mxu1 %v5590_v38  ;;  %v15444_v7 = vsub.f32 %v15268_v46, %v15380_v37  ;;  %v15448_v1 = vsub.f32 %v15277_v26, %v15380_v37  ;;  %v15452_v31 = vsub.f32 %v15298_v9, %v15380_v37  ;;  %v5639_v38 = vld [vmem:[#allocation2 + $0x199] sm:$0xff] }
 0x575   :  { %17561 = vst [vmem:[#allocation28_spill] sm:$0xff] %v15416_v23  ;;  %17562 = vst [vmem:[#allocation29_spill] sm:$0xff] %v15420_v42  ;;  %12250 = vmatmul.mubr.bf16.gmra.mrb[176].mxu0 %v5714_v30  ;;  %v15456_v63 = vsub.f32 %v15308_v54, %v15380_v37  ;;  %v15460_v8 = vsub.f32 %v15295_v13, %v15380_v37  ;;  %7084 = vmatprep.mubr.bf16.mxu1 %v5655_v3  ;;  %v5640_v30 = vld [vmem:[#allocation2 + $0x1a1] sm:$0xff]  ;;  %v5697_v3 = vld [vmem:[#allocation2 + $0x152] sm:$0xff] }
 0x576   :  { %17563 = vst [vmem:[#allocation24_spill] sm:$0xff] %v15424_v40  ;;  %17564 = vst [vmem:[#allocation23_spill] sm:$0xff] %v15428_v60  ;;  %v15464_v46 = vsub.f32 %v15304_v47, %v15380_v37  ;;  %v15468_v26 = vsub.f32 %v15319_v59, %v15380_v37  ;;  %v15472_v9 = vsub.f32 %v15329_v56, %v15380_v37  ;;  %12253 = vmatprep.mubr.bf16.mxu0 %v5715_v43 }
 0x577   :  { %17565 = vst [vmem:[#allocation6_spill] sm:$0xff] %v15432_v18  ;;  %17566 = vst [vmem:[#allocation8_spill] sm:$0xff] %v15460_v8  ;;  %v15476_v54 = vsub.f32 %v15316_v0, %v15380_v37  ;;  %v11323_v13 = vpop.f32.mrb[44].mxu1  ;;  %v15480_v47 = vsub.f32 %v15325_v35, %v15380_v37  ;;  %v15484_v59 = vsub.f32 %v15340_v34, %v15380_v37 }
 0x578   :  { %17567 = vst [vmem:[#allocation27_spill] sm:$0xff] %v15464_v46  ;;  %17568 = vst [vmem:[#allocation30_spill] sm:$0xff] %v15468_v26  ;;  %v15488_v56 = vsub.f32 %v15337_v48, %v15380_v37  ;;  %v15492_v0 = vsub.f32 %v15346_v57, %v15380_v37  ;;  %v11253_v12 = vpop.f32.mrb[72].mxu0  ;;  %v11324_v49 = vpop.f32.mrb[45].mxu1  ;;  %v5656_v48 = vpack.c.bf16 %v5640_v30, %v5639_v38  ;;  %v12617_v26 = vld [vmem:[#allocation2] sm:$0xff] }
 0x579   :  { %17569 = vst [vmem:[#allocation31_spill] sm:$0xff] %v15472_v9  ;;  %17570 = vst [vmem:[#allocation32_spill] sm:$0xff] %v15476_v54  ;;  %v11254_v43 = vpop.f32.mrb[73].mxu0  ;;  %v11326_v35 = vpop.f32.mrb[46].mxu1  ;;  %v5717_v57 = vpack.c.bf16 %v5698_v36, %v5697_v3  ;;  %v5700_v9 = vld [vmem:[#allocation2 + $0x172] sm:$0xff]  ;;  %v5592_v46 = vpack.c.bf16 %v12617_v26, %v12617_v26  ;;  %v15512_v26 = vadd.f32 %v15412_v39, %v15396_v52 }
 0x57a   :  { %17571 = vst [vmem:[#allocation33_spill] sm:$0xff] %v15480_v47  ;;  %17572 = vst [vmem:[#allocation34_spill] sm:$0xff] %v15484_v59  ;;  %v11256_v47 = vpop.f32.mrb[74].mxu0  ;;  %v11327_v34 = vpop.f32.mrb[47].mxu1  ;;  %v5591_v59 = vpack.c.bf16 %v5574_v24, %v5573_v5  ;;  %v15500_v5 = vsub.f32 %v15169_v19, %v15380_v37  ;;  %v11322_v19 = vadd.f32 %v15398_v17, %v15394_v62 }
 0x57b   :  { %17573 = vst [vmem:[#allocation35_spill] sm:$0xff] %v15488_v56  ;;  %17574 = vst [vmem:[#allocation36_spill] sm:$0xff] %v15492_v0  ;;  %v11257_v54 = vpop.f32.mrb[75].mxu0  ;;  %v15496_v56 = vsub.f32 %v15178_v61, %v15380_v37  ;;  %v5699_v0 = vld [vmem:[#allocation2 + $0x16a] sm:$0xff]  ;;  %v15506_v61 = vadd.f32 %v15392_v50, %v15384_v33  ;;  %v11328_v33 = vadd.f32 %v11327_v34, %v11326_v35 }
 0x57c   :  { %7085 = vmatmul.mubr.bf16.gmra.mrb[152].mxu1 %v5591_v59  ;;  %v5718_v8 = vpack.c.bf16 %v5700_v9, %v5699_v0  ;;  %v15516_v9 = vadd.f32 %v11254_v43, %v11253_v12  ;;  %v11325_v59 = vadd.f32 %v11324_v49, %v11323_v13  ;;  %v15518_v38 = vadd.f32 %v11257_v54, %v11256_v47  ;;  %v17576_v12 = vld [vmem:[#allocation10_spill] sm:$0xff] }
 0x57d   :  { %12254 = vmatmul.mubr.bf16.gmra.mrb[180].mxu0 %v5716_v2  ;;  %7092 = vmatprep.mubr.bf16.mxu1 %v5656_v48  ;;  %v4809_v24 = vmul.f32 %v15496_v56, %v15496_v56  ;;  %v11319_v2 = vadd.f32 %v15386_v16, %v15382_v29  ;;  %v15526_v62 = vadd.f32 %v11322_v19, %v15260_v21 }
 0x57e   :  { %12257 = vmatprep.mubr.bf16.mxu0 %v5717_v57  ;;  %v15529_v17 = vadd.f32 %v11325_v59, %v15274_v15  ;;  %v15534_v54 = vadd.f32 %v11328_v33, %v15285_v32  ;;  %v15541_v13 = vsub.f32 %v15172_v22, %v15380_v37  ;;  %v15548_v21 = vsub.f32 %v15175_v51, %v15380_v37  ;;  %v17575_v15 = vld [vmem:[#allocation12_spill] sm:$0xff] }
 0x57f   :  { %v11329_v28 = vpop.f32.mrb[48].mxu1  ;;  %v15523_v52 = vadd.f32 %v11319_v2, %v15249_v53  ;;  %v5704_v32 = vld [vmem:[#allocation2 + $0x1a2] sm:$0xff]  ;;  %v15555_v22 = vsub.f32 %v17576_v12, %v15380_v37 }
 0x580   :  { %v11259_v36 = vpop.f32.mrb[76].mxu0  ;;  %v11330_v6 = vpop.f32.mrb[49].mxu1  ;;  %v17577_v2 = vld [vmem:[#allocation11_spill] sm:$0xff] }
 0x581   :  { %v11260_v0 = vpop.f32.mrb[77].mxu0  ;;  %v11332_v4 = vpop.f32.mrb[50].mxu1  ;;  %v11331_v29 = vadd.f32 %v11330_v6, %v11329_v28  ;;  %v4811_v6 = vmul.f32 %v15548_v21, %v15548_v21 }
 0x582   :  { %v15520_v50 = vadd.f32 %v11260_v0, %v11259_v36  ;;  %v11262_v16 = vpop.f32.mrb[78].mxu0  ;;  %v11333_v30 = vpop.f32.mrb[51].mxu1  ;;  %v15561_v36 = vsub.f32 %v17577_v2, %v15380_v37 }
 0x583   :  { %v11263_v3 = vpop.f32.mrb[79].mxu0  ;;  %v11334_v48 = vadd.f32 %v11333_v30, %v11332_v4  ;;  %v15537_v28 = vadd.f32 %v11331_v29, %v15301_v14  ;;  %v4808_v14 = vmul.f32 %v15541_v13, %v15541_v13  ;;  %v17579_v30 = vld [vmem:[#allocation7_spill] sm:$0xff] }
 0x584   :  { %v15531_v39 = vadd.f32 %v11263_v3, %v11262_v16  ;;  %7093 = vmatmul.mubr.bf16.gmra.mrb[156].mxu1 %v5592_v46  ;;  %v5703_v46 = vld [vmem:[#allocation2 + $0x19a] sm:$0xff]  ;;  %v15572_v3 = vsub.f32 %v17579_v30, %v15380_v37  ;;  %v17583_v30 = vld [vmem:[#allocation16_spill] sm:$0xff] }
 0x585   :  { %12258 = vmatmul.mubr.bf16.gmra.mrb[184].mxu0 %v5718_v8  ;;  %v15544_v53 = vadd.f32 %v11334_v48, %v15310_v27  ;;  %v4810_v27 = vmul.f32 %v15500_v5, %v15500_v5  ;;  %v4840_v43 = vadd.f32 %v4809_v24, %v4808_v14  ;;  %v5720_v57 = vpack.c.bf16 %v5704_v32, %v5703_v46  ;;  %v17578_v16 = vld [vmem:[#allocation14_spill] sm:$0xff]  ;;  %v17580_v32 = vld [vmem:[#allocation13_spill] sm:$0xff] }
 0x586   :  { %12261 = vmatprep.mubr.bf16.mxu0 %v17575_v15  ;;  %v4812_v48 = vmul.f32 %v15555_v22, %v15555_v22 }
 0x587   :  { %v11335_v47 = vpop.f32.mrb[52].mxu1  ;;  %v4841_v4 = vadd.f32 %v4840_v43, %v4810_v27  ;;  %v4813_v27 = vmul.f32 %v15561_v36, %v15561_v36  ;;  %v4814_v43 = vmul.f32 %v15572_v3, %v15572_v3 }
 0x588   :  { %v11265_v8 = vpop.f32.mrb[80].mxu0  ;;  %v11336_v49 = vpop.f32.mrb[53].mxu1 }
 0x589   :  { %v11266_v51 = vpop.f32.mrb[81].mxu0  ;;  %v11337_v35 = vadd.f32 %v11336_v49, %v11335_v47  ;;  %v11338_v34 = vpop.f32.mrb[54].mxu1  ;;  %v4842_v46 = vadd.f32 %v4841_v4, %v4811_v6  ;;  %v17581_v47 = vld [vmem:[#allocation9_spill] sm:$0xff] }
 0x58a   :  { %v15565_v19 = vadd.f32 %v11266_v51, %v11265_v8  ;;  %v11268_v59 = vpop.f32.mrb[82].mxu0  ;;  %v11339_v0 = vpop.f32.mrb[55].mxu1  ;;  %v15583_v12 = vsub.f32 %v17581_v47, %v15380_v37 }
 0x58b   :  { %v11269_v33 = vpop.f32.mrb[83].mxu0  ;;  %v11340_v29 = vadd.f32 %v11339_v0, %v11338_v34  ;;  %v15568_v24 = vadd.f32 %v11337_v35, %v17578_v16  ;;  %v4843_v8 = vadd.f32 %v4842_v46, %v4812_v48  ;;  %v4816_v46 = vmul.f32 %v15402_v20, %v15402_v20 }
 0x58c   :  { %v15576_v15 = vadd.f32 %v11269_v33, %v11268_v59  ;;  %17582 = vst [vmem:[#allocation12_spill] sm:$0xff] %v15583_v12  ;;  %v4815_v59 = vmul.f32 %v15583_v12, %v15583_v12 }
 0x58d   :  { %12262 = vmatmul.mubr.bf16.gmra.mrb[188].mxu0 %v5720_v57  ;;  %v15579_v14 = vadd.f32 %v11340_v29, %v17580_v32  ;;  %v4844_v34 = vadd.f32 %v4843_v8, %v4813_v27  ;;  %v17584_v27 = vld [vmem:[#allocation15_spill] sm:$0xff] }
 0x58f   :  { %v11341_v49 = vpop.f32.mrb[56].mxu1  ;;  %v4845_v33 = vadd.f32 %v4844_v34, %v4814_v43  ;;  %v4818_v43 = vmul.f32 %v15410_v44, %v15410_v44  ;;  %v4820_v44 = vmul.f32 %v15420_v42, %v15420_v42 }
 0x590   :  { %v11271_v51 = vpop.f32.mrb[84].mxu0  ;;  %v11342_v35 = vpop.f32.mrb[57].mxu1 }
 0x591   :  { %v11272_v2 = vpop.f32.mrb[85].mxu0  ;;  %v11343_v57 = vadd.f32 %v11342_v35, %v11341_v49  ;;  %v11344_v6 = vpop.f32.mrb[58].mxu1  ;;  %v4846_v47 = vadd.f32 %v4845_v33, %v4815_v59  ;;  %v4817_v49 = vmul.f32 %v15406_v55, %v15406_v55  ;;  %v4819_v59 = vmul.f32 %v15416_v23, %v15416_v23  ;;  %v17585_v23 = vld [vmem:[#allocation21_spill] sm:$0xff] }
 0x592   :  { %v15591_v0 = vadd.f32 %v11272_v2, %v11271_v51  ;;  %v11274_v37 = vpop.f32.mrb[86].mxu0  ;;  %v11345_v4 = vpop.f32.mrb[59].mxu1 }
 0x593   :  { %v11275_v29 = vpop.f32.mrb[87].mxu0  ;;  %v11346_v16 = vadd.f32 %v11345_v4, %v11344_v6  ;;  %v15594_v48 = vadd.f32 %v11343_v57, %v17583_v30  ;;  %v4847_v51 = vadd.f32 %v4846_v47, %v4816_v46 }
 0x594   :  { %v15598_v32 = vadd.f32 %v11275_v29, %v11274_v37 }
 0x595   :  { %v15601_v8 = vadd.f32 %v11346_v16, %v17584_v27  ;;  %v4848_v57 = vadd.f32 %v4847_v51, %v4817_v49 }
 0x597   :  { %v11347_v35 = vpop.f32.mrb[60].mxu1  ;;  %v4849_v16 = vadd.f32 %v4848_v57, %v4818_v43  ;;  %v4822_v43 = vmul.f32 %v15428_v60, %v15428_v60  ;;  %v4824_v60 = vmul.f32 %v15436_v10, %v15436_v10 }
 0x598   :  { %v11277_v34 = vpop.f32.mrb[88].mxu0  ;;  %v11348_v2 = vpop.f32.mrb[61].mxu1 }
 0x599   :  { %v11278_v6 = vpop.f32.mrb[89].mxu0  ;;  %v11349_v4 = vadd.f32 %v11348_v2, %v11347_v35  ;;  %v11350_v30 = vpop.f32.mrb[62].mxu1  ;;  %v4850_v51 = vadd.f32 %v4849_v16, %v4819_v59  ;;  %v4823_v59 = vmul.f32 %v15432_v18, %v15432_v18 }
 0x59a   :  { %v15609_v37 = vadd.f32 %v11278_v6, %v11277_v34  ;;  %v11280_v33 = vpop.f32.mrb[90].mxu0  ;;  %v11351_v29 = vpop.f32.mrb[63].mxu1  ;;  %v4821_v34 = vmul.f32 %v15424_v40, %v15424_v40  ;;  %v4828_v40 = vmul.f32 %v15452_v31, %v15452_v31 }
 0x59b   :  { %v11281_v27 = vpop.f32.mrb[91].mxu0  ;;  %v11352_v46 = vadd.f32 %v11351_v29, %v11350_v30  ;;  %v15612_v47 = vadd.f32 %v11349_v4, %v15358_v11  ;;  %v4851_v2 = vadd.f32 %v4850_v51, %v4820_v44 }
 0x59c   :  { %v15616_v49 = vadd.f32 %v11281_v27, %v11280_v33 }
 0x59d   :  { %v15619_v35 = vadd.f32 %v11352_v46, %v15363_v45  ;;  %v4852_v4 = vadd.f32 %v4851_v2, %v4821_v34 }
 0x59f   :  { %v11353_v6 = vpop.f32.mrb[64].mxu1  ;;  %v4853_v27 = vadd.f32 %v4852_v4, %v4822_v43 }
 0x5a0   :  { %v11283_v57 = vpop.f32.mrb[92].mxu0  ;;  %v11354_v11 = vpop.f32.mrb[65].mxu1 }
 0x5a1   :  { %v11284_v30 = vpop.f32.mrb[93].mxu0  ;;  %v11355_v29 = vadd.f32 %v11354_v11, %v11353_v6  ;;  %v11356_v42 = vpop.f32.mrb[66].mxu1  ;;  %v4854_v2 = vadd.f32 %v4853_v27, %v4823_v59  ;;  %v4827_v59 = vmul.f32 %v15448_v1, %v15448_v1 }
 0x5a2   :  { %v15627_v33 = vadd.f32 %v11284_v30, %v11283_v57  ;;  %v11286_v45 = vpop.f32.mrb[94].mxu0  ;;  %v11357_v16 = vpop.f32.mrb[67].mxu1  ;;  %v4825_v57 = vmul.f32 %v15440_v25, %v15440_v25 }
 0x5a3   :  { %v15630_v44 = vadd.f32 %v11355_v29, %v15369_v58  ;;  %v11287_v46 = vpop.f32.mrb[95].mxu0  ;;  %v11358_v51 = vadd.f32 %v11357_v16, %v11356_v42  ;;  %v4855_v11 = vadd.f32 %v4854_v2, %v4824_v60  ;;  %v4826_v58 = vmul.f32 %v15444_v7, %v15444_v7 }
 0x5a4   :  { %v15634_v34 = vadd.f32 %v11287_v46, %v11286_v45 }
 0x5a5   :  { %v15637_v6 = vadd.f32 %v11358_v51, %v15374_v41  ;;  %v4856_v42 = vadd.f32 %v4855_v11, %v4825_v57 }
 0x5a7   :  { %v11359_v30 = vpop.f32.mrb[68].mxu1  ;;  %v4857_v46 = vadd.f32 %v4856_v42, %v4826_v58  ;;  %v17586_v58 = vld [vmem:[#allocation22_spill] sm:$0xff] }
 0x5a8   :  { %v11417_v43 = vpop.f32.mrb[96].mxu0  ;;  %v11360_v4 = vpop.f32.mrb[69].mxu1 }
 0x5a9   :  { %v11361_v29 = vadd.f32 %v11360_v4, %v11359_v30  ;;  %v11418_v16 = vpop.f32.mrb[97].mxu0  ;;  %v11362_v18 = vpop.f32.mrb[70].mxu1  ;;  %v4858_v30 = vadd.f32 %v4857_v46, %v4827_v59  ;;  %v17589_v46 = vld [vmem:[#allocation27_spill] sm:$0xff] }
 0x5aa   :  { %v11419_v45 = vadd.f32 %v11418_v16, %v11417_v43  ;;  %v11420_v41 = vpop.f32.mrb[98].mxu0  ;;  %v11363_v27 = vpop.f32.mrb[71].mxu1  ;;  %v4829_v43 = vmul.f32 %v15456_v63, %v15456_v63 }
 0x5ab   :  { %v15646_v51 = vadd.f32 %v11361_v29, %v15506_v61  ;;  %v11364_v60 = vadd.f32 %v11363_v27, %v11362_v18  ;;  %v11421_v2 = vpop.f32.mrb[99].mxu0  ;;  %v4859_v61 = vadd.f32 %v4858_v30, %v4828_v40  ;;  %v17588_v29 = vld [vmem:[#allocation8_spill] sm:$0xff] }
 0x5ac   :  { %v15651_v57 = vadd.f32 %v11419_v45, %v17585_v23  ;;  %v11422_v11 = vadd.f32 %v11421_v2, %v11420_v41  ;;  %v4830_v16 = vmul.f32 %v17588_v29, %v17588_v29 }
 0x5ad   :  { %v15654_v4 = vadd.f32 %v11364_v60, %v15512_v26  ;;  %v4860_v23 = vadd.f32 %v4859_v61, %v4829_v43  ;;  %v4831_v26 = vmul.f32 %v17589_v46, %v17589_v46 }
 0x5ae   :  { %v15659_v42 = vadd.f32 %v11422_v11, %v17586_v58  ;;  %v17590_v58 = vld [vmem:[#allocation30_spill] sm:$0xff] }
 0x5af   :  { %v11365_v18 = vpop.f32.mrb[72].mxu1  ;;  %v4861_v12 = vadd.f32 %v4860_v23, %v4830_v16  ;;  %v4832_v29 = vmul.f32 %v17590_v58, %v17590_v58  ;;  %v17594_v16 = vld [vmem:[#allocation17_spill] sm:$0xff] }
 0x5b0   :  { %17587 = vst [vmem:[#allocation10_spill] sm:$0xff] %v15659_v42  ;;  %v11423_v27 = vpop.f32.mrb[100].mxu0  ;;  %v11366_v55 = vpop.f32.mrb[73].mxu1  ;;  %v17591_v42 = vld [vmem:[#allocation18_spill] sm:$0xff] }
 0x5b1   :  { %v11367_v45 = vadd.f32 %v11366_v55, %v11365_v18  ;;  %v11424_v41 = vpop.f32.mrb[101].mxu0  ;;  %v11368_v59 = vpop.f32.mrb[74].mxu1  ;;  %v4862_v61 = vadd.f32 %v4861_v12, %v4831_v26  ;;  %v17596_v26 = vld [vmem:[#allocation33_spill] sm:$0xff] }
 0x5b2   :  { %v11425_v60 = vadd.f32 %v11424_v41, %v11423_v27  ;;  %v11426_v2 = vpop.f32.mrb[102].mxu0  ;;  %v11369_v20 = vpop.f32.mrb[75].mxu1  ;;  %v17593_v27 = vld [vmem:[#allocation31_spill] sm:$0xff] }
 0x5b3   :  { %v15666_v11 = vadd.f32 %v11367_v45, %v15516_v9  ;;  %v11370_v40 = vadd.f32 %v11369_v20, %v11368_v59  ;;  %v11427_v30 = vpop.f32.mrb[103].mxu0  ;;  %v4833_v41 = vmul.f32 %v17593_v27, %v17593_v27  ;;  %v4863_v9 = vadd.f32 %v4862_v61, %v4832_v29  ;;  %v17595_v45 = vld [vmem:[#allocation32_spill] sm:$0xff] }
 0x5b4   :  { %v15671_v43 = vadd.f32 %v11425_v60, %v17591_v42  ;;  %v11428_v55 = vadd.f32 %v11427_v30, %v11426_v2  ;;  %v4834_v59 = vmul.f32 %v17595_v45, %v17595_v45 }
 0x5b5   :  { %v15674_v18 = vadd.f32 %v11370_v40, %v15518_v38  ;;  %v4864_v42 = vadd.f32 %v4863_v9, %v4833_v41  ;;  %v4835_v38 = vmul.f32 %v17596_v26, %v17596_v26 }
 0x5b6   :  { %v15679_v23 = vadd.f32 %v11428_v55, %v17594_v16  ;;  %v17597_v16 = vld [vmem:[#allocation34_spill] sm:$0xff] }
 0x5b7   :  { %17592 = vst [vmem:[#allocation11_spill] sm:$0xff] %v15674_v18  ;;  %v11371_v20 = vpop.f32.mrb[76].mxu1  ;;  %v4865_v18 = vadd.f32 %v4864_v42, %v4834_v59  ;;  %v4836_v45 = vmul.f32 %v17597_v16, %v17597_v16  ;;  %v17599_v42 = vld [vmem:[#allocation35_spill] sm:$0xff] }
 0x5b8   :  { %v11429_v58 = vpop.f32.mrb[104].mxu0  ;;  %v11372_v46 = vpop.f32.mrb[77].mxu1 }
 0x5b9   :  { %v11373_v60 = vadd.f32 %v11372_v46, %v11371_v20  ;;  %v11430_v2 = vpop.f32.mrb[105].mxu0  ;;  %v11374_v12 = vpop.f32.mrb[78].mxu1  ;;  %v4866_v9 = vadd.f32 %v4865_v18, %v4835_v38  ;;  %v17600_v38 = vld [vmem:[#allocation36_spill] sm:$0xff] }
 0x5ba   :  { %v11431_v40 = vadd.f32 %v11430_v2, %v11429_v58  ;;  %v11432_v30 = vpop.f32.mrb[106].mxu0  ;;  %v11375_v27 = vpop.f32.mrb[79].mxu1  ;;  %v17598_v58 = vld [vmem:[#allocation25_spill] sm:$0xff] }
 0x5bb   :  { %v15686_v55 = vadd.f32 %v11373_v60, %v15520_v50  ;;  %v11376_v29 = vadd.f32 %v11375_v27, %v11374_v12  ;;  %v11433_v61 = vpop.f32.mrb[107].mxu0  ;;  %v4837_v2 = vmul.f32 %v17598_v58, %v17598_v58  ;;  %v4867_v50 = vadd.f32 %v4866_v9, %v4836_v45 }
 0x5bc   :  { %v15691_v41 = vadd.f32 %v11431_v40, %v15523_v52  ;;  %v11434_v46 = vadd.f32 %v11433_v61, %v11432_v30  ;;  %v4838_v60 = vmul.f32 %v17599_v42, %v17599_v42 }
 0x5bd   :  { %v15694_v20 = vadd.f32 %v11376_v29, %v15531_v39  ;;  %v4868_v52 = vadd.f32 %v4867_v50, %v4837_v2  ;;  %v4839_v39 = vmul.f32 %v17600_v38, %v17600_v38 }
 0x5be   :  { %v15699_v59 = vadd.f32 %v11434_v46, %v15526_v62 }
 0x5bf   :  { %v11377_v27 = vpop.f32.mrb[80].mxu1  ;;  %v4869_v26 = vadd.f32 %v4868_v52, %v4838_v60 }
 0x5c0   :  { %v11435_v12 = vpop.f32.mrb[108].mxu0  ;;  %v11378_v16 = vpop.f32.mrb[81].mxu1 }
 0x5c1   :  { %v11379_v40 = vadd.f32 %v11378_v16, %v11377_v27  ;;  %v11436_v30 = vpop.f32.mrb[109].mxu0  ;;  %v11380_v18 = vpop.f32.mrb[82].mxu1  ;;  %v4870_v2 = vadd.f32 %v4869_v26, %v4839_v39 }
 0x5c2   :  { %v11437_v29 = vadd.f32 %v11436_v30, %v11435_v12  ;;  %v11438_v61 = vpop.f32.mrb[110].mxu0  ;;  %v11381_v58 = vpop.f32.mrb[83].mxu1 }
 0x5c3   :  { %v15706_v62 = vadd.f32 %v11379_v40, %v15565_v19  ;;  %v11382_v45 = vadd.f32 %v11381_v58, %v11380_v18  ;;  %v11439_v46 = vpop.f32.mrb[111].mxu0  ;;  %v4871_v27 = vrot.slane %v4870_v2, 4 }
 0x5c4   :  { %v15709_v9 = vadd.f32 %v11437_v29, %v15529_v17  ;;  %v11440_v42 = vadd.f32 %v11439_v46, %v11438_v61 }
 0x5c5   :  { %v15712_v16 = vadd.f32 %v11382_v45, %v15576_v15  ;;  %v4872_v52 = vadd.f32 %v4871_v27, %v4870_v2 }
 0x5c6   :  { %v15715_v50 = vadd.f32 %v11440_v42, %v15534_v54 }
 0x5c7   :  { %v11383_v12 = vpop.f32.mrb[84].mxu1  ;;  %v4873_v29 = vrot.slane %v4872_v52, 2 }
 0x5c8   :  { %v11441_v30 = vpop.f32.mrb[112].mxu0  ;;  %v11384_v60 = vpop.f32.mrb[85].mxu1 }
 0x5c9   :  { %v11385_v19 = vadd.f32 %v11384_v60, %v11383_v12  ;;  %v11442_v40 = vpop.f32.mrb[113].mxu0  ;;  %v11386_v58 = vpop.f32.mrb[86].mxu1  ;;  %v4874_v61 = vadd.f32 %v4873_v29, %v4872_v52 }
 0x5ca   :  { %v11443_v18 = vadd.f32 %v11442_v40, %v11441_v30  ;;  %v11444_v38 = vpop.f32.mrb[114].mxu0  ;;  %v11387_v17 = vpop.f32.mrb[87].mxu1 }
 0x5cb   :  { %v15718_v26 = vadd.f32 %v11385_v19, %v15591_v0  ;;  %v11388_v15 = vadd.f32 %v11387_v17, %v11386_v58  ;;  %v11445_v39 = vpop.f32.mrb[115].mxu0  ;;  %v4875_v2 = vrot.slane %v4874_v61, 1 }
 0x5cc   :  { %v15721_v54 = vadd.f32 %v11443_v18, %v15537_v28  ;;  %v11446_v42 = vadd.f32 %v11445_v39, %v11444_v38 }
 0x5cd   :  { %v15724_v45 = vadd.f32 %v11388_v15, %v15598_v32  ;;  %v4876_v60 = vadd.f32 %v4875_v2, %v4874_v61 }
 0x5ce   :  { %v15727_v46 = vadd.f32 %v11446_v42, %v15544_v53 }
 0x5cf   :  { %v11389_v27 = vpop.f32.mrb[88].mxu1  ;;  %v4877_v18 = vmul.f32 0.00390625, %v4876_v60 }
 0x5d0   :  { %v11447_v12 = vpop.f32.mrb[116].mxu0  ;;  %v11390_v30 = vpop.f32.mrb[89].mxu1 }
 0x5d1   :  { %v11391_v0 = vadd.f32 %v11390_v30, %v11389_v27  ;;  %v11448_v19 = vpop.f32.mrb[117].mxu0  ;;  %v11392_v40 = vpop.f32.mrb[90].mxu1  ;;  %v4878_v15 = vadd.f32 1e-05, %v4877_v18 }
 0x5d2   :  { %v11449_v58 = vadd.f32 %v11448_v19, %v11447_v12  ;;  %v11450_v17 = vpop.f32.mrb[118].mxu0  ;;  %v11393_v28 = vpop.f32.mrb[91].mxu1 }
 0x5d3   :  { %v15730_v38 = vadd.f32 %v11391_v0, %v15609_v37  ;;  %v11394_v32 = vadd.f32 %v11393_v28, %v11392_v40  ;;  %v11451_v52 = vpop.f32.mrb[119].mxu0  ;;  %12606 = vrsqrt.f32 %v4878_v15  ;;  %v4880_v28 = vld [vmem:[%s17428_s5] sm:$0x1] }
 0x5d4   :  { %v15733_v53 = vadd.f32 %v11449_v58, %v15568_v24  ;;  %v11452_v29 = vadd.f32 %v11451_v52, %v11450_v17 }
 0x5d5   :  { %v15736_v39 = vadd.f32 %v11394_v32, %v15616_v49 }
 0x5d6   :  { %v15739_v42 = vadd.f32 %v11452_v29, %v15579_v14 }
 0x5d7   :  { %v11395_v61 = vpop.f32.mrb[92].mxu1 }
 0x5d8   :  { %v11453_v2 = vpop.f32.mrb[120].mxu0  ;;  %v11396_v27 = vpop.f32.mrb[93].mxu1 }
 0x5d9   :  { %v11397_v12 = vadd.f32 %v11396_v27, %v11395_v61  ;;  %v11454_v37 = vpop.f32.mrb[121].mxu0  ;;  %v11398_v30 = vpop.f32.mrb[94].mxu1 }
 0x5da   :  { %v11455_v60 = vadd.f32 %v11454_v37, %v11453_v2  ;;  %v11456_v0 = vpop.f32.mrb[122].mxu0  ;;  %v11399_v19 = vpop.f32.mrb[95].mxu1 }
 0x5db   :  { %v15742_v24 = vadd.f32 %v11397_v12, %v15627_v33  ;;  %v11400_v40 = vadd.f32 %v11399_v19, %v11398_v30  ;;  %v11457_v58 = vpop.f32.mrb[123].mxu0  ;;  %v15767_v19 = vld [vmem:[%s17429_s6] ss:$0 sm:$0xff] }
 0x5dc   :  { %v15745_v49 = vadd.f32 %v11455_v60, %v15594_v48  ;;  %v11458_v14 = vadd.f32 %v11457_v58, %v11456_v0 }
 0x5dd   :  { %v15748_v17 = vadd.f32 %v11400_v40, %v15634_v34  ;;  %v12607_v52 = vpop.eup %12606  ;;  %v17601_v34 = vld [vmem:[#allocation5_spill] sm:$0xff] }
 0x5de   :  { %v15754_v18 = vadd.f32 %v11458_v14, %v15601_v8  ;;  %v4881_v15 = vmul.f32 %v12607_v52, %v4880_v28 }
 0x5df   :  { %v11529_v32 = vpop.f32.mrb[96].mxu1 }
 0x5e0   :  { %v11459_v33 = vpop.f32.mrb[124].mxu0  ;;  %v11530_v29 = vpop.f32.mrb[97].mxu1  ;;  %v15757_v30 = vrot.slane %v4881_v15, %v17601_v34 }
 0x5e1   :  { %v11460_v61 = vpop.f32.mrb[125].mxu0  ;;  %v11531_v2 = vadd.f32 %v11530_v29, %v11529_v32  ;;  %v11532_v48 = vpop.f32.mrb[98].mxu1 }
 0x5e2   :  { %v11461_v27 = vadd.f32 %v11460_v61, %v11459_v33  ;;  %v11462_v12 = vpop.f32.mrb[126].mxu0  ;;  %v11533_v37 = vpop.f32.mrb[99].mxu1  ;;  %v4886_v14 = vmul.f32 %v15757_v30, %v15541_v13  ;;  %v4902_v28 = vmul.f32 %v15757_v30, %v15436_v10  ;;  %v4887_v52 = vmul.f32 %v15757_v30, %v15496_v56 }
 0x5e3   :  { %v11463_v60 = vpop.f32.mrb[127].mxu0  ;;  %v15759_v0 = vadd.f32 %v11533_v37, %v11532_v48  ;;  %v15762_v8 = vadd.f32 %v11531_v2, %v15651_v57  ;;  %v4903_v33 = vmul.f32 %v15757_v30, %v15440_v25  ;;  %v4888_v2 = vmul.f32 %v15757_v30, %v15500_v5 }
 0x5e4   :  { %v15770_v40 = vadd.f32 %v11461_v27, %v15612_v47  ;;  %v11464_v58 = vadd.f32 %v11463_v60, %v11462_v12  ;;  %v4925_v32 = vadd.f32 %v15767_v19, %v4886_v14  ;;  %v4941_v57 = vadd.f32 %v15767_v19, %v4902_v28 }
 0x5e5   :  { %v4926_v37 = vadd.f32 %v15767_v19, %v4887_v52  ;;  %v4942_v25 = vadd.f32 %v15767_v19, %v4903_v33  ;;  %v4904_v60 = vmul.f32 %v15757_v30, %v15444_v7  ;;  %v4889_v5 = vmul.f32 %v15757_v30, %v15548_v21 }
 0x5e6   :  { %4957 = vxpose.xlu0.b32.start [1/16] (narrow) %v4925_v32, 8  ;;  %4989 = vxpose.xlu1.b32.start [1/16] (narrow) %v4941_v57, 8  ;;  %v15783_v13 = vadd.f32 %v11464_v58, %v15619_v35  ;;  %v4927_v57 = vadd.f32 %v15767_v19, %v4888_v2  ;;  %v4905_v7 = vmul.f32 %v15757_v30, %v15448_v1 }
 0x5e7   :  { %v11535_v29 = vpop.f32.mrb[100].mxu1  ;;  %v4943_v52 = vadd.f32 %v15767_v19, %v4904_v60  ;;  %v4928_v21 = vadd.f32 %v15767_v19, %v4889_v5  ;;  %v4906_v1 = vmul.f32 %v15757_v30, %v15452_v31 }
 0x5e8   :  { %v11465_v47 = vpop.f32.mrb[128].mxu0  ;;  %v11536_v15 = vpop.f32.mrb[101].mxu1  ;;  %v4944_v2 = vadd.f32 %v15767_v19, %v4905_v7 }
 0x5e9   :  { %v11466_v61 = vpop.f32.mrb[129].mxu0  ;;  %v11538_v10 = vpop.f32.mrb[102].mxu1  ;;  %v11537_v27 = vadd.f32 %v11536_v15, %v11535_v29  ;;  %v4945_v31 = vadd.f32 %v15767_v19, %v4906_v1 }
 0x5ea   :  { %v11467_v48 = vadd.f32 %v11466_v61, %v11465_v47  ;;  %v11468_v12 = vpop.f32.mrb[130].mxu0  ;;  %v11539_v56 = vpop.f32.mrb[103].mxu1  ;;  %4958 = vxpose.xlu0.b32.cont [2/16] (narrow) %v4926_v37, 8  ;;  %4990 = vxpose.xlu1.b32.cont [2/16] (narrow) %v4942_v25, 8 }
 0x5eb   :  { %v11469_v14 = vpop.f32.mrb[131].mxu0  ;;  %v11540_v28 = vadd.f32 %v11539_v56, %v11538_v10 }
 0x5ec   :  { %v15792_v35 = vadd.f32 %v11467_v48, %v15630_v44  ;;  %v11470_v58 = vadd.f32 %v11469_v14, %v11468_v12  ;;  %v4890_v12 = vmul.f32 %v15757_v30, %v15555_v22  ;;  %v4891_v14 = vmul.f32 %v15757_v30, %v15561_v36 }
 0x5ed   :  { %v4892_v36 = vmul.f32 %v15757_v30, %v15572_v3 }
 0x5ee   :  { %v15797_v32 = vadd.f32 %v11470_v58, %v15637_v6  ;;  %4959 = vxpose.xlu0.b32.cont [3/16] (narrow) %v4927_v57, 8  ;;  %4991 = vxpose.xlu1.b32.cont [3/16] (narrow) %v4943_v52, 8  ;;  %v4907_v58 = vmul.f32 %v15757_v30, %v15456_v63  ;;  %v4929_v22 = vadd.f32 %v15767_v19, %v4890_v12 }
 0x5ef   :  { %v11541_v33 = vpop.f32.mrb[104].mxu1  ;;  %v4930_v63 = vadd.f32 %v15767_v19, %v4891_v14  ;;  %v17605_v14 = vld [vmem:[#allocation12_spill] sm:$0xff] }
 0x5f0   :  { %v11471_v29 = vpop.f32.mrb[132].mxu0  ;;  %v11542_v44 = vpop.f32.mrb[105].mxu1 }
 0x5f1   :  { %v11472_v47 = vpop.f32.mrb[133].mxu0  ;;  %v11543_v15 = vadd.f32 %v11542_v44, %v11541_v33  ;;  %v11544_v61 = vpop.f32.mrb[106].mxu1  ;;  %v15825_v33 = vadd.f32 %v11540_v28, %v15679_v23  ;;  %v17603_v28 = vld [vmem:[#allocation8_spill] sm:$0xff] }
 0x5f2   :  { %v11473_v10 = vadd.f32 %v11472_v47, %v11471_v29  ;;  %v11474_v6 = vpop.f32.mrb[134].mxu0  ;;  %v11545_v48 = vpop.f32.mrb[107].mxu1  ;;  %4960 = vxpose.xlu0.b32.cont [4/16] (narrow) %v4928_v21, 8  ;;  %4992 = vxpose.xlu1.b32.cont [4/16] (narrow) %v4944_v2, 8  ;;  %v4946_v47 = vadd.f32 %v15767_v19, %v4907_v58  ;;  %v17602_v21 = vld [vmem:[#allocation10_spill] sm:$0xff] }
 0x5f3   :  { %v11475_v56 = vpop.f32.mrb[135].mxu0  ;;  %v11546_v37 = vadd.f32 %v11545_v48, %v11544_v61  ;;  %v15836_v23 = vadd.f32 %v11543_v15, %v15691_v41 }
 0x5f4   :  { %v15810_v25 = vadd.f32 %v11473_v10, %v15646_v51  ;;  %v11476_v60 = vadd.f32 %v11475_v56, %v11474_v6  ;;  %v15822_v51 = vadd.f32 %v11537_v27, %v15671_v43  ;;  %v15833_v10 = vadd.f32 %v15759_v0, %v17602_v21  ;;  %v17604_v0 = vld [vmem:[#allocation11_spill] sm:$0xff] }
 0x5f5   :  { %v4908_v6 = vmul.f32 %v15757_v30, %v17603_v28  ;;  %v15844_v12 = vadd.f32 %v11546_v37, %v15699_v59  ;;  %v4893_v59 = vmul.f32 %v15757_v30, %v17605_v14  ;;  %v17606_v37 = vld [vmem:[#allocation27_spill] sm:$0xff] }
 0x5f6   :  { %v15817_v5 = vadd.f32 %v11476_v60, %v15654_v4  ;;  %4961 = vxpose.xlu0.b32.cont [5/16] (narrow) %v4929_v22, 8  ;;  %4993 = vxpose.xlu1.b32.cont [5/16] (narrow) %v4945_v31, 8  ;;  %v4931_v60 = vadd.f32 %v15767_v19, %v4892_v36  ;;  %v17608_v36 = vld [vmem:[#allocation30_spill] sm:$0xff]  ;;  %v17610_v14 = vld [vmem:[#allocation31_spill] sm:$0xff] }
 0x5f7   :  { %v11547_v57 = vpop.f32.mrb[108].mxu1 }
 0x5f8   :  { %v11477_v52 = vpop.f32.mrb[136].mxu0  ;;  %v11548_v7 = vpop.f32.mrb[109].mxu1 }
 0x5f9   :  { %v11478_v4 = vpop.f32.mrb[137].mxu0  ;;  %v11549_v29 = vadd.f32 %v11548_v7, %v11547_v57  ;;  %v11550_v44 = vpop.f32.mrb[110].mxu1  ;;  %v17607_v7 = vld [vmem:[#allocation26_spill] sm:$0xff] }
 0x5fa   :  { %v11479_v61 = vadd.f32 %v11478_v4, %v11477_v52  ;;  %v11480_v43 = vpop.f32.mrb[138].mxu0  ;;  %v11551_v27 = vpop.f32.mrb[111].mxu1  ;;  %4962 = vxpose.xlu0.b32.cont [6/16] (narrow) %v4930_v63, 8  ;;  %4994 = vxpose.xlu1.b32.cont [6/16] (narrow) %v4946_v47, 8  ;;  %v4894_v63 = vmul.f32 %v15757_v30, %v17607_v7  ;;  %v4910_v4 = vmul.f32 %v15757_v30, %v17608_v36  ;;  %v17612_v36 = vld [vmem:[#allocation32_spill] sm:$0xff] }
 0x5fb   :  { %v11481_v48 = vpop.f32.mrb[139].mxu0  ;;  %v11552_v3 = vadd.f32 %v11551_v27, %v11550_v44  ;;  %v15841_v2 = vadd.f32 %v11549_v29, %v15709_v9  ;;  %v4947_v9 = vadd.f32 %v15767_v19, %v4908_v6 }
 0x5fc   :  { %v15847_v1 = vadd.f32 %v11479_v61, %v15666_v11  ;;  %v11482_v56 = vadd.f32 %v11481_v48, %v11480_v43  ;;  %v4909_v11 = vmul.f32 %v15757_v30, %v17606_v37  ;;  %v4932_v61 = vadd.f32 %v15767_v19, %v4893_v59 }
 0x5fd   :  { %v15850_v41 = vadd.f32 %v11552_v3, %v15715_v50 }
 0x5fe   :  { %v15853_v15 = vadd.f32 %v11482_v56, %v17604_v0  ;;  %4963 = vxpose.xlu0.b32.cont [7/16] (narrow) %v4931_v60, 8  ;;  %4995 = vxpose.xlu1.b32.cont [7/16] (narrow) %v4947_v9, 8  ;;  %v4948_v43 = vadd.f32 %v15767_v19, %v4909_v11  ;;  %v17609_v56 = vld [vmem:[#allocation20_spill] sm:$0xff]  ;;  %v4933_v9 = vadd.f32 %v15767_v19, %v4894_v63 }
 0x5ff   :  { %v11553_v58 = vpop.f32.mrb[112].mxu1  ;;  %v4895_v0 = vmul.f32 %v15757_v30, %v17609_v56 }
 0x600   :  { %v11483_v22 = vpop.f32.mrb[140].mxu0  ;;  %v11554_v31 = vpop.f32.mrb[113].mxu1 }
 0x601   :  { %v11484_v50 = vpop.f32.mrb[141].mxu0  ;;  %v11555_v57 = vadd.f32 %v11554_v31, %v11553_v58  ;;  %v11556_v52 = vpop.f32.mrb[114].mxu1  ;;  %v4934_v31 = vadd.f32 %v15767_v19, %v4895_v0  ;;  %v17613_v0 = vld [vmem:[#allocation28_spill] sm:$0xff] }
 0x602   :  { %v11485_v29 = vadd.f32 %v11484_v50, %v11483_v22  ;;  %v11486_v44 = vpop.f32.mrb[142].mxu0  ;;  %v11557_v47 = vpop.f32.mrb[115].mxu1  ;;  %4964 = vxpose.xlu0.b32.cont [8/16] (narrow) %v4932_v61, 8  ;;  %4996 = vxpose.xlu1.b32.cont [8/16] (narrow) %v4948_v43, 8  ;;  %v17611_v50 = vld [vmem:[#allocation19_spill] sm:$0xff] }
 0x603   :  { %v11487_v27 = vpop.f32.mrb[143].mxu0  ;;  %v11558_v21 = vadd.f32 %v11557_v47, %v11556_v52  ;;  %v15868_v28 = vadd.f32 %v11555_v57, %v15721_v54  ;;  %v4949_v54 = vadd.f32 %v15767_v19, %v4910_v4  ;;  %v4912_v4 = vmul.f32 %v15757_v30, %v17612_v36 }
 0x604   :  { %v15871_v6 = vadd.f32 %v11485_v29, %v15686_v55  ;;  %v11488_v48 = vadd.f32 %v11487_v27, %v11486_v44  ;;  %v4911_v55 = vmul.f32 %v15757_v30, %v17610_v14 }
 0x605   :  { %v15874_v3 = vadd.f32 %v11558_v21, %v15727_v46  ;;  %v4951_v56 = vadd.f32 %v15767_v19, %v4912_v4 }
 0x606   :  { %v15879_v60 = vadd.f32 %v11488_v48, %v15694_v20  ;;  %4965 = vxpose.xlu0.b32.cont [9/16] (narrow) %v4933_v9, 8  ;;  %4997 = vxpose.xlu1.b32.cont [9/16] (narrow) %v4949_v54, 8  ;;  %v4896_v20 = vmul.f32 %v15757_v30, %v17611_v50  ;;  %v4950_v63 = vadd.f32 %v15767_v19, %v4911_v55  ;;  %v17614_v9 = vld [vmem:[#allocation33_spill] sm:$0xff] }
 0x607   :  { %v11559_v59 = vpop.f32.mrb[116].mxu1 }
 0x608   :  { %v11489_v37 = vpop.f32.mrb[144].mxu0  ;;  %v11560_v11 = vpop.f32.mrb[117].mxu1  ;;  %v4935_v48 = vadd.f32 %v15767_v19, %v4896_v20 }
 0x609   :  { %v11490_v46 = vpop.f32.mrb[145].mxu0  ;;  %v11561_v58 = vadd.f32 %v11560_v11, %v11559_v59  ;;  %v11562_v22 = vpop.f32.mrb[118].mxu1 }
 0x60a   :  { %v11491_v57 = vadd.f32 %v11490_v46, %v11489_v37  ;;  %v11492_v52 = vpop.f32.mrb[146].mxu0  ;;  %v11563_v7 = vpop.f32.mrb[119].mxu1  ;;  %4966 = vxpose.xlu0.b32.cont [10/16] (narrow) %v4934_v31, 8  ;;  %4998 = vxpose.xlu1.b32.cont [10/16] (narrow) %v4950_v63, 8  ;;  %v17616_v46 = vld [vmem:[#allocation34_spill] sm:$0xff] }
 0x60b   :  { %v11493_v29 = vpop.f32.mrb[147].mxu0  ;;  %v11564_v44 = vadd.f32 %v11563_v7, %v11562_v22  ;;  %v15892_v47 = vadd.f32 %v11561_v58, %v15733_v53  ;;  %v4897_v53 = vmul.f32 %v15757_v30, %v17613_v0  ;;  %v4914_v58 = vmul.f32 %v15757_v30, %v17616_v46  ;;  %v17618_v0 = vld [vmem:[#allocation25_spill] sm:$0xff] }
 0x60c   :  { %v15895_v61 = vadd.f32 %v11491_v57, %v15706_v62  ;;  %v11494_v43 = vadd.f32 %v11493_v29, %v11492_v52  ;;  %v4913_v62 = vmul.f32 %v15757_v30, %v17614_v9 }
 0x60d   :  { %v15898_v27 = vadd.f32 %v11564_v44, %v15739_v42  ;;  %v4936_v20 = vadd.f32 %v15767_v19, %v4897_v53 }
 0x60e   :  { %v15901_v21 = vadd.f32 %v11494_v43, %v15712_v16  ;;  %4967 = vxpose.xlu0.b32.cont [11/16] (narrow) %v4935_v48, 8  ;;  %4999 = vxpose.xlu1.b32.cont [11/16] (narrow) %v4951_v56, 8  ;;  %v17615_v16 = vld [vmem:[#allocation29_spill] sm:$0xff]  ;;  %v4952_v57 = vadd.f32 %v15767_v19, %v4913_v62  ;;  %v4953_v48 = vadd.f32 %v15767_v19, %v4914_v58  ;;  %v17617_v56 = vld [vmem:[#allocation24_spill] sm:$0xff] }
 0x60f   :  { %v11565_v54 = vpop.f32.mrb[120].mxu1  ;;  %v4898_v11 = vmul.f32 %v15757_v30, %v17615_v16 }
 0x610   :  { %v11495_v14 = vpop.f32.mrb[148].mxu0  ;;  %v11566_v55 = vpop.f32.mrb[121].mxu1 }
 0x611   :  { %v11496_v42 = vpop.f32.mrb[149].mxu0  ;;  %v11567_v59 = vadd.f32 %v11566_v55, %v11565_v54  ;;  %v11568_v37 = vpop.f32.mrb[122].mxu1  ;;  %v4937_v43 = vadd.f32 %v15767_v19, %v4898_v11 }
 0x612   :  { %v11497_v22 = vadd.f32 %v11496_v42, %v11495_v14  ;;  %v11498_v31 = vpop.f32.mrb[150].mxu0  ;;  %v11569_v50 = vpop.f32.mrb[123].mxu1  ;;  %4968 = vxpose.xlu0.b32.cont [12/16] (narrow) %v4936_v20, 8  ;;  %5000 = vxpose.xlu1.b32.cont [12/16] (narrow) %v4952_v57, 8  ;;  %v17620_v42 = vld [vmem:[#allocation35_spill] sm:$0xff] }
 0x613   :  { %v11499_v52 = vpop.f32.mrb[151].mxu0  ;;  %v11570_v7 = vadd.f32 %v11569_v50, %v11568_v37  ;;  %v15916_v63 = vadd.f32 %v11567_v59, %v15745_v49  ;;  %v4899_v49 = vmul.f32 %v15757_v30, %v17617_v56  ;;  %v4916_v59 = vmul.f32 %v15757_v30, %v17620_v42  ;;  %v17622_v56 = vld [vmem:[#allocation36_spill] sm:$0xff] }
 0x614   :  { %v15919_v36 = vadd.f32 %v11497_v22, %v15718_v26  ;;  %v11500_v4 = vadd.f32 %v11499_v52, %v11498_v31  ;;  %v4915_v26 = vmul.f32 %v15757_v30, %v17618_v0 }
 0x615   :  { %v15922_v29 = vadd.f32 %v11570_v7, %v15754_v18  ;;  %v4938_v46 = vadd.f32 %v15767_v19, %v4899_v49 }
 0x616   :  { %v15925_v44 = vadd.f32 %v11500_v4, %v15724_v45  ;;  %4969 = vxpose.xlu0.b32.cont [13/16] (narrow) %v4937_v43, 8  ;;  %5001 = vxpose.xlu1.b32.cont [13/16] (narrow) %v4953_v48, 8  ;;  %v17619_v45 = vld [vmem:[#allocation23_spill] sm:$0xff]  ;;  %v4954_v58 = vadd.f32 %v15767_v19, %v4915_v26  ;;  %v4955_v43 = vadd.f32 %v15767_v19, %v4916_v59  ;;  %v17621_v48 = vld [vmem:[#allocation6_spill] sm:$0xff] }
 0x617   :  { %v11571_v53 = vpop.f32.mrb[124].mxu1  ;;  %v4900_v55 = vmul.f32 %v15757_v30, %v17619_v45 }
 0x618   :  { %v11501_v9 = vpop.f32.mrb[152].mxu0  ;;  %v11572_v62 = vpop.f32.mrb[125].mxu1 }
 0x619   :  { %v11502_v18 = vpop.f32.mrb[153].mxu0  ;;  %v11573_v54 = vadd.f32 %v11572_v62, %v11571_v53  ;;  %v11574_v14 = vpop.f32.mrb[126].mxu1  ;;  %v4939_v4 = vadd.f32 %v15767_v19, %v4900_v55 }
 0x61a   :  { %v11503_v37 = vadd.f32 %v11502_v18, %v11501_v9  ;;  %v11504_v16 = vpop.f32.mrb[154].mxu0  ;;  %v11575_v11 = vpop.f32.mrb[127].mxu1  ;;  %4970 = vxpose.xlu0.b32.cont [14/16] (narrow) %v4938_v46, 8  ;;  %5002 = vxpose.xlu1.b32.cont [14/16] (narrow) %v4954_v58, 8 }
 0x61b   :  { %v11505_v22 = vpop.f32.mrb[155].mxu0  ;;  %v11576_v31 = vadd.f32 %v11575_v11, %v11574_v14  ;;  %v15940_v50 = vadd.f32 %v11573_v54, %v15770_v40  ;;  %v4901_v40 = vmul.f32 %v15757_v30, %v17621_v48 }
 0x61c   :  { %v15943_v20 = vadd.f32 %v11503_v37, %v15730_v38  ;;  %v11506_v57 = vadd.f32 %v11505_v22, %v11504_v16  ;;  %v4917_v38 = vmul.f32 %v15757_v30, %v17622_v56 }
 0x61d   :  { %v15946_v52 = vadd.f32 %v11576_v31, %v15783_v13  ;;  %v4940_v54 = vadd.f32 %v15767_v19, %v4901_v40 }
 0x61e   :  { %v15949_v7 = vadd.f32 %v11506_v57, %v15736_v39  ;;  %4971 = vxpose.xlu0.b32.cont [15/16] (narrow) %v4939_v4, 8  ;;  %5003 = vxpose.xlu1.b32.cont [15/16] (narrow) %v4955_v43, 8  ;;  %v4956_v14 = vadd.f32 %v15767_v19, %v4917_v38 }
 0x61f   :  { %v11577_v49 = vpop.f32.mrb[128].mxu1 }
 0x620   :  { %v11507_v0 = vpop.f32.mrb[156].mxu0  ;;  %v11578_v26 = vpop.f32.mrb[129].mxu1 }
 0x621   :  { %v11508_v13 = vpop.f32.mrb[157].mxu0  ;;  %v11579_v53 = vadd.f32 %v11578_v26, %v11577_v49  ;;  %v11580_v9 = vpop.f32.mrb[130].mxu1 }
 0x622   :  { %v11509_v39 = vadd.f32 %v11508_v13, %v11507_v0  ;;  %v11510_v62 = vpop.f32.mrb[158].mxu0  ;;  %v11581_v18 = vpop.f32.mrb[131].mxu1  ;;  %4972 = vxpose.xlu0.b32.end [16/16] (narrow) %v4940_v54, 8  ;;  %5004 = vxpose.xlu1.b32.end [16/16] (narrow) %v4956_v14, 8 }
 0x623   :  { %v11511_v45 = vpop.f32.mrb[159].mxu0  ;;  %v11582_v55 = vadd.f32 %v11581_v18, %v11580_v9  ;;  %v15960_v42 = vadd.f32 %v11579_v53, %v15792_v35 }
 0x624   :  { %v15963_v30 = vadd.f32 %v11509_v39, %v15742_v24  ;;  %v11512_v59 = vadd.f32 %v11511_v45, %v11510_v62 }
 0x625   :  { %v15966_v37 = vadd.f32 %v11582_v55, %v15797_v32 }
 0x626   :  { %v15969_v16 = vadd.f32 %v11512_v59, %v15748_v17 }
 0x627   :  { %v11583_v11 = vpop.f32.mrb[132].mxu1 }
 0x628   :  { %v12235_v46 = vpop.f32.mrb[160].mxu0  ;;  %v11584_v19 = vpop.f32.mrb[133].mxu1 }
 0x629   :  { %v15972_v58 = vadd.f32 %v12235_v46, %v15822_v51  ;;  %v11585_v35 = vadd.f32 %v11584_v19, %v11583_v11  ;;  %v7135_v22 = vpop.f32.mrb[161].mxu0  ;;  %v11586_v31 = vpop.f32.mrb[134].mxu1 }
 0x62a   :  { %v15975_v24 = vadd.f32 %v7135_v22, %v15762_v8  ;;  %v12236_v57 = vpop.f32.mrb[162].mxu0  ;;  %v11587_v4 = vpop.f32.mrb[135].mxu1 }
 0x62b   :  { %v15978_v32 = vadd.f32 %v12236_v57, %v15825_v33  ;;  %v11588_v43 = vadd.f32 %v11587_v4, %v11586_v31  ;;  %v7138_v17 = vpop.f32.mrb[163].mxu0  ;;  %v15981_v48 = vadd.f32 %v11585_v35, %v15810_v25 }
 0x62c   :  { %v15984_v40 = vadd.f32 %v7138_v17, %v15833_v10 }
 0x62d   :  { %v15987_v51 = vadd.f32 %v11588_v43, %v15817_v5 }
 0x62e   :  { %v7262_v8 = vadd.f32 %v15984_v40, %v15975_v24 }
 0x62f   :  { %v11589_v56 = vpop.f32.mrb[136].mxu1 }
 0x630   :  { %v7263_v38 = vadd.f32 %v7262_v8, %v15972_v58  ;;  %v12239_v49 = vpop.f32.mrb[164].mxu0  ;;  %v11590_v33 = vpop.f32.mrb[137].mxu1 }
 0x631   :  { %v15993_v0 = vadd.f32 %v12239_v49, %v15841_v2  ;;  %v11591_v26 = vadd.f32 %v11590_v33, %v11589_v56  ;;  %v7151_v25 = vpop.f32.mrb[165].mxu0  ;;  %v11592_v13 = vpop.f32.mrb[138].mxu1 }
 0x632   :  { %v15996_v10 = vadd.f32 %v7151_v25, %v15836_v23  ;;  %v7264_v5 = vadd.f32 %v7263_v38, %v15978_v32  ;;  %v12240_v53 = vpop.f32.mrb[166].mxu0  ;;  %v11593_v9 = vpop.f32.mrb[139].mxu1 }
 0x633   :  { %v16000_v39 = vadd.f32 %v12240_v53, %v15850_v41  ;;  %v11594_v62 = vadd.f32 %v11593_v9, %v11592_v13  ;;  %v7154_v18 = vpop.f32.mrb[167].mxu0  ;;  %v16003_v54 = vadd.f32 %v11591_v26, %v15847_v1 }
 0x634   :  { %v7265_v2 = vadd.f32 %v7264_v5, %v15996_v10  ;;  %v16007_v14 = vadd.f32 %v7154_v18, %v15844_v12 }
 0x635   :  { %v16010_v23 = vadd.f32 %v11594_v62, %v15853_v15 }
 0x636   :  { %v7266_v45 = vadd.f32 %v7265_v2, %v16007_v14 }
 0x637   :  { %v11595_v55 = vpop.f32.mrb[140].mxu1 }
 0x638   :  { %v7267_v59 = vadd.f32 %v7266_v45, %v15993_v0  ;;  %v12243_v41 = vpop.f32.mrb[168].mxu0  ;;  %v11596_v11 = vpop.f32.mrb[141].mxu1 }
 0x639   :  { %v16015_v46 = vadd.f32 %v12243_v41, %v15892_v47  ;;  %v11597_v1 = vadd.f32 %v11596_v11, %v11595_v55  ;;  %v7167_v19 = vpop.f32.mrb[169].mxu0  ;;  %v11598_v35 = vpop.f32.mrb[142].mxu1 }
 0x63a   :  { %v16018_v22 = vadd.f32 %v7167_v19, %v15868_v28  ;;  %v7268_v12 = vadd.f32 %v7267_v59, %v16000_v39  ;;  %v12244_v15 = vpop.f32.mrb[170].mxu0  ;;  %v11599_v31 = vpop.f32.mrb[143].mxu1 }
 0x63b   :  { %v16022_v57 = vadd.f32 %v12244_v15, %v15898_v27  ;;  %v11600_v4 = vadd.f32 %v11599_v31, %v11598_v35  ;;  %v7170_v43 = vpop.f32.mrb[171].mxu0  ;;  %v7063_v17 = vadd.f32 %v11597_v1, %v15871_v6 }
 0x63c   :  { %v7269_v47 = vadd.f32 %v7268_v12, %v16018_v22  ;;  %v16027_v8 = vadd.f32 %v7170_v43, %v15874_v3 }
 0x63d   :  { %v7066_v56 = vadd.f32 %v11600_v4, %v15879_v60 }
 0x63e   :  { %v7270_v28 = vadd.f32 %v7269_v47, %v16027_v8 }
 0x63f   :  { %v11601_v38 = vpop.f32.mrb[144].mxu1 }
 0x640   :  { %v7271_v49 = vadd.f32 %v7270_v28, %v16015_v46  ;;  %v12247_v33 = vpop.f32.mrb[172].mxu0  ;;  %v11602_v26 = vpop.f32.mrb[145].mxu1 }
 0x641   :  { %v16033_v27 = vadd.f32 %v12247_v33, %v15940_v50  ;;  %v11603_v25 = vadd.f32 %v11602_v26, %v11601_v38  ;;  %v7183_v13 = vpop.f32.mrb[173].mxu0  ;;  %v11604_v6 = vpop.f32.mrb[146].mxu1 }
 0x642   :  { %v16036_v5 = vadd.f32 %v7183_v13, %v15916_v63  ;;  %v7272_v3 = vadd.f32 %v7271_v49, %v16022_v57  ;;  %v12248_v53 = vpop.f32.mrb[174].mxu0  ;;  %v11605_v60 = vpop.f32.mrb[147].mxu1 }
 0x643   :  { %v16040_v9 = vadd.f32 %v12248_v53, %v15946_v52  ;;  %v11606_v62 = vadd.f32 %v11605_v60, %v11604_v6  ;;  %v7186_v18 = vpop.f32.mrb[175].mxu0  ;;  %v7071_v2 = vadd.f32 %v11603_v25, %v15895_v61 }
 0x644   :  { %v7273_v50 = vadd.f32 %v7272_v3, %v16036_v5  ;;  %v16045_v45 = vadd.f32 %v7186_v18, %v15922_v29 }
 0x645   :  { %v7074_v55 = vadd.f32 %v11606_v62, %v15901_v21 }
 0x646   :  { %v7274_v63 = vadd.f32 %v7273_v50, %v16045_v45 }
 0x647   :  { %v11607_v59 = vpop.f32.mrb[148].mxu1 }
 0x648   :  { %v7275_v41 = vadd.f32 %v7274_v63, %v16033_v27  ;;  %v12251_v11 = vpop.f32.mrb[176].mxu0  ;;  %v11608_v1 = vpop.f32.mrb[149].mxu1 }
 0x649   :  { %v16051_v52 = vadd.f32 %v12251_v11, %v15981_v48  ;;  %v11609_v19 = vadd.f32 %v11608_v1, %v11607_v59  ;;  %v7199_v35 = vpop.f32.mrb[177].mxu0  ;;  %v11610_v61 = vpop.f32.mrb[150].mxu1 }
 0x64a   :  { %v16054_v12 = vadd.f32 %v7199_v35, %v15960_v42  ;;  %v7276_v29 = vadd.f32 %v7275_v41, %v16040_v9  ;;  %v12252_v15 = vpop.f32.mrb[178].mxu0  ;;  %v11611_v21 = vpop.f32.mrb[151].mxu1 }
 0x64b   :  { %v16058_v31 = vadd.f32 %v12252_v15, %v15987_v51  ;;  %v11612_v4 = vadd.f32 %v11611_v21, %v11610_v61  ;;  %v7202_v43 = vpop.f32.mrb[179].mxu0  ;;  %v7079_v47 = vadd.f32 %v11609_v19, %v15919_v36 }
 0x64c   :  { %v7277_v48 = vadd.f32 %v7276_v29, %v16054_v12  ;;  %v16063_v28 = vadd.f32 %v7202_v43, %v15966_v37 }
 0x64d   :  { %v7082_v38 = vadd.f32 %v11612_v4, %v15925_v44 }
 0x64e   :  { %v7278_v42 = vadd.f32 %v7277_v48, %v16063_v28 }
 0x64f   :  { %v11613_v49 = vpop.f32.mrb[152].mxu1 }
 0x650   :  { %v7279_v33 = vadd.f32 %v7278_v42, %v16051_v52  ;;  %v12255_v26 = vpop.f32.mrb[180].mxu0  ;;  %v11614_v25 = vpop.f32.mrb[153].mxu1 }
 0x651   :  { %v16068_v51 = vadd.f32 %v12255_v26, %v7063_v17  ;;  %v11615_v13 = vadd.f32 %v11614_v25, %v11613_v49  ;;  %v7215_v6 = vpop.f32.mrb[181].mxu0  ;;  %v11616_v3 = vpop.f32.mrb[154].mxu1 }
 0x652   :  { %v16071_v36 = vadd.f32 %v7215_v6, %v16003_v54  ;;  %v7280_v37 = vadd.f32 %v7279_v33, %v16058_v31  ;;  %v12256_v53 = vpop.f32.mrb[182].mxu0  ;;  %v11617_v60 = vpop.f32.mrb[155].mxu1 }
 0x653   :  { %v16074_v44 = vadd.f32 %v12256_v53, %v7066_v56  ;;  %v11618_v62 = vadd.f32 %v11617_v60, %v11616_v3  ;;  %v7218_v18 = vpop.f32.mrb[183].mxu0  ;;  %v7087_v50 = vadd.f32 %v11615_v13, %v15943_v20 }
 0x654   :  { %v7281_v63 = vadd.f32 %v7280_v37, %v16071_v36  ;;  %v16079_v17 = vadd.f32 %v7218_v18, %v16010_v23  ;;  %v12533_v18 = vld [vmem:[%s17425_s4] sm:$0xff]  }
 0x655   :  { %v7090_v59 = vadd.f32 %v11618_v62, %v15949_v7  ;;  %v12532_v62 = vld [vmem:[%s17425_s4 + $0x40] sm:$0xff]  }
 0x656   :  { %v7282_v54 = vadd.f32 %v7281_v63, %v16079_v17  ;;  %11649 = vmatprep.subr.bf16.mxu1 %v12532_v62 }
 0x657   :  { %v11619_v41 = vpop.f32.mrb[156].mxu1  ;;  %11650 = vmatpush3.bf16.msra.mxu1 %v12533_v18 }
 0x658   :  { %v7283_v11 = vadd.f32 %v7282_v54, %v16068_v51  ;;  %v12259_v1 = vpop.f32.mrb[184].mxu0  ;;  %v11620_v19 = vpop.f32.mrb[157].mxu1  ;;  %v12535_v54 = vld [vmem:[%s17425_s4 + $0x8] sm:$0xff]  }
 0x659   :  { %v16084_v56 = vadd.f32 %v12259_v1, %v7079_v47  ;;  %v11621_v35 = vadd.f32 %v11620_v19, %v11619_v41  ;;  %v7231_v61 = vpop.f32.mrb[185].mxu0  ;;  %v11622_v29 = vpop.f32.mrb[158].mxu1  ;;  %v12536_v1 = vld [vmem:[%s17425_s4 + $0x50] sm:$0xff]  }
 0x65a   :  { %v16086_v20 = vadd.f32 %v7231_v61, %v7071_v2  ;;  %v7284_v15 = vadd.f32 %v7283_v11, %v16074_v44  ;;  %v12260_v23 = vpop.f32.mrb[186].mxu0  ;;  %v11623_v21 = vpop.f32.mrb[159].mxu1  ;;  %v12537_v19 = vld [vmem:[%s17425_s4 + $0x10] sm:$0xff]  }
 0x65b   :  { %v16089_v4 = vadd.f32 %v12260_v23, %v7082_v38  ;;  %v11624_v7 = vadd.f32 %v11623_v21, %v11622_v29  ;;  %v7234_v43 = vpop.f32.mrb[187].mxu0  ;;  %v7095_v48 = vadd.f32 %v11621_v35, %v15963_v30  ;;  %v12538_v29 = vld [vmem:[%s17425_s4 + $0x58] sm:$0xff]   ;;  %v12547_v21 = vld [vmem:[%s17425_s4 + $0x80] sm:$0xff]  }
 0x65c   :  { %v7285_v42 = vadd.f32 %v7284_v15, %v16086_v20  ;;  %v16093_v49 = vadd.f32 %v7234_v43, %v7074_v55  ;;  %v12546_v15 = vld [vmem:[%s17425_s4 + $0xc0] sm:$0xff]   ;;  %v12539_v23 = vld [vmem:[%s17425_s4 + $0x18] sm:$0xff]  }
 0x65d   :  { %v7098_v47 = vadd.f32 %v11624_v7, %v15969_v16  ;;  %11761 = vmatprep.subr.bf16.mxu0 %v12546_v15 }
 0x65e   :  { %v7286_v33 = vadd.f32 %v7285_v42, %v16093_v49  ;;  %11762 = vmatpush3.bf16.msra.mxu0 %v12547_v21  ;;  %v12548_v42 = vld [vmem:[%s17425_s4 + $0xc8] sm:$0xff]  }
 0x65f   :  { %11763 = vmatprep.subr.bf16.mxu0 %v12548_v42 }
 0x660   :  { %v7287_v2 = vadd.f32 %v7286_v33, %v16084_v56  ;;  %v12263_v26 = vpop.f32.mrb[188].mxu0  ;;  %v12549_v33 = vld [vmem:[%s17425_s4 + $0x88] sm:$0xff]  }
 0x661   :  { %v16098_v25 = vadd.f32 %v12263_v26, %v7095_v48  ;;  %v7247_v13 = vpop.f32.mrb[189].mxu0  ;;  %v12540_v48 = vld [vmem:[%s17425_s4 + $0x60] sm:$0xff]  }
 0x662   :  { %v16100_v38 = vadd.f32 %v7247_v13, %v7087_v50  ;;  %v7288_v6 = vadd.f32 %v7287_v2, %v16089_v4  ;;  %v12264_v3 = vpop.f32.mrb[190].mxu0  ;;  %11764 = vmatpush3.bf16.msra.mxu0 %v12549_v33 }
 0x663   :  { %v16103_v30 = vadd.f32 %v12264_v3, %v7098_v47  ;;  %v7250_v37 = vpop.f32.mrb[191].mxu0  ;;  %v12541_v47 = vld [vmem:[%s17425_s4 + $0x20] sm:$0xff]   ;;  %v12542_v3 = vld [vmem:[%s17425_s4 + $0x68] sm:$0xff]  }
 0x664   :  { %v7289_v55 = vadd.f32 %v7288_v6, %v16100_v38  ;;  %v16106_v53 = vadd.f32 %v7250_v37, %v7090_v59  ;;  %v12534_v59 = vld [vmem:[%s17425_s4 + $0x48] sm:$0xff]  }
 0x665   :  { %11651 = vmatprep.subr.bf16.mxu1 %v12534_v59 }
 0x666   :  { %v7290_v16 = vadd.f32 %v7289_v55, %v16106_v53  ;;  %11652 = vmatpush3.bf16.msra.mxu1 %v12535_v54  ;;  %v12543_v55 = vld [vmem:[%s17425_s4 + $0x28] sm:$0xff]  }
 0x667   :  { %11653 = vmatprep.subr.bf16.mxu1 %v12536_v1  ;;  %v7610_v1 = vld [vmem:[#allocation2 + $0x9] sm:$0xff] }
 0x668   :  { %v7291_v60 = vadd.f32 %v7290_v16, %v16098_v25 }
 0x66a   :  { %v7292_v50 = vadd.f32 %v7291_v60, %v16103_v30  ;;  %11654 = vmatpush3.bf16.msra.mxu1 %v12537_v19  ;;  %v12558_v19 = vld [vmem:[%s17425_s4 + $0xe8] sm:$0xff]  }
 0x66b   :  { %11655 = vmatprep.subr.bf16.mxu1 %v12538_v29 }
 0x66c   :  { %v7293_v63 = vrot.slane %v7292_v50, 4 }
 0x66e   :  { %v7294_v41 = vadd.f32 %v7293_v63, %v7292_v50  ;;  %11656 = vmatpush3.bf16.msra.mxu1 %v12539_v23  ;;  %v12554_v50 = vld [vmem:[%s17425_s4 + $0xd8] sm:$0xff]   ;;  %v12618_v23 = vld [vmem:[#allocation2] sm:$0xff] }
 0x66f   :  { %11657 = vmatprep.subr.bf16.mxu1 %v12540_v48  ;;  %v7577_v21 = vpack.c.bf16 %v12618_v23, %v12618_v23  ;;  %v12566_v48 = vld [vmem:[%s17425_s4 + $0x148] sm:$0xff]  }
 0x670   :  { %v7295_v11 = vrot.slane %v7294_v41, 2 }
 0x672   :  { %v7296_v35 = vadd.f32 %v7295_v11, %v7294_v41  ;;  %11658 = vmatpush3.bf16.msra.mxu1 %v12541_v47  ;;  %v12557_v41 = vld [vmem:[%s17425_s4 + $0xa0] sm:$0xff]  }
 0x673   :  { %11659 = vmatprep.subr.bf16.mxu1 %v12542_v3  ;;  %v7609_v11 = vld [vmem:[#allocation2 + $0x1] sm:$0xff] }
 0x674   :  { %v7297_v61 = vrot.slane %v7296_v35, 1  ;;  %v7641_v15 = vpack.c.bf16 %v7610_v1, %v7609_v11 }
 0x676   :  { %v7298_v7 = vadd.f32 %v7297_v61, %v7296_v35  ;;  %11660 = vmatpush3.bf16.msra.mxu1 %v12543_v55  ;;  %8873 = vmatprep.mubr.bf16.mxu1 %v7641_v15 }
 0x678   :  { %v16141_v43 = vmul.f32 0.00390625, %v7298_v7  ;;  %v12559_v7 = vld [vmem:[%s17425_s4 + $0xa8] sm:$0xff]  }
 0x67a   :  { %v16157_v2 = vsub.f32 %v16018_v22, %v16141_v43  ;;  %v16161_v26 = vsub.f32 %v16027_v8, %v16141_v43  ;;  %v16165_v13 = vsub.f32 %v16015_v46, %v16141_v43  ;;  %v16169_v6 = vsub.f32 %v16022_v57, %v16141_v43  ;;  %v12552_v22 = vld [vmem:[%s17425_s4 + $0xd0] sm:$0xff]  }
 0x67b   :  { %v16179_v8 = vsub.f32 %v16036_v5, %v16141_v43  ;;  %v16183_v46 = vsub.f32 %v16045_v45, %v16141_v43  ;;  %v16187_v57 = vsub.f32 %v16033_v27, %v16141_v43  ;;  %v16191_v37 = vsub.f32 %v16040_v9, %v16141_v43  ;;  %v12553_v5 = vld [vmem:[%s17425_s4 + $0x90] sm:$0xff]   ;;  %11765 = vmatprep.subr.bf16.mxu0 %v12552_v22 }
 0x67c   :  { %v16201_v45 = vsub.f32 %v16054_v12, %v16141_v43  ;;  %v16205_v27 = vsub.f32 %v16063_v28, %v16141_v43  ;;  %v16209_v9 = vsub.f32 %v16051_v52, %v16141_v43  ;;  %v16213_v16 = vsub.f32 %v16058_v31, %v16141_v43  ;;  %11766 = vmatpush3.bf16.msra.mxu0 %v12553_v5  ;;  %v12567_v5 = vld [vmem:[%s17425_s4 + $0x108] sm:$0xff]  }
 0x67d   :  { %v16217_v60 = vsub.f32 %v16071_v36, %v16141_v43  ;;  %v16221_v12 = vsub.f32 %v16079_v17, %v16141_v43  ;;  %v16225_v28 = vsub.f32 %v16068_v51, %v16141_v43  ;;  %v16229_v52 = vsub.f32 %v16074_v44, %v16141_v43  ;;  %v12544_v44 = vld [vmem:[%s17425_s4 + $0x70] sm:$0xff]   ;;  %11767 = vmatprep.subr.bf16.mxu0 %v12554_v50 }
 0x67e   :  { %v16233_v31 = vsub.f32 %v16086_v20, %v16141_v43  ;;  %v16237_v36 = vsub.f32 %v16093_v49, %v16141_v43  ;;  %v16241_v17 = vsub.f32 %v16084_v56, %v16141_v43  ;;  %v16245_v51 = vsub.f32 %v16089_v4, %v16141_v43  ;;  %v12545_v20 = vld [vmem:[%s17425_s4 + $0x30] sm:$0xff]   ;;  %v12550_v49 = vld [vmem:[%s17425_s4 + $0x78] sm:$0xff]   ;;  %11661 = vmatprep.subr.bf16.mxu1 %v12544_v44 }
 0x67f   :  { %v16258_v56 = vsub.f32 %v16100_v38, %v16141_v43  ;;  %v16262_v4 = vsub.f32 %v16106_v53, %v16141_v43  ;;  %v16266_v62 = vsub.f32 %v16098_v25, %v16141_v43  ;;  %v16270_v18 = vsub.f32 %v16103_v30, %v16141_v43  ;;  %v12555_v25 = vld [vmem:[%s17425_s4 + $0x98] sm:$0xff]   ;;  %11662 = vmatpush3.bf16.msra.mxu1 %v12545_v20 }
 0x680   :  { %v16277_v38 = vsub.f32 %v15975_v24, %v16141_v43  ;;  %v16281_v53 = vsub.f32 %v15984_v40, %v16141_v43  ;;  %v12551_v30 = vld [vmem:[%s17425_s4 + $0x38] sm:$0xff]   ;;  %11663 = vmatprep.subr.bf16.mxu1 %v12550_v49  ;;  %v12556_v24 = vld [vmem:[%s17425_s4 + $0xe0] sm:$0xff]   ;;  %v16297_v63 = vsub.f32 %v15972_v58, %v16141_v43  ;;  %11768 = vmatpush3.bf16.msra.mxu0 %v12555_v25 }
 0x681   :  { %v12560_v40 = vld [vmem:[%s17425_s4 + $0x140] sm:$0xff]   ;;  %v16311_v58 = vsub.f32 %v15978_v32, %v16141_v43  ;;  %11769 = vmatprep.subr.bf16.mxu0 %v12556_v24  ;;  %v16315_v35 = vsub.f32 %v15996_v10, %v16141_v43  ;;  %v12561_v10 = vld [vmem:[%s17425_s4 + $0xf0] sm:$0xff]   ;;  %v16333_v42 = vsub.f32 %v16007_v14, %v16141_v43  ;;  %v16339_v3 = vsub.f32 %v15993_v0, %v16141_v43  ;;  %v12564_v0 = vld [vmem:[%s17425_s4 + $0xf8] sm:$0xff]  }
 0x682   :  { %v7332_v59 = vmul.f32 %v16277_v38, %v16277_v38  ;;  %v7333_v54 = vmul.f32 %v16281_v53, %v16281_v53  ;;  %v7334_v61 = vmul.f32 %v16297_v63, %v16297_v63  ;;  %v12562_v32 = vld [vmem:[%s17425_s4 + $0x100] sm:$0xff]   ;;  %v12563_v14 = vld [vmem:[%s17425_s4 + $0xb0] sm:$0xff]   ;;  %v16354_v44 = vsub.f32 %v16000_v39, %v16141_v43 }
 0x683   :  { %11664 = vmatpush3.bf16.msra.mxu1 %v12551_v30  ;;  %v7335_v47 = vmul.f32 %v16311_v58, %v16311_v58  ;;  %v7336_v22 = vmul.f32 %v16315_v35, %v16315_v35  ;;  %v7337_v20 = vmul.f32 %v16333_v42, %v16333_v42  ;;  %v7338_v50 = vmul.f32 %v16339_v3, %v16339_v3  ;;  %v12565_v30 = vld [vmem:[%s17425_s4 + $0xb8] sm:$0xff]   ;;  %v12568_v43 = vld [vmem:[%s17425_s4 + $0x150] sm:$0xff]  }
 0x684   :  { %11873 = vmatprep.subr.bf16.mxu1 %v12560_v40  ;;  %v7364_v29 = vadd.f32 %v7333_v54, %v7332_v59  ;;  %11770 = vmatpush3.bf16.msra.mxu0 %v12557_v41  ;;  %v7339_v24 = vmul.f32 %v16354_v44, %v16354_v44  ;;  %v7340_v40 = vmul.f32 %v16157_v2, %v16157_v2 }
 0x685   :  { %11771 = vmatprep.subr.bf16.mxu0 %v12558_v19  ;;  %v7341_v54 = vmul.f32 %v16161_v26, %v16161_v26  ;;  %v7342_v11 = vmul.f32 %v16165_v13, %v16165_v13  ;;  %v7343_v19 = vmul.f32 %v16169_v6, %v16169_v6  ;;  %v7344_v15 = vmul.f32 %v16179_v8, %v16179_v8 }
 0x686   :  { %v7365_v33 = vadd.f32 %v7364_v29, %v7334_v61  ;;  %8874 = vmatmul.mubr.bf16.vlgmr.msra.gmra.mrb[160].mxu1 %v7577_v21  ;;  %v12569_v29 = vld [vmem:[%s17425_s4 + $0x110] sm:$0xff]   ;;  %v7345_v21 = vmul.f32 %v16183_v46, %v16183_v46 }
 0x687   :  { %11874 = vmatpush3.bf16.msra.mxu1 %v12562_v32  ;;  %v7346_v32 = vmul.f32 %v16187_v57, %v16187_v57 }
 0x688   :  { %v7366_v55 = vadd.f32 %v7365_v33, %v7335_v47  ;;  %11772 = vmatpush3.bf16.msra.mxu0 %v12559_v7  ;;  %11875 = vmatprep.subr.bf16.mxu1 %v12566_v48  ;;  %v7347_v48 = vmul.f32 %v16191_v37, %v16191_v37  ;;  %v12570_v33 = vld [vmem:[%s17425_s4 + $0x158] sm:$0xff]  }
 0x689   :  { %11773 = vmatprep.subr.bf16.mxu0 %v12561_v10 }
 0x68a   :  { %v7367_v49 = vadd.f32 %v7366_v55, %v7336_v22  ;;  %v7348_v22 = vmul.f32 %v16201_v45, %v16201_v45 }
 0x68b   :  { %11876 = vmatpush3.bf16.msra.mxu1 %v12567_v5 }
 0x68c   :  { %v7368_v25 = vadd.f32 %v7367_v49, %v7337_v20  ;;  %11774 = vmatpush3.bf16.msra.mxu0 %v12563_v14  ;;  %11877 = vmatprep.subr.bf16.mxu1 %v12568_v43  ;;  %v7349_v14 = vmul.f32 %v16205_v27, %v16205_v27  ;;  %v7351_v49 = vmul.f32 %v16213_v16, %v16213_v16 }
 0x68d   :  { %11775 = vmatprep.subr.bf16.mxu0 %v12564_v0  ;;  %v7350_v0 = vmul.f32 %v16209_v9, %v16209_v9 }
 0x68e   :  { %v7369_v39 = vadd.f32 %v7368_v25, %v7338_v50  ;;  %v12571_v25 = vld [vmem:[%s17425_s4 + $0x118] sm:$0xff]  }
 0x68f   :  { %11878 = vmatpush3.bf16.msra.mxu1 %v12569_v29  ;;  %v7357_v29 = vmul.f32 %v16237_v36, %v16237_v36 }
 0x690   :  { %v7370_v59 = vadd.f32 %v7369_v39, %v7339_v24  ;;  %11776 = vmatpush3.bf16.msra.mxu0 %v12565_v30  ;;  %11879 = vmatprep.subr.bf16.mxu1 %v12570_v33  ;;  %v7352_v30 = vmul.f32 %v16217_v60, %v16217_v60  ;;  %v7353_v39 = vmul.f32 %v16221_v12, %v16221_v12 }
 0x691   :  { %v7361_v33 = vmul.f32 %v16262_v4, %v16262_v4 }
 0x692   :  { %v7371_v41 = vadd.f32 %v7370_v59, %v7340_v40  ;;  %v7354_v40 = vmul.f32 %v16225_v28, %v16225_v28 }
 0x693   :  { %11880 = vmatpush3.bf16.msra.mxu1 %v12571_v25 }
 0x694   :  { %v7372_v1 = vadd.f32 %v7371_v41, %v7341_v54  ;;  %v7355_v54 = vmul.f32 %v16229_v52, %v16229_v52 }
 0x696   :  { %v7373_v61 = vadd.f32 %v7372_v1, %v7342_v11  ;;  %v12572_v11 = vld [vmem:[%s17425_s4 + $0x160] sm:$0xff]  }
 0x697   :  { %v12573_v1 = vld [vmem:[%s17425_s4 + $0x1c0] sm:$0xff]   ;;  %11881 = vmatprep.subr.bf16.mxu1 %v12572_v11  ;;  %v12582_v11 = vld [vmem:[%s17425_s4 + $0x130] sm:$0xff]  }
 0x698   :  { %v7374_v23 = vadd.f32 %v7373_v61, %v7343_v19  ;;  %v7356_v19 = vmul.f32 %v16233_v31, %v16233_v31  ;;  %11985 = vmatprep.subr.bf16.mxu0 %v12573_v1  ;;  %v7404_v1 = vld [vmem:[%s17426_s2] sm:$0x1] }
 0x69a   :  { %v7375_v7 = vadd.f32 %v7374_v23, %v7344_v15  ;;  %v7358_v23 = vmul.f32 %v16241_v17, %v16241_v17 }
 0x69c   :  { %v7376_v10 = vadd.f32 %v7375_v7, %v7345_v21  ;;  %v7359_v7 = vmul.f32 %v16245_v51, %v16245_v51 }
 0x69e   :  { %v7377_v47 = vadd.f32 %v7376_v10, %v7346_v32  ;;  %v12574_v10 = vld [vmem:[%s17425_s4 + $0x120] sm:$0xff]  }
 0x69f   :  { %11882 = vmatpush3.bf16.msra.mxu1 %v12574_v10 }
 0x6a0   :  { %v7378_v55 = vadd.f32 %v7377_v47, %v7347_v48  ;;  %v7360_v48 = vmul.f32 %v16258_v56, %v16258_v56 }
 0x6a2   :  { %v7379_v5 = vadd.f32 %v7378_v55, %v7348_v22  ;;  %v7362_v55 = vmul.f32 %v16266_v62, %v16266_v62 }
 0x6a4   :  { %v7380_v20 = vadd.f32 %v7379_v5, %v7349_v14  ;;  %v7363_v5 = vmul.f32 %v16270_v18, %v16270_v18 }
 0x6a6   :  { %v7381_v50 = vadd.f32 %v7380_v20, %v7350_v0  ;;  %v12576_v20 = vld [vmem:[%s17425_s4 + $0x168] sm:$0xff]  }
 0x6a7   :  { %11883 = vmatprep.subr.bf16.mxu1 %v12576_v20 }
 0x6a8   :  { %v7382_v24 = vadd.f32 %v7381_v50, %v7351_v49 }
 0x6aa   :  { %v7383_v43 = vadd.f32 %v7382_v24, %v7352_v30  ;;  %v12578_v24 = vld [vmem:[%s17425_s4 + $0x128] sm:$0xff]  }
 0x6ab   :  { %11884 = vmatpush3.bf16.msra.mxu1 %v12578_v24 }
 0x6ac   :  { %v7384_v59 = vadd.f32 %v7383_v43, %v7353_v39 }
 0x6ae   :  { %v7385_v41 = vadd.f32 %v7384_v59, %v7354_v40 }
 0x6b0   :  { %v7386_v61 = vadd.f32 %v7385_v41, %v7355_v54  ;;  %v12580_v54 = vld [vmem:[%s17425_s4 + $0x170] sm:$0xff]  }
 0x6b1   :  { %11885 = vmatprep.subr.bf16.mxu1 %v12580_v54 }
 0x6b2   :  { %v7387_v15 = vadd.f32 %v7386_v61, %v7356_v19  ;;  %11886 = vmatpush3.bf16.msra.mxu1 %v12582_v11 }
 0x6b4   :  { %v7388_v21 = vadd.f32 %v7387_v15, %v7357_v29  ;;  %v12584_v15 = vld [vmem:[%s17425_s4 + $0x178] sm:$0xff]  }
 0x6b5   :  { %11887 = vmatprep.subr.bf16.mxu1 %v12584_v15 }
 0x6b6   :  { %v7389_v32 = vadd.f32 %v7388_v21, %v7358_v23  ;;  %v16456_v23 = vld [vmem:[%s17427_s3] ss:$0 sm:$0xff] }
 0x6b8   :  { %v7390_v47 = vadd.f32 %v7389_v32, %v7359_v7 }
 0x6ba   :  { %v7391_v22 = vadd.f32 %v7390_v47, %v7360_v48 }
 0x6bc   :  { %v7392_v14 = vadd.f32 %v7391_v22, %v7361_v33 }
 0x6be   :  { %v7393_v0 = vadd.f32 %v7392_v14, %v7362_v55 }
 0x6c0   :  { %v7394_v49 = vadd.f32 %v7393_v0, %v7363_v5 }
 0x6c2   :  { %v7395_v50 = vrot.slane %v7394_v49, 4 }
 0x6c4   :  { %v7396_v25 = vadd.f32 %v7395_v50, %v7394_v49 }
 0x6c6   :  { %v7397_v30 = vrot.slane %v7396_v25, 2 }
 0x6c8   :  { %v7398_v39 = vadd.f32 %v7397_v30, %v7396_v25 }
 0x6ca   :  { %v7399_v43 = vrot.slane %v7398_v39, 1 }
 0x6cc   :  { %v7400_v40 = vadd.f32 %v7399_v43, %v7398_v39 }
 0x6ce   :  { %v7401_v59 = vmul.f32 0.00390625, %v7400_v40 }
 0x6d0   :  { %v7402_v41 = vadd.f32 1e-05, %v7401_v59 }
 0x6d2   :  { %12608 = vrsqrt.f32 %v7402_v41 }
 0x6dc   :  { %v12609_v19 = vpop.eup %12608 }
 0x6dd   :  { %v7405_v61 = vmul.f32 %v12609_v19, %v7404_v1 }
 0x6df   :  { %v7409_v29 = vrot.slane %v7405_v61, %v17601_v34 }
 0x6e1   :  { %v7439_v21 = vmul.f32 %v7409_v29, %v16262_v4  ;;  %v7410_v7 = vmul.f32 %v7409_v29, %v16277_v38  ;;  %v7411_v32 = vmul.f32 %v7409_v29, %v16281_v53  ;;  %v7412_v10 = vmul.f32 %v7409_v29, %v16297_v63 }
 0x6e2   :  { %v7413_v48 = vmul.f32 %v7409_v29, %v16311_v58  ;;  %v7414_v47 = vmul.f32 %v7409_v29, %v16315_v35  ;;  %v7415_v33 = vmul.f32 %v7409_v29, %v16333_v42  ;;  %v7416_v22 = vmul.f32 %v7409_v29, %v16339_v3 }
 0x6e3   :  { %v7478_v55 = vadd.f32 %v16456_v23, %v7439_v21  ;;  %v7417_v14 = vmul.f32 %v7409_v29, %v16354_v44  ;;  %v7418_v4 = vmul.f32 %v7409_v29, %v16157_v2  ;;  %v7419_v38 = vmul.f32 %v7409_v29, %v16161_v26 }
 0x6e4   :  { %v7420_v53 = vmul.f32 %v7409_v29, %v16165_v13  ;;  %v7421_v63 = vmul.f32 %v7409_v29, %v16169_v6  ;;  %v7422_v58 = vmul.f32 %v7409_v29, %v16179_v8  ;;  %v7423_v35 = vmul.f32 %v7409_v29, %v16183_v46  ;;  %v12586_v6 = vld [vmem:[%s17425_s4 + $0x138] sm:$0xff]  }
 0x6e5   :  { %v7510_v5 = vmax.f32 %v7478_v55, 0.0  ;;  %v7424_v42 = vmul.f32 %v7409_v29, %v16187_v57  ;;  %v7425_v3 = vmul.f32 %v7409_v29, %v16191_v37  ;;  %v7426_v0 = vmul.f32 %v7409_v29, %v16201_v45  ;;  %11888 = vmatpush3.bf16.msra.mxu1 %v12586_v6 }
 0x6e6   :  { %v7427_v44 = vmul.f32 %v7409_v29, %v16205_v27  ;;  %v7428_v2 = vmul.f32 %v7409_v29, %v16209_v9  ;;  %v7429_v26 = vmul.f32 %v7409_v29, %v16213_v16  ;;  %v7430_v13 = vmul.f32 %v7409_v29, %v16217_v60 }
 0x6e7   :  { %v7431_v8 = vmul.f32 %v7409_v29, %v16221_v12  ;;  %v7432_v46 = vmul.f32 %v7409_v29, %v16225_v28  ;;  %v7433_v57 = vmul.f32 %v7409_v29, %v16229_v52  ;;  %v7434_v37 = vmul.f32 %v7409_v29, %v16233_v31  ;;  %7542 = vst [vmem:[#allocation2 + $0x171] sm:$0xff] %v7510_v5 }
 0x6e8   :  { %v7435_v45 = vmul.f32 %v7409_v29, %v16237_v36  ;;  %v7436_v27 = vmul.f32 %v7409_v29, %v16241_v17  ;;  %v7437_v9 = vmul.f32 %v7409_v29, %v16245_v51  ;;  %v7438_v16 = vmul.f32 %v7409_v29, %v16258_v56 }
 0x6e9   :  { %v7440_v60 = vmul.f32 %v7409_v29, %v16266_v62  ;;  %v7441_v12 = vmul.f32 %v7409_v29, %v16270_v18  ;;  %v16495_v28 = vadd.f32 %v16456_v23, %v7410_v7  ;;  %v16498_v52 = vadd.f32 %v16456_v23, %v7411_v32 }
 0x6ea   :  { %v16501_v31 = vadd.f32 %v16456_v23, %v7412_v10  ;;  %v16504_v36 = vadd.f32 %v16456_v23, %v7413_v48  ;;  %v16507_v17 = vadd.f32 %v16456_v23, %v7414_v47  ;;  %v16510_v51 = vadd.f32 %v16456_v23, %v7415_v33  ;;  %v16587_v10 = vld [vmem:[%s17425_s4 + $0x200] sm:$0xff]  }
 0x6eb   :  { %v16513_v56 = vadd.f32 %v16456_v23, %v7416_v22  ;;  %v16516_v62 = vadd.f32 %v16456_v23, %v7417_v14  ;;  %v16519_v18 = vadd.f32 %v16456_v23, %v7418_v4  ;;  %v16522_v20 = vadd.f32 %v16456_v23, %v7419_v38  ;;  %12265 = vmatprep.subr.bf16.mxu1 %v16587_v10 }
 0x6ec   :  { %v16525_v49 = vadd.f32 %v16456_v23, %v7420_v53  ;;  %v16528_v50 = vadd.f32 %v16456_v23, %v7421_v63  ;;  %v16531_v25 = vadd.f32 %v16456_v23, %v7422_v58  ;;  %v16534_v30 = vadd.f32 %v16456_v23, %v7423_v35 }
 0x6ed   :  { %v16537_v24 = vadd.f32 %v16456_v23, %v7424_v42  ;;  %v16540_v39 = vadd.f32 %v16456_v23, %v7425_v3  ;;  %v16543_v43 = vadd.f32 %v16456_v23, %v7426_v0  ;;  %v16546_v40 = vadd.f32 %v16456_v23, %v7427_v44 }
 0x6ee   :  { %v16549_v59 = vadd.f32 %v16456_v23, %v7428_v2  ;;  %v16552_v54 = vadd.f32 %v16456_v23, %v7429_v26  ;;  %v16555_v41 = vadd.f32 %v16456_v23, %v7430_v13  ;;  %v16558_v11 = vadd.f32 %v16456_v23, %v7431_v8 }
 0x6ef   :  { %v16561_v1 = vadd.f32 %v16456_v23, %v7432_v46  ;;  %v16564_v19 = vadd.f32 %v16456_v23, %v7433_v57  ;;  %v16567_v61 = vadd.f32 %v16456_v23, %v7434_v37  ;;  %v16570_v29 = vadd.f32 %v16456_v23, %v7435_v45 }
 0x6f0   :  { %v16573_v15 = vadd.f32 %v16456_v23, %v7436_v27  ;;  %v16576_v21 = vadd.f32 %v16456_v23, %v7437_v9  ;;  %v16579_v7 = vadd.f32 %v16456_v23, %v7438_v16  ;;  %v16582_v32 = vadd.f32 %v16456_v23, %v7440_v60  ;;  %v7673_v9 = vld [vmem:[#allocation2 + $0x2] sm:$0xff]  ;;  %v7674_v16 = vld [vmem:[#allocation2 + $0xa] sm:$0xff] }
 0x6f1   :  { %v16590_v48 = vadd.f32 %v16456_v23, %v7441_v12  ;;  %v7481_v47 = vmax.f32 %v16495_v28, 0.0  ;;  %v7482_v33 = vmax.f32 %v16498_v52, 0.0  ;;  %v7483_v22 = vmax.f32 %v16501_v31, 0.0  ;;  %v12579_v31 = vld [vmem:[%s17425_s4 + $0x188] sm:$0xff]  }
 0x6f2   :  { %v7484_v55 = vmax.f32 %v16504_v36, 0.0  ;;  %v7485_v14 = vmax.f32 %v16507_v17, 0.0  ;;  %v7486_v4 = vmax.f32 %v16510_v51, 0.0  ;;  %v7487_v38 = vmax.f32 %v16513_v56, 0.0  ;;  %v12581_v36 = vld [vmem:[%s17425_s4 + $0x1d0] sm:$0xff]   ;;  %v12587_v17 = vld [vmem:[%s17425_s4 + $0x198] sm:$0xff]  }
 0x6f3   :  { %v7488_v53 = vmax.f32 %v16516_v62, 0.0  ;;  %v7489_v23 = vmax.f32 %v16519_v18, 0.0  ;;  %v7490_v63 = vmax.f32 %v16522_v20, 0.0  ;;  %v7491_v58 = vmax.f32 %v16525_v49, 0.0  ;;  %7513 = vst [vmem:[#allocation2 + $0x19] sm:$0xff] %v7481_v47  ;;  %7514 = vst [vmem:[#allocation2 + $0x21] sm:$0xff] %v7482_v33 }
 0x6f4   :  { %7515 = vst [vmem:[#allocation2 + $0x31] sm:$0xff] %v7483_v22  ;;  %v7492_v35 = vmax.f32 %v16528_v50, 0.0  ;;  %v7493_v5 = vmax.f32 %v16531_v25, 0.0  ;;  %v7494_v42 = vmax.f32 %v16534_v30, 0.0  ;;  %v7495_v3 = vmax.f32 %v16537_v24, 0.0  ;;  %7516 = vst [vmem:[#allocation2 + $0x39] sm:$0xff] %v7484_v55 }
 0x6f5   :  { %7517 = vst [vmem:[#allocation2 + $0x49] sm:$0xff] %v7485_v14  ;;  %7518 = vst [vmem:[#allocation2 + $0x51] sm:$0xff] %v7486_v4  ;;  %v7496_v0 = vmax.f32 %v16540_v39, 0.0  ;;  %v7497_v44 = vmax.f32 %v16543_v43, 0.0  ;;  %v7498_v2 = vmax.f32 %v16546_v40, 0.0  ;;  %v7499_v26 = vmax.f32 %v16549_v59, 0.0 }
 0x6f6   :  { %7519 = vst [vmem:[#allocation2 + $0x61] sm:$0xff] %v7487_v38  ;;  %7520 = vst [vmem:[#allocation2 + $0x69] sm:$0xff] %v7488_v53  ;;  %v7500_v13 = vmax.f32 %v16552_v54, 0.0  ;;  %v7501_v6 = vmax.f32 %v16555_v41, 0.0  ;;  %v7502_v8 = vmax.f32 %v16558_v11, 0.0  ;;  %v7503_v46 = vmax.f32 %v16561_v1, 0.0 }
 0x6f7   :  { %7521 = vst [vmem:[#allocation2 + $0x79] sm:$0xff] %v7489_v23  ;;  %7522 = vst [vmem:[#allocation2 + $0x81] sm:$0xff] %v7490_v63  ;;  %v7504_v57 = vmax.f32 %v16564_v19, 0.0  ;;  %v7505_v37 = vmax.f32 %v16567_v61, 0.0  ;;  %v7506_v45 = vmax.f32 %v16570_v29, 0.0  ;;  %v7507_v27 = vmax.f32 %v16573_v15, 0.0 }
 0x6f8   :  { %7523 = vst [vmem:[#allocation2 + $0x91] sm:$0xff] %v7491_v58  ;;  %7524 = vst [vmem:[#allocation2 + $0x99] sm:$0xff] %v7492_v35  ;;  %v7508_v60 = vmax.f32 %v16576_v21, 0.0  ;;  %v7509_v12 = vmax.f32 %v16579_v7, 0.0  ;;  %v7511_v28 = vmax.f32 %v16582_v32, 0.0  ;;  %v7512_v52 = vmax.f32 %v16590_v48, 0.0 }
 0x6f9   :  { %7525 = vst [vmem:[#allocation2 + $0xa9] sm:$0xff] %v7493_v5  ;;  %7526 = vst [vmem:[#allocation2 + $0xb1] sm:$0xff] %v7494_v42  ;;  %v7642_v59 = vpack.c.bf16 %v7482_v33, %v7481_v47  ;;  %v7705_v11 = vpack.c.bf16 %v7674_v16, %v7673_v9  ;;  %v12575_v29 = vld [vmem:[%s17425_s4 + $0x180] sm:$0xff]   ;;  %v16661_v15 = vpack.c.bf16 %v7500_v13, %v7499_v26  ;;  %v12577_v48 = vld [vmem:[%s17425_s4 + $0x1c8] sm:$0xff]  }
 0x6fa   :  { %7527 = vst [vmem:[#allocation2 + $0xc1] sm:$0xff] %v7495_v3  ;;  %7528 = vst [vmem:[#allocation2 + $0xc9] sm:$0xff] %v7496_v0  ;;  %v7737_v54 = vld [vmem:[#allocation2 + $0x18] sm:$0xff]  ;;  %v7738_v41 = vld [vmem:[#allocation2 + $0x20] sm:$0xff]  ;;  %v16663_v21 = vpack.c.bf16 %v7502_v8, %v7501_v6  ;;  %v7643_v32 = vpack.c.bf16 %v7484_v55, %v7483_v22  ;;  %v16672_v47 = vpack.c.bf16 %v7504_v57, %v7503_v46 }
 0x6fb   :  { %7529 = vst [vmem:[#allocation2 + $0xd9] sm:$0xff] %v7497_v44  ;;  %7530 = vst [vmem:[#allocation2 + $0xe1] sm:$0xff] %v7498_v2  ;;  %v7739_v1 = vld [vmem:[#allocation2 + $0x30] sm:$0xff]  ;;  %8881 = vmatprep.mubr.bf16.mxu1 %v7642_v59  ;;  %v7769_v19 = vpack.c.bf16 %v7738_v41, %v7737_v54  ;;  %v7740_v61 = vld [vmem:[#allocation2 + $0x38] sm:$0xff]  ;;  %v16674_v33 = vpack.c.bf16 %v7506_v45, %v7505_v37  ;;  %v7648_v49 = vpack.c.bf16 %v7494_v42, %v7493_v5 }
 0x6fc   :  { %7531 = vst [vmem:[#allocation2 + $0xf1] sm:$0xff] %v7499_v26  ;;  %7532 = vst [vmem:[#allocation2 + $0xf9] sm:$0xff] %v7500_v13  ;;  %v16676_v9 = vpack.c.bf16 %v7740_v61, %v7739_v1  ;;  %v16678_v26 = vpack.c.bf16 %v7508_v60, %v7507_v27  ;;  %v7675_v22 = vld [vmem:[#allocation2 + $0x1a] sm:$0xff]  ;;  %v7676_v55 = vld [vmem:[#allocation2 + $0x22] sm:$0xff]  ;;  %v7646_v61 = vpack.c.bf16 %v7490_v63, %v7489_v23 }
 0x6fd   :  { %7533 = vst [vmem:[#allocation2 + $0x109] sm:$0xff] %v7501_v6  ;;  %7534 = vst [vmem:[#allocation2 + $0x111] sm:$0xff] %v7502_v8  ;;  %9034 = vmatprep.mubr.bf16.mxu0 %v7769_v19  ;;  %8882 = vmatmul.mubr.bf16.gmra.mrb[164].mxu1 %v7769_v19  ;;  %v7741_v13 = vld [vmem:[#allocation2 + $0x48] sm:$0xff]  ;;  %v7742_v6 = vld [vmem:[#allocation2 + $0x50] sm:$0xff]  ;;  %v7649_v25 = vpack.c.bf16 %v7496_v0, %v7495_v3  ;;  %v7650_v24 = vpack.c.bf16 %v7498_v2, %v7497_v44 }
 0x6fe   :  { %7535 = vst [vmem:[#allocation2 + $0x121] sm:$0xff] %v7503_v46  ;;  %7536 = vst [vmem:[#allocation2 + $0x129] sm:$0xff] %v7504_v57  ;;  %9035 = vmatmul.mubr.bf16.vlgmr.msra.gmra.mrb[192].mxu0 %v7705_v11  ;;  %8889 = vmatprep.mubr.bf16.mxu1 %v7643_v32  ;;  %v12583_v8 = vld [vmem:[%s17425_s4 + $0x190] sm:$0xff]   ;;  %v16690_v46 = vpack.c.bf16 %v7676_v55, %v7675_v22  ;;  %v7644_v57 = vpack.c.bf16 %v7486_v4, %v7485_v14  ;;  %v12588_v51 = vld [vmem:[%s17425_s4 + $0x1e0] sm:$0xff]  }
 0x6ff   :  { %7537 = vst [vmem:[#allocation2 + $0x139] sm:$0xff] %v7505_v37  ;;  %7538 = vst [vmem:[#allocation2 + $0x141] sm:$0xff] %v7506_v45  ;;  %9042 = vmatprep.mubr.bf16.mxu0 %v16676_v9  ;;  %11986 = vmatpush3.bf16.msra.mxu0 %v12575_v29  ;;  %v12585_v37 = vld [vmem:[%s17425_s4 + $0x1d8] sm:$0xff]   ;;  %v16700_v45 = vpack.c.bf16 %v7742_v6, %v7741_v13  ;;  %v7744_v16 = vld [vmem:[#allocation2 + $0x68] sm:$0xff] }
 0x700   :  { %7539 = vst [vmem:[#allocation2 + $0x151] sm:$0xff] %v7507_v27  ;;  %7540 = vst [vmem:[#allocation2 + $0x159] sm:$0xff] %v7508_v60  ;;  %11987 = vmatprep.subr.bf16.mxu0 %v12577_v48  ;;  %v7677_v14 = vld [vmem:[#allocation2 + $0x32] sm:$0xff]  ;;  %v7678_v4 = vld [vmem:[#allocation2 + $0x3a] sm:$0xff] }
 0x701   :  { %7541 = vst [vmem:[#allocation2 + $0x169] sm:$0xff] %v7509_v12  ;;  %7543 = vst [vmem:[#allocation2 + $0x181] sm:$0xff] %v7511_v28  ;;  %v7743_v27 = vld [vmem:[#allocation2 + $0x60] sm:$0xff]  ;;  %v16713_v28 = vpack.c.bf16 %v7678_v4, %v7677_v14  ;;  %v12590_v59 = vld [vmem:[%s17425_s4 + $0x1e8] sm:$0xff]  }
 0x702   :  { %7544 = vst [vmem:[#allocation2 + $0x189] sm:$0xff] %v7512_v52  ;;  %v12589_v60 = vld [vmem:[%s17425_s4 + $0x1a0] sm:$0xff]   ;;  %v7645_v52 = vpack.c.bf16 %v7488_v53, %v7487_v38  ;;  %v16723_v54 = vpack.c.bf16 %v7744_v16, %v7743_v27  ;;  %v12591_v56 = vld [vmem:[%s17425_s4 + $0x1a8] sm:$0xff]   ;;  %v12593_v62 = vld [vmem:[%s17425_s4 + $0x1f0] sm:$0xff]  }
 0x703   :  { %11988 = vmatpush3.bf16.msra.mxu0 %v12579_v31  ;;  %v7679_v38 = vld [vmem:[#allocation2 + $0x4a] sm:$0xff]  ;;  %v7680_v53 = vld [vmem:[#allocation2 + $0x52] sm:$0xff]  ;;  %v7746_v11 = vld [vmem:[#allocation2 + $0x80] sm:$0xff] }
 0x704   :  { %11989 = vmatprep.subr.bf16.mxu0 %v12581_v36  ;;  %v7745_v41 = vld [vmem:[#allocation2 + $0x78] sm:$0xff]  ;;  %v12594_v1 = vld [vmem:[%s17425_s4 + $0x1b0] sm:$0xff]   ;;  %v16736_v19 = vpack.c.bf16 %v7680_v53, %v7679_v38  ;;  %v7681_v20 = vld [vmem:[#allocation2 + $0x62] sm:$0xff]  ;;  %v7647_v36 = vpack.c.bf16 %v7492_v35, %v7491_v58 }
 0x705   :  { %8890 = vmatmul.mubr.bf16.gmra.mrb[168].mxu1 %v16676_v9  ;;  %v12595_v29 = vld [vmem:[%s17425_s4 + $0x1f8] sm:$0xff]   ;;  %v16746_v32 = vpack.c.bf16 %v7746_v11, %v7745_v41  ;;  %v7682_v23 = vld [vmem:[#allocation2 + $0x6a] sm:$0xff]  ;;  %v7684_v13 = vld [vmem:[#allocation2 + $0x82] sm:$0xff] }
 0x706   :  { %9043 = vmatmul.mubr.bf16.gmra.mrb[196].mxu0 %v16690_v46  ;;  %8897 = vmatprep.mubr.bf16.mxu1 %v7644_v57  ;;  %v12596_v18 = vld [vmem:[%s17425_s4 + $0x1b8] sm:$0xff]   ;;  %v7747_v63 = vld [vmem:[#allocation2 + $0x90] sm:$0xff]  ;;  %v16753_v31 = vpack.c.bf16 %v7682_v23, %v7681_v20  ;;  %v7749_v6 = vld [vmem:[#allocation2 + $0xa8] sm:$0xff] }
 0x707   :  { %9050 = vmatprep.mubr.bf16.mxu0 %v16700_v45  ;;  %11990 = vmatpush3.bf16.msra.mxu0 %v12583_v8  ;;  %v7748_v48 = vld [vmem:[#allocation2 + $0x98] sm:$0xff]  ;;  %v7750_v8 = vld [vmem:[#allocation2 + $0xb0] sm:$0xff]  ;;  %v7754_v4 = vld [vmem:[#allocation2 + $0xe0] sm:$0xff] }
 0x708   :  { %11991 = vmatprep.subr.bf16.mxu0 %v12585_v37  ;;  %v16760_v22 = vpack.c.bf16 %v7748_v48, %v7747_v63  ;;  %v7683_v55 = vld [vmem:[#allocation2 + $0x7a] sm:$0xff]  ;;  %v16771_v50 = vpack.c.bf16 %v7750_v8, %v7749_v6  ;;  %v7685_v58 = vld [vmem:[#allocation2 + $0x92] sm:$0xff]  ;;  %v7687_v5 = vld [vmem:[#allocation2 + $0xaa] sm:$0xff] }
 0x709   :  { %v16764_v57 = vpack.c.bf16 %v7684_v13, %v7683_v55  ;;  %v7686_v35 = vld [vmem:[#allocation2 + $0x9a] sm:$0xff]  ;;  %v7688_v42 = vld [vmem:[#allocation2 + $0xb2] sm:$0xff]  ;;  %v7689_v3 = vld [vmem:[#allocation2 + $0xc2] sm:$0xff] }
 0x70a   :  { %v7751_v37 = vld [vmem:[#allocation2 + $0xc0] sm:$0xff]  ;;  %v7753_v14 = vld [vmem:[#allocation2 + $0xd8] sm:$0xff]  ;;  %v16786_v27 = vpack.c.bf16 %v7688_v42, %v7687_v5  ;;  %v7690_v0 = vld [vmem:[#allocation2 + $0xca] sm:$0xff] }
 0x70b   :  { %11992 = vmatpush3.bf16.msra.mxu0 %v12587_v17  ;;  %v7752_v17 = vld [vmem:[#allocation2 + $0xc8] sm:$0xff]  ;;  %v16793_v39 = vpack.c.bf16 %v7754_v4, %v7753_v14  ;;  %v7755_v16 = vld [vmem:[#allocation2 + $0xf0] sm:$0xff]  ;;  %v7691_v40 = vld [vmem:[#allocation2 + $0xda] sm:$0xff] }
 0x70c   :  { %11993 = vmatprep.subr.bf16.mxu0 %v12588_v51  ;;  %v16775_v51 = vpack.c.bf16 %v7686_v35, %v7685_v58  ;;  %v16782_v30 = vpack.c.bf16 %v7752_v17, %v7751_v37  ;;  %v7692_v44 = vld [vmem:[#allocation2 + $0xe2] sm:$0xff]  ;;  %v7693_v38 = vld [vmem:[#allocation2 + $0xf2] sm:$0xff]  ;;  %v7699_v37 = vld [vmem:[#allocation2 + $0x13a] sm:$0xff] }
 0x70d   :  { %8898 = vmatmul.mubr.bf16.gmra.mrb[172].mxu1 %v16700_v45  ;;  %v7757_v2 = vld [vmem:[#allocation2 + $0x108] sm:$0xff]  ;;  %v7759_v53 = vld [vmem:[#allocation2 + $0x120] sm:$0xff]  ;;  %v7763_v48 = vld [vmem:[#allocation2 + $0x150] sm:$0xff] }
 0x70e   :  { %9051 = vmatmul.mubr.bf16.gmra.mrb[200].mxu0 %v16713_v28  ;;  %8905 = vmatprep.mubr.bf16.mxu1 %v7645_v52  ;;  %v16797_v52 = vpack.c.bf16 %v7690_v0, %v7689_v3  ;;  %v7760_v41 = vld [vmem:[#allocation2 + $0x128] sm:$0xff]  ;;  %v7766_v42 = vld [vmem:[#allocation2 + $0x170] sm:$0xff]  ;;  %v7702_v3 = vld [vmem:[#allocation2 + $0x15a] sm:$0xff] }
 0x70f   :  { %9058 = vmatprep.mubr.bf16.mxu0 %v16723_v54  ;;  %11994 = vmatpush3.bf16.msra.mxu0 %v12589_v60  ;;  %v7756_v60 = vld [vmem:[#allocation2 + $0xf8] sm:$0xff]  ;;  %v7697_v63 = vld [vmem:[#allocation2 + $0x122] sm:$0xff] }
 0x710   :  { %11995 = vmatprep.subr.bf16.mxu0 %v12590_v59  ;;  %v16800_v43 = vpack.c.bf16 %v7756_v60, %v7755_v16  ;;  %v7758_v59 = vld [vmem:[#allocation2 + $0x110] sm:$0xff]  ;;  %v7700_v17 = vld [vmem:[#allocation2 + $0x142] sm:$0xff] }
 0x711   :  { %v7765_v5 = vld [vmem:[#allocation2 + $0x168] sm:$0xff]  ;;  %v16843_v14 = vpack.c.bf16 %v7700_v17, %v7699_v37  ;;  %v7767_v0 = vld [vmem:[#allocation2 + $0x180] sm:$0xff]  ;;  %v8004_v17 = vld [vmem:[#allocation2 + $0xb1] sm:$0xff] }
 0x712   :  { %v7768_v16 = vld [vmem:[#allocation2 + $0x188] sm:$0xff] }
 0x713   :  { %11996 = vmatpush3.bf16.msra.mxu0 %v12591_v56  ;;  %v16805_v56 = vpack.c.bf16 %v7692_v44, %v7691_v40  ;;  %v16856_v7 = vpack.c.bf16 %v7768_v16, %v7767_v0  ;;  %v7802_v40 = vld [vmem:[#allocation2 + $0x21] sm:$0xff]  ;;  %v7703_v44 = vld [vmem:[#allocation2 + $0x16a] sm:$0xff] }
 0x714   :  { %11997 = vmatprep.subr.bf16.mxu0 %v12593_v62  ;;  %v16808_v62 = vpack.c.bf16 %v7758_v59, %v7757_v2  ;;  %v7704_v2 = vld [vmem:[#allocation2 + $0x172] sm:$0xff]  ;;  %v8003_v37 = vld [vmem:[#allocation2 + $0xa9] sm:$0xff] }
 0x715   :  { %8906 = vmatmul.mubr.bf16.gmra.mrb[176].mxu1 %v16723_v54  ;;  %v7993_v59 = vld [vmem:[#allocation2 + $0x31] sm:$0xff] }
 0x716   :  { %9059 = vmatmul.mubr.bf16.gmra.mrb[204].mxu0 %v16736_v19  ;;  %8913 = vmatprep.mubr.bf16.mxu1 %v7646_v61  ;;  %v7695_v61 = vld [vmem:[#allocation2 + $0x10a] sm:$0xff] }
 0x717   :  { %9066 = vmatprep.mubr.bf16.mxu0 %v16746_v32  ;;  %11998 = vmatpush3.bf16.msra.mxu0 %v12594_v1  ;;  %v16816_v1 = vpack.c.bf16 %v7760_v41, %v7759_v53  ;;  %v16861_v53 = vpack.c.bf16 %v7704_v2, %v7703_v44  ;;  %v12597_v41 = vld [vmem:[%s17425_s4 + $0x208] sm:$0xff]  }
 0x718   :  { %11999 = vmatprep.subr.bf16.mxu0 %v12595_v29  ;;  %v7761_v29 = vld [vmem:[#allocation2 + $0x138] sm:$0xff] }
 0x71b   :  { %12000 = vmatpush3.bf16.msra.mxu0 %v12596_v18  ;;  %v7762_v18 = vld [vmem:[#allocation2 + $0x140] sm:$0xff] }
 0x71c   :  { %v16824_v23 = vpack.c.bf16 %v7762_v18, %v7761_v29  ;;  %v7996_v29 = vld [vmem:[#allocation2 + $0x51] sm:$0xff] }
 0x71d   :  { %8914 = vmatmul.mubr.bf16.gmra.mrb[180].mxu1 %v16746_v32  ;;  %v12599_v18 = vld [vmem:[%s17425_s4 + $0x218] sm:$0xff]  }
 0x71e   :  { %9067 = vmatmul.mubr.bf16.gmra.mrb[208].mxu0 %v16753_v31  ;;  %8921 = vmatprep.mubr.bf16.mxu1 %v7647_v36  ;;  %v7764_v36 = vld [vmem:[#allocation2 + $0x158] sm:$0xff] }
 0x71f   :  { %9074 = vmatprep.mubr.bf16.mxu0 %v16760_v22  ;;  %v16834_v58 = vpack.c.bf16 %v7764_v36, %v7763_v48  ;;  %v12601_v48 = vld [vmem:[%s17425_s4 + $0x228] sm:$0xff]  }
 0x725   :  { %8922 = vmatmul.mubr.bf16.gmra.mrb[184].mxu1 %v16760_v22 }
 0x726   :  { %9075 = vmatmul.mubr.bf16.gmra.mrb[212].mxu0 %v16764_v57  ;;  %8929 = vmatprep.mubr.bf16.mxu1 %v7648_v49 }
 0x727   :  { %9082 = vmatprep.mubr.bf16.mxu0 %v16771_v50 }
 0x72d   :  { %8930 = vmatmul.mubr.bf16.gmra.mrb[188].mxu1 %v16771_v50 }
 0x72e   :  { %9083 = vmatmul.mubr.bf16.gmra.mrb[216].mxu0 %v16775_v51  ;;  %8937 = vmatprep.mubr.bf16.mxu1 %v7649_v25  ;;  %v16841_v25 = vld [vmem:[#allocation2 + $0x171] sm:$0xff] }
 0x72f   :  { %9090 = vmatprep.mubr.bf16.mxu0 %v16782_v30  ;;  %v7656_v4 = vpack.c.bf16 %v16841_v25, %v7509_v12  ;;  %v7801_v12 = vld [vmem:[#allocation2 + $0x19] sm:$0xff] }
 0x735   :  { %8938 = vmatmul.mubr.bf16.gmra.mrb[192].mxu1 %v16782_v30 }
 0x736   :  { %9091 = vmatmul.mubr.bf16.gmra.mrb[220].mxu0 %v16786_v27  ;;  %8945 = vmatprep.mubr.bf16.mxu1 %v7650_v24  ;;  %v16849_v24 = vpack.c.bf16 %v7766_v42, %v7765_v5  ;;  %v8030_v5 = vpack.c.bf16 %v8004_v17, %v8003_v37  ;;  %v7896_v37 = vld [vmem:[#allocation2 + $0x18a] sm:$0xff] }
 0x737   :  { %9098 = vmatprep.mubr.bf16.mxu0 %v16793_v39 }
 0x73d   :  { %8946 = vmatmul.mubr.bf16.gmra.mrb[196].mxu1 %v16793_v39 }
 0x73e   :  { %9099 = vmatmul.mubr.bf16.gmra.mrb[224].mxu0 %v16797_v52  ;;  %8953 = vmatprep.mubr.bf16.mxu1 %v16661_v15  ;;  %v7694_v15 = vld [vmem:[#allocation2 + $0xfa] sm:$0xff] }
 0x73f   :  { %9106 = vmatprep.mubr.bf16.mxu0 %v16800_v43  ;;  %v16813_v11 = vpack.c.bf16 %v7694_v15, %v7693_v38  ;;  %v7994_v38 = vld [vmem:[#allocation2 + $0x39] sm:$0xff]  ;;  %v7833_v15 = vpack.c.bf16 %v7802_v40, %v7801_v12 }
 0x745   :  { %8954 = vmatmul.mubr.bf16.gmra.mrb[200].mxu1 %v16800_v43 }
 0x746   :  { %9107 = vmatmul.mubr.bf16.gmra.mrb[228].mxu0 %v16805_v56  ;;  %8961 = vmatprep.mubr.bf16.mxu1 %v16663_v21  ;;  %v7696_v21 = vld [vmem:[#allocation2 + $0x112] sm:$0xff] }
 0x747   :  { %9114 = vmatprep.mubr.bf16.mxu0 %v16808_v62  ;;  %v16821_v20 = vpack.c.bf16 %v7696_v21, %v7695_v61  ;;  %v8025_v61 = vpack.c.bf16 %v7994_v38, %v7993_v59  ;;  %v7995_v21 = vld [vmem:[#allocation2 + $0x49] sm:$0xff]  ;;  %v8017_v59 = vld [vmem:[#allocation2 + $0x151] sm:$0xff] }
 0x74d   :  { %8962 = vmatmul.mubr.bf16.gmra.mrb[204].mxu1 %v16808_v62 }
 0x74e   :  { %9115 = vmatmul.mubr.bf16.gmra.mrb[232].mxu0 %v16813_v11  ;;  %8969 = vmatprep.mubr.bf16.mxu1 %v16672_v47  ;;  %v7698_v47 = vld [vmem:[#allocation2 + $0x12a] sm:$0xff] }
 0x74f   :  { %9122 = vmatprep.mubr.bf16.mxu0 %v16816_v1  ;;  %v16829_v6 = vpack.c.bf16 %v7698_v47, %v7697_v63  ;;  %v8026_v63 = vpack.c.bf16 %v7996_v29, %v7995_v21  ;;  %v7998_v47 = vld [vmem:[#allocation2 + $0x69] sm:$0xff] }
 0x755   :  { %8970 = vmatmul.mubr.bf16.gmra.mrb[208].mxu1 %v16816_v1 }
 0x756   :  { %9123 = vmatmul.mubr.bf16.gmra.mrb[236].mxu0 %v16821_v20  ;;  %8977 = vmatprep.mubr.bf16.mxu1 %v16674_v33 }
 0x757   :  { %9130 = vmatprep.mubr.bf16.mxu0 %v16824_v23 }
 0x759   :  { %v11665_v55 = vpop.f32.mrb[160].mxu1 }
 0x75a   :  { %v11666_v13 = vpop.f32.mrb[161].mxu1 }
 0x75b   :  { %v16831_v8 = vadd.f32 %v11666_v13, %v11665_v55  ;;  %v11668_v49 = vpop.f32.mrb[162].mxu1  ;;  %v8000_v55 = vld [vmem:[#allocation2 + $0x81] sm:$0xff]  ;;  %v12603_v13 = vld [vmem:[%s17425_s4 + $0x238] sm:$0xff]  }
 0x75c   :  { %v11669_v35 = vpop.f32.mrb[163].mxu1 }
 0x75d   :  { %8978 = vmatmul.mubr.bf16.gmra.mrb[212].mxu1 %v16824_v23  ;;  %v16838_v33 = vadd.f32 %v11669_v35, %v11668_v49 }
 0x75e   :  { %9131 = vmatmul.mubr.bf16.gmra.mrb[240].mxu0 %v16829_v6  ;;  %8985 = vmatprep.mubr.bf16.mxu1 %v16678_v26  ;;  %v7701_v26 = vld [vmem:[#allocation2 + $0x152] sm:$0xff] }
 0x75f   :  { %9138 = vmatprep.mubr.bf16.mxu0 %v16834_v58  ;;  %v16853_v60 = vpack.c.bf16 %v7702_v3, %v7701_v26 }
 0x765   :  { %8986 = vmatmul.mubr.bf16.gmra.mrb[216].mxu1 %v16834_v58 }
 0x766   :  { %9139 = vmatmul.mubr.bf16.gmra.mrb[244].mxu0 %v16843_v14  ;;  %8993 = vmatprep.mubr.bf16.mxu1 %v7656_v4 }
 0x767   :  { %9146 = vmatprep.mubr.bf16.mxu0 %v16849_v24 }
 0x76d   :  { %8994 = vmatmul.mubr.bf16.gmra.mrb[220].mxu1 %v16849_v24 }
 0x76e   :  { %9147 = vmatmul.mubr.bf16.gmra.mrb[248].mxu0 %v16853_v60  ;;  %9195 = vmatprep.mubr.bf16.mxu1 %v16690_v46  ;;  %v12598_v46 = vld [vmem:[%s17425_s4 + $0x210] sm:$0xff]  }
 0x76f   :  { %9154 = vmatprep.mubr.bf16.mxu0 %v16856_v7 }
 0x775   :  { %9196 = vmatmul.mubr.bf16.vlgmr.msra.gmra.mrb[224].mxu1 %v7833_v15 }
 0x776   :  { %9155 = vmatmul.mubr.bf16.gmra.mrb[252].mxu0 %v16861_v53  ;;  %12266 = vmatpush3.bf16.msra.mxu1 %v16587_v10  ;;  %v12600_v10 = vld [vmem:[%s17425_s4 + $0x220] sm:$0xff]  }
 0x777   :  { %9203 = vmatprep.mubr.bf16.mxu1 %v16713_v28  ;;  %9356 = vmatprep.mubr.bf16.mxu0 %v8025_v61  ;;  %v7997_v28 = vld [vmem:[#allocation2 + $0x61] sm:$0xff] }
 0x778   :  { %12267 = vmatprep.subr.bf16.mxu1 %v12597_v41  ;;  %v8027_v36 = vpack.c.bf16 %v7998_v47, %v7997_v28 }
 0x77a   :  { %12268 = vmatpush3.bf16.msra.mxu1 %v12597_v41 }
 0x77b   :  { %12269 = vmatprep.subr.bf16.mxu1 %v12598_v46 }
 0x77d   :  { %9204 = vmatmul.mubr.bf16.gmra.mrb[228].mxu1 %v8025_v61 }
 0x77e   :  { %9357 = vmatmul.mubr.bf16.vlgmr.msra.gmra.mrb[0].mxu0 %v16676_v9  ;;  %9211 = vmatprep.mubr.bf16.mxu1 %v16736_v19  ;;  %v12602_v9 = vld [vmem:[%s17425_s4 + $0x230] sm:$0xff]   ;;  %v7999_v19 = vld [vmem:[#allocation2 + $0x79] sm:$0xff] }
 0x77f   :  { %9364 = vmatprep.mubr.bf16.mxu0 %v8026_v63  ;;  %12270 = vmatpush3.bf16.msra.mxu1 %v12598_v46  ;;  %v8028_v49 = vpack.c.bf16 %v8000_v55, %v7999_v19 }
 0x780   :  { %12271 = vmatprep.subr.bf16.mxu1 %v12599_v18 }
 0x783   :  { %12272 = vmatpush3.bf16.msra.mxu1 %v12599_v18 }
 0x784   :  { %12273 = vmatprep.subr.bf16.mxu1 %v12600_v10 }
 0x785   :  { %9212 = vmatmul.mubr.bf16.gmra.mrb[232].mxu1 %v8026_v63 }
 0x786   :  { %9365 = vmatmul.mubr.bf16.gmra.mrb[4].mxu0 %v16700_v45  ;;  %9219 = vmatprep.mubr.bf16.mxu1 %v16753_v31  ;;  %v8001_v45 = vld [vmem:[#allocation2 + $0x91] sm:$0xff]  ;;  %v8002_v31 = vld [vmem:[#allocation2 + $0x99] sm:$0xff] }
 0x787   :  { %9372 = vmatprep.mubr.bf16.mxu0 %v8027_v36  ;;  %12274 = vmatpush3.bf16.msra.mxu1 %v12600_v10  ;;  %v8029_v35 = vpack.c.bf16 %v8002_v31, %v8001_v45 }
 0x788   :  { %12275 = vmatprep.subr.bf16.mxu1 %v12601_v48 }
 0x78b   :  { %12276 = vmatpush3.bf16.msra.mxu1 %v12601_v48  ;;  %v8019_v48 = vld [vmem:[#allocation2 + $0x169] sm:$0xff] }
 0x78c   :  { %12277 = vmatprep.subr.bf16.mxu1 %v12602_v9 }
 0x78d   :  { %9220 = vmatmul.mubr.bf16.gmra.mrb[236].mxu1 %v8027_v36 }
 0x78e   :  { %9373 = vmatmul.mubr.bf16.gmra.mrb[8].mxu0 %v16723_v54  ;;  %9227 = vmatprep.mubr.bf16.mxu1 %v16764_v57  ;;  %v8005_v54 = vld [vmem:[#allocation2 + $0xc1] sm:$0xff]  ;;  %v8006_v57 = vld [vmem:[#allocation2 + $0xc9] sm:$0xff] }
 0x78f   :  { %9380 = vmatprep.mubr.bf16.mxu0 %v8028_v49  ;;  %12278 = vmatpush3.bf16.msra.mxu1 %v12602_v9  ;;  %v8031_v42 = vpack.c.bf16 %v8006_v57, %v8005_v54  ;;  %v8021_v57 = vld [vmem:[#allocation2 + $0x181] sm:$0xff] }
 0x790   :  { %12279 = vmatprep.subr.bf16.mxu1 %v12603_v13 }
 0x793   :  { %12280 = vmatpush3.bf16.msra.mxu1 %v12603_v13 }
 0x795   :  { %9228 = vmatmul.mubr.bf16.gmra.mrb[240].mxu1 %v8028_v49 }
 0x796   :  { %9381 = vmatmul.mubr.bf16.gmra.mrb[12].mxu0 %v16746_v32  ;;  %9235 = vmatprep.mubr.bf16.mxu1 %v16775_v51  ;;  %v8007_v32 = vld [vmem:[#allocation2 + $0xd9] sm:$0xff]  ;;  %v8008_v51 = vld [vmem:[#allocation2 + $0xe1] sm:$0xff] }
 0x797   :  { %9388 = vmatprep.mubr.bf16.mxu0 %v8029_v35  ;;  %v8032_v4 = vpack.c.bf16 %v8008_v51, %v8007_v32 }
 0x79d   :  { %9236 = vmatmul.mubr.bf16.gmra.mrb[244].mxu1 %v8029_v35  ;;  %v7895_v35 = vld [vmem:[#allocation2 + $0x182] sm:$0xff] }
 0x79e   :  { %9389 = vmatmul.mubr.bf16.gmra.mrb[16].mxu0 %v16760_v22  ;;  %9243 = vmatprep.mubr.bf16.mxu1 %v16786_v27  ;;  %v8009_v22 = vld [vmem:[#allocation2 + $0xf1] sm:$0xff]  ;;  %v8010_v27 = vld [vmem:[#allocation2 + $0xf9] sm:$0xff] }
 0x79f   :  { %9396 = vmatprep.mubr.bf16.mxu0 %v8030_v5  ;;  %v8033_v26 = vpack.c.bf16 %v8010_v27, %v8009_v22  ;;  %v16924_v22 = vpack.c.bf16 %v7896_v37, %v7895_v35  ;;  %v8063_v37 = vld [vmem:[#allocation2 + $0x7a] sm:$0xff] }
 0x7a5   :  { %9244 = vmatmul.mubr.bf16.gmra.mrb[248].mxu1 %v8030_v5 }
 0x7a6   :  { %9397 = vmatmul.mubr.bf16.gmra.mrb[20].mxu0 %v16771_v50  ;;  %9251 = vmatprep.mubr.bf16.mxu1 %v16797_v52  ;;  %v8011_v50 = vld [vmem:[#allocation2 + $0x109] sm:$0xff]  ;;  %v8012_v52 = vld [vmem:[#allocation2 + $0x111] sm:$0xff] }
 0x7a7   :  { %9404 = vmatprep.mubr.bf16.mxu0 %v8031_v42  ;;  %v8034_v3 = vpack.c.bf16 %v8012_v52, %v8011_v50 }
 0x7ad   :  { %9252 = vmatmul.mubr.bf16.gmra.mrb[252].mxu1 %v8031_v42  ;;  %v8022_v42 = vld [vmem:[#allocation2 + $0x189] sm:$0xff] }
 0x7ae   :  { %9405 = vmatmul.mubr.bf16.gmra.mrb[24].mxu0 %v16782_v30  ;;  %9259 = vmatprep.mubr.bf16.mxu1 %v16805_v56  ;;  %v8013_v30 = vld [vmem:[#allocation2 + $0x121] sm:$0xff]  ;;  %v8014_v56 = vld [vmem:[#allocation2 + $0x129] sm:$0xff] }
 0x7af   :  { %9412 = vmatprep.mubr.bf16.mxu0 %v8032_v4  ;;  %v8035_v0 = vpack.c.bf16 %v8014_v56, %v8013_v30  ;;  %v8024_v30 = vld [vmem:[#allocation2 + $0x1a1] sm:$0xff] }
 0x7b5   :  { %9260 = vmatmul.mubr.bf16.gmra.mrb[0].mxu1 %v8032_v4 }
 0x7b6   :  { %9413 = vmatmul.mubr.bf16.gmra.mrb[28].mxu0 %v16793_v39  ;;  %9267 = vmatprep.mubr.bf16.mxu1 %v16813_v11  ;;  %v8015_v39 = vld [vmem:[#allocation2 + $0x139] sm:$0xff]  ;;  %v8016_v11 = vld [vmem:[#allocation2 + $0x141] sm:$0xff] }
 0x7b7   :  { %9420 = vmatprep.mubr.bf16.mxu0 %v8033_v26  ;;  %v8036_v16 = vpack.c.bf16 %v8016_v11, %v8015_v39  ;;  %v8057_v39 = vld [vmem:[#allocation2 + $0x32] sm:$0xff]  ;;  %v8058_v11 = vld [vmem:[#allocation2 + $0x3a] sm:$0xff] }
 0x7bd   :  { %9268 = vmatmul.mubr.bf16.gmra.mrb[4].mxu1 %v8033_v26  ;;  %v8039_v26 = vpack.c.bf16 %v8022_v42, %v8021_v57  ;;  %v8065_v57 = vld [vmem:[#allocation2 + $0x92] sm:$0xff]  ;;  %v8066_v42 = vld [vmem:[#allocation2 + $0x9a] sm:$0xff] }
 0x7be   :  { %9421 = vmatmul.mubr.bf16.gmra.mrb[32].mxu0 %v16800_v43  ;;  %9275 = vmatprep.mubr.bf16.mxu1 %v16821_v20 }
 0x7bf   :  { %9428 = vmatprep.mubr.bf16.mxu0 %v8034_v3 }
 0x7c5   :  { %9276 = vmatmul.mubr.bf16.gmra.mrb[8].mxu1 %v8034_v3  ;;  %v8023_v3 = vld [vmem:[#allocation2 + $0x199] sm:$0xff] }
 0x7c6   :  { %9429 = vmatmul.mubr.bf16.gmra.mrb[36].mxu0 %v16808_v62  ;;  %9283 = vmatprep.mubr.bf16.mxu1 %v16829_v6  ;;  %v8018_v62 = vld [vmem:[#allocation2 + $0x159] sm:$0xff] }
 0x7c7   :  { %9436 = vmatprep.mubr.bf16.mxu0 %v8035_v0 }
 0x7cd   :  { %9284 = vmatmul.mubr.bf16.gmra.mrb[12].mxu1 %v8035_v0 }
 0x7ce   :  { %9437 = vmatmul.mubr.bf16.gmra.mrb[40].mxu0 %v16816_v1  ;;  %9291 = vmatprep.mubr.bf16.mxu1 %v16843_v14  ;;  %v8037_v14 = vpack.c.bf16 %v8018_v62, %v8017_v59  ;;  %v8089_v62 = vpack.c.bf16 %v8058_v11, %v8057_v39 }
 0x7cf   :  { %9444 = vmatprep.mubr.bf16.mxu0 %v8036_v16 }
 0x7d0   :  { %v11671_v43 = vpop.f32.mrb[164].mxu1 }
 0x7d1   :  { %v11777_v20 = vpop.f32.mrb[192].mxu0  ;;  %v11672_v12 = vpop.f32.mrb[165].mxu1 }
 0x7d2   :  { %v11673_v40 = vadd.f32 %v11672_v12, %v11671_v43  ;;  %v11778_v44 = vpop.f32.mrb[193].mxu0  ;;  %v11674_v2 = vpop.f32.mrb[166].mxu1 }
 0x7d3   :  { %v11779_v38 = vadd.f32 %v11778_v44, %v11777_v20  ;;  %v11780_v6 = vpop.f32.mrb[194].mxu0  ;;  %v11675_v15 = vpop.f32.mrb[167].mxu1 }
 0x7d4   :  { %v11676_v41 = vadd.f32 %v11675_v15, %v11674_v2  ;;  %v11781_v61 = vpop.f32.mrb[195].mxu0  ;;  %v8040_v2 = vpack.c.bf16 %v8024_v30, %v8023_v3  ;;  %v8093_v30 = vpack.c.bf16 %v8066_v42, %v8065_v57 }
 0x7d5   :  { %v16910_v46 = vadd.f32 %v11779_v38, %v16831_v8  ;;  %v11782_v1 = vadd.f32 %v11781_v61, %v11780_v6  ;;  %9292 = vmatmul.mubr.bf16.gmra.mrb[16].mxu1 %v8036_v16  ;;  %v8059_v61 = vld [vmem:[#allocation2 + $0x4a] sm:$0xff] }
 0x7d6   :  { %9445 = vmatmul.mubr.bf16.gmra.mrb[44].mxu0 %v16824_v23  ;;  %9299 = vmatprep.mubr.bf16.mxu1 %v16853_v60 }
 0x7d7   :  { %v16915_v21 = vadd.f32 %v11782_v1, %v16838_v33  ;;  %9452 = vmatprep.mubr.bf16.mxu0 %v8037_v14  ;;  %v8038_v33 = vpack.c.bf16 %v16841_v25, %v8019_v48  ;;  %v8060_v1 = vld [vmem:[#allocation2 + $0x52] sm:$0xff]  ;;  %v12619_v48 = vld [vmem:[#allocation2] sm:$0xff] }
 0x7d8   :  { %v11677_v29 = vpop.f32.mrb[168].mxu1 }
 0x7d9   :  { %v11783_v18 = vpop.f32.mrb[196].mxu0  ;;  %v11678_v63 = vpop.f32.mrb[169].mxu1 }
 0x7da   :  { %v11679_v10 = vadd.f32 %v11678_v63, %v11677_v29  ;;  %v11784_v28 = vpop.f32.mrb[197].mxu0  ;;  %v11680_v47 = vpop.f32.mrb[170].mxu1  ;;  %v8062_v63 = vld [vmem:[#allocation2 + $0x6a] sm:$0xff] }
 0x7db   :  { %v11785_v8 = vadd.f32 %v11784_v28, %v11783_v18  ;;  %v11786_v36 = vpop.f32.mrb[198].mxu0  ;;  %v11681_v9 = vpop.f32.mrb[171].mxu1  ;;  %v8061_v18 = vld [vmem:[#allocation2 + $0x62] sm:$0xff] }
 0x7dc   :  { %v11682_v19 = vadd.f32 %v11681_v9, %v11680_v47  ;;  %v11787_v55 = vpop.f32.mrb[199].mxu0 }
 0x7dd   :  { %v16917_v13 = vadd.f32 %v11785_v8, %v11673_v40  ;;  %v11788_v23 = vadd.f32 %v11787_v55, %v11786_v36  ;;  %9300 = vmatmul.mubr.bf16.gmra.mrb[20].mxu1 %v8037_v14  ;;  %v7976_v8 = vpack.c.bf16 %v12619_v48, %v12619_v48  ;;  %v8072_v48 = vld [vmem:[#allocation2 + $0xe2] sm:$0xff] }
 0x7de   :  { %9453 = vmatmul.mubr.bf16.gmra.mrb[48].mxu0 %v16834_v58  ;;  %9307 = vmatprep.mubr.bf16.mxu1 %v16861_v53 }
 0x7df   :  { %v16922_v60 = vadd.f32 %v11788_v23, %v11676_v41  ;;  %9460 = vmatprep.mubr.bf16.mxu0 %v8038_v33 }
 0x7e0   :  { %v11683_v49 = vpop.f32.mrb[172].mxu1 }
 0x7e1   :  { %v11789_v45 = vpop.f32.mrb[200].mxu0  ;;  %v11684_v31 = vpop.f32.mrb[173].mxu1 }
 0x7e2   :  { %v11685_v17 = vadd.f32 %v11684_v31, %v11683_v49  ;;  %v11790_v5 = vpop.f32.mrb[201].mxu0  ;;  %v11686_v54 = vpop.f32.mrb[174].mxu1 }
 0x7e3   :  { %v11791_v32 = vadd.f32 %v11790_v5, %v11789_v45  ;;  %v11792_v51 = vpop.f32.mrb[202].mxu0  ;;  %v11687_v25 = vpop.f32.mrb[175].mxu1 }
 0x7e4   :  { %v11688_v4 = vadd.f32 %v11687_v25, %v11686_v54  ;;  %v11793_v58 = vpop.f32.mrb[203].mxu0 }
 0x7e5   :  { %v16926_v53 = vadd.f32 %v11791_v32, %v11679_v10  ;;  %v11794_v27 = vadd.f32 %v11793_v58, %v11792_v51  ;;  %9308 = vmatmul.mubr.bf16.gmra.mrb[24].mxu1 %v8038_v33  ;;  %v8091_v33 = vpack.c.bf16 %v8062_v63, %v8061_v18 }
 0x7e6   :  { %9461 = vmatmul.mubr.bf16.gmra.mrb[52].mxu0 %v16849_v24  ;;  %9315 = vmatprep.mubr.bf16.mxu1 %v16924_v22 }
 0x7e7   :  { %v16930_v50 = vadd.f32 %v11794_v27, %v11682_v19  ;;  %9468 = vmatprep.mubr.bf16.mxu0 %v8039_v26 }
 0x7e8   :  { %v11689_v52 = vpop.f32.mrb[176].mxu1 }
 0x7e9   :  { %v11795_v56 = vpop.f32.mrb[204].mxu0  ;;  %v11690_v0 = vpop.f32.mrb[177].mxu1 }
 0x7ea   :  { %v11691_v16 = vadd.f32 %v11690_v0, %v11689_v52  ;;  %v11796_v43 = vpop.f32.mrb[205].mxu0  ;;  %v11692_v20 = vpop.f32.mrb[178].mxu1 }
 0x7eb   :  { %v11797_v12 = vadd.f32 %v11796_v43, %v11795_v56  ;;  %v11798_v40 = vpop.f32.mrb[206].mxu0  ;;  %v11693_v44 = vpop.f32.mrb[179].mxu1  ;;  %v8068_v43 = vld [vmem:[#allocation2 + $0xb2] sm:$0xff] }
 0x7ec   :  { %v11694_v24 = vadd.f32 %v11693_v44, %v11692_v20  ;;  %v11799_v59 = vpop.f32.mrb[207].mxu0  ;;  %v8070_v44 = vld [vmem:[#allocation2 + $0xca] sm:$0xff] }
 0x7ed   :  { %v16932_v38 = vadd.f32 %v11797_v12, %v11685_v17  ;;  %v11800_v6 = vadd.f32 %v11799_v59, %v11798_v40  ;;  %9316 = vmatmul.mubr.bf16.gmra.mrb[28].mxu1 %v8039_v26  ;;  %v8064_v17 = vld [vmem:[#allocation2 + $0x82] sm:$0xff] }
 0x7ee   :  { %9469 = vmatmul.mubr.bf16.gmra.mrb[56].mxu0 %v16856_v7  ;;  %12281 = vmatprep.mubr.bf16.mxu1 %v8089_v62  ;;  %v8090_v7 = vpack.c.bf16 %v8060_v1, %v8059_v61  ;;  %v8092_v26 = vpack.c.bf16 %v8064_v17, %v8063_v37  ;;  %v8069_v40 = vld [vmem:[#allocation2 + $0xc2] sm:$0xff] }
 0x7ef   :  { %v16935_v15 = vadd.f32 %v11800_v6, %v11688_v4  ;;  %9476 = vmatprep.mubr.bf16.mxu0 %v8040_v2 }
 0x7f0   :  { %v11695_v41 = vpop.f32.mrb[180].mxu1 }
 0x7f1   :  { %v11801_v14 = vpop.f32.mrb[208].mxu0  ;;  %v11696_v29 = vpop.f32.mrb[181].mxu1 }
 0x7f2   :  { %v11697_v10 = vadd.f32 %v11696_v29, %v11695_v41  ;;  %v11802_v28 = vpop.f32.mrb[209].mxu0  ;;  %v11698_v47 = vpop.f32.mrb[182].mxu1  ;;  %v8095_v29 = vpack.c.bf16 %v8070_v44, %v8069_v40 }
 0x7f3   :  { %v11803_v36 = vadd.f32 %v11802_v28, %v11801_v14  ;;  %v11804_v9 = vpop.f32.mrb[210].mxu0  ;;  %v11699_v19 = vpop.f32.mrb[183].mxu1 }
 0x7f4   :  { %v11700_v55 = vadd.f32 %v11699_v19, %v11698_v47  ;;  %v11805_v23 = vpop.f32.mrb[211].mxu0  ;;  %v8071_v47 = vld [vmem:[#allocation2 + $0xda] sm:$0xff] }
 0x7f5   :  { %v16937_v49 = vadd.f32 %v11803_v36, %v11691_v16  ;;  %v11806_v45 = vadd.f32 %v11805_v23, %v11804_v9  ;;  %12282 = vmatmul.mubr.bf16.vlgmr.msra.gmra.mrb[32].mxu1 %v8090_v7  ;;  %v8067_v16 = vld [vmem:[#allocation2 + $0xaa] sm:$0xff]  ;;  %v8073_v9 = vld [vmem:[#allocation2 + $0xf2] sm:$0xff]  ;;  %v8074_v19 = vld [vmem:[#allocation2 + $0xfa] sm:$0xff]  ;;  %v8096_v37 = vpack.c.bf16 %v8072_v48, %v8071_v47 }
 0x7f6   :  { %9477 = vmatmul.mubr.bf16.gmra.mrb[60].mxu0 %v7976_v8  ;;  %12285 = vmatprep.mubr.bf16.mxu1 %v8091_v33  ;;  %v8094_v61 = vpack.c.bf16 %v8068_v43, %v8067_v16 }
 0x7f7   :  { %v16939_v31 = vadd.f32 %v11806_v45, %v11694_v24 }
 0x7f8   :  { %v11701_v35 = vpop.f32.mrb[184].mxu1 }
 0x7f9   :  { %v11807_v5 = vpop.f32.mrb[212].mxu0  ;;  %v11702_v54 = vpop.f32.mrb[185].mxu1 }
 0x7fa   :  { %v11703_v32 = vadd.f32 %v11702_v54, %v11701_v35  ;;  %v11808_v51 = vpop.f32.mrb[213].mxu0  ;;  %v11704_v25 = vpop.f32.mrb[186].mxu1  ;;  %v8097_v54 = vpack.c.bf16 %v8074_v19, %v8073_v9 }
 0x7fb   :  { %v11809_v4 = vadd.f32 %v11808_v51, %v11807_v5  ;;  %v11810_v58 = vpop.f32.mrb[214].mxu0  ;;  %v11705_v27 = vpop.f32.mrb[187].mxu1 }
 0x7fc   :  { %v11706_v52 = vadd.f32 %v11705_v27, %v11704_v25  ;;  %v11811_v3 = vpop.f32.mrb[215].mxu0  ;;  %v8075_v25 = vld [vmem:[#allocation2 + $0x10a] sm:$0xff] }
 0x7fd   :  { %v16941_v56 = vadd.f32 %v11809_v4, %v11697_v10  ;;  %v11812_v0 = vadd.f32 %v11811_v3, %v11810_v58  ;;  %12286 = vmatmul.mubr.bf16.gmra.mrb[36].mxu1 %v8092_v26  ;;  %v8076_v4 = vld [vmem:[#allocation2 + $0x112] sm:$0xff]  ;;  %v8077_v26 = vld [vmem:[#allocation2 + $0x122] sm:$0xff] }
 0x7fe   :  { %12289 = vmatprep.mubr.bf16.mxu1 %v8093_v30 }
 0x7ff   :  { %v16943_v39 = vadd.f32 %v11812_v0, %v11700_v55 }
 0x800   :  { %v11707_v11 = vpop.f32.mrb[188].mxu1 }
 0x801   :  { %v11813_v20 = vpop.f32.mrb[216].mxu0  ;;  %v11708_v12 = vpop.f32.mrb[189].mxu1 }
 0x802   :  { %v11709_v2 = vadd.f32 %v11708_v12, %v11707_v11  ;;  %v11814_v24 = vpop.f32.mrb[217].mxu0  ;;  %v11710_v59 = vpop.f32.mrb[190].mxu1 }
 0x803   :  { %v11815_v62 = vadd.f32 %v11814_v24, %v11813_v20  ;;  %v11816_v6 = vpop.f32.mrb[218].mxu0  ;;  %v11711_v41 = vpop.f32.mrb[191].mxu1  ;;  %v8098_v20 = vpack.c.bf16 %v8076_v4, %v8075_v25 }
 0x804   :  { %v11712_v1 = vadd.f32 %v11711_v41, %v11710_v59  ;;  %v11817_v14 = vpop.f32.mrb[219].mxu0  ;;  %v8080_v41 = vld [vmem:[#allocation2 + $0x142] sm:$0xff] }
 0x805   :  { %v16945_v18 = vadd.f32 %v11815_v62, %v11703_v32  ;;  %v11818_v63 = vadd.f32 %v11817_v14, %v11816_v6  ;;  %12290 = vmatmul.mubr.bf16.gmra.mrb[40].mxu1 %v8094_v61  ;;  %v8079_v6 = vld [vmem:[#allocation2 + $0x13a] sm:$0xff]  ;;  %v8081_v14 = vld [vmem:[#allocation2 + $0x152] sm:$0xff] }
 0x806   :  { %12293 = vmatprep.mubr.bf16.mxu1 %v8095_v29  ;;  %v8082_v29 = vld [vmem:[#allocation2 + $0x15a] sm:$0xff]  ;;  %v8100_v9 = vpack.c.bf16 %v8080_v41, %v8079_v6 }
 0x807   :  { %v16947_v10 = vadd.f32 %v11818_v63, %v11706_v52  ;;  %v8078_v52 = vld [vmem:[#allocation2 + $0x12a] sm:$0xff] }
 0x808   :  { %v11713_v28 = vpop.f32.mrb[192].mxu1  ;;  %v8099_v44 = vpack.c.bf16 %v8078_v52, %v8077_v26 }
 0x809   :  { %v11819_v8 = vpop.f32.mrb[220].mxu0  ;;  %v11714_v36 = vpop.f32.mrb[193].mxu1 }
 0x80a   :  { %v11715_v7 = vadd.f32 %v11714_v36, %v11713_v28  ;;  %v11820_v55 = vpop.f32.mrb[221].mxu0  ;;  %v11716_v23 = vpop.f32.mrb[194].mxu1 }
 0x80b   :  { %v11821_v33 = vadd.f32 %v11820_v55, %v11819_v8  ;;  %v11822_v45 = vpop.f32.mrb[222].mxu0  ;;  %v11717_v35 = vpop.f32.mrb[195].mxu1  ;;  %v8101_v55 = vpack.c.bf16 %v8082_v29, %v8081_v14 }
 0x80c   :  { %v11718_v17 = vadd.f32 %v11717_v35, %v11716_v23  ;;  %v11823_v5 = vpop.f32.mrb[223].mxu0 }
 0x80d   :  { %v16949_v57 = vadd.f32 %v11821_v33, %v11709_v2  ;;  %v11824_v42 = vadd.f32 %v11823_v5, %v11822_v45  ;;  %12294 = vmatmul.mubr.bf16.gmra.mrb[44].mxu1 %v8096_v37  ;;  %v8083_v37 = vld [vmem:[#allocation2 + $0x16a] sm:$0xff] }
 0x80e   :  { %12297 = vmatprep.mubr.bf16.mxu1 %v8097_v54 }
 0x80f   :  { %v16951_v32 = vadd.f32 %v11824_v42, %v11712_v1 }
 0x810   :  { %v11719_v51 = vpop.f32.mrb[196].mxu1 }
 0x811   :  { %v11825_v58 = vpop.f32.mrb[224].mxu0  ;;  %v11720_v27 = vpop.f32.mrb[197].mxu1 }
 0x812   :  { %v11721_v3 = vadd.f32 %v11720_v27, %v11719_v51  ;;  %v11826_v30 = vpop.f32.mrb[225].mxu0  ;;  %v11722_v0 = vpop.f32.mrb[198].mxu1 }
 0x813   :  { %v11827_v11 = vadd.f32 %v11826_v30, %v11825_v58  ;;  %v11828_v16 = vpop.f32.mrb[226].mxu0  ;;  %v11723_v43 = vpop.f32.mrb[199].mxu1 }
 0x814   :  { %v11724_v12 = vadd.f32 %v11723_v43, %v11722_v0  ;;  %v11829_v40 = vpop.f32.mrb[227].mxu0 }
 0x815   :  { %v16953_v2 = vadd.f32 %v11827_v11, %v11715_v7  ;;  %v11830_v24 = vadd.f32 %v11829_v40, %v11828_v16  ;;  %12298 = vmatmul.mubr.bf16.gmra.mrb[48].mxu1 %v8098_v20  ;;  %v8087_v11 = vld [vmem:[#allocation2 + $0x19a] sm:$0xff]  ;;  %v8088_v16 = vld [vmem:[#allocation2 + $0x1a2] sm:$0xff] }
 0x816   :  { %12301 = vmatprep.mubr.bf16.mxu1 %v8099_v44  ;;  %v8104_v44 = vpack.c.bf16 %v8088_v16, %v8087_v11 }
 0x817   :  { %v16955_v59 = vadd.f32 %v11830_v24, %v11718_v17  ;;  %v8084_v17 = vld [vmem:[#allocation2 + $0x172] sm:$0xff] }
 0x818   :  { %v11725_v62 = vpop.f32.mrb[200].mxu1  ;;  %v8102_v26 = vpack.c.bf16 %v8084_v17, %v8083_v37 }
 0x819   :  { %v11831_v61 = vpop.f32.mrb[228].mxu0  ;;  %v11726_v1 = vpop.f32.mrb[201].mxu1 }
 0x81a   :  { %v11727_v63 = vadd.f32 %v11726_v1, %v11725_v62  ;;  %v11832_v28 = vpop.f32.mrb[229].mxu0  ;;  %v11728_v47 = vpop.f32.mrb[202].mxu1 }
 0x81b   :  { %v11833_v48 = vadd.f32 %v11832_v28, %v11831_v61  ;;  %v11834_v8 = vpop.f32.mrb[230].mxu0  ;;  %v11729_v36 = vpop.f32.mrb[203].mxu1 }
 0x81c   :  { %v11730_v19 = vadd.f32 %v11729_v36, %v11728_v47  ;;  %v11835_v7 = vpop.f32.mrb[231].mxu0 }
 0x81d   :  { %v16957_v23 = vadd.f32 %v11833_v48, %v11721_v3  ;;  %v11836_v33 = vadd.f32 %v11835_v7, %v11834_v8  ;;  %12302 = vmatmul.mubr.bf16.gmra.mrb[52].mxu1 %v8100_v9 }
 0x81e   :  { %12305 = vmatprep.mubr.bf16.mxu1 %v8101_v55 }
 0x81f   :  { %v16959_v45 = vadd.f32 %v11836_v33, %v11724_v12 }
 0x820   :  { %v11731_v35 = vpop.f32.mrb[204].mxu1 }
 0x821   :  { %v11837_v5 = vpop.f32.mrb[232].mxu0  ;;  %v11732_v54 = vpop.f32.mrb[205].mxu1 }
 0x822   :  { %v11733_v42 = vadd.f32 %v11732_v54, %v11731_v35  ;;  %v11838_v51 = vpop.f32.mrb[233].mxu0  ;;  %v11734_v25 = vpop.f32.mrb[206].mxu1 }
 0x823   :  { %v11839_v4 = vadd.f32 %v11838_v51, %v11837_v5  ;;  %v11840_v58 = vpop.f32.mrb[234].mxu0  ;;  %v11735_v27 = vpop.f32.mrb[207].mxu1 }
 0x824   :  { %v11736_v52 = vadd.f32 %v11735_v27, %v11734_v25  ;;  %v11841_v3 = vpop.f32.mrb[235].mxu0 }
 0x825   :  { %v16961_v30 = vadd.f32 %v11839_v4, %v11727_v63  ;;  %v11842_v0 = vadd.f32 %v11841_v3, %v11840_v58  ;;  %12306 = vmatmul.mubr.bf16.gmra.mrb[56].mxu1 %v8102_v26 }
 0x826   :  { %12309 = vmatprep.mubr.bf16.mxu1 %v16924_v22 }
 0x827   :  { %v16964_v43 = vadd.f32 %v11842_v0, %v11730_v19 }
 0x828   :  { %v11737_v20 = vpop.f32.mrb[208].mxu1 }
 0x829   :  { %v11843_v12 = vpop.f32.mrb[236].mxu0  ;;  %v11738_v40 = vpop.f32.mrb[209].mxu1 }
 0x82a   :  { %v11739_v24 = vadd.f32 %v11738_v40, %v11737_v20  ;;  %v11844_v62 = vpop.f32.mrb[237].mxu0  ;;  %v11740_v6 = vpop.f32.mrb[210].mxu1 }
 0x82b   :  { %v11845_v41 = vadd.f32 %v11844_v62, %v11843_v12  ;;  %v11846_v61 = vpop.f32.mrb[238].mxu0  ;;  %v11741_v1 = vpop.f32.mrb[211].mxu1 }
 0x82c   :  { %v11742_v14 = vadd.f32 %v11741_v1, %v11740_v6  ;;  %v11847_v29 = vpop.f32.mrb[239].mxu0 }
 0x82d   :  { %v16966_v63 = vadd.f32 %v11845_v41, %v11733_v42  ;;  %v11848_v28 = vadd.f32 %v11847_v29, %v11846_v61  ;;  %12310 = vmatmul.mubr.bf16.gmra.mrb[60].mxu1 %v8104_v44 }
 0x82f   :  { %v16968_v22 = vadd.f32 %v11848_v28, %v11736_v52 }
 0x830   :  { %v11743_v47 = vpop.f32.mrb[212].mxu1 }
 0x831   :  { %v11849_v48 = vpop.f32.mrb[240].mxu0  ;;  %v11744_v8 = vpop.f32.mrb[213].mxu1 }
 0x832   :  { %v11745_v36 = vadd.f32 %v11744_v8, %v11743_v47  ;;  %v11850_v9 = vpop.f32.mrb[241].mxu0  ;;  %v11746_v19 = vpop.f32.mrb[214].mxu1 }
 0x833   :  { %v11851_v7 = vadd.f32 %v11850_v9, %v11849_v48  ;;  %v11852_v55 = vpop.f32.mrb[242].mxu0  ;;  %v11747_v33 = vpop.f32.mrb[215].mxu1 }
 0x834   :  { %v11748_v35 = vadd.f32 %v11747_v33, %v11746_v19  ;;  %v11853_v37 = vpop.f32.mrb[243].mxu0 }
 0x835   :  { %v16970_v17 = vadd.f32 %v11851_v7, %v11739_v24  ;;  %v11854_v5 = vadd.f32 %v11853_v37, %v11852_v55 }
 0x837   :  { %v16972_v54 = vadd.f32 %v11854_v5, %v11742_v14 }
 0x838   :  { %v11749_v42 = vpop.f32.mrb[216].mxu1 }
 0x839   :  { %v11855_v51 = vpop.f32.mrb[244].mxu0  ;;  %v11750_v25 = vpop.f32.mrb[217].mxu1 }
 0x83a   :  { %v11751_v4 = vadd.f32 %v11750_v25, %v11749_v42  ;;  %v11856_v58 = vpop.f32.mrb[245].mxu0  ;;  %v11752_v27 = vpop.f32.mrb[218].mxu1 }
 0x83b   :  { %v11857_v26 = vadd.f32 %v11856_v58, %v11855_v51  ;;  %v11858_v52 = vpop.f32.mrb[246].mxu0  ;;  %v11753_v3 = vpop.f32.mrb[219].mxu1 }
 0x83c   :  { %v11754_v0 = vadd.f32 %v11753_v3, %v11752_v27  ;;  %v11859_v11 = vpop.f32.mrb[247].mxu0 }
 0x83d   :  { %v16974_v16 = vadd.f32 %v11857_v26, %v11745_v36  ;;  %v11860_v20 = vadd.f32 %v11859_v11, %v11858_v52 }
 0x83f   :  { %v16976_v12 = vadd.f32 %v11860_v20, %v11748_v35 }
 0x840   :  { %v11755_v40 = vpop.f32.mrb[220].mxu1 }
 0x841   :  { %v11861_v44 = vpop.f32.mrb[248].mxu0  ;;  %v11756_v24 = vpop.f32.mrb[221].mxu1 }
 0x842   :  { %v11757_v62 = vadd.f32 %v11756_v24, %v11755_v40  ;;  %v11862_v6 = vpop.f32.mrb[249].mxu0  ;;  %v11758_v41 = vpop.f32.mrb[222].mxu1 }
 0x843   :  { %v11863_v61 = vadd.f32 %v11862_v6, %v11861_v44  ;;  %v11864_v1 = vpop.f32.mrb[250].mxu0  ;;  %v11759_v14 = vpop.f32.mrb[223].mxu1 }
 0x844   :  { %v11760_v29 = vadd.f32 %v11759_v14, %v11758_v41  ;;  %v11865_v28 = vpop.f32.mrb[251].mxu0 }
 0x845   :  { %v16978_v47 = vadd.f32 %v11863_v61, %v11751_v4  ;;  %v11866_v48 = vadd.f32 %v11865_v28, %v11864_v1 }
 0x847   :  { %v16980_v8 = vadd.f32 %v11866_v48, %v11754_v0 }
 0x848   :  { %v11889_v36 = vpop.f32.mrb[224].mxu1 }
 0x849   :  { %v11867_v9 = vpop.f32.mrb[252].mxu0  ;;  %v11890_v19 = vpop.f32.mrb[225].mxu1 }
 0x84a   :  { %v11868_v7 = vpop.f32.mrb[253].mxu0  ;;  %v11891_v55 = vadd.f32 %v11890_v19, %v11889_v36  ;;  %v11892_v33 = vpop.f32.mrb[226].mxu1 }
 0x84b   :  { %v11869_v35 = vadd.f32 %v11868_v7, %v11867_v9  ;;  %v11870_v37 = vpop.f32.mrb[254].mxu0  ;;  %v11893_v5 = vpop.f32.mrb[227].mxu1 }
 0x84c   :  { %v9198_v42 = vadd.f32 %v11891_v55, %v16910_v46  ;;  %v11871_v51 = vpop.f32.mrb[255].mxu0  ;;  %v11894_v25 = vadd.f32 %v11893_v5, %v11892_v33 }
 0x84d   :  { %v16983_v58 = vadd.f32 %v11869_v35, %v11757_v62  ;;  %v11872_v4 = vadd.f32 %v11871_v51, %v11870_v37 }
 0x84e   :  { %v9201_v27 = vadd.f32 %v11894_v25, %v16915_v21 }
 0x84f   :  { %v16986_v26 = vadd.f32 %v11872_v4, %v11760_v29 }
 0x850   :  { %v11895_v52 = vpop.f32.mrb[228].mxu1 }
 0x851   :  { %v12001_v3 = vpop.f32.mrb[0].mxu0  ;;  %v11896_v0 = vpop.f32.mrb[229].mxu1 }
 0x852   :  { %v11897_v11 = vadd.f32 %v11896_v0, %v11895_v52  ;;  %v12002_v20 = vpop.f32.mrb[1].mxu0  ;;  %v11898_v40 = vpop.f32.mrb[230].mxu1 }
 0x853   :  { %v12003_v44 = vadd.f32 %v12002_v20, %v12001_v3  ;;  %v12004_v24 = vpop.f32.mrb[2].mxu0  ;;  %v11899_v6 = vpop.f32.mrb[231].mxu1 }
 0x854   :  { %v9206_v46 = vadd.f32 %v11897_v11, %v16917_v13  ;;  %v11900_v41 = vadd.f32 %v11899_v6, %v11898_v40  ;;  %v12005_v61 = vpop.f32.mrb[3].mxu0 }
 0x855   :  { %v12006_v62 = vadd.f32 %v12005_v61, %v12004_v24  ;;  %v16989_v1 = vadd.f32 %v12003_v44, %v9198_v42 }
 0x856   :  { %v9209_v21 = vadd.f32 %v11900_v41, %v16922_v60 }
 0x857   :  { %v16992_v14 = vadd.f32 %v12006_v62, %v9201_v27 }
 0x858   :  { %v11901_v29 = vpop.f32.mrb[232].mxu1 }
 0x859   :  { %v12007_v28 = vpop.f32.mrb[4].mxu0  ;;  %v11902_v48 = vpop.f32.mrb[233].mxu1 }
 0x85a   :  { %v11903_v36 = vadd.f32 %v11902_v48, %v11901_v29  ;;  %v12008_v9 = vpop.f32.mrb[5].mxu0  ;;  %v11904_v19 = vpop.f32.mrb[234].mxu1 }
 0x85b   :  { %v12009_v7 = vadd.f32 %v12008_v9, %v12007_v28  ;;  %v12010_v55 = vpop.f32.mrb[6].mxu0  ;;  %v11905_v33 = vpop.f32.mrb[235].mxu1 }
 0x85c   :  { %v9214_v13 = vadd.f32 %v11903_v36, %v16926_v53  ;;  %v11906_v35 = vadd.f32 %v11905_v33, %v11904_v19  ;;  %v12011_v37 = vpop.f32.mrb[7].mxu0 }
 0x85d   :  { %v12012_v5 = vadd.f32 %v12011_v37, %v12010_v55  ;;  %v16995_v42 = vadd.f32 %v12009_v7, %v9206_v46 }
 0x85e   :  { %v9217_v60 = vadd.f32 %v11906_v35, %v16930_v50 }
 0x85f   :  { %v16998_v51 = vadd.f32 %v12012_v5, %v9209_v21 }
 0x860   :  { %v11907_v25 = vpop.f32.mrb[236].mxu1 }
 0x861   :  { %v12013_v4 = vpop.f32.mrb[8].mxu0  ;;  %v11908_v27 = vpop.f32.mrb[237].mxu1 }
 0x862   :  { %v11909_v52 = vadd.f32 %v11908_v27, %v11907_v25  ;;  %v12014_v3 = vpop.f32.mrb[9].mxu0  ;;  %v11910_v0 = vpop.f32.mrb[238].mxu1 }
 0x863   :  { %v12015_v11 = vadd.f32 %v12014_v3, %v12013_v4  ;;  %v12016_v20 = vpop.f32.mrb[10].mxu0  ;;  %v11911_v40 = vpop.f32.mrb[239].mxu1 }
 0x864   :  { %v9222_v53 = vadd.f32 %v11909_v52, %v16932_v38  ;;  %v11912_v44 = vadd.f32 %v11911_v40, %v11910_v0  ;;  %v12017_v24 = vpop.f32.mrb[11].mxu0 }
 0x865   :  { %v12018_v6 = vadd.f32 %v12017_v24, %v12016_v20  ;;  %v17001_v46 = vadd.f32 %v12015_v11, %v9214_v13 }
 0x866   :  { %v9225_v50 = vadd.f32 %v11912_v44, %v16935_v15 }
 0x867   :  { %v17004_v41 = vadd.f32 %v12018_v6, %v9217_v60 }
 0x868   :  { %v11913_v61 = vpop.f32.mrb[240].mxu1 }
 0x869   :  { %v12019_v62 = vpop.f32.mrb[12].mxu0  ;;  %v11914_v21 = vpop.f32.mrb[241].mxu1 }
 0x86a   :  { %v11915_v29 = vadd.f32 %v11914_v21, %v11913_v61  ;;  %v12020_v28 = vpop.f32.mrb[13].mxu0  ;;  %v11916_v48 = vpop.f32.mrb[242].mxu1 }
 0x86b   :  { %v12021_v36 = vadd.f32 %v12020_v28, %v12019_v62  ;;  %v12022_v9 = vpop.f32.mrb[14].mxu0  ;;  %v11917_v19 = vpop.f32.mrb[243].mxu1 }
 0x86c   :  { %v9230_v38 = vadd.f32 %v11915_v29, %v16937_v49  ;;  %v11918_v7 = vadd.f32 %v11917_v19, %v11916_v48  ;;  %v12023_v55 = vpop.f32.mrb[15].mxu0 }
 0x86d   :  { %v12024_v33 = vadd.f32 %v12023_v55, %v12022_v9  ;;  %v17007_v13 = vadd.f32 %v12021_v36, %v9222_v53 }
 0x86e   :  { %v9233_v15 = vadd.f32 %v11918_v7, %v16939_v31 }
 0x86f   :  { %v17010_v35 = vadd.f32 %v12024_v33, %v9225_v50 }
 0x870   :  { %v11919_v37 = vpop.f32.mrb[244].mxu1 }
 0x871   :  { %v12025_v5 = vpop.f32.mrb[16].mxu0  ;;  %v11920_v60 = vpop.f32.mrb[245].mxu1 }
 0x872   :  { %v11921_v25 = vadd.f32 %v11920_v60, %v11919_v37  ;;  %v12026_v4 = vpop.f32.mrb[17].mxu0  ;;  %v11922_v27 = vpop.f32.mrb[246].mxu1 }
 0x873   :  { %v12027_v52 = vadd.f32 %v12026_v4, %v12025_v5  ;;  %v12028_v3 = vpop.f32.mrb[18].mxu0  ;;  %v11923_v0 = vpop.f32.mrb[247].mxu1 }
 0x874   :  { %v9238_v49 = vadd.f32 %v11921_v25, %v16941_v56  ;;  %v11924_v11 = vadd.f32 %v11923_v0, %v11922_v27  ;;  %v12029_v20 = vpop.f32.mrb[19].mxu0 }
 0x875   :  { %v12030_v40 = vadd.f32 %v12029_v20, %v12028_v3  ;;  %v17013_v53 = vadd.f32 %v12027_v52, %v9230_v38 }
 0x876   :  { %v9241_v31 = vadd.f32 %v11924_v11, %v16943_v39 }
 0x877   :  { %v17016_v44 = vadd.f32 %v12030_v40, %v9233_v15 }
 0x878   :  { %v11925_v24 = vpop.f32.mrb[248].mxu1 }
 0x879   :  { %v12031_v6 = vpop.f32.mrb[20].mxu0  ;;  %v11926_v50 = vpop.f32.mrb[249].mxu1 }
 0x87a   :  { %v11927_v61 = vadd.f32 %v11926_v50, %v11925_v24  ;;  %v12032_v62 = vpop.f32.mrb[21].mxu0  ;;  %v11928_v21 = vpop.f32.mrb[250].mxu1 }
 0x87b   :  { %v12033_v29 = vadd.f32 %v12032_v62, %v12031_v6  ;;  %v12034_v28 = vpop.f32.mrb[22].mxu0  ;;  %v11929_v48 = vpop.f32.mrb[251].mxu1 }
 0x87c   :  { %v9246_v56 = vadd.f32 %v11927_v61, %v16945_v18  ;;  %v11930_v36 = vadd.f32 %v11929_v48, %v11928_v21  ;;  %v12035_v9 = vpop.f32.mrb[23].mxu0 }
 0x87d   :  { %v12036_v19 = vadd.f32 %v12035_v9, %v12034_v28  ;;  %v17019_v38 = vadd.f32 %v12033_v29, %v9238_v49 }
 0x87e   :  { %v9249_v39 = vadd.f32 %v11930_v36, %v16947_v10 }
 0x87f   :  { %v17022_v7 = vadd.f32 %v12036_v19, %v9241_v31 }
 0x880   :  { %v11931_v55 = vpop.f32.mrb[252].mxu1 }
 0x881   :  { %v12037_v33 = vpop.f32.mrb[24].mxu0  ;;  %v11932_v15 = vpop.f32.mrb[253].mxu1 }
 0x882   :  { %v11933_v37 = vadd.f32 %v11932_v15, %v11931_v55  ;;  %v12038_v5 = vpop.f32.mrb[25].mxu0  ;;  %v11934_v60 = vpop.f32.mrb[254].mxu1 }
 0x883   :  { %v12039_v25 = vadd.f32 %v12038_v5, %v12037_v33  ;;  %v12040_v4 = vpop.f32.mrb[26].mxu0  ;;  %v11935_v27 = vpop.f32.mrb[255].mxu1 }
 0x884   :  { %v9254_v18 = vadd.f32 %v11933_v37, %v16949_v57  ;;  %v11936_v52 = vadd.f32 %v11935_v27, %v11934_v60  ;;  %v12041_v3 = vpop.f32.mrb[27].mxu0 }
 0x885   :  { %v12042_v0 = vadd.f32 %v12041_v3, %v12040_v4  ;;  %v17025_v49 = vadd.f32 %v12039_v25, %v9246_v56 }
 0x886   :  { %v9257_v10 = vadd.f32 %v11936_v52, %v16951_v32 }
 0x887   :  { %v17028_v11 = vadd.f32 %v12042_v0, %v9249_v39 }
 0x888   :  { %v11937_v20 = vpop.f32.mrb[0].mxu1 }
 0x889   :  { %v12043_v40 = vpop.f32.mrb[28].mxu0  ;;  %v11938_v31 = vpop.f32.mrb[1].mxu1 }
 0x88a   :  { %v11939_v24 = vadd.f32 %v11938_v31, %v11937_v20  ;;  %v12044_v6 = vpop.f32.mrb[29].mxu0  ;;  %v11940_v50 = vpop.f32.mrb[2].mxu1 }
 0x88b   :  { %v12045_v61 = vadd.f32 %v12044_v6, %v12043_v40  ;;  %v12046_v62 = vpop.f32.mrb[30].mxu0  ;;  %v11941_v21 = vpop.f32.mrb[3].mxu1 }
 0x88c   :  { %v9262_v57 = vadd.f32 %v11939_v24, %v16953_v2  ;;  %v11942_v29 = vadd.f32 %v11941_v21, %v11940_v50  ;;  %v12047_v28 = vpop.f32.mrb[31].mxu0 }
 0x88d   :  { %v12048_v48 = vadd.f32 %v12047_v28, %v12046_v62  ;;  %v17031_v56 = vadd.f32 %v12045_v61, %v9254_v18 }
 0x88e   :  { %v9265_v32 = vadd.f32 %v11942_v29, %v16955_v59 }
 0x88f   :  { %v17034_v36 = vadd.f32 %v12048_v48, %v9257_v10 }
 0x890   :  { %v11943_v9 = vpop.f32.mrb[4].mxu1 }
 0x891   :  { %v12049_v19 = vpop.f32.mrb[32].mxu0  ;;  %v11944_v39 = vpop.f32.mrb[5].mxu1 }
 0x892   :  { %v11945_v55 = vadd.f32 %v11944_v39, %v11943_v9  ;;  %v12050_v33 = vpop.f32.mrb[33].mxu0  ;;  %v11946_v15 = vpop.f32.mrb[6].mxu1 }
 0x893   :  { %v12051_v37 = vadd.f32 %v12050_v33, %v12049_v19  ;;  %v12052_v5 = vpop.f32.mrb[34].mxu0  ;;  %v11947_v60 = vpop.f32.mrb[7].mxu1 }
 0x894   :  { %v9270_v2 = vadd.f32 %v11945_v55, %v16957_v23  ;;  %v11948_v25 = vadd.f32 %v11947_v60, %v11946_v15  ;;  %v12053_v4 = vpop.f32.mrb[35].mxu0 }
 0x895   :  { %v12054_v27 = vadd.f32 %v12053_v4, %v12052_v5  ;;  %v17037_v18 = vadd.f32 %v12051_v37, %v9262_v57 }
 0x896   :  { %v9273_v59 = vadd.f32 %v11948_v25, %v16959_v45 }
 0x897   :  { %v17040_v52 = vadd.f32 %v12054_v27, %v9265_v32 }
 0x898   :  { %v11949_v3 = vpop.f32.mrb[8].mxu1 }
 0x899   :  { %v12055_v0 = vpop.f32.mrb[36].mxu0  ;;  %v11950_v10 = vpop.f32.mrb[9].mxu1 }
 0x89a   :  { %v11951_v20 = vadd.f32 %v11950_v10, %v11949_v3  ;;  %v12056_v40 = vpop.f32.mrb[37].mxu0  ;;  %v11952_v31 = vpop.f32.mrb[10].mxu1 }
 0x89b   :  { %v12057_v24 = vadd.f32 %v12056_v40, %v12055_v0  ;;  %v12058_v6 = vpop.f32.mrb[38].mxu0  ;;  %v11953_v50 = vpop.f32.mrb[11].mxu1 }
 0x89c   :  { %v9278_v23 = vadd.f32 %v11951_v20, %v16961_v30  ;;  %v11954_v61 = vadd.f32 %v11953_v50, %v11952_v31  ;;  %v12059_v62 = vpop.f32.mrb[39].mxu0 }
 0x89d   :  { %v12060_v21 = vadd.f32 %v12059_v62, %v12058_v6  ;;  %v17043_v57 = vadd.f32 %v12057_v24, %v9270_v2 }
 0x89e   :  { %v9281_v45 = vadd.f32 %v11954_v61, %v16964_v43 }
 0x89f   :  { %v17046_v29 = vadd.f32 %v12060_v21, %v9273_v59 }
 0x8a0   :  { %v11955_v28 = vpop.f32.mrb[12].mxu1 }
 0x8a1   :  { %v12061_v48 = vpop.f32.mrb[40].mxu0  ;;  %v11956_v32 = vpop.f32.mrb[13].mxu1 }
 0x8a2   :  { %v11957_v9 = vadd.f32 %v11956_v32, %v11955_v28  ;;  %v12062_v19 = vpop.f32.mrb[41].mxu0  ;;  %v11958_v39 = vpop.f32.mrb[14].mxu1 }
 0x8a3   :  { %v12063_v55 = vadd.f32 %v12062_v19, %v12061_v48  ;;  %v12064_v33 = vpop.f32.mrb[42].mxu0  ;;  %v11959_v15 = vpop.f32.mrb[15].mxu1 }
 0x8a4   :  { %v9286_v30 = vadd.f32 %v11957_v9, %v16966_v63  ;;  %v11960_v37 = vadd.f32 %v11959_v15, %v11958_v39  ;;  %v12065_v5 = vpop.f32.mrb[43].mxu0 }
 0x8a5   :  { %v12066_v60 = vadd.f32 %v12065_v5, %v12064_v33  ;;  %v17049_v2 = vadd.f32 %v12063_v55, %v9278_v23 }
 0x8a6   :  { %v9289_v43 = vadd.f32 %v11960_v37, %v16968_v22 }
 0x8a7   :  { %v17052_v25 = vadd.f32 %v12066_v60, %v9281_v45 }
 0x8a8   :  { %v11961_v4 = vpop.f32.mrb[16].mxu1 }
 0x8a9   :  { %v12067_v27 = vpop.f32.mrb[44].mxu0  ;;  %v11962_v59 = vpop.f32.mrb[17].mxu1 }
 0x8aa   :  { %v11963_v3 = vadd.f32 %v11962_v59, %v11961_v4  ;;  %v12068_v0 = vpop.f32.mrb[45].mxu0  ;;  %v11964_v10 = vpop.f32.mrb[18].mxu1 }
 0x8ab   :  { %v12069_v20 = vadd.f32 %v12068_v0, %v12067_v27  ;;  %v12070_v40 = vpop.f32.mrb[46].mxu0  ;;  %v11965_v31 = vpop.f32.mrb[19].mxu1 }
 0x8ac   :  { %v9294_v63 = vadd.f32 %v11963_v3, %v16970_v17  ;;  %v11966_v24 = vadd.f32 %v11965_v31, %v11964_v10  ;;  %v12071_v6 = vpop.f32.mrb[47].mxu0 }
 0x8ad   :  { %v12072_v50 = vadd.f32 %v12071_v6, %v12070_v40  ;;  %v17055_v23 = vadd.f32 %v12069_v20, %v9286_v30 }
 0x8ae   :  { %v9297_v22 = vadd.f32 %v11966_v24, %v16972_v54 }
 0x8af   :  { %v17058_v61 = vadd.f32 %v12072_v50, %v9289_v43 }
 0x8b0   :  { %v11967_v62 = vpop.f32.mrb[20].mxu1 }
 0x8b1   :  { %v12073_v21 = vpop.f32.mrb[48].mxu0  ;;  %v11968_v45 = vpop.f32.mrb[21].mxu1 }
 0x8b2   :  { %v11969_v28 = vadd.f32 %v11968_v45, %v11967_v62  ;;  %v12074_v48 = vpop.f32.mrb[49].mxu0  ;;  %v11970_v32 = vpop.f32.mrb[22].mxu1 }
 0x8b3   :  { %v12075_v9 = vadd.f32 %v12074_v48, %v12073_v21  ;;  %v12076_v19 = vpop.f32.mrb[50].mxu0  ;;  %v11971_v39 = vpop.f32.mrb[23].mxu1 }
 0x8b4   :  { %v9302_v17 = vadd.f32 %v11969_v28, %v16974_v16  ;;  %v11972_v55 = vadd.f32 %v11971_v39, %v11970_v32  ;;  %v12077_v33 = vpop.f32.mrb[51].mxu0 }
 0x8b5   :  { %v12078_v15 = vadd.f32 %v12077_v33, %v12076_v19  ;;  %v17061_v30 = vadd.f32 %v12075_v9, %v9294_v63 }
 0x8b6   :  { %v9305_v54 = vadd.f32 %v11972_v55, %v16976_v12 }
 0x8b7   :  { %v17064_v37 = vadd.f32 %v12078_v15, %v9297_v22 }
 0x8b8   :  { %v11973_v5 = vpop.f32.mrb[24].mxu1 }
 0x8b9   :  { %v12079_v60 = vpop.f32.mrb[52].mxu0  ;;  %v11974_v43 = vpop.f32.mrb[25].mxu1 }
 0x8ba   :  { %v11975_v4 = vadd.f32 %v11974_v43, %v11973_v5  ;;  %v12080_v27 = vpop.f32.mrb[53].mxu0  ;;  %v11976_v59 = vpop.f32.mrb[26].mxu1 }
 0x8bb   :  { %v12081_v3 = vadd.f32 %v12080_v27, %v12079_v60  ;;  %v12082_v0 = vpop.f32.mrb[54].mxu0  ;;  %v11977_v10 = vpop.f32.mrb[27].mxu1 }
 0x8bc   :  { %v9310_v16 = vadd.f32 %v11975_v4, %v16978_v47  ;;  %v11978_v20 = vadd.f32 %v11977_v10, %v11976_v59  ;;  %v12083_v40 = vpop.f32.mrb[55].mxu0 }
 0x8bd   :  { %v12084_v31 = vadd.f32 %v12083_v40, %v12082_v0  ;;  %v17067_v63 = vadd.f32 %v12081_v3, %v9302_v17 }
 0x8be   :  { %v9313_v12 = vadd.f32 %v11978_v20, %v16980_v8 }
 0x8bf   :  { %v17070_v24 = vadd.f32 %v12084_v31, %v9305_v54 }
 0x8c0   :  { %v11979_v6 = vpop.f32.mrb[28].mxu1 }
 0x8c1   :  { %v12085_v50 = vpop.f32.mrb[56].mxu0  ;;  %v11980_v22 = vpop.f32.mrb[29].mxu1 }
 0x8c2   :  { %v11981_v62 = vadd.f32 %v11980_v22, %v11979_v6  ;;  %v12086_v21 = vpop.f32.mrb[57].mxu0  ;;  %v11982_v45 = vpop.f32.mrb[30].mxu1 }
 0x8c3   :  { %v12087_v28 = vadd.f32 %v12086_v21, %v12085_v50  ;;  %v12088_v48 = vpop.f32.mrb[58].mxu0  ;;  %v11983_v32 = vpop.f32.mrb[31].mxu1 }
 0x8c4   :  { %v9318_v47 = vadd.f32 %v11981_v62, %v16983_v58  ;;  %v11984_v9 = vadd.f32 %v11983_v32, %v11982_v45  ;;  %v12089_v19 = vpop.f32.mrb[59].mxu0 }
 0x8c5   :  { %v12090_v39 = vadd.f32 %v12089_v19, %v12088_v48  ;;  %v17073_v17 = vadd.f32 %v12087_v28, %v9310_v16 }
 0x8c6   :  { %v9321_v8 = vadd.f32 %v11984_v9, %v16986_v26 }
 0x8c7   :  { %v17076_v55 = vadd.f32 %v12090_v39, %v9313_v12 }
 0x8c8   :  { %v12283_v33 = vpop.f32.mrb[32].mxu1 }
 0x8c9   :  { %v12091_v15 = vpop.f32.mrb[60].mxu0  ;;  %v17079_v54 = vadd.f32 %v12283_v33, %v16995_v42  ;;  %v9519_v5 = vpop.f32.mrb[33].mxu1 }
 0x8ca   :  { %v12092_v60 = vpop.f32.mrb[61].mxu0  ;;  %v17082_v43 = vadd.f32 %v9519_v5, %v16989_v1  ;;  %v12284_v58 = vpop.f32.mrb[34].mxu1 }
 0x8cb   :  { %v12093_v4 = vadd.f32 %v12092_v60, %v12091_v15  ;;  %v12094_v27 = vpop.f32.mrb[62].mxu0  ;;  %v17085_v59 = vadd.f32 %v12284_v58, %v16998_v51  ;;  %v9522_v3 = vpop.f32.mrb[35].mxu1 }
 0x8cc   :  { %v12095_v26 = vpop.f32.mrb[63].mxu0  ;;  %v17088_v0 = vadd.f32 %v9522_v3, %v16992_v14 }
 0x8cd   :  { %v12096_v10 = vadd.f32 %v12095_v26, %v12094_v27  ;;  %v17090_v16 = vadd.f32 %v12093_v4, %v9318_v47 }
 0x8ce   :  { %v9646_v42 = vadd.f32 %v17088_v0, %v17082_v43 }
 0x8cf   :  { %v17094_v20 = vadd.f32 %v12096_v10, %v9321_v8 }
 0x8d0   :  { %v9647_v1 = vadd.f32 %v9646_v42, %v17079_v54  ;;  %v12287_v40 = vpop.f32.mrb[36].mxu1 }
 0x8d1   :  { %v17098_v31 = vadd.f32 %v12287_v40, %v17007_v13  ;;  %v9535_v51 = vpop.f32.mrb[37].mxu1 }
 0x8d2   :  { %v17101_v12 = vadd.f32 %v9535_v51, %v17001_v46  ;;  %v9648_v14 = vadd.f32 %v9647_v1, %v17085_v59  ;;  %v12288_v6 = vpop.f32.mrb[38].mxu1 }
 0x8d3   :  { %v17105_v50 = vadd.f32 %v12288_v6, %v17010_v35  ;;  %v9538_v22 = vpop.f32.mrb[39].mxu1 }
 0x8d4   :  { %v9649_v62 = vadd.f32 %v9648_v14, %v17101_v12  ;;  %v17109_v21 = vadd.f32 %v9538_v22, %v17004_v41 }
 0x8d6   :  { %v9650_v45 = vadd.f32 %v9649_v62, %v17109_v21 }
 0x8d8   :  { %v9651_v13 = vadd.f32 %v9650_v45, %v17098_v31  ;;  %v12291_v28 = vpop.f32.mrb[40].mxu1 }
 0x8d9   :  { %v17114_v46 = vadd.f32 %v12291_v28, %v17019_v38  ;;  %v9551_v48 = vpop.f32.mrb[41].mxu1 }
 0x8da   :  { %v17117_v32 = vadd.f32 %v9551_v48, %v17013_v53  ;;  %v9652_v35 = vadd.f32 %v9651_v13, %v17105_v50  ;;  %v12292_v47 = vpop.f32.mrb[42].mxu1 }
 0x8db   :  { %v17121_v9 = vadd.f32 %v12292_v47, %v17022_v7  ;;  %v9554_v41 = vpop.f32.mrb[43].mxu1 }
 0x8dc   :  { %v9653_v19 = vadd.f32 %v9652_v35, %v17117_v32  ;;  %v17125_v39 = vadd.f32 %v9554_v41, %v17016_v44 }
 0x8de   :  { %v9654_v8 = vadd.f32 %v9653_v19, %v17125_v39 }
 0x8e0   :  { %v9655_v38 = vadd.f32 %v9654_v8, %v17114_v46  ;;  %v12295_v33 = vpop.f32.mrb[44].mxu1 }
 0x8e1   :  { %v17130_v53 = vadd.f32 %v12295_v33, %v17031_v56  ;;  %v9567_v15 = vpop.f32.mrb[45].mxu1 }
 0x8e2   :  { %v17133_v5 = vadd.f32 %v9567_v15, %v17025_v49  ;;  %v9656_v7 = vadd.f32 %v9655_v38, %v17121_v9  ;;  %v12296_v60 = vpop.f32.mrb[46].mxu1 }
 0x8e3   :  { %v17137_v58 = vadd.f32 %v12296_v60, %v17034_v36  ;;  %v9570_v44 = vpop.f32.mrb[47].mxu1 }
 0x8e4   :  { %v9657_v4 = vadd.f32 %v9656_v7, %v17133_v5  ;;  %v17141_v27 = vadd.f32 %v9570_v44, %v17028_v11 }
 0x8e6   :  { %v9658_v3 = vadd.f32 %v9657_v4, %v17141_v27 }
 0x8e8   :  { %v9659_v56 = vadd.f32 %v9658_v3, %v17130_v53  ;;  %v12299_v26 = vpop.f32.mrb[48].mxu1 }
 0x8e9   :  { %v17146_v49 = vadd.f32 %v12299_v26, %v17043_v57  ;;  %v9583_v10 = vpop.f32.mrb[49].mxu1 }
 0x8ea   :  { %v9584_v42 = vadd.f32 %v9583_v10, %v17037_v18  ;;  %v9660_v36 = vadd.f32 %v9659_v56, %v17137_v58  ;;  %v12300_v1 = vpop.f32.mrb[50].mxu1 }
 0x8eb   :  { %v9595_v40 = vadd.f32 %v12300_v1, %v17046_v29  ;;  %v9586_v51 = vpop.f32.mrb[51].mxu1 }
 0x8ec   :  { %v9661_v14 = vadd.f32 %v9660_v36, %v9584_v42  ;;  %v9587_v11 = vadd.f32 %v9586_v51, %v17040_v52 }
 0x8ee   :  { %v9662_v6 = vadd.f32 %v9661_v14, %v9587_v11 }
 0x8f0   :  { %v9663_v22 = vadd.f32 %v9662_v6, %v17146_v49  ;;  %v12303_v62 = vpop.f32.mrb[52].mxu1 }
 0x8f1   :  { %v9608_v45 = vadd.f32 %v12303_v62, %v17055_v23  ;;  %v9599_v57 = vpop.f32.mrb[53].mxu1 }
 0x8f2   :  { %v9600_v13 = vadd.f32 %v9599_v57, %v17049_v2  ;;  %v9664_v28 = vadd.f32 %v9663_v22, %v9595_v40  ;;  %v12304_v18 = vpop.f32.mrb[54].mxu1 }
 0x8f3   :  { %v9611_v48 = vadd.f32 %v12304_v18, %v17058_v61  ;;  %v9602_v35 = vpop.f32.mrb[55].mxu1 }
 0x8f4   :  { %v9665_v47 = vadd.f32 %v9664_v28, %v9600_v13  ;;  %v9603_v29 = vadd.f32 %v9602_v35, %v17052_v25 }
 0x8f6   :  { %v9666_v41 = vadd.f32 %v9665_v47, %v9603_v29 }
 0x8f8   :  { %v9667_v19 = vadd.f32 %v9666_v41, %v9608_v45  ;;  %v12307_v52 = vpop.f32.mrb[56].mxu1 }
 0x8f9   :  { %v9624_v8 = vadd.f32 %v12307_v52, %v17067_v63  ;;  %v9615_v38 = vpop.f32.mrb[57].mxu1 }
 0x8fa   :  { %v9616_v33 = vadd.f32 %v9615_v38, %v17061_v30  ;;  %v9668_v23 = vadd.f32 %v9667_v19, %v9611_v48  ;;  %v12308_v15 = vpop.f32.mrb[58].mxu1 }
 0x8fb   :  { %v9627_v2 = vadd.f32 %v12308_v15, %v17070_v24  ;;  %v9618_v7 = vpop.f32.mrb[59].mxu1 }
 0x8fc   :  { %v9669_v60 = vadd.f32 %v9668_v23, %v9616_v33  ;;  %v9619_v61 = vadd.f32 %v9618_v7, %v17064_v37 }
 0x8fe   :  { %v9670_v44 = vadd.f32 %v9669_v60, %v9619_v61 }
 0x900   :  { %v9671_v4 = vadd.f32 %v9670_v44, %v9624_v8  ;;  %v12311_v3 = vpop.f32.mrb[60].mxu1 }
 0x901   :  { %v9640_v25 = vadd.f32 %v12311_v3, %v17090_v16  ;;  %v9631_v56 = vpop.f32.mrb[61].mxu1 }
 0x902   :  { %v9632_v26 = vadd.f32 %v9631_v56, %v17073_v17  ;;  %v9672_v63 = vadd.f32 %v9671_v4, %v9627_v2  ;;  %v12312_v10 = vpop.f32.mrb[62].mxu1 }
 0x903   :  { %v9643_v30 = vadd.f32 %v12312_v10, %v17094_v20  ;;  %v9634_v36 = vpop.f32.mrb[63].mxu1 }
 0x904   :  { %v9673_v1 = vadd.f32 %v9672_v63, %v9632_v26  ;;  %v9635_v24 = vadd.f32 %v9634_v36, %v17076_v55 }
 0x906   :  { %v9674_v51 = vadd.f32 %v9673_v1, %v9635_v24 }
 0x908   :  { %v9675_v14 = vadd.f32 %v9674_v51, %v9640_v25 }
 0x90a   :  { %v9676_v6 = vadd.f32 %v9675_v14, %v9643_v30 }
 0x90c   :  { %v9677_v37 = vrot.slane %v9676_v6, 4 }
 0x90e   :  { %v9678_v22 = vadd.f32 %v9677_v37, %v9676_v6 }
 0x910   :  { %v9679_v62 = vrot.slane %v9678_v22, 2 }
 0x912   :  { %v9680_v57 = vadd.f32 %v9679_v62, %v9678_v22 }
 0x914   :  { %v9681_v28 = vrot.slane %v9680_v57, 1 }
 0x916   :  { %v9682_v16 = vadd.f32 %v9681_v28, %v9680_v57 }
 0x918   :  { %v9683_v18 = vmul.f32 0.00390625, %v9682_v16 }
 0x91a   :  { %v17166_v17 = vsub.f32 %v17117_v32, %v9683_v18  ;;  %v17169_v35 = vsub.f32 %v17125_v39, %v9683_v18  ;;  %v17172_v20 = vsub.f32 %v17114_v46, %v9683_v18  ;;  %v17175_v55 = vsub.f32 %v17121_v9, %v9683_v18 }
 0x91b   :  { %v17178_v47 = vsub.f32 %v17133_v5, %v9683_v18  ;;  %v17181_v41 = vsub.f32 %v17141_v27, %v9683_v18  ;;  %v17184_v19 = vsub.f32 %v17130_v53, %v9683_v18  ;;  %v17187_v32 = vsub.f32 %v17137_v58, %v9683_v18 }
 0x91c   :  { %v17189_v39 = vsub.f32 %v9584_v42, %v9683_v18  ;;  %v17191_v52 = vsub.f32 %v9587_v11, %v9683_v18  ;;  %v17194_v46 = vsub.f32 %v17146_v49, %v9683_v18  ;;  %v17196_v9 = vsub.f32 %v9595_v40, %v9683_v18 }
 0x91d   :  { %v17198_v5 = vsub.f32 %v9600_v13, %v9683_v18  ;;  %v17200_v38 = vsub.f32 %v9603_v29, %v9683_v18  ;;  %v17202_v27 = vsub.f32 %v9608_v45, %v9683_v18  ;;  %v17204_v53 = vsub.f32 %v9611_v48, %v9683_v18 }
 0x91e   :  { %v17206_v23 = vsub.f32 %v9616_v33, %v9683_v18  ;;  %v17208_v58 = vsub.f32 %v9619_v61, %v9683_v18  ;;  %v17210_v42 = vsub.f32 %v9624_v8, %v9683_v18  ;;  %v17212_v11 = vsub.f32 %v9627_v2, %v9683_v18 }
 0x91f   :  { %v17214_v49 = vsub.f32 %v9632_v26, %v9683_v18  ;;  %v17216_v40 = vsub.f32 %v9635_v24, %v9683_v18  ;;  %v17218_v13 = vsub.f32 %v9640_v25, %v9683_v18  ;;  %v17220_v29 = vsub.f32 %v9643_v30, %v9683_v18 }
 0x920   :  { %v17223_v45 = vsub.f32 %v17082_v43, %v9683_v18  ;;  %v17226_v48 = vsub.f32 %v17088_v0, %v9683_v18  ;;  %v17229_v33 = vsub.f32 %v17079_v54, %v9683_v18  ;;  %v17236_v2 = vsub.f32 %v17085_v59, %v9683_v18 }
 0x921   :  { %v17239_v7 = vsub.f32 %v17101_v12, %v9683_v18  ;;  %v17244_v60 = vsub.f32 %v17109_v21, %v9683_v18  ;;  %v17249_v44 = vsub.f32 %v17098_v31, %v9683_v18  ;;  %v17254_v12 = vsub.f32 %v17105_v50, %v9683_v18 }
 0x922   :  { %v9716_v8 = vmul.f32 %v17223_v45, %v17223_v45  ;;  %v9717_v15 = vmul.f32 %v17226_v48, %v17226_v48  ;;  %v9718_v43 = vmul.f32 %v17229_v33, %v17229_v33  ;;  %v9719_v54 = vmul.f32 %v17236_v2, %v17236_v2 }
 0x923   :  { %v9720_v59 = vmul.f32 %v17239_v7, %v17239_v7  ;;  %v9721_v3 = vmul.f32 %v17244_v60, %v17244_v60  ;;  %v9722_v21 = vmul.f32 %v17249_v44, %v17249_v44  ;;  %v9723_v26 = vmul.f32 %v17254_v12, %v17254_v12 }
 0x924   :  { %v9748_v0 = vadd.f32 %v9717_v15, %v9716_v8  ;;  %v9724_v63 = vmul.f32 %v17166_v17, %v17166_v17  ;;  %v9725_v50 = vmul.f32 %v17169_v35, %v17169_v35  ;;  %v9726_v36 = vmul.f32 %v17172_v20, %v17172_v20 }
 0x925   :  { %v9727_v24 = vmul.f32 %v17175_v55, %v17175_v55  ;;  %v9728_v14 = vmul.f32 %v17178_v47, %v17178_v47  ;;  %v9729_v37 = vmul.f32 %v17181_v41, %v17181_v41  ;;  %v9730_v62 = vmul.f32 %v17184_v19, %v17184_v19 }
 0x926   :  { %v9749_v61 = vadd.f32 %v9748_v0, %v9718_v43  ;;  %v9731_v28 = vmul.f32 %v17187_v32, %v17187_v32  ;;  %v9732_v18 = vmul.f32 %v17189_v39, %v17189_v39  ;;  %v9733_v15 = vmul.f32 %v17191_v52, %v17191_v52 }
 0x927   :  { %v9734_v0 = vmul.f32 %v17194_v46, %v17194_v46 }
 0x928   :  { %v9750_v4 = vadd.f32 %v9749_v61, %v9719_v54  ;;  %v9735_v61 = vmul.f32 %v17196_v9, %v17196_v9 }
 0x92a   :  { %v9751_v25 = vadd.f32 %v9750_v4, %v9720_v59  ;;  %v9736_v4 = vmul.f32 %v17198_v5, %v17198_v5 }
 0x92c   :  { %v9752_v56 = vadd.f32 %v9751_v25, %v9721_v3  ;;  %v4973_v25 = vpop.trf.xlu0 }
 0x92e   :  { %v9753_v31 = vadd.f32 %v9752_v56, %v9722_v21  ;;  %v5005_v21 = vpop.trf.xlu1 }
 0x92f   :  { %v5023_v56 = vcombine.low %v4973_v25, %v5005_v21 }
 0x930   :  { %v9754_v10 = vadd.f32 %v9753_v31, %v9723_v26  ;;  %v9737_v26 = vmul.f32 %v17200_v38, %v17200_v38 }
 0x931   :  { %5025 = vst [vmem:[%s17430_s7] sm:$0xff] %v5023_v56 }
 0x932   :  { %v9755_v30 = vadd.f32 %v9754_v10, %v9724_v63  ;;  %v9738_v63 = vmul.f32 %v17202_v27, %v17202_v27 }
 0x934   :  { %v9756_v1 = vadd.f32 %v9755_v30, %v9725_v50  ;;  %v9739_v50 = vmul.f32 %v17204_v53, %v17204_v53 }
 0x936   :  { %v9757_v51 = vadd.f32 %v9756_v1, %v9726_v36  ;;  %v9740_v36 = vmul.f32 %v17206_v23, %v17206_v23 }
 0x938   :  { %v9758_v6 = vadd.f32 %v9757_v51, %v9727_v24  ;;  %v9741_v24 = vmul.f32 %v17208_v58, %v17208_v58 }
 0x93a   :  { %v9759_v22 = vadd.f32 %v9758_v6, %v9728_v14  ;;  %v9742_v14 = vmul.f32 %v17210_v42, %v17210_v42 }
 0x93c   :  { %v9760_v57 = vadd.f32 %v9759_v22, %v9729_v37  ;;  %v9743_v37 = vmul.f32 %v17212_v11, %v17212_v11 }
 0x93e   :  { %v9761_v16 = vadd.f32 %v9760_v57, %v9730_v62  ;;  %v9744_v62 = vmul.f32 %v17214_v49, %v17214_v49 }
 0x940   :  { %v9762_v8 = vadd.f32 %v9761_v16, %v9731_v28  ;;  %v9745_v28 = vmul.f32 %v17216_v40, %v17216_v40 }
 0x942   :  { %v9763_v43 = vadd.f32 %v9762_v8, %v9732_v18  ;;  %v9746_v18 = vmul.f32 %v17218_v13, %v17218_v13 }
 0x944   :  { %v9764_v54 = vadd.f32 %v9763_v43, %v9733_v15  ;;  %v9747_v15 = vmul.f32 %v17220_v29, %v17220_v29 }
 0x946   :  { %v9765_v59 = vadd.f32 %v9764_v54, %v9734_v0 }
 0x948   :  { %v9766_v3 = vadd.f32 %v9765_v59, %v9735_v61 }
 0x94a   :  { %v9767_v31 = vadd.f32 %v9766_v3, %v9736_v4 }
 0x94c   :  { %v9768_v10 = vadd.f32 %v9767_v31, %v9737_v26  ;;  %v9788_v31 = vld [vmem:[%s17428_s5] sm:$0x1] }
 0x94e   :  { %v9769_v30 = vadd.f32 %v9768_v10, %v9738_v63 }
 0x950   :  { %v9770_v1 = vadd.f32 %v9769_v30, %v9739_v50  ;;  %v17322_v50 = vld [vmem:[%s17429_s6] ss:$0 sm:$0xff] }
 0x952   :  { %v9771_v51 = vadd.f32 %v9770_v1, %v9740_v36 }
 0x954   :  { %v9772_v6 = vadd.f32 %v9771_v51, %v9741_v24 }
 0x956   :  { %v9773_v22 = vadd.f32 %v9772_v6, %v9742_v14 }
 0x958   :  { %v9774_v57 = vadd.f32 %v9773_v22, %v9743_v37 }
 0x95a   :  { %v9775_v16 = vadd.f32 %v9774_v57, %v9744_v62 }
 0x95c   :  { %v9776_v8 = vadd.f32 %v9775_v16, %v9745_v28 }
 0x95e   :  { %v9777_v43 = vadd.f32 %v9776_v8, %v9746_v18 }
 0x960   :  { %v9778_v0 = vadd.f32 %v9777_v43, %v9747_v15 }
 0x962   :  { %v9779_v54 = vrot.slane %v9778_v0, 4 }
 0x964   :  { %v9780_v61 = vadd.f32 %v9779_v54, %v9778_v0 }
 0x966   :  { %v9781_v59 = vrot.slane %v9780_v61, 2 }
 0x968   :  { %v9782_v4 = vadd.f32 %v9781_v59, %v9780_v61 }
 0x96a   :  { %v9783_v3 = vrot.slane %v9782_v4, 1 }
 0x96c   :  { %v9784_v25 = vadd.f32 %v9783_v3, %v9782_v4 }
 0x96e   :  { %v9785_v21 = vmul.f32 0.00390625, %v9784_v25 }
 0x970   :  { %v9786_v56 = vadd.f32 1e-05, %v9785_v21 }
 0x972   :  { %12610 = vrsqrt.f32 %v9786_v56 }
 0x97c   :  { %v12611_v26 = vpop.eup %12610 }
 0x97d   :  { %v9789_v63 = vmul.f32 %v12611_v26, %v9788_v31 }
 0x97f   :  { %v17317_v10 = vrot.slane %v9789_v63, %v17601_v34 }
 0x981   :  { %v9810_v30 = vmul.f32 %v17317_v10, %v17189_v39  ;;  %v9794_v36 = vmul.f32 %v17317_v10, %v17223_v45  ;;  %v9795_v1 = vmul.f32 %v17317_v10, %v17226_v48  ;;  %v9811_v24 = vmul.f32 %v17317_v10, %v17191_v52 }
 0x982   :  { %v9796_v14 = vmul.f32 %v17317_v10, %v17229_v33  ;;  %v9812_v39 = vmul.f32 %v17317_v10, %v17194_v46  ;;  %v9797_v52 = vmul.f32 %v17317_v10, %v17236_v2  ;;  %v9813_v48 = vmul.f32 %v17317_v10, %v17196_v9 }
 0x983   :  { %v9849_v34 = vadd.f32 %v17322_v50, %v9810_v30  ;;  %v9833_v51 = vadd.f32 %v17322_v50, %v9794_v36  ;;  %v9850_v45 = vadd.f32 %v17322_v50, %v9811_v24  ;;  %v9834_v6 = vadd.f32 %v17322_v50, %v9795_v1 }
 0x984   :  { %v9851_v37 = vadd.f32 %v17322_v50, %v9812_v39  ;;  %v9835_v22 = vadd.f32 %v17322_v50, %v9796_v14  ;;  %v9798_v46 = vmul.f32 %v17317_v10, %v17239_v7  ;;  %v9814_v33 = vmul.f32 %v17317_v10, %v17198_v5 }
 0x985   :  { %9897 = vxpose.xlu1.b32.start [1/16] (narrow) %v9849_v34, 8  ;;  %9865 = vxpose.xlu0.b32.start [1/16] (narrow) %v9833_v51, 8  ;;  %v9852_v62 = vadd.f32 %v17322_v50, %v9813_v48  ;;  %v9836_v57 = vadd.f32 %v17322_v50, %v9797_v52  ;;  %v9799_v9 = vmul.f32 %v17317_v10, %v17244_v60 }
 0x986   :  { %v9815_v2 = vmul.f32 %v17317_v10, %v17200_v38  ;;  %v9853_v28 = vadd.f32 %v17322_v50, %v9814_v33  ;;  %v9837_v16 = vadd.f32 %v17322_v50, %v9798_v46  ;;  %v9800_v5 = vmul.f32 %v17317_v10, %v17249_v44 }
 0x987   :  { %v9816_v7 = vmul.f32 %v17317_v10, %v17202_v27  ;;  %v9838_v8 = vadd.f32 %v17322_v50, %v9799_v9  ;;  %v9801_v38 = vmul.f32 %v17317_v10, %v17254_v12  ;;  %v9817_v60 = vmul.f32 %v17317_v10, %v17204_v53 }
 0x988   :  { %v9854_v18 = vadd.f32 %v17322_v50, %v9815_v2  ;;  %v9839_v43 = vadd.f32 %v17322_v50, %v9800_v5  ;;  %v9802_v27 = vmul.f32 %v17317_v10, %v17166_v17  ;;  %v9818_v44 = vmul.f32 %v17317_v10, %v17206_v23 }
 0x989   :  { %9898 = vxpose.xlu1.b32.cont [2/16] (narrow) %v9850_v45, 8  ;;  %9866 = vxpose.xlu0.b32.cont [2/16] (narrow) %v9834_v6, 8  ;;  %v9855_v15 = vadd.f32 %v17322_v50, %v9816_v7  ;;  %v9856_v0 = vadd.f32 %v17322_v50, %v9817_v60  ;;  %v9840_v54 = vadd.f32 %v17322_v50, %v9801_v38 }
 0x98a   :  { %v9803_v53 = vmul.f32 %v17317_v10, %v17169_v35  ;;  %v9819_v12 = vmul.f32 %v17317_v10, %v17208_v58  ;;  %v9857_v61 = vadd.f32 %v17322_v50, %v9818_v44  ;;  %v9841_v59 = vadd.f32 %v17322_v50, %v9802_v27 }
 0x98b   :  { %v9804_v17 = vmul.f32 %v17317_v10, %v17172_v20  ;;  %v9820_v23 = vmul.f32 %v17317_v10, %v17210_v42  ;;  %v9805_v35 = vmul.f32 %v17317_v10, %v17175_v55  ;;  %v9821_v58 = vmul.f32 %v17317_v10, %v17212_v11 }
 0x98c   :  { %v9858_v4 = vadd.f32 %v17322_v50, %v9819_v12  ;;  %v9842_v3 = vadd.f32 %v17322_v50, %v9803_v53  ;;  %v9806_v20 = vmul.f32 %v17317_v10, %v17178_v47  ;;  %v9822_v42 = vmul.f32 %v17317_v10, %v17214_v49 }
 0x98d   :  { %9899 = vxpose.xlu1.b32.cont [3/16] (narrow) %v9851_v37, 8  ;;  %9867 = vxpose.xlu0.b32.cont [3/16] (narrow) %v9835_v22, 8  ;;  %v9859_v25 = vadd.f32 %v17322_v50, %v9820_v23  ;;  %v9843_v21 = vadd.f32 %v17322_v50, %v9804_v17  ;;  %v9860_v56 = vadd.f32 %v17322_v50, %v9821_v58 }
 0x98e   :  { %v9844_v26 = vadd.f32 %v17322_v50, %v9805_v35  ;;  %v9823_v55 = vmul.f32 %v17317_v10, %v17216_v40  ;;  %v9807_v11 = vmul.f32 %v17317_v10, %v17181_v41  ;;  %v9861_v31 = vadd.f32 %v17322_v50, %v9822_v42 }
 0x98f   :  { %v9845_v63 = vadd.f32 %v17322_v50, %v9806_v20  ;;  %v9808_v47 = vmul.f32 %v17317_v10, %v17184_v19  ;;  %v9824_v49 = vmul.f32 %v17317_v10, %v17218_v13  ;;  %v9809_v41 = vmul.f32 %v17317_v10, %v17187_v32 }
 0x990   :  { %v9862_v30 = vadd.f32 %v17322_v50, %v9823_v55  ;;  %v9846_v36 = vadd.f32 %v17322_v50, %v9807_v11  ;;  %v9825_v40 = vmul.f32 %v17317_v10, %v17220_v29 }
 0x991   :  { %9900 = vxpose.xlu1.b32.cont [4/16] (narrow) %v9852_v62, 8  ;;  %9868 = vxpose.xlu0.b32.cont [4/16] (narrow) %v9836_v57, 8  ;;  %v9863_v1 = vadd.f32 %v17322_v50, %v9824_v49  ;;  %v9847_v24 = vadd.f32 %v17322_v50, %v9808_v47  ;;  %v9848_v13 = vadd.f32 %v17322_v50, %v9809_v41 }
 0x992   :  { %v9864_v19 = vadd.f32 %v17322_v50, %v9825_v40 }
 0x995   :  { %9901 = vxpose.xlu1.b32.cont [5/16] (narrow) %v9853_v28, 8  ;;  %9869 = vxpose.xlu0.b32.cont [5/16] (narrow) %v9837_v16, 8 }
 0x999   :  { %9902 = vxpose.xlu1.b32.cont [6/16] (narrow) %v9854_v18, 8  ;;  %9870 = vxpose.xlu0.b32.cont [6/16] (narrow) %v9838_v8, 8 }
 0x99d   :  { %9903 = vxpose.xlu1.b32.cont [7/16] (narrow) %v9855_v15, 8  ;;  %9871 = vxpose.xlu0.b32.cont [7/16] (narrow) %v9839_v43, 8 }
 0x9a1   :  { %9904 = vxpose.xlu1.b32.cont [8/16] (narrow) %v9856_v0, 8  ;;  %9872 = vxpose.xlu0.b32.cont [8/16] (narrow) %v9840_v54, 8 }
 0x9a5   :  { %9905 = vxpose.xlu1.b32.cont [9/16] (narrow) %v9857_v61, 8  ;;  %9873 = vxpose.xlu0.b32.cont [9/16] (narrow) %v9841_v59, 8 }
 0x9a9   :  { %9906 = vxpose.xlu1.b32.cont [10/16] (narrow) %v9858_v4, 8  ;;  %9874 = vxpose.xlu0.b32.cont [10/16] (narrow) %v9842_v3, 8 }
 0x9ad   :  { %9907 = vxpose.xlu1.b32.cont [11/16] (narrow) %v9859_v25, 8  ;;  %9875 = vxpose.xlu0.b32.cont [11/16] (narrow) %v9843_v21, 8 }
 0x9b1   :  { %9908 = vxpose.xlu1.b32.cont [12/16] (narrow) %v9860_v56, 8  ;;  %9876 = vxpose.xlu0.b32.cont [12/16] (narrow) %v9844_v26, 8 }
 0x9b5   :  { %9909 = vxpose.xlu1.b32.cont [13/16] (narrow) %v9861_v31, 8  ;;  %9877 = vxpose.xlu0.b32.cont [13/16] (narrow) %v9845_v63, 8 }
 0x9b9   :  { %9910 = vxpose.xlu1.b32.cont [14/16] (narrow) %v9862_v30, 8  ;;  %9878 = vxpose.xlu0.b32.cont [14/16] (narrow) %v9846_v36, 8 }
 0x9bd   :  { %9911 = vxpose.xlu1.b32.cont [15/16] (narrow) %v9863_v1, 8  ;;  %9879 = vxpose.xlu0.b32.cont [15/16] (narrow) %v9847_v24, 8 }
 0x9c1   :  { %9912 = vxpose.xlu1.b32.end [16/16] (narrow) %v9864_v19, 8  ;;  %9880 = vxpose.xlu0.b32.end [16/16] (narrow) %v9848_v13, 8 }
 0xa05   :  { %v9881_v34 = vpop.trf.xlu0  ;;  %v9913_v51 = vpop.trf.xlu1 }
 0xa06   :  { %v9931_v14 = vcombine.low %v9881_v34, %v9913_v51 }
 0xa08   :  { %10232 = vst [vmem:[%s17430_s7 + $0x8] sm:$0xff] %v9931_v14 }

</bundles_post_ra>
